<compile_context>
chip_gen: v7x
topology: tpu7x:2x2x1
jax: 0.10.0
libtpu: 0.0.40
codegen_flags: <defaults>
</compile_context>

<pallas_src>
import functools
import math

import jax
import jax.numpy as jnp
from jax.experimental import pallas as pl
from jax.experimental.pallas import tpu as pltpu

BN_EPS = 1e-5
LANE = 128


def _round_up(x, m):
    return ((x + m - 1) // m) * m


def _pad_c(c):
    return _round_up(c, LANE)


def _pad_to(a, shape):
    return jnp.pad(a, [(0, t - s) for s, t in zip(a.shape, shape)])


# ---------------------------------------------------------------------------
# Kernel 1: fused matmul + bias (BN scale pre-folded into W) + act [+ residual]
# ---------------------------------------------------------------------------
def _matmul_kernel(*refs, act, has_res):
    if has_res:
        x_ref, w_ref, b_ref, r_ref, o_ref = refs
    else:
        x_ref, w_ref, b_ref, o_ref = refs
        r_ref = None
    y = jnp.dot(x_ref[...], w_ref[...], preferred_element_type=jnp.float32)
    y = y + b_ref[...]
    if act == "relu":
        y = jnp.maximum(y, 0.0)
    # Residual is only ever used with act == "none" (post-BN add, no re-act).
    if r_ref is not None:
        y = y + r_ref[...].astype(jnp.float32)
    o_ref[...] = y.astype(o_ref.dtype)


def _pick_tile_m(m):
    # Biggest tile that still guarantees >= 2 grid steps (both v7x TCs busy);
    # M is padded up to a tile multiple by the caller.
    for t in (2048, 1024, 512, 256, 128):
        if m > t:
            return t
    if m > 16:                       # still split tiny M in two for v7x
        return _round_up((m + 1) // 2, 8)
    return _round_up(max(m, 8), 8)


def matmul_affine_act(x, w, bias, act="none", residual=None):
    """y = act((x @ w) + bias) [+ residual].  x:(M,K) bf16, w:(K,N) bf16."""
    M, K = x.shape
    N = w.shape[1]
    tile_m = _pick_tile_m(M)
    Mp = _round_up(M, tile_m)
    if Mp != M:
        x = jnp.pad(x, ((0, Mp - M), (0, 0)))
        if residual is not None:
            residual = jnp.pad(residual, ((0, Mp - M), (0, 0)))
    has_res = residual is not None

    in_specs = [
        pl.BlockSpec((tile_m, K), lambda i: (i, 0)),
        pl.BlockSpec((K, N), lambda i: (0, 0)),
        pl.BlockSpec((1, N), lambda i: (0, 0)),
    ]
    args = [x, w, bias.reshape(1, N)]
    if has_res:
        in_specs.append(pl.BlockSpec((tile_m, N), lambda i: (i, 0)))
        args.append(residual)

    out = pl.pallas_call(
        functools.partial(_matmul_kernel, act=act, has_res=has_res),
        out_shape=jax.ShapeDtypeStruct((Mp, N), jnp.bfloat16),
        grid=(Mp // tile_m,),
        in_specs=in_specs,
        out_specs=pl.BlockSpec((tile_m, N), lambda i: (i, 0)),
        compiler_params=pltpu.CompilerParams(dimension_semantics=("parallel",)),
    )(*args)
    return out[:M] if Mp != M else out


# ---------------------------------------------------------------------------
# Kernel 1b: gated project matmul for SE blocks
#   y = (x * gate[batch]) @ W + bias [+ residual]   (SE rescale folded in)
# ---------------------------------------------------------------------------
def _gated_matmul_kernel(*refs, has_res):
    if has_res:
        x_ref, g_ref, w_ref, b_ref, r_ref, o_ref = refs
    else:
        x_ref, g_ref, w_ref, b_ref, o_ref = refs
        r_ref = None
    xg = (x_ref[0].astype(jnp.float32) * g_ref[0]).astype(jnp.bfloat16)
    y = jnp.dot(xg, w_ref[...], preferred_element_type=jnp.float32) + b_ref[...]
    if r_ref is not None:
        y = y + r_ref[0].astype(jnp.float32)
    o_ref[0] = y.astype(o_ref.dtype)


def matmul_gated_project(x3, gate, w, bias, residual3=None):
    """x3:(N,HW,K) bf16, gate:(N,1,K) f32, w:(K,Nc) bf16 -> (N,HW,Nc) bf16."""
    Nb, HW, K = x3.shape
    Nc = w.shape[1]
    tile = _pick_tile_m(HW)
    HWp = _round_up(HW, tile)
    if HWp != HW:
        x3 = jnp.pad(x3, ((0, 0), (0, HWp - HW), (0, 0)))
        if residual3 is not None:
            residual3 = jnp.pad(residual3, ((0, 0), (0, HWp - HW), (0, 0)))
    has_res = residual3 is not None

    in_specs = [
        pl.BlockSpec((1, tile, K), lambda n, t: (n, t, 0)),
        pl.BlockSpec((1, 1, K), lambda n, t: (n, 0, 0)),
        pl.BlockSpec((K, Nc), lambda n, t: (0, 0)),
        pl.BlockSpec((1, Nc), lambda n, t: (0, 0)),
    ]
    args = [x3, gate, w, bias.reshape(1, Nc)]
    if has_res:
        in_specs.append(pl.BlockSpec((1, tile, Nc), lambda n, t: (n, t, 0)))
        args.append(residual3)

    out = pl.pallas_call(
        functools.partial(_gated_matmul_kernel, has_res=has_res),
        out_shape=jax.ShapeDtypeStruct((Nb, HWp, Nc), jnp.bfloat16),
        grid=(Nb, HWp // tile),
        in_specs=in_specs,
        out_specs=pl.BlockSpec((1, tile, Nc), lambda n, t: (n, t, 0)),
        compiler_params=pltpu.CompilerParams(
            dimension_semantics=("parallel", "parallel")),
    )(*args)
    return out[:, :HW, :]


# ---------------------------------------------------------------------------
# Kernel 2: depthwise KxK conv (stride folded in via stride-phase layout) +
#           bias (BN scale pre-folded) + ReLU, spatially tiled over output rows.
# Optional second output: per-(batch, channel) sums of the activation (feeds SE
# pooling without another pass over the expanded tensor).
#   xph[n, (ph*s+pw)*hph + r, c, :] = xpad[n, s*r+ph, s*c+pw, :]
#   out[i, j] = sum_{dh,dw} w[dh,dw] * xpad[s*i+dh, s*j+dw]
#             = sum_{dh,dw} w[dh,dw] * xph[(dh%s, dw%s), i+dh//s, j+dw//s]
# ---------------------------------------------------------------------------
def _dwconv_kernel(*refs, k, stride, hph, qh, with_pool):
    if with_pool:
        x_ref, w_ref, b_ref, o_ref, p_ref = refs
    else:
        x_ref, w_ref, b_ref, o_ref = refs
        p_ref = None
    th, wo, ct = o_ref.shape[1], o_ref.shape[2], o_ref.shape[3]
    t = pl.program_id(2)
    r0 = pl.multiple_of(t * th, th)

    # Hoisted bf16->f32 cast: one slab per stride-phase covering this row tile.
    slabs = []
    for ph in range(stride):
        for pw in range(stride):
            base = (ph * stride + pw) * hph
            slabs.append(
                x_ref[0, pl.ds(base + r0, th + qh), :, :].astype(jnp.float32))

    acc = jnp.zeros((th, wo, ct), jnp.float32)
    for dh in range(k):
        ph, ih = dh % stride, dh // stride
        for dw in range(k):
            pw, iw = dw % stride, dw // stride
            tap = slabs[ph * stride + pw][ih:ih + th, iw:iw + wo, :]
            acc = acc + tap * w_ref[dh * k + dw]
    y = jnp.maximum(acc + b_ref[0], 0.0)
    o_ref[0] = y.astype(o_ref.dtype)

    if with_pool:
        @pl.when(t == 0)
        def _():
            p_ref[...] = jnp.zeros_like(p_ref)
        p_ref[...] += jnp.sum(y, axis=(0, 1)).reshape(1, 1, ct)


def _pick_tile_h(ho):
    for t in (16, 8, 4):
        if ho % t == 0 and ho // t >= 2:
            return t
    return ho


def dwconv_bn_relu(x, p, k, stride, with_pool=False):
    """Depthwise KxK 'same' conv (stride in-kernel) + folded BN + ReLU."""
    N, H, W, C = x.shape                      # C is a multiple of 128 (bf16)
    pad = k // 2
    ho = (H + 2 * pad - k) // stride + 1
    wo = (W + 2 * pad - k) // stride + 1
    qh = (k - 1) // stride                    # extra rows/cols per phase
    qw = (k - 1) // stride
    hph, wph = ho + qh, wo + qw
    need_h, need_w = stride * hph, stride * wph
    xp = jnp.pad(x, ((0, 0),
                     (pad, max(pad, need_h - H - pad)),
                     (pad, max(pad, need_w - W - pad)),
                     (0, 0)))[:, :need_h, :need_w, :]
    if stride == 1:
        xph = xp                                                   # (N,hph,wph,C)
    else:
        # TODO(synk): this wrapper-side phase transpose costs one extra XLA HBM
        # round trip for stride-2 layers; an in-kernel strided-DMA phase split
        # would remove it.
        xph = (xp.reshape(N, hph, stride, wph, stride, C)
                 .transpose(0, 2, 4, 1, 3, 5)
                 .reshape(N, stride * stride * hph, wph, C))

    th = _pick_tile_h(ho)
    nt = ho // th

    out_shape = [jax.ShapeDtypeStruct((N, ho, wo, C), jnp.bfloat16)]
    out_specs = [pl.BlockSpec((1, th, wo, LANE), lambda n, c, t: (n, t, 0, c))]
    if with_pool:
        out_shape.append(jax.ShapeDtypeStruct((N, 1, C), jnp.float32))
        out_specs.append(pl.BlockSpec((1, 1, LANE), lambda n, c, t: (n, 0, c)))

    res = pl.pallas_call(
        functools.partial(_dwconv_kernel, k=k, stride=stride, hph=hph, qh=qh,
                          with_pool=with_pool),
        out_shape=tuple(out_shape) if with_pool else out_shape[0],
        grid=(N, C // LANE, nt),
        in_specs=[
            # Input block index ignores the row-tile axis -> stays resident.
            pl.BlockSpec((1, stride * stride * hph, wph, LANE),
                         lambda n, c, t: (n, 0, 0, c)),
            pl.BlockSpec((k * k, LANE), lambda n, c, t: (0, c)),
            pl.BlockSpec((1, LANE), lambda n, c, t: (0, c)),
        ],
        out_specs=tuple(out_specs) if with_pool else out_specs[0],
        compiler_params=pltpu.CompilerParams(
            dimension_semantics=("parallel", "parallel", "arbitrary")),
    )(xph, p["w"], p["bias"].reshape(1, C))
    if with_pool:
        return res[0], res[1]
    return res, None


# ---------------------------------------------------------------------------
# Kernel 3: SE gate from pooled channel sums (tiny):
#   gate = sigmoid(fc2(relu(fc1(pool / HW))))
# ---------------------------------------------------------------------------
def _se_gate_kernel(p_ref, w1_ref, b1_ref, w2_ref, b2_ref, g_ref, *, inv_hw):
    pooled = (p_ref[...] * inv_hw).astype(jnp.bfloat16)          # (Np, C)
    h = jnp.dot(pooled, w1_ref[...],
                preferred_element_type=jnp.float32) + b1_ref[...]
    h = jnp.maximum(h, 0.0).astype(jnp.bfloat16)                 # (Np, Cr)
    g = jnp.dot(h, w2_ref[...],
                preferred_element_type=jnp.float32) + b2_ref[...]
    g_ref[...] = jax.nn.sigmoid(g)


def se_gate(p, pool, hw):
    """pool:(N,1,C) raw channel sums (f32) -> gate:(N,1,C) f32."""
    N, _, C = pool.shape
    Cr = p["w1"].shape[1]
    Np = _round_up(N, 8)
    pool2 = pool.reshape(N, C)
    if Np != N:
        pool2 = jnp.pad(pool2, ((0, Np - N), (0, 0)))
    g = pl.pallas_call(
        functools.partial(_se_gate_kernel, inv_hw=1.0 / float(hw)),
        out_shape=jax.ShapeDtypeStruct((Np, C), jnp.float32),
        grid=(1,),
        in_specs=[pl.BlockSpec((Np, C), lambda i: (0, 0)),
                  pl.BlockSpec((C, Cr), lambda i: (0, 0)),
                  pl.BlockSpec((1, Cr), lambda i: (0, 0)),
                  pl.BlockSpec((Cr, C), lambda i: (0, 0)),
                  pl.BlockSpec((1, C), lambda i: (0, 0))],
        out_specs=pl.BlockSpec((Np, C), lambda i: (0, 0)),
    )(pool2, p["w1"], p["b1"].reshape(1, Cr), p["w2"], p["b2"].reshape(1, C))
    return g[:N].reshape(N, 1, C)


# ---------------------------------------------------------------------------
# Parameter init (deterministic, synthetic; padded to 128-lane channel tiles).
# BN is folded to an inference-mode affine and its scale is folded into W.
# ---------------------------------------------------------------------------
def init_conv_bn(key, cin, cout):
    kw, kg, kb = jax.random.split(key, 3)
    cin_p, cout_p = _pad_c(cin), _pad_c(cout)
    w = jax.random.normal(kw, (cin, cout), jnp.float32) / math.sqrt(cin)
    gamma = 1.0 + 0.1 * jax.random.normal(kg, (cout,), jnp.float32)
    beta = 0.1 * jax.random.normal(kb, (cout,), jnp.float32)
    scale = gamma / math.sqrt(1.0 + BN_EPS)       # BN folded (mean=0, var=1)
    w = w * scale[None, :]                        # fold BN scale into weights
    return {"w": _pad_to(w, (cin_p, cout_p)).astype(jnp.bfloat16),
            "bias": _pad_to(beta, (cout_p,))}


def init_dw_bn(key, c, k):
    kw, kg, kb = jax.random.split(key, 3)
    c_p = _pad_c(c)
    w = jax.random.normal(kw, (k * k, c), jnp.float32) / math.sqrt(k * k)
    gamma = 1.0 + 0.1 * jax.random.normal(kg, (c,), jnp.float32)
    beta = 0.1 * jax.random.normal(kb, (c,), jnp.float32)
    scale = gamma / math.sqrt(1.0 + BN_EPS)
    w = w * scale[None, :]                        # fold BN scale into weights
    return {"w": _pad_to(w, (k * k, c_p)),
            "bias": _pad_to(beta, (c_p,))}


def init_se(key, cexp, cred):
    k1, k2, k3, k4 = jax.random.split(key, 4)
    ce_p, cr_p = _pad_c(cexp), _pad_c(cred)
    w1 = jax.random.normal(k1, (cexp, cred), jnp.float32) / math.sqrt(cexp)
    b1 = 0.1 * jax.random.normal(k2, (cred,), jnp.float32)
    w2 = jax.random.normal(k3, (cred, cexp), jnp.float32) / math.sqrt(cred)
    b2 = 0.1 * jax.random.normal(k4, (cexp,), jnp.float32)
    return {"w1": _pad_to(w1, (ce_p, cr_p)).astype(jnp.bfloat16),
            "b1": _pad_to(b1, (cr_p,)),
            "w2": _pad_to(w2, (cr_p, ce_p)).astype(jnp.bfloat16),
            "b2": _pad_to(b2, (ce_p,))}


def init_block(key, b, cin, k, cout, s):
    if b == 0:                                          # SepConv
        k1, k2 = jax.random.split(key)
        return {"type": "sep", "k": k, "s": s, "cin": cin, "cout": cout,
                "dw": init_dw_bn(k1, cin, k),
                "pw": init_conv_bn(k2, cin, cout)}
    t = 3 if b == 3 else 6
    use_se = b not in (0, 3, 6)                         # other codes -> MBConv6 + SE
    cexp = cin * t
    keys = jax.random.split(key, 4)
    p = {"type": "mb", "k": k, "s": s, "cin": cin, "cout": cout, "use_se": use_se,
         "expand": init_conv_bn(keys[0], cin, cexp),
         "dw": init_dw_bn(keys[1], cexp, k),
         "project": init_conv_bn(keys[2], cexp, cout)}
    if use_se:
        p["se"] = init_se(keys[3], cexp, max(1, cin // 4))
    return p


# ---------------------------------------------------------------------------
# Glue: blocks and the Make_Layers stack
# ---------------------------------------------------------------------------
def conv1x1_bn(p, x, act, residual=None):
    N, H, W, C = x.shape
    res = (residual.reshape(N * H * W, residual.shape[-1])
           if residual is not None else None)
    y = matmul_affine_act(x.reshape(N * H * W, C), p["w"], p["bias"],
                          act=act, residual=res)
    return y.reshape(N, H, W, -1)


def conv1x1_project_gated(p, x, gate, residual=None):
    N, H, W, C = x.shape
    x3 = x.reshape(N, H * W, C)
    res3 = (residual.reshape(N, H * W, residual.shape[-1])
            if residual is not None else None)
    y = matmul_gated_project(x3, gate, p["w"], p["bias"], residual3=res3)
    return y.reshape(N, H, W, -1)


def apply_block(p, x):
    if p["type"] == "sep":
        y, _ = dwconv_bn_relu(x, p["dw"], p["k"], p["s"])
        return conv1x1_bn(p["pw"], y, act="none")
    y = conv1x1_bn(p["expand"], x, act="relu")
    res = x if (p["s"] == 1 and p["cin"] == p["cout"]) else None
    if p.get("use_se", False):
        y, pool = dwconv_bn_relu(y, p["dw"], p["k"], p["s"], with_pool=True)
        hw = y.shape[1] * y.shape[2]
        gate = se_gate(p["se"], pool, hw)
        return conv1x1_project_gated(p["project"], y, gate, residual=res)
    y, _ = dwconv_bn_relu(y, p["dw"], p["k"], p["s"])
    return conv1x1_bn(p["project"], y, act="none", residual=res)  # fused residual


def init_make_layers(key, layers_configs):
    keys = jax.random.split(key, len(layers_configs))
    return [init_block(kk, *cfg) for kk, cfg in zip(keys, layers_configs)]


def make_layers_forward(params, x_nchw):
    cin, cout = params[0]["cin"], params[-1]["cout"]
    x = jnp.transpose(x_nchw, (0, 2, 3, 1))                        # NCHW -> NHWC
    x = jnp.pad(x, ((0, 0), (0, 0), (0, 0), (0, _pad_c(cin) - cin)))
    x = x.astype(jnp.bfloat16)
    for blk in params:
        x = apply_block(blk, x)
    x = x[..., :cout].astype(jnp.float32)
    return jnp.transpose(x, (0, 3, 1, 2))                          # NHWC -> NCHW


# ---------------------------------------------------------------------------
if __name__ == "__main__":
    # One Make_Layers stack that exercises every branch of MBConv():
    #   b==0 -> SepConv, b==3 -> MBConv3, b==6 -> MBConv6, else -> MBConv6 + SE
    LAYERS_CONFIGS = [
        [0, 32, 3, 16, 1],
        [6, 16, 3, 24, 2],
        [6, 24, 3, 24, 1],
        [3, 24, 5, 40, 2],
        [3, 40, 5, 40, 1],
        [62, 40, 3, 80, 2],
        [62, 80, 3, 80, 1],
    ]
    key = jax.random.PRNGKey(0)
    pkey, xkey = jax.random.split(key)
    params = init_make_layers(pkey, LAYERS_CONFIGS)
    x = jax.random.normal(xkey, (2, 32, 16, 16), jnp.float32)

    fwd = jax.jit(lambda inp: make_layers_forward(params, inp))
    out = jax.block_until_ready(fwd(x))
    assert out.shape == (2, 80, 2, 2), out.shape
    assert bool(jnp.all(jnp.isfinite(out)))
    print("KERNEL_OK")
</pallas_src>

<mosaic_0001>
module attributes {stable_mosaic.version = 11 : i64} {
  func.func @_matmul_kernel(%arg0: i32, %arg1: memref<256x128xbf16, #tpu.memory_space<vmem>>, %arg2: memref<128x128xbf16, #tpu.memory_space<vmem>>, %arg3: memref<1x128xf32, #tpu.memory_space<vmem>>, %arg4: memref<256x128xbf16, #tpu.memory_space<vmem>>) attributes {dimension_semantics = [#tpu.dimension_semantics<parallel>], iteration_bounds = array<i64: 2>, scalar_prefetch = 0 : i64, scratch_operands = 0 : i64, tpu.core_type = #tpu.core_type<tc>, window_params = [{transform_indices = @transform_0, window_bounds = array<i64: 256, 128>}, {pipeline_mode = #tpu.pipeline_mode<synchronous>, transform_indices = @transform_1, window_bounds = array<i64: 128, 128>}, {pipeline_mode = #tpu.pipeline_mode<synchronous>, transform_indices = @transform_2, window_bounds = array<i64: 1, 128>}, {transform_indices = @transform_3, window_bounds = array<i64: 256, 128>}]} {
    %c0 = arith.constant 0 : index
    %c0_0 = arith.constant 0 : index
    %0 = vector.load %arg1[%c0, %c0_0] : memref<256x128xbf16, #tpu.memory_space<vmem>>, vector<256x128xbf16>
    %c0_1 = arith.constant 0 : index
    %c0_2 = arith.constant 0 : index
    %1 = vector.load %arg2[%c0_1, %c0_2] : memref<128x128xbf16, #tpu.memory_space<vmem>>, vector<128x128xbf16>
    %cst = arith.constant dense<0.000000e+00> : vector<256x128xf32>
    %2 = tpu.matmul %0, %1, %cst {dimension_numbers = #tpu.dot_dimension_numbers<[1], [0], [0], [1], [0, 0, 1, 1], [], []>} : vector<256x128xbf16>, vector<128x128xbf16>, vector<256x128xf32> -> vector<256x128xf32>
    %c0_3 = arith.constant 0 : index
    %c0_4 = arith.constant 0 : index
    %3 = vector.load %arg3[%c0_3, %c0_4] : memref<1x128xf32, #tpu.memory_space<vmem>>, vector<1x128xf32>
    %4 = vector.broadcast %3 : vector<1x128xf32> to vector<256x128xf32>
    %5 = arith.addf %2, %4 : vector<256x128xf32>
    %6 = arith.truncf %5 : vector<256x128xf32> to vector<256x128xbf16>
    %c0_5 = arith.constant 0 : index
    %c0_6 = arith.constant 0 : index
    %7 = vector.load %arg4[%c0_5, %c0_6] : memref<256x128xbf16, #tpu.memory_space<vmem>>, vector<256x128xbf16>
    tpu.vector_store %arg4[%c0_5, %c0_6], %6 {strides = array<i32>} : memref<256x128xbf16, #tpu.memory_space<vmem>>, vector<256x128xbf16>,
    return
  }
  func.func @transform_0(%arg0: i32) -> (i32, i32) {
    %c0_i32 = arith.constant 0 : i32
    %c0_i32_0 = arith.constant 0 : i32
    return %arg0, %c0_i32 : i32, i32
  }
  func.func @transform_1(%arg0: i32) -> (i32, i32) {
    %c0_i32 = arith.constant 0 : i32
    %c0_i32_0 = arith.constant 0 : i32
    %c0_i32_1 = arith.constant 0 : i32
    return %c0_i32, %c0_i32_0 : i32, i32
  }
  func.func @transform_2(%arg0: i32) -> (i32, i32) {
    %c0_i32 = arith.constant 0 : i32
    %c0_i32_0 = arith.constant 0 : i32
    %c0_i32_1 = arith.constant 0 : i32
    return %c0_i32, %c0_i32_0 : i32, i32
  }
  func.func @transform_3(%arg0: i32) -> (i32, i32) {
    %c0_i32 = arith.constant 0 : i32
    %c0_i32_0 = arith.constant 0 : i32
    return %arg0, %c0_i32 : i32, i32
  }
}

module attributes {stable_mosaic.version = 11 : i64} {
  func.func @_dwconv_kernel(%arg0: i32, %arg1: i32, %arg2: i32, %arg3: memref<1x18x18x128xbf16, #tpu.memory_space<vmem>>, %arg4: memref<9x128xf32, #tpu.memory_space<vmem>>, %arg5: memref<1x128xf32, #tpu.memory_space<vmem>>, %arg6: memref<1x8x16x128xbf16, #tpu.memory_space<vmem>>) attributes {dimension_semantics = [#tpu.dimension_semantics<parallel>, #tpu.dimension_semantics<parallel>, #tpu.dimension_semantics<arbitrary>], iteration_bounds = array<i64: 2, 1, 2>, scalar_prefetch = 0 : i64, scratch_operands = 0 : i64, tpu.core_type = #tpu.core_type<tc>, window_params = [{transform_indices = @transform_0, window_bounds = array<i64: 1, 18, 18, 128>}, {transform_indices = @transform_1, window_bounds = array<i64: 9, 128>}, {transform_indices = @transform_2, window_bounds = array<i64: 1, 128>}, {transform_indices = @transform_3, window_bounds = array<i64: 1, 8, 16, 128>}]} {
    %c8_i32 = arith.constant 8 : i32
    %0 = arith.muli %arg2, %c8_i32 : i32
    %1 = tpu.assume_multiple %0, 8 : i32
    %c0_i32 = arith.constant 0 : i32
    %2 = arith.addi %c0_i32, %1 : i32
    %c0 = arith.constant 0 : index
    %3 = arith.index_cast %2 : i32 to index
    %c0_0 = arith.constant 0 : index
    %c0_1 = arith.constant 0 : index
    %4 = vector.load %arg3[%c0, %3, %c0_0, %c0_1] : memref<1x18x18x128xbf16, #tpu.memory_space<vmem>>, vector<1x10x18x128xbf16>
    %5 = vector.shape_cast %4 : vector<1x10x18x128xbf16> to vector<10x18x128xbf16>
    %6 = arith.extf %5 : vector<10x18x128xbf16> to vector<10x18x128xf32>
    %cst = arith.constant 0.000000e+00 : f32
    %7 = vector.broadcast %cst : f32 to vector<8x16x128xf32>
    %8 = vector.extract_strided_slice %6 {offsets = [0, 0, 0], sizes = [8, 16, 128], strides = [1, 1, 1]} : vector<10x18x128xf32> to vector<8x16x128xf32>
    %c0_2 = arith.constant 0 : index
    %c0_3 = arith.constant 0 : index
    %9 = vector.load %arg4[%c0_2, %c0_3] : memref<9x128xf32, #tpu.memory_space<vmem>>, vector<1x128xf32>
    %10 = vector.shape_cast %9 : vector<1x128xf32> to vector<128xf32>
    %11 = vector.shape_cast %10 : vector<128xf32> to vector<1x1x128xf32>
    %12 = vector.broadcast %11 : vector<1x1x128xf32> to vector<8x16x128xf32>
    %13 = arith.mulf %8, %12 : vector<8x16x128xf32>
    %14 = arith.addf %7, %13 : vector<8x16x128xf32>
    %15 = vector.extract_strided_slice %6 {offsets = [0, 1, 0], sizes = [8, 16, 128], strides = [1, 1, 1]} : vector<10x18x128xf32> to vector<8x16x128xf32>
    %c1 = arith.constant 1 : index
    %c0_4 = arith.constant 0 : index
    %16 = vector.load %arg4[%c1, %c0_4] : memref<9x128xf32, #tpu.memory_space<vmem>>, vector<1x128xf32>
    %17 = vector.shape_cast %16 : vector<1x128xf32> to vector<128xf32>
    %18 = vector.shape_cast %17 : vector<128xf32> to vector<1x1x128xf32>
    %19 = vector.broadcast %18 : vector<1x1x128xf32> to vector<8x16x128xf32>
    %20 = arith.mulf %15, %19 : vector<8x16x128xf32>
    %21 = arith.addf %14, %20 : vector<8x16x128xf32>
    %22 = vector.extract_strided_slice %6 {offsets = [0, 2, 0], sizes = [8, 16, 128], strides = [1, 1, 1]} : vector<10x18x128xf32> to vector<8x16x128xf32>
    %c2 = arith.constant 2 : index
    %c0_5 = arith.constant 0 : index
    %23 = vector.load %arg4[%c2, %c0_5] : memref<9x128xf32, #tpu.memory_space<vmem>>, vector<1x128xf32>
    %24 = vector.shape_cast %23 : vector<1x128xf32> to vector<128xf32>
    %25 = vector.shape_cast %24 : vector<128xf32> to vector<1x1x128xf32>
    %26 = vector.broadcast %25 : vector<1x1x128xf32> to vector<8x16x128xf32>
    %27 = arith.mulf %22, %26 : vector<8x16x128xf32>
    %28 = arith.addf %21, %27 : vector<8x16x128xf32>
    %29 = vector.extract_strided_slice %6 {offsets = [1, 0, 0], sizes = [8, 16, 128], strides = [1, 1, 1]} : vector<10x18x128xf32> to vector<8x16x128xf32>
    %c3 = arith.constant 3 : index
    %c0_6 = arith.constant 0 : index
    %30 = vector.load %arg4[%c3, %c0_6] : memref<9x128xf32, #tpu.memory_space<vmem>>, vector<1x128xf32>
    %31 = vector.shape_cast %30 : vector<1x128xf32> to vector<128xf32>
    %32 = vector.shape_cast %31 : vector<128xf32> to vector<1x1x128xf32>
    %33 = vector.broadcast %32 : vector<1x1x128xf32> to vector<8x16x128xf32>
    %34 = arith.mulf %29, %33 : vector<8x16x128xf32>
    %35 = arith.addf %28, %34 : vector<8x16x128xf32>
    %36 = vector.extract_strided_slice %6 {offsets = [1, 1, 0], sizes = [8, 16, 128], strides = [1, 1, 1]} : vector<10x18x128xf32> to vector<8x16x128xf32>
    %c4 = arith.constant 4 : index
    %c0_7 = arith.constant 0 : index
    %37 = vector.load %arg4[%c4, %c0_7] : memref<9x128xf32, #tpu.memory_space<vmem>>, vector<1x128xf32>
    %38 = vector.shape_cast %37 : vector<1x128xf32> to vector<128xf32>
    %39 = vector.shape_cast %38 : vector<128xf32> to vector<1x1x128xf32>
    %40 = vector.broadcast %39 : vector<1x1x128xf32> to vector<8x16x128xf32>
    %41 = arith.mulf %36, %40 : vector<8x16x128xf32>
    %42 = arith.addf %35, %41 : vector<8x16x128xf32>
    %43 = vector.extract_strided_slice %6 {offsets = [1, 2, 0], sizes = [8, 16, 128], strides = [1, 1, 1]} : vector<10x18x128xf32> to vector<8x16x128xf32>
    %c5 = arith.constant 5 : index
    %c0_8 = arith.constant 0 : index
    %44 = vector.load %arg4[%c5, %c0_8] : memref<9x128xf32, #tpu.memory_space<vmem>>, vector<1x128xf32>
    %45 = vector.shape_cast %44 : vector<1x128xf32> to vector<128xf32>
    %46 = vector.shape_cast %45 : vector<128xf32> to vector<1x1x128xf32>
    %47 = vector.broadcast %46 : vector<1x1x128xf32> to vector<8x16x128xf32>
    %48 = arith.mulf %43, %47 : vector<8x16x128xf32>
    %49 = arith.addf %42, %48 : vector<8x16x128xf32>
    %50 = vector.extract_strided_slice %6 {offsets = [2, 0, 0], sizes = [8, 16, 128], strides = [1, 1, 1]} : vector<10x18x128xf32> to vector<8x16x128xf32>
    %c6 = arith.constant 6 : index
    %c0_9 = arith.constant 0 : index
    %51 = vector.load %arg4[%c6, %c0_9] : memref<9x128xf32, #tpu.memory_space<vmem>>, vector<1x128xf32>
    %52 = vector.shape_cast %51 : vector<1x128xf32> to vector<128xf32>
    %53 = vector.shape_cast %52 : vector<128xf32> to vector<1x1x128xf32>
    %54 = vector.broadcast %53 : vector<1x1x128xf32> to vector<8x16x128xf32>
    %55 = arith.mulf %50, %54 : vector<8x16x128xf32>
    %56 = arith.addf %49, %55 : vector<8x16x128xf32>
    %57 = vector.extract_strided_slice %6 {offsets = [2, 1, 0], sizes = [8, 16, 128], strides = [1, 1, 1]} : vector<10x18x128xf32> to vector<8x16x128xf32>
    %c7 = arith.constant 7 : index
    %c0_10 = arith.constant 0 : index
    %58 = vector.load %arg4[%c7, %c0_10] : memref<9x128xf32, #tpu.memory_space<vmem>>, vector<1x128xf32>
    %59 = vector.shape_cast %58 : vector<1x128xf32> to vector<128xf32>
    %60 = vector.shape_cast %59 : vector<128xf32> to vector<1x1x128xf32>
    %61 = vector.broadcast %60 : vector<1x1x128xf32> to vector<8x16x128xf32>
    %62 = arith.mulf %57, %61 : vector<8x16x128xf32>
    %63 = arith.addf %56, %62 : vector<8x16x128xf32>
    %64 = vector.extract_strided_slice %6 {offsets = [2, 2, 0], sizes = [8, 16, 128], strides = [1, 1, 1]} : vector<10x18x128xf32> to vector<8x16x128xf32>
    %c8 = arith.constant 8 : index
    %c0_11 = arith.constant 0 : index
    %65 = vector.load %arg4[%c8, %c0_11] : memref<9x128xf32, #tpu.memory_space<vmem>>, vector<1x128xf32>
    %66 = vector.shape_cast %65 : vector<1x128xf32> to vector<128xf32>
    %67 = vector.shape_cast %66 : vector<128xf32> to vector<1x1x128xf32>
    %68 = vector.broadcast %67 : vector<1x1x128xf32> to vector<8x16x128xf32>
    %69 = arith.mulf %64, %68 : vector<8x16x128xf32>
    %70 = arith.addf %63, %69 : vector<8x16x128xf32>
    %c0_12 = arith.constant 0 : index
    %c0_13 = arith.constant 0 : index
    %71 = vector.load %arg5[%c0_12, %c0_13] : memref<1x128xf32, #tpu.memory_space<vmem>>, vector<1x128xf32>
    %72 = vector.shape_cast %71 : vector<1x128xf32> to vector<128xf32>
    %73 = vector.shape_cast %72 : vector<128xf32> to vector<1x1x128xf32>
    %74 = vector.broadcast %73 : vector<1x1x128xf32> to vector<8x16x128xf32>
    %75 = arith.addf %70, %74 : vector<8x16x128xf32>
    %cst_14 = arith.constant 0.000000e+00 : f32
    %76 = vector.broadcast %cst_14 : f32 to vector<8x16x128xf32>
    %77 = arith.maximumf %75, %76 : vector<8x16x128xf32>
    %78 = arith.truncf %77 : vector<8x16x128xf32> to vector<8x16x128xbf16>
    %c0_15 = arith.constant 0 : index
    %c0_16 = arith.constant 0 : index
    %c0_17 = arith.constant 0 : index
    %c0_18 = arith.constant 0 : index
    %79 = vector.load %arg6[%c0_15, %c0_16, %c0_17, %c0_18] : memref<1x8x16x128xbf16, #tpu.memory_space<vmem>>, vector<1x8x16x128xbf16>
    %80 = vector.shape_cast %79 : vector<1x8x16x128xbf16> to vector<8x16x128xbf16>
    %81 = vector.shape_cast %78 : vector<8x16x128xbf16> to vector<1x8x16x128xbf16>
    tpu.vector_store %arg6[%c0_15, %c0_16, %c0_17, %c0_18], %81 {strides = array<i32>} : memref<1x8x16x128xbf16, #tpu.memory_space<vmem>>, vector<1x8x16x128xbf16>,
    return
  }
  func.func @transform_0(%arg0: i32, %arg1: i32, %arg2: i32) -> (i32, i32, i32, i32) {
    %c0_i32 = arith.constant 0 : i32
    %c0_i32_0 = arith.constant 0 : i32
    %c0_i32_1 = arith.constant 0 : i32
    return %arg0, %c0_i32, %c0_i32_0, %arg1 : i32, i32, i32, i32
  }
  func.func @transform_1(%arg0: i32, %arg1: i32, %arg2: i32) -> (i32, i32) {
    %c0_i32 = arith.constant 0 : i32
    %c0_i32_0 = arith.constant 0 : i32
    return %c0_i32, %arg1 : i32, i32
  }
  func.func @transform_2(%arg0: i32, %arg1: i32, %arg2: i32) -> (i32, i32) {
    %c0_i32 = arith.constant 0 : i32
    %c0_i32_0 = arith.constant 0 : i32
    return %c0_i32, %arg1 : i32, i32
  }
  func.func @transform_3(%arg0: i32, %arg1: i32, %arg2: i32) -> (i32, i32, i32, i32) {
    %c0_i32 = arith.constant 0 : i32
    %c0_i32_0 = arith.constant 0 : i32
    return %arg0, %arg2, %c0_i32, %arg1 : i32, i32, i32, i32
  }
}

module attributes {stable_mosaic.version = 11 : i64} {
  func.func @_matmul_kernel(%arg0: i32, %arg1: memref<256x128xbf16, #tpu.memory_space<vmem>>, %arg2: memref<128x128xbf16, #tpu.memory_space<vmem>>, %arg3: memref<1x128xf32, #tpu.memory_space<vmem>>, %arg4: memref<256x128xbf16, #tpu.memory_space<vmem>>) attributes {dimension_semantics = [#tpu.dimension_semantics<parallel>], iteration_bounds = array<i64: 2>, scalar_prefetch = 0 : i64, scratch_operands = 0 : i64, tpu.core_type = #tpu.core_type<tc>, window_params = [{transform_indices = @transform_0, window_bounds = array<i64: 256, 128>}, {pipeline_mode = #tpu.pipeline_mode<synchronous>, transform_indices = @transform_1, window_bounds = array<i64: 128, 128>}, {pipeline_mode = #tpu.pipeline_mode<synchronous>, transform_indices = @transform_2, window_bounds = array<i64: 1, 128>}, {transform_indices = @transform_3, window_bounds = array<i64: 256, 128>}]} {
    %c0 = arith.constant 0 : index
    %c0_0 = arith.constant 0 : index
    %0 = vector.load %arg1[%c0, %c0_0] : memref<256x128xbf16, #tpu.memory_space<vmem>>, vector<256x128xbf16>
    %c0_1 = arith.constant 0 : index
    %c0_2 = arith.constant 0 : index
    %1 = vector.load %arg2[%c0_1, %c0_2] : memref<128x128xbf16, #tpu.memory_space<vmem>>, vector<128x128xbf16>
    %cst = arith.constant dense<0.000000e+00> : vector<256x128xf32>
    %2 = tpu.matmul %0, %1, %cst {dimension_numbers = #tpu.dot_dimension_numbers<[1], [0], [0], [1], [0, 0, 1, 1], [], []>} : vector<256x128xbf16>, vector<128x128xbf16>, vector<256x128xf32> -> vector<256x128xf32>
    %c0_3 = arith.constant 0 : index
    %c0_4 = arith.constant 0 : index
    %3 = vector.load %arg3[%c0_3, %c0_4] : memref<1x128xf32, #tpu.memory_space<vmem>>, vector<1x128xf32>
    %4 = vector.broadcast %3 : vector<1x128xf32> to vector<256x128xf32>
    %5 = arith.addf %2, %4 : vector<256x128xf32>
    %cst_5 = arith.constant 0.000000e+00 : f32
    %6 = vector.broadcast %cst_5 : f32 to vector<256x128xf32>
    %7 = arith.maximumf %5, %6 : vector<256x128xf32>
    %8 = arith.truncf %7 : vector<256x128xf32> to vector<256x128xbf16>
    %c0_6 = arith.constant 0 : index
    %c0_7 = arith.constant 0 : index
    %9 = vector.load %arg4[%c0_6, %c0_7] : memref<256x128xbf16, #tpu.memory_space<vmem>>, vector<256x128xbf16>
    tpu.vector_store %arg4[%c0_6, %c0_7], %8 {strides = array<i32>} : memref<256x128xbf16, #tpu.memory_space<vmem>>, vector<256x128xbf16>,
    return
  }
  func.func @transform_0(%arg0: i32) -> (i32, i32) {
    %c0_i32 = arith.constant 0 : i32
    %c0_i32_0 = arith.constant 0 : i32
    return %arg0, %c0_i32 : i32, i32
  }
  func.func @transform_1(%arg0: i32) -> (i32, i32) {
    %c0_i32 = arith.constant 0 : i32
    %c0_i32_0 = arith.constant 0 : i32
    %c0_i32_1 = arith.constant 0 : i32
    return %c0_i32, %c0_i32_0 : i32, i32
  }
  func.func @transform_2(%arg0: i32) -> (i32, i32) {
    %c0_i32 = arith.constant 0 : i32
    %c0_i32_0 = arith.constant 0 : i32
    %c0_i32_1 = arith.constant 0 : i32
    return %c0_i32, %c0_i32_0 : i32, i32
  }
  func.func @transform_3(%arg0: i32) -> (i32, i32) {
    %c0_i32 = arith.constant 0 : i32
    %c0_i32_0 = arith.constant 0 : i32
    return %arg0, %c0_i32 : i32, i32
  }
}

module attributes {stable_mosaic.version = 11 : i64} {
  func.func @_dwconv_kernel(%arg0: i32, %arg1: i32, %arg2: i32, %arg3: memref<1x36x9x128xbf16, #tpu.memory_space<vmem>>, %arg4: memref<9x128xf32, #tpu.memory_space<vmem>>, %arg5: memref<1x128xf32, #tpu.memory_space<vmem>>, %arg6: memref<1x4x8x128xbf16, #tpu.memory_space<vmem>>) attributes {dimension_semantics = [#tpu.dimension_semantics<parallel>, #tpu.dimension_semantics<parallel>, #tpu.dimension_semantics<arbitrary>], iteration_bounds = array<i64: 2, 1, 2>, scalar_prefetch = 0 : i64, scratch_operands = 0 : i64, tpu.core_type = #tpu.core_type<tc>, window_params = [{transform_indices = @transform_0, window_bounds = array<i64: 1, 36, 9, 128>}, {transform_indices = @transform_1, window_bounds = array<i64: 9, 128>}, {transform_indices = @transform_2, window_bounds = array<i64: 1, 128>}, {transform_indices = @transform_3, window_bounds = array<i64: 1, 4, 8, 128>}]} {
    %c4_i32 = arith.constant 4 : i32
    %0 = arith.muli %arg2, %c4_i32 : i32
    %1 = tpu.assume_multiple %0, 4 : i32
    %c0_i32 = arith.constant 0 : i32
    %2 = arith.addi %c0_i32, %1 : i32
    %c0 = arith.constant 0 : index
    %3 = arith.index_cast %2 : i32 to index
    %c0_0 = arith.constant 0 : index
    %c0_1 = arith.constant 0 : index
    %4 = vector.load %arg3[%c0, %3, %c0_0, %c0_1] : memref<1x36x9x128xbf16, #tpu.memory_space<vmem>>, vector<1x5x9x128xbf16>
    %5 = vector.shape_cast %4 : vector<1x5x9x128xbf16> to vector<5x9x128xbf16>
    %6 = arith.extf %5 : vector<5x9x128xbf16> to vector<5x9x128xf32>
    %c9_i32 = arith.constant 9 : i32
    %7 = arith.addi %c9_i32, %1 : i32
    %c0_2 = arith.constant 0 : index
    %8 = arith.index_cast %7 : i32 to index
    %c0_3 = arith.constant 0 : index
    %c0_4 = arith.constant 0 : index
    %9 = vector.load %arg3[%c0_2, %8, %c0_3, %c0_4] : memref<1x36x9x128xbf16, #tpu.memory_space<vmem>>, vector<1x5x9x128xbf16>
    %10 = vector.shape_cast %9 : vector<1x5x9x128xbf16> to vector<5x9x128xbf16>
    %11 = arith.extf %10 : vector<5x9x128xbf16> to vector<5x9x128xf32>
    %c18_i32 = arith.constant 18 : i32
    %12 = arith.addi %c18_i32, %1 : i32
    %c0_5 = arith.constant 0 : index
    %13 = arith.index_cast %12 : i32 to index
    %c0_6 = arith.constant 0 : index
    %c0_7 = arith.constant 0 : index
    %14 = vector.load %arg3[%c0_5, %13, %c0_6, %c0_7] : memref<1x36x9x128xbf16, #tpu.memory_space<vmem>>, vector<1x5x9x128xbf16>
    %15 = vector.shape_cast %14 : vector<1x5x9x128xbf16> to vector<5x9x128xbf16>
    %16 = arith.extf %15 : vector<5x9x128xbf16> to vector<5x9x128xf32>
    %c27_i32 = arith.constant 27 : i32
    %17 = arith.addi %c27_i32, %1 : i32
    %c0_8 = arith.constant 0 : index
    %18 = arith.index_cast %17 : i32 to index
    %c0_9 = arith.constant 0 : index
    %c0_10 = arith.constant 0 : index
    %19 = vector.load %arg3[%c0_8, %18, %c0_9, %c0_10] : memref<1x36x9x128xbf16, #tpu.memory_space<vmem>>, vector<1x5x9x128xbf16>
    %20 = vector.shape_cast %19 : vector<1x5x9x128xbf16> to vector<5x9x128xbf16>
    %21 = arith.extf %20 : vector<5x9x128xbf16> to vector<5x9x128xf32>
    %cst = arith.constant 0.000000e+00 : f32
    %22 = vector.broadcast %cst : f32 to vector<4x8x128xf32>
    %23 = vector.extract_strided_slice %6 {offsets = [0, 0, 0], sizes = [4, 8, 128], strides = [1, 1, 1]} : vector<5x9x128xf32> to vector<4x8x128xf32>
    %c0_11 = arith.constant 0 : index
    %c0_12 = arith.constant 0 : index
    %24 = vector.load %arg4[%c0_11, %c0_12] : memref<9x128xf32, #tpu.memory_space<vmem>>, vector<1x128xf32>
    %25 = vector.shape_cast %24 : vector<1x128xf32> to vector<128xf32>
    %26 = vector.shape_cast %25 : vector<128xf32> to vector<1x1x128xf32>
    %27 = vector.broadcast %26 : vector<1x1x128xf32> to vector<4x8x128xf32>
    %28 = arith.mulf %23, %27 : vector<4x8x128xf32>
    %29 = arith.addf %22, %28 : vector<4x8x128xf32>
    %30 = vector.extract_strided_slice %11 {offsets = [0, 0, 0], sizes = [4, 8, 128], strides = [1, 1, 1]} : vector<5x9x128xf32> to vector<4x8x128xf32>
    %c1 = arith.constant 1 : index
    %c0_13 = arith.constant 0 : index
    %31 = vector.load %arg4[%c1, %c0_13] : memref<9x128xf32, #tpu.memory_space<vmem>>, vector<1x128xf32>
    %32 = vector.shape_cast %31 : vector<1x128xf32> to vector<128xf32>
    %33 = vector.shape_cast %32 : vector<128xf32> to vector<1x1x128xf32>
    %34 = vector.broadcast %33 : vector<1x1x128xf32> to vector<4x8x128xf32>
    %35 = arith.mulf %30, %34 : vector<4x8x128xf32>
    %36 = arith.addf %29, %35 : vector<4x8x128xf32>
    %37 = vector.extract_strided_slice %6 {offsets = [0, 1, 0], sizes = [4, 8, 128], strides = [1, 1, 1]} : vector<5x9x128xf32> to vector<4x8x128xf32>
    %c2 = arith.constant 2 : index
    %c0_14 = arith.constant 0 : index
    %38 = vector.load %arg4[%c2, %c0_14] : memref<9x128xf32, #tpu.memory_space<vmem>>, vector<1x128xf32>
    %39 = vector.shape_cast %38 : vector<1x128xf32> to vector<128xf32>
    %40 = vector.shape_cast %39 : vector<128xf32> to vector<1x1x128xf32>
    %41 = vector.broadcast %40 : vector<1x1x128xf32> to vector<4x8x128xf32>
    %42 = arith.mulf %37, %41 : vector<4x8x128xf32>
    %43 = arith.addf %36, %42 : vector<4x8x128xf32>
    %44 = vector.extract_strided_slice %16 {offsets = [0, 0, 0], sizes = [4, 8, 128], strides = [1, 1, 1]} : vector<5x9x128xf32> to vector<4x8x128xf32>
    %c3 = arith.constant 3 : index
    %c0_15 = arith.constant 0 : index
    %45 = vector.load %arg4[%c3, %c0_15] : memref<9x128xf32, #tpu.memory_space<vmem>>, vector<1x128xf32>
    %46 = vector.shape_cast %45 : vector<1x128xf32> to vector<128xf32>
    %47 = vector.shape_cast %46 : vector<128xf32> to vector<1x1x128xf32>
    %48 = vector.broadcast %47 : vector<1x1x128xf32> to vector<4x8x128xf32>
    %49 = arith.mulf %44, %48 : vector<4x8x128xf32>
    %50 = arith.addf %43, %49 : vector<4x8x128xf32>
    %51 = vector.extract_strided_slice %21 {offsets = [0, 0, 0], sizes = [4, 8, 128], strides = [1, 1, 1]} : vector<5x9x128xf32> to vector<4x8x128xf32>
    %c4 = arith.constant 4 : index
    %c0_16 = arith.constant 0 : index
    %52 = vector.load %arg4[%c4, %c0_16] : memref<9x128xf32, #tpu.memory_space<vmem>>, vector<1x128xf32>
    %53 = vector.shape_cast %52 : vector<1x128xf32> to vector<128xf32>
    %54 = vector.shape_cast %53 : vector<128xf32> to vector<1x1x128xf32>
    %55 = vector.broadcast %54 : vector<1x1x128xf32> to vector<4x8x128xf32>
    %56 = arith.mulf %51, %55 : vector<4x8x128xf32>
    %57 = arith.addf %50, %56 : vector<4x8x128xf32>
    %58 = vector.extract_strided_slice %16 {offsets = [0, 1, 0], sizes = [4, 8, 128], strides = [1, 1, 1]} : vector<5x9x128xf32> to vector<4x8x128xf32>
    %c5 = arith.constant 5 : index
    %c0_17 = arith.constant 0 : index
    %59 = vector.load %arg4[%c5, %c0_17] : memref<9x128xf32, #tpu.memory_space<vmem>>, vector<1x128xf32>
    %60 = vector.shape_cast %59 : vector<1x128xf32> to vector<128xf32>
    %61 = vector.shape_cast %60 : vector<128xf32> to vector<1x1x128xf32>
    %62 = vector.broadcast %61 : vector<1x1x128xf32> to vector<4x8x128xf32>
    %63 = arith.mulf %58, %62 : vector<4x8x128xf32>
    %64 = arith.addf %57, %63 : vector<4x8x128xf32>
    %65 = vector.extract_strided_slice %6 {offsets = [1, 0, 0], sizes = [4, 8, 128], strides = [1, 1, 1]} : vector<5x9x128xf32> to vector<4x8x128xf32>
    %c6 = arith.constant 6 : index
    %c0_18 = arith.constant 0 : index
    %66 = vector.load %arg4[%c6, %c0_18] : memref<9x128xf32, #tpu.memory_space<vmem>>, vector<1x128xf32>
    %67 = vector.shape_cast %66 : vector<1x128xf32> to vector<128xf32>
    %68 = vector.shape_cast %67 : vector<128xf32> to vector<1x1x128xf32>
    %69 = vector.broadcast %68 : vector<1x1x128xf32> to vector<4x8x128xf32>
    %70 = arith.mulf %65, %69 : vector<4x8x128xf32>
    %71 = arith.addf %64, %70 : vector<4x8x128xf32>
    %72 = vector.extract_strided_slice %11 {offsets = [1, 0, 0], sizes = [4, 8, 128], strides = [1, 1, 1]} : vector<5x9x128xf32> to vector<4x8x128xf32>
    %c7 = arith.constant 7 : index
    %c0_19 = arith.constant 0 : index
    %73 = vector.load %arg4[%c7, %c0_19] : memref<9x128xf32, #tpu.memory_space<vmem>>, vector<1x128xf32>
    %74 = vector.shape_cast %73 : vector<1x128xf32> to vector<128xf32>
    %75 = vector.shape_cast %74 : vector<128xf32> to vector<1x1x128xf32>
    %76 = vector.broadcast %75 : vector<1x1x128xf32> to vector<4x8x128xf32>
    %77 = arith.mulf %72, %76 : vector<4x8x128xf32>
    %78 = arith.addf %71, %77 : vector<4x8x128xf32>
    %79 = vector.extract_strided_slice %6 {offsets = [1, 1, 0], sizes = [4, 8, 128], strides = [1, 1, 1]} : vector<5x9x128xf32> to vector<4x8x128xf32>
    %c8 = arith.constant 8 : index
    %c0_20 = arith.constant 0 : index
    %80 = vector.load %arg4[%c8, %c0_20] : memref<9x128xf32, #tpu.memory_space<vmem>>, vector<1x128xf32>
    %81 = vector.shape_cast %80 : vector<1x128xf32> to vector<128xf32>
    %82 = vector.shape_cast %81 : vector<128xf32> to vector<1x1x128xf32>
    %83 = vector.broadcast %82 : vector<1x1x128xf32> to vector<4x8x128xf32>
    %84 = arith.mulf %79, %83 : vector<4x8x128xf32>
    %85 = arith.addf %78, %84 : vector<4x8x128xf32>
    %c0_21 = arith.constant 0 : index
    %c0_22 = arith.constant 0 : index
    %86 = vector.load %arg5[%c0_21, %c0_22] : memref<1x128xf32, #tpu.memory_space<vmem>>, vector<1x128xf32>
    %87 = vector.shape_cast %86 : vector<1x128xf32> to vector<128xf32>
    %88 = vector.shape_cast %87 : vector<128xf32> to vector<1x1x128xf32>
    %89 = vector.broadcast %88 : vector<1x1x128xf32> to vector<4x8x128xf32>
    %90 = arith.addf %85, %89 : vector<4x8x128xf32>
    %cst_23 = arith.constant 0.000000e+00 : f32
    %91 = vector.broadcast %cst_23 : f32 to vector<4x8x128xf32>
    %92 = arith.maximumf %90, %91 : vector<4x8x128xf32>
    %93 = arith.truncf %92 : vector<4x8x128xf32> to vector<4x8x128xbf16>
    %c0_24 = arith.constant 0 : index
    %c0_25 = arith.constant 0 : index
    %c0_26 = arith.constant 0 : index
    %c0_27 = arith.constant 0 : index
    %94 = vector.load %arg6[%c0_24, %c0_25, %c0_26, %c0_27] : memref<1x4x8x128xbf16, #tpu.memory_space<vmem>>, vector<1x4x8x128xbf16>
    %95 = vector.shape_cast %94 : vector<1x4x8x128xbf16> to vector<4x8x128xbf16>
    %96 = vector.shape_cast %93 : vector<4x8x128xbf16> to vector<1x4x8x128xbf16>
    tpu.vector_store %arg6[%c0_24, %c0_25, %c0_26, %c0_27], %96 {strides = array<i32>} : memref<1x4x8x128xbf16, #tpu.memory_space<vmem>>, vector<1x4x8x128xbf16>,
    return
  }
  func.func @transform_0(%arg0: i32, %arg1: i32, %arg2: i32) -> (i32, i32, i32, i32) {
    %c0_i32 = arith.constant 0 : i32
    %c0_i32_0 = arith.constant 0 : i32
    %c0_i32_1 = arith.constant 0 : i32
    return %arg0, %c0_i32, %c0_i32_0, %arg1 : i32, i32, i32, i32
  }
  func.func @transform_1(%arg0: i32, %arg1: i32, %arg2: i32) -> (i32, i32) {
    %c0_i32 = arith.constant 0 : i32
    %c0_i32_0 = arith.constant 0 : i32
    return %c0_i32, %arg1 : i32, i32
  }
  func.func @transform_2(%arg0: i32, %arg1: i32, %arg2: i32) -> (i32, i32) {
    %c0_i32 = arith.constant 0 : i32
    %c0_i32_0 = arith.constant 0 : i32
    return %c0_i32, %arg1 : i32, i32
  }
  func.func @transform_3(%arg0: i32, %arg1: i32, %arg2: i32) -> (i32, i32, i32, i32) {
    %c0_i32 = arith.constant 0 : i32
    %c0_i32_0 = arith.constant 0 : i32
    return %arg0, %arg2, %c0_i32, %arg1 : i32, i32, i32, i32
  }
}

module attributes {stable_mosaic.version = 11 : i64} {
  func.func @_matmul_kernel(%arg0: i32, %arg1: memref<64x128xbf16, #tpu.memory_space<vmem>>, %arg2: memref<128x128xbf16, #tpu.memory_space<vmem>>, %arg3: memref<1x128xf32, #tpu.memory_space<vmem>>, %arg4: memref<64x128xbf16, #tpu.memory_space<vmem>>) attributes {dimension_semantics = [#tpu.dimension_semantics<parallel>], iteration_bounds = array<i64: 2>, scalar_prefetch = 0 : i64, scratch_operands = 0 : i64, tpu.core_type = #tpu.core_type<tc>, window_params = [{transform_indices = @transform_0, window_bounds = array<i64: 64, 128>}, {pipeline_mode = #tpu.pipeline_mode<synchronous>, transform_indices = @transform_1, window_bounds = array<i64: 128, 128>}, {pipeline_mode = #tpu.pipeline_mode<synchronous>, transform_indices = @transform_2, window_bounds = array<i64: 1, 128>}, {transform_indices = @transform_3, window_bounds = array<i64: 64, 128>}]} {
    %c0 = arith.constant 0 : index
    %c0_0 = arith.constant 0 : index
    %0 = vector.load %arg1[%c0, %c0_0] : memref<64x128xbf16, #tpu.memory_space<vmem>>, vector<64x128xbf16>
    %c0_1 = arith.constant 0 : index
    %c0_2 = arith.constant 0 : index
    %1 = vector.load %arg2[%c0_1, %c0_2] : memref<128x128xbf16, #tpu.memory_space<vmem>>, vector<128x128xbf16>
    %cst = arith.constant dense<0.000000e+00> : vector<64x128xf32>
    %2 = tpu.matmul %0, %1, %cst {dimension_numbers = #tpu.dot_dimension_numbers<[1], [0], [0], [1], [0, 0, 1, 1], [], []>} : vector<64x128xbf16>, vector<128x128xbf16>, vector<64x128xf32> -> vector<64x128xf32>
    %c0_3 = arith.constant 0 : index
    %c0_4 = arith.constant 0 : index
    %3 = vector.load %arg3[%c0_3, %c0_4] : memref<1x128xf32, #tpu.memory_space<vmem>>, vector<1x128xf32>
    %4 = vector.broadcast %3 : vector<1x128xf32> to vector<64x128xf32>
    %5 = arith.addf %2, %4 : vector<64x128xf32>
    %6 = arith.truncf %5 : vector<64x128xf32> to vector<64x128xbf16>
    %c0_5 = arith.constant 0 : index
    %c0_6 = arith.constant 0 : index
    %7 = vector.load %arg4[%c0_5, %c0_6] : memref<64x128xbf16, #tpu.memory_space<vmem>>, vector<64x128xbf16>
    tpu.vector_store %arg4[%c0_5, %c0_6], %6 {strides = array<i32>} : memref<64x128xbf16, #tpu.memory_space<vmem>>, vector<64x128xbf16>,
    return
  }
  func.func @transform_0(%arg0: i32) -> (i32, i32) {
    %c0_i32 = arith.constant 0 : i32
    %c0_i32_0 = arith.constant 0 : i32
    return %arg0, %c0_i32 : i32, i32
  }
  func.func @transform_1(%arg0: i32) -> (i32, i32) {
    %c0_i32 = arith.constant 0 : i32
    %c0_i32_0 = arith.constant 0 : i32
    %c0_i32_1 = arith.constant 0 : i32
    return %c0_i32, %c0_i32_0 : i32, i32
  }
  func.func @transform_2(%arg0: i32) -> (i32, i32) {
    %c0_i32 = arith.constant 0 : i32
    %c0_i32_0 = arith.constant 0 : i32
    %c0_i32_1 = arith.constant 0 : i32
    return %c0_i32, %c0_i32_0 : i32, i32
  }
  func.func @transform_3(%arg0: i32) -> (i32, i32) {
    %c0_i32 = arith.constant 0 : i32
    %c0_i32_0 = arith.constant 0 : i32
    return %arg0, %c0_i32 : i32, i32
  }
}

module attributes {stable_mosaic.version = 11 : i64} {
  func.func @_matmul_kernel(%arg0: i32, %arg1: memref<64x128xbf16, #tpu.memory_space<vmem>>, %arg2: memref<128x256xbf16, #tpu.memory_space<vmem>>, %arg3: memref<1x256xf32, #tpu.memory_space<vmem>>, %arg4: memref<64x256xbf16, #tpu.memory_space<vmem>>) attributes {dimension_semantics = [#tpu.dimension_semantics<parallel>], iteration_bounds = array<i64: 2>, scalar_prefetch = 0 : i64, scratch_operands = 0 : i64, tpu.core_type = #tpu.core_type<tc>, window_params = [{transform_indices = @transform_0, window_bounds = array<i64: 64, 128>}, {pipeline_mode = #tpu.pipeline_mode<synchronous>, transform_indices = @transform_1, window_bounds = array<i64: 128, 256>}, {pipeline_mode = #tpu.pipeline_mode<synchronous>, transform_indices = @transform_2, window_bounds = array<i64: 1, 256>}, {transform_indices = @transform_3, window_bounds = array<i64: 64, 256>}]} {
    %c0 = arith.constant 0 : index
    %c0_0 = arith.constant 0 : index
    %0 = vector.load %arg1[%c0, %c0_0] : memref<64x128xbf16, #tpu.memory_space<vmem>>, vector<64x128xbf16>
    %c0_1 = arith.constant 0 : index
    %c0_2 = arith.constant 0 : index
    %1 = vector.load %arg2[%c0_1, %c0_2] : memref<128x256xbf16, #tpu.memory_space<vmem>>, vector<128x256xbf16>
    %cst = arith.constant dense<0.000000e+00> : vector<64x256xf32>
    %2 = tpu.matmul %0, %1, %cst {dimension_numbers = #tpu.dot_dimension_numbers<[1], [0], [0], [1], [0, 0, 1, 1], [], []>} : vector<64x128xbf16>, vector<128x256xbf16>, vector<64x256xf32> -> vector<64x256xf32>
    %c0_3 = arith.constant 0 : index
    %c0_4 = arith.constant 0 : index
    %3 = vector.load %arg3[%c0_3, %c0_4] : memref<1x256xf32, #tpu.memory_space<vmem>>, vector<1x256xf32>
    %4 = vector.broadcast %3 : vector<1x256xf32> to vector<64x256xf32>
    %5 = arith.addf %2, %4 : vector<64x256xf32>
    %cst_5 = arith.constant 0.000000e+00 : f32
    %6 = vector.broadcast %cst_5 : f32 to vector<64x256xf32>
    %7 = arith.maximumf %5, %6 : vector<64x256xf32>
    %8 = arith.truncf %7 : vector<64x256xf32> to vector<64x256xbf16>
    %c0_6 = arith.constant 0 : index
    %c0_7 = arith.constant 0 : index
    %9 = vector.load %arg4[%c0_6, %c0_7] : memref<64x256xbf16, #tpu.memory_space<vmem>>, vector<64x256xbf16>
    tpu.vector_store %arg4[%c0_6, %c0_7], %8 {strides = array<i32>} : memref<64x256xbf16, #tpu.memory_space<vmem>>, vector<64x256xbf16>,
    return
  }
  func.func @transform_0(%arg0: i32) -> (i32, i32) {
    %c0_i32 = arith.constant 0 : i32
    %c0_i32_0 = arith.constant 0 : i32
    return %arg0, %c0_i32 : i32, i32
  }
  func.func @transform_1(%arg0: i32) -> (i32, i32) {
    %c0_i32 = arith.constant 0 : i32
    %c0_i32_0 = arith.constant 0 : i32
    %c0_i32_1 = arith.constant 0 : i32
    return %c0_i32, %c0_i32_0 : i32, i32
  }
  func.func @transform_2(%arg0: i32) -> (i32, i32) {
    %c0_i32 = arith.constant 0 : i32
    %c0_i32_0 = arith.constant 0 : i32
    %c0_i32_1 = arith.constant 0 : i32
    return %c0_i32, %c0_i32_0 : i32, i32
  }
  func.func @transform_3(%arg0: i32) -> (i32, i32) {
    %c0_i32 = arith.constant 0 : i32
    %c0_i32_0 = arith.constant 0 : i32
    return %arg0, %c0_i32 : i32, i32
  }
}

module attributes {stable_mosaic.version = 11 : i64} {
  func.func @_dwconv_kernel(%arg0: i32, %arg1: i32, %arg2: i32, %arg3: memref<1x10x10x128xbf16, #tpu.memory_space<vmem>>, %arg4: memref<9x128xf32, #tpu.memory_space<vmem>>, %arg5: memref<1x128xf32, #tpu.memory_space<vmem>>, %arg6: memref<1x4x8x128xbf16, #tpu.memory_space<vmem>>) attributes {dimension_semantics = [#tpu.dimension_semantics<parallel>, #tpu.dimension_semantics<parallel>, #tpu.dimension_semantics<arbitrary>], iteration_bounds = array<i64: 2, 2, 2>, scalar_prefetch = 0 : i64, scratch_operands = 0 : i64, tpu.core_type = #tpu.core_type<tc>, window_params = [{transform_indices = @transform_0, window_bounds = array<i64: 1, 10, 10, 128>}, {transform_indices = @transform_1, window_bounds = array<i64: 9, 128>}, {transform_indices = @transform_2, window_bounds = array<i64: 1, 128>}, {transform_indices = @transform_3, window_bounds = array<i64: 1, 4, 8, 128>}]} {
    %c4_i32 = arith.constant 4 : i32
    %0 = arith.muli %arg2, %c4_i32 : i32
    %1 = tpu.assume_multiple %0, 4 : i32
    %c0_i32 = arith.constant 0 : i32
    %2 = arith.addi %c0_i32, %1 : i32
    %c0 = arith.constant 0 : index
    %3 = arith.index_cast %2 : i32 to index
    %c0_0 = arith.constant 0 : index
    %c0_1 = arith.constant 0 : index
    %4 = vector.load %arg3[%c0, %3, %c0_0, %c0_1] : memref<1x10x10x128xbf16, #tpu.memory_space<vmem>>, vector<1x6x10x128xbf16>
    %5 = vector.shape_cast %4 : vector<1x6x10x128xbf16> to vector<6x10x128xbf16>
    %6 = arith.extf %5 : vector<6x10x128xbf16> to vector<6x10x128xf32>
    %cst = arith.constant 0.000000e+00 : f32
    %7 = vector.broadcast %cst : f32 to vector<4x8x128xf32>
    %8 = vector.extract_strided_slice %6 {offsets = [0, 0, 0], sizes = [4, 8, 128], strides = [1, 1, 1]} : vector<6x10x128xf32> to vector<4x8x128xf32>
    %c0_2 = arith.constant 0 : index
    %c0_3 = arith.constant 0 : index
    %9 = vector.load %arg4[%c0_2, %c0_3] : memref<9x128xf32, #tpu.memory_space<vmem>>, vector<1x128xf32>
    %10 = vector.shape_cast %9 : vector<1x128xf32> to vector<128xf32>
    %11 = vector.shape_cast %10 : vector<128xf32> to vector<1x1x128xf32>
    %12 = vector.broadcast %11 : vector<1x1x128xf32> to vector<4x8x128xf32>
    %13 = arith.mulf %8, %12 : vector<4x8x128xf32>
    %14 = arith.addf %7, %13 : vector<4x8x128xf32>
    %15 = vector.extract_strided_slice %6 {offsets = [0, 1, 0], sizes = [4, 8, 128], strides = [1, 1, 1]} : vector<6x10x128xf32> to vector<4x8x128xf32>
    %c1 = arith.constant 1 : index
    %c0_4 = arith.constant 0 : index
    %16 = vector.load %arg4[%c1, %c0_4] : memref<9x128xf32, #tpu.memory_space<vmem>>, vector<1x128xf32>
    %17 = vector.shape_cast %16 : vector<1x128xf32> to vector<128xf32>
    %18 = vector.shape_cast %17 : vector<128xf32> to vector<1x1x128xf32>
    %19 = vector.broadcast %18 : vector<1x1x128xf32> to vector<4x8x128xf32>
    %20 = arith.mulf %15, %19 : vector<4x8x128xf32>
    %21 = arith.addf %14, %20 : vector<4x8x128xf32>
    %22 = vector.extract_strided_slice %6 {offsets = [0, 2, 0], sizes = [4, 8, 128], strides = [1, 1, 1]} : vector<6x10x128xf32> to vector<4x8x128xf32>
    %c2 = arith.constant 2 : index
    %c0_5 = arith.constant 0 : index
    %23 = vector.load %arg4[%c2, %c0_5] : memref<9x128xf32, #tpu.memory_space<vmem>>, vector<1x128xf32>
    %24 = vector.shape_cast %23 : vector<1x128xf32> to vector<128xf32>
    %25 = vector.shape_cast %24 : vector<128xf32> to vector<1x1x128xf32>
    %26 = vector.broadcast %25 : vector<1x1x128xf32> to vector<4x8x128xf32>
    %27 = arith.mulf %22, %26 : vector<4x8x128xf32>
    %28 = arith.addf %21, %27 : vector<4x8x128xf32>
    %29 = vector.extract_strided_slice %6 {offsets = [1, 0, 0], sizes = [4, 8, 128], strides = [1, 1, 1]} : vector<6x10x128xf32> to vector<4x8x128xf32>
    %c3 = arith.constant 3 : index
    %c0_6 = arith.constant 0 : index
    %30 = vector.load %arg4[%c3, %c0_6] : memref<9x128xf32, #tpu.memory_space<vmem>>, vector<1x128xf32>
    %31 = vector.shape_cast %30 : vector<1x128xf32> to vector<128xf32>
    %32 = vector.shape_cast %31 : vector<128xf32> to vector<1x1x128xf32>
    %33 = vector.broadcast %32 : vector<1x1x128xf32> to vector<4x8x128xf32>
    %34 = arith.mulf %29, %33 : vector<4x8x128xf32>
    %35 = arith.addf %28, %34 : vector<4x8x128xf32>
    %36 = vector.extract_strided_slice %6 {offsets = [1, 1, 0], sizes = [4, 8, 128], strides = [1, 1, 1]} : vector<6x10x128xf32> to vector<4x8x128xf32>
    %c4 = arith.constant 4 : index
    %c0_7 = arith.constant 0 : index
    %37 = vector.load %arg4[%c4, %c0_7] : memref<9x128xf32, #tpu.memory_space<vmem>>, vector<1x128xf32>
    %38 = vector.shape_cast %37 : vector<1x128xf32> to vector<128xf32>
    %39 = vector.shape_cast %38 : vector<128xf32> to vector<1x1x128xf32>
    %40 = vector.broadcast %39 : vector<1x1x128xf32> to vector<4x8x128xf32>
    %41 = arith.mulf %36, %40 : vector<4x8x128xf32>
    %42 = arith.addf %35, %41 : vector<4x8x128xf32>
    %43 = vector.extract_strided_slice %6 {offsets = [1, 2, 0], sizes = [4, 8, 128], strides = [1, 1, 1]} : vector<6x10x128xf32> to vector<4x8x128xf32>
    %c5 = arith.constant 5 : index
    %c0_8 = arith.constant 0 : index
    %44 = vector.load %arg4[%c5, %c0_8] : memref<9x128xf32, #tpu.memory_space<vmem>>, vector<1x128xf32>
    %45 = vector.shape_cast %44 : vector<1x128xf32> to vector<128xf32>
    %46 = vector.shape_cast %45 : vector<128xf32> to vector<1x1x128xf32>
    %47 = vector.broadcast %46 : vector<1x1x128xf32> to vector<4x8x128xf32>
    %48 = arith.mulf %43, %47 : vector<4x8x128xf32>
    %49 = arith.addf %42, %48 : vector<4x8x128xf32>
    %50 = vector.extract_strided_slice %6 {offsets = [2, 0, 0], sizes = [4, 8, 128], strides = [1, 1, 1]} : vector<6x10x128xf32> to vector<4x8x128xf32>
    %c6 = arith.constant 6 : index
    %c0_9 = arith.constant 0 : index
    %51 = vector.load %arg4[%c6, %c0_9] : memref<9x128xf32, #tpu.memory_space<vmem>>, vector<1x128xf32>
    %52 = vector.shape_cast %51 : vector<1x128xf32> to vector<128xf32>
    %53 = vector.shape_cast %52 : vector<128xf32> to vector<1x1x128xf32>
    %54 = vector.broadcast %53 : vector<1x1x128xf32> to vector<4x8x128xf32>
    %55 = arith.mulf %50, %54 : vector<4x8x128xf32>
    %56 = arith.addf %49, %55 : vector<4x8x128xf32>
    %57 = vector.extract_strided_slice %6 {offsets = [2, 1, 0], sizes = [4, 8, 128], strides = [1, 1, 1]} : vector<6x10x128xf32> to vector<4x8x128xf32>
    %c7 = arith.constant 7 : index
    %c0_10 = arith.constant 0 : index
    %58 = vector.load %arg4[%c7, %c0_10] : memref<9x128xf32, #tpu.memory_space<vmem>>, vector<1x128xf32>
    %59 = vector.shape_cast %58 : vector<1x128xf32> to vector<128xf32>
    %60 = vector.shape_cast %59 : vector<128xf32> to vector<1x1x128xf32>
    %61 = vector.broadcast %60 : vector<1x1x128xf32> to vector<4x8x128xf32>
    %62 = arith.mulf %57, %61 : vector<4x8x128xf32>
    %63 = arith.addf %56, %62 : vector<4x8x128xf32>
    %64 = vector.extract_strided_slice %6 {offsets = [2, 2, 0], sizes = [4, 8, 128], strides = [1, 1, 1]} : vector<6x10x128xf32> to vector<4x8x128xf32>
    %c8 = arith.constant 8 : index
    %c0_11 = arith.constant 0 : index
    %65 = vector.load %arg4[%c8, %c0_11] : memref<9x128xf32, #tpu.memory_space<vmem>>, vector<1x128xf32>
    %66 = vector.shape_cast %65 : vector<1x128xf32> to vector<128xf32>
    %67 = vector.shape_cast %66 : vector<128xf32> to vector<1x1x128xf32>
    %68 = vector.broadcast %67 : vector<1x1x128xf32> to vector<4x8x128xf32>
    %69 = arith.mulf %64, %68 : vector<4x8x128xf32>
    %70 = arith.addf %63, %69 : vector<4x8x128xf32>
    %c0_12 = arith.constant 0 : index
    %c0_13 = arith.constant 0 : index
    %71 = vector.load %arg5[%c0_12, %c0_13] : memref<1x128xf32, #tpu.memory_space<vmem>>, vector<1x128xf32>
    %72 = vector.shape_cast %71 : vector<1x128xf32> to vector<128xf32>
    %73 = vector.shape_cast %72 : vector<128xf32> to vector<1x1x128xf32>
    %74 = vector.broadcast %73 : vector<1x1x128xf32> to vector<4x8x128xf32>
    %75 = arith.addf %70, %74 : vector<4x8x128xf32>
    %cst_14 = arith.constant 0.000000e+00 : f32
    %76 = vector.broadcast %cst_14 : f32 to vector<4x8x128xf32>
    %77 = arith.maximumf %75, %76 : vector<4x8x128xf32>
    %78 = arith.truncf %77 : vector<4x8x128xf32> to vector<4x8x128xbf16>
    %c0_15 = arith.constant 0 : index
    %c0_16 = arith.constant 0 : index
    %c0_17 = arith.constant 0 : index
    %c0_18 = arith.constant 0 : index
    %79 = vector.load %arg6[%c0_15, %c0_16, %c0_17, %c0_18] : memref<1x4x8x128xbf16, #tpu.memory_space<vmem>>, vector<1x4x8x128xbf16>
    %80 = vector.shape_cast %79 : vector<1x4x8x128xbf16> to vector<4x8x128xbf16>
    %81 = vector.shape_cast %78 : vector<4x8x128xbf16> to vector<1x4x8x128xbf16>
    tpu.vector_store %arg6[%c0_15, %c0_16, %c0_17, %c0_18], %81 {strides = array<i32>} : memref<1x4x8x128xbf16, #tpu.memory_space<vmem>>, vector<1x4x8x128xbf16>,
    return
  }
  func.func @transform_0(%arg0: i32, %arg1: i32, %arg2: i32) -> (i32, i32, i32, i32) {
    %c0_i32 = arith.constant 0 : i32
    %c0_i32_0 = arith.constant 0 : i32
    %c0_i32_1 = arith.constant 0 : i32
    return %arg0, %c0_i32, %c0_i32_0, %arg1 : i32, i32, i32, i32
  }
  func.func @transform_1(%arg0: i32, %arg1: i32, %arg2: i32) -> (i32, i32) {
    %c0_i32 = arith.constant 0 : i32
    %c0_i32_0 = arith.constant 0 : i32
    return %c0_i32, %arg1 : i32, i32
  }
  func.func @transform_2(%arg0: i32, %arg1: i32, %arg2: i32) -> (i32, i32) {
    %c0_i32 = arith.constant 0 : i32
    %c0_i32_0 = arith.constant 0 : i32
    return %c0_i32, %arg1 : i32, i32
  }
  func.func @transform_3(%arg0: i32, %arg1: i32, %arg2: i32) -> (i32, i32, i32, i32) {
    %c0_i32 = arith.constant 0 : i32
    %c0_i32_0 = arith.constant 0 : i32
    return %arg0, %arg2, %c0_i32, %arg1 : i32, i32, i32, i32
  }
}

module attributes {stable_mosaic.version = 11 : i64} {
  func.func @_matmul_kernel(%arg0: i32, %arg1: memref<64x128xbf16, #tpu.memory_space<vmem>>, %arg2: memref<128x128xbf16, #tpu.memory_space<vmem>>, %arg3: memref<1x128xf32, #tpu.memory_space<vmem>>, %arg4: memref<64x128xbf16, #tpu.memory_space<vmem>>) attributes {dimension_semantics = [#tpu.dimension_semantics<parallel>], iteration_bounds = array<i64: 2>, scalar_prefetch = 0 : i64, scratch_operands = 0 : i64, tpu.core_type = #tpu.core_type<tc>, window_params = [{transform_indices = @transform_0, window_bounds = array<i64: 64, 128>}, {pipeline_mode = #tpu.pipeline_mode<synchronous>, transform_indices = @transform_1, window_bounds = array<i64: 128, 128>}, {pipeline_mode = #tpu.pipeline_mode<synchronous>, transform_indices = @transform_2, window_bounds = array<i64: 1, 128>}, {transform_indices = @transform_3, window_bounds = array<i64: 64, 128>}]} {
    %c0 = arith.constant 0 : index
    %c0_0 = arith.constant 0 : index
    %0 = vector.load %arg1[%c0, %c0_0] : memref<64x128xbf16, #tpu.memory_space<vmem>>, vector<64x128xbf16>
    %c0_1 = arith.constant 0 : index
    %c0_2 = arith.constant 0 : index
    %1 = vector.load %arg2[%c0_1, %c0_2] : memref<128x128xbf16, #tpu.memory_space<vmem>>, vector<128x128xbf16>
    %cst = arith.constant dense<0.000000e+00> : vector<64x128xf32>
    %2 = tpu.matmul %0, %1, %cst {dimension_numbers = #tpu.dot_dimension_numbers<[1], [0], [0], [1], [0, 0, 1, 1], [], []>} : vector<64x128xbf16>, vector<128x128xbf16>, vector<64x128xf32> -> vector<64x128xf32>
    %c0_3 = arith.constant 0 : index
    %c0_4 = arith.constant 0 : index
    %3 = vector.load %arg3[%c0_3, %c0_4] : memref<1x128xf32, #tpu.memory_space<vmem>>, vector<1x128xf32>
    %4 = vector.broadcast %3 : vector<1x128xf32> to vector<64x128xf32>
    %5 = arith.addf %2, %4 : vector<64x128xf32>
    %cst_5 = arith.constant 0.000000e+00 : f32
    %6 = vector.broadcast %cst_5 : f32 to vector<64x128xf32>
    %7 = arith.maximumf %5, %6 : vector<64x128xf32>
    %8 = arith.truncf %7 : vector<64x128xf32> to vector<64x128xbf16>
    %c0_6 = arith.constant 0 : index
    %c0_7 = arith.constant 0 : index
    %9 = vector.load %arg4[%c0_6, %c0_7] : memref<64x128xbf16, #tpu.memory_space<vmem>>, vector<64x128xbf16>
    tpu.vector_store %arg4[%c0_6, %c0_7], %8 {strides = array<i32>} : memref<64x128xbf16, #tpu.memory_space<vmem>>, vector<64x128xbf16>,
    return
  }
  func.func @transform_0(%arg0: i32) -> (i32, i32) {
    %c0_i32 = arith.constant 0 : i32
    %c0_i32_0 = arith.constant 0 : i32
    return %arg0, %c0_i32 : i32, i32
  }
  func.func @transform_1(%arg0: i32) -> (i32, i32) {
    %c0_i32 = arith.constant 0 : i32
    %c0_i32_0 = arith.constant 0 : i32
    %c0_i32_1 = arith.constant 0 : i32
    return %c0_i32, %c0_i32_0 : i32, i32
  }
  func.func @transform_2(%arg0: i32) -> (i32, i32) {
    %c0_i32 = arith.constant 0 : i32
    %c0_i32_0 = arith.constant 0 : i32
    %c0_i32_1 = arith.constant 0 : i32
    return %c0_i32, %c0_i32_0 : i32, i32
  }
  func.func @transform_3(%arg0: i32) -> (i32, i32) {
    %c0_i32 = arith.constant 0 : i32
    %c0_i32_0 = arith.constant 0 : i32
    return %arg0, %c0_i32 : i32, i32
  }
}

module attributes {stable_mosaic.version = 11 : i64} {
  func.func @_matmul_kernel(%arg0: i32, %arg1: memref<64x256xbf16, #tpu.memory_space<vmem>>, %arg2: memref<256x128xbf16, #tpu.memory_space<vmem>>, %arg3: memref<1x128xf32, #tpu.memory_space<vmem>>, %arg4: memref<64x128xbf16, #tpu.memory_space<vmem>>, %arg5: memref<64x128xbf16, #tpu.memory_space<vmem>>) attributes {dimension_semantics = [#tpu.dimension_semantics<parallel>], iteration_bounds = array<i64: 2>, scalar_prefetch = 0 : i64, scratch_operands = 0 : i64, tpu.core_type = #tpu.core_type<tc>, window_params = [{transform_indices = @transform_0, window_bounds = array<i64: 64, 256>}, {pipeline_mode = #tpu.pipeline_mode<synchronous>, transform_indices = @transform_1, window_bounds = array<i64: 256, 128>}, {pipeline_mode = #tpu.pipeline_mode<synchronous>, transform_indices = @transform_2, window_bounds = array<i64: 1, 128>}, {transform_indices = @transform_3, window_bounds = array<i64: 64, 128>}, {transform_indices = @transform_4, window_bounds = array<i64: 64, 128>}]} {
    %c0 = arith.constant 0 : index
    %c0_0 = arith.constant 0 : index
    %0 = vector.load %arg1[%c0, %c0_0] : memref<64x256xbf16, #tpu.memory_space<vmem>>, vector<64x256xbf16>
    %c0_1 = arith.constant 0 : index
    %c0_2 = arith.constant 0 : index
    %1 = vector.load %arg2[%c0_1, %c0_2] : memref<256x128xbf16, #tpu.memory_space<vmem>>, vector<256x128xbf16>
    %cst = arith.constant dense<0.000000e+00> : vector<64x128xf32>
    %2 = tpu.matmul %0, %1, %cst {dimension_numbers = #tpu.dot_dimension_numbers<[1], [0], [0], [1], [0, 0, 1, 1], [], []>} : vector<64x256xbf16>, vector<256x128xbf16>, vector<64x128xf32> -> vector<64x128xf32>
    %c0_3 = arith.constant 0 : index
    %c0_4 = arith.constant 0 : index
    %3 = vector.load %arg3[%c0_3, %c0_4] : memref<1x128xf32, #tpu.memory_space<vmem>>, vector<1x128xf32>
    %4 = vector.broadcast %3 : vector<1x128xf32> to vector<64x128xf32>
    %5 = arith.addf %2, %4 : vector<64x128xf32>
    %c0_5 = arith.constant 0 : index
    %c0_6 = arith.constant 0 : index
    %6 = vector.load %arg4[%c0_5, %c0_6] : memref<64x128xbf16, #tpu.memory_space<vmem>>, vector<64x128xbf16>
    %7 = arith.extf %6 : vector<64x128xbf16> to vector<64x128xf32>
    %8 = arith.addf %5, %7 : vector<64x128xf32>
    %9 = arith.truncf %8 : vector<64x128xf32> to vector<64x128xbf16>
    %c0_7 = arith.constant 0 : index
    %c0_8 = arith.constant 0 : index
    %10 = vector.load %arg5[%c0_7, %c0_8] : memref<64x128xbf16, #tpu.memory_space<vmem>>, vector<64x128xbf16>
    tpu.vector_store %arg5[%c0_7, %c0_8], %9 {strides = array<i32>} : memref<64x128xbf16, #tpu.memory_space<vmem>>, vector<64x128xbf16>,
    return
  }
  func.func @transform_0(%arg0: i32) -> (i32, i32) {
    %c0_i32 = arith.constant 0 : i32
    %c0_i32_0 = arith.constant 0 : i32
    return %arg0, %c0_i32 : i32, i32
  }
  func.func @transform_1(%arg0: i32) -> (i32, i32) {
    %c0_i32 = arith.constant 0 : i32
    %c0_i32_0 = arith.constant 0 : i32
    %c0_i32_1 = arith.constant 0 : i32
    return %c0_i32, %c0_i32_0 : i32, i32
  }
  func.func @transform_2(%arg0: i32) -> (i32, i32) {
    %c0_i32 = arith.constant 0 : i32
    %c0_i32_0 = arith.constant 0 : i32
    %c0_i32_1 = arith.constant 0 : i32
    return %c0_i32, %c0_i32_0 : i32, i32
  }
  func.func @transform_3(%arg0: i32) -> (i32, i32) {
    %c0_i32 = arith.constant 0 : i32
    %c0_i32_0 = arith.constant 0 : i32
    return %arg0, %c0_i32 : i32, i32
  }
  func.func @transform_4(%arg0: i32) -> (i32, i32) {
    %c0_i32 = arith.constant 0 : i32
    %c0_i32_0 = arith.constant 0 : i32
    return %arg0, %c0_i32 : i32, i32
  }
}

module attributes {stable_mosaic.version = 11 : i64} {
  func.func @_dwconv_kernel(%arg0: i32, %arg1: i32, %arg2: i32, %arg3: memref<1x24x6x128xbf16, #tpu.memory_space<vmem>>, %arg4: memref<25x128xf32, #tpu.memory_space<vmem>>, %arg5: memref<1x128xf32, #tpu.memory_space<vmem>>, %arg6: memref<1x4x4x128xbf16, #tpu.memory_space<vmem>>) attributes {dimension_semantics = [#tpu.dimension_semantics<parallel>, #tpu.dimension_semantics<parallel>, #tpu.dimension_semantics<arbitrary>], iteration_bounds = array<i64: 2, 1, 1>, scalar_prefetch = 0 : i64, scratch_operands = 0 : i64, tpu.core_type = #tpu.core_type<tc>, window_params = [{transform_indices = @transform_0, window_bounds = array<i64: 1, 24, 6, 128>}, {transform_indices = @transform_1, window_bounds = array<i64: 25, 128>}, {transform_indices = @transform_2, window_bounds = array<i64: 1, 128>}, {transform_indices = @transform_3, window_bounds = array<i64: 1, 4, 4, 128>}]} {
    %c4_i32 = arith.constant 4 : i32
    %0 = arith.muli %arg2, %c4_i32 : i32
    %1 = tpu.assume_multiple %0, 4 : i32
    %c0_i32 = arith.constant 0 : i32
    %2 = arith.addi %c0_i32, %1 : i32
    %c0 = arith.constant 0 : index
    %3 = arith.index_cast %2 : i32 to index
    %c0_0 = arith.constant 0 : index
    %c0_1 = arith.constant 0 : index
    %4 = vector.load %arg3[%c0, %3, %c0_0, %c0_1] : memref<1x24x6x128xbf16, #tpu.memory_space<vmem>>, vector<1x6x6x128xbf16>
    %5 = vector.shape_cast %4 : vector<1x6x6x128xbf16> to vector<6x6x128xbf16>
    %6 = arith.extf %5 : vector<6x6x128xbf16> to vector<6x6x128xf32>
    %c6_i32 = arith.constant 6 : i32
    %7 = arith.addi %c6_i32, %1 : i32
    %c0_2 = arith.constant 0 : index
    %8 = arith.index_cast %7 : i32 to index
    %c0_3 = arith.constant 0 : index
    %c0_4 = arith.constant 0 : index
    %9 = vector.load %arg3[%c0_2, %8, %c0_3, %c0_4] : memref<1x24x6x128xbf16, #tpu.memory_space<vmem>>, vector<1x6x6x128xbf16>
    %10 = vector.shape_cast %9 : vector<1x6x6x128xbf16> to vector<6x6x128xbf16>
    %11 = arith.extf %10 : vector<6x6x128xbf16> to vector<6x6x128xf32>
    %c12_i32 = arith.constant 12 : i32
    %12 = arith.addi %c12_i32, %1 : i32
    %c0_5 = arith.constant 0 : index
    %13 = arith.index_cast %12 : i32 to index
    %c0_6 = arith.constant 0 : index
    %c0_7 = arith.constant 0 : index
    %14 = vector.load %arg3[%c0_5, %13, %c0_6, %c0_7] : memref<1x24x6x128xbf16, #tpu.memory_space<vmem>>, vector<1x6x6x128xbf16>
    %15 = vector.shape_cast %14 : vector<1x6x6x128xbf16> to vector<6x6x128xbf16>
    %16 = arith.extf %15 : vector<6x6x128xbf16> to vector<6x6x128xf32>
    %c18_i32 = arith.constant 18 : i32
    %17 = arith.addi %c18_i32, %1 : i32
    %c0_8 = arith.constant 0 : index
    %18 = arith.index_cast %17 : i32 to index
    %c0_9 = arith.constant 0 : index
    %c0_10 = arith.constant 0 : index
    %19 = vector.load %arg3[%c0_8, %18, %c0_9, %c0_10] : memref<1x24x6x128xbf16, #tpu.memory_space<vmem>>, vector<1x6x6x128xbf16>
    %20 = vector.shape_cast %19 : vector<1x6x6x128xbf16> to vector<6x6x128xbf16>
    %21 = arith.extf %20 : vector<6x6x128xbf16> to vector<6x6x128xf32>
    %cst = arith.constant 0.000000e+00 : f32
    %22 = vector.broadcast %cst : f32 to vector<4x4x128xf32>
    %23 = vector.extract_strided_slice %6 {offsets = [0, 0, 0], sizes = [4, 4, 128], strides = [1, 1, 1]} : vector<6x6x128xf32> to vector<4x4x128xf32>
    %c0_11 = arith.constant 0 : index
    %c0_12 = arith.constant 0 : index
    %24 = vector.load %arg4[%c0_11, %c0_12] : memref<25x128xf32, #tpu.memory_space<vmem>>, vector<1x128xf32>
    %25 = vector.shape_cast %24 : vector<1x128xf32> to vector<128xf32>
    %26 = vector.shape_cast %25 : vector<128xf32> to vector<1x1x128xf32>
    %27 = vector.broadcast %26 : vector<1x1x128xf32> to vector<4x4x128xf32>
    %28 = arith.mulf %23, %27 : vector<4x4x128xf32>
    %29 = arith.addf %22, %28 : vector<4x4x128xf32>
    %30 = vector.extract_strided_slice %11 {offsets = [0, 0, 0], sizes = [4, 4, 128], strides = [1, 1, 1]} : vector<6x6x128xf32> to vector<4x4x128xf32>
    %c1 = arith.constant 1 : index
    %c0_13 = arith.constant 0 : index
    %31 = vector.load %arg4[%c1, %c0_13] : memref<25x128xf32, #tpu.memory_space<vmem>>, vector<1x128xf32>
    %32 = vector.shape_cast %31 : vector<1x128xf32> to vector<128xf32>
    %33 = vector.shape_cast %32 : vector<128xf32> to vector<1x1x128xf32>
    %34 = vector.broadcast %33 : vector<1x1x128xf32> to vector<4x4x128xf32>
    %35 = arith.mulf %30, %34 : vector<4x4x128xf32>
    %36 = arith.addf %29, %35 : vector<4x4x128xf32>
    %37 = vector.extract_strided_slice %6 {offsets = [0, 1, 0], sizes = [4, 4, 128], strides = [1, 1, 1]} : vector<6x6x128xf32> to vector<4x4x128xf32>
    %c2 = arith.constant 2 : index
    %c0_14 = arith.constant 0 : index
    %38 = vector.load %arg4[%c2, %c0_14] : memref<25x128xf32, #tpu.memory_space<vmem>>, vector<1x128xf32>
    %39 = vector.shape_cast %38 : vector<1x128xf32> to vector<128xf32>
    %40 = vector.shape_cast %39 : vector<128xf32> to vector<1x1x128xf32>
    %41 = vector.broadcast %40 : vector<1x1x128xf32> to vector<4x4x128xf32>
    %42 = arith.mulf %37, %41 : vector<4x4x128xf32>
    %43 = arith.addf %36, %42 : vector<4x4x128xf32>
    %44 = vector.extract_strided_slice %11 {offsets = [0, 1, 0], sizes = [4, 4, 128], strides = [1, 1, 1]} : vector<6x6x128xf32> to vector<4x4x128xf32>
    %c3 = arith.constant 3 : index
    %c0_15 = arith.constant 0 : index
    %45 = vector.load %arg4[%c3, %c0_15] : memref<25x128xf32, #tpu.memory_space<vmem>>, vector<1x128xf32>
    %46 = vector.shape_cast %45 : vector<1x128xf32> to vector<128xf32>
    %47 = vector.shape_cast %46 : vector<128xf32> to vector<1x1x128xf32>
    %48 = vector.broadcast %47 : vector<1x1x128xf32> to vector<4x4x128xf32>
    %49 = arith.mulf %44, %48 : vector<4x4x128xf32>
    %50 = arith.addf %43, %49 : vector<4x4x128xf32>
    %51 = vector.extract_strided_slice %6 {offsets = [0, 2, 0], sizes = [4, 4, 128], strides = [1, 1, 1]} : vector<6x6x128xf32> to vector<4x4x128xf32>
    %c4 = arith.constant 4 : index
    %c0_16 = arith.constant 0 : index
    %52 = vector.load %arg4[%c4, %c0_16] : memref<25x128xf32, #tpu.memory_space<vmem>>, vector<1x128xf32>
    %53 = vector.shape_cast %52 : vector<1x128xf32> to vector<128xf32>
    %54 = vector.shape_cast %53 : vector<128xf32> to vector<1x1x128xf32>
    %55 = vector.broadcast %54 : vector<1x1x128xf32> to vector<4x4x128xf32>
    %56 = arith.mulf %51, %55 : vector<4x4x128xf32>
    %57 = arith.addf %50, %56 : vector<4x4x128xf32>
    %58 = vector.extract_strided_slice %16 {offsets = [0, 0, 0], sizes = [4, 4, 128], strides = [1, 1, 1]} : vector<6x6x128xf32> to vector<4x4x128xf32>
    %c5 = arith.constant 5 : index
    %c0_17 = arith.constant 0 : index
    %59 = vector.load %arg4[%c5, %c0_17] : memref<25x128xf32, #tpu.memory_space<vmem>>, vector<1x128xf32>
    %60 = vector.shape_cast %59 : vector<1x128xf32> to vector<128xf32>
    %61 = vector.shape_cast %60 : vector<128xf32> to vector<1x1x128xf32>
    %62 = vector.broadcast %61 : vector<1x1x128xf32> to vector<4x4x128xf32>
    %63 = arith.mulf %58, %62 : vector<4x4x128xf32>
    %64 = arith.addf %57, %63 : vector<4x4x128xf32>
    %65 = vector.extract_strided_slice %21 {offsets = [0, 0, 0], sizes = [4, 4, 128], strides = [1, 1, 1]} : vector<6x6x128xf32> to vector<4x4x128xf32>
    %c6 = arith.constant 6 : index
    %c0_18 = arith.constant 0 : index
    %66 = vector.load %arg4[%c6, %c0_18] : memref<25x128xf32, #tpu.memory_space<vmem>>, vector<1x128xf32>
    %67 = vector.shape_cast %66 : vector<1x128xf32> to vector<128xf32>
    %68 = vector.shape_cast %67 : vector<128xf32> to vector<1x1x128xf32>
    %69 = vector.broadcast %68 : vector<1x1x128xf32> to vector<4x4x128xf32>
    %70 = arith.mulf %65, %69 : vector<4x4x128xf32>
    %71 = arith.addf %64, %70 : vector<4x4x128xf32>
    %72 = vector.extract_strided_slice %16 {offsets = [0, 1, 0], sizes = [4, 4, 128], strides = [1, 1, 1]} : vector<6x6x128xf32> to vector<4x4x128xf32>
    %c7 = arith.constant 7 : index
    %c0_19 = arith.constant 0 : index
    %73 = vector.load %arg4[%c7, %c0_19] : memref<25x128xf32, #tpu.memory_space<vmem>>, vector<1x128xf32>
    %74 = vector.shape_cast %73 : vector<1x128xf32> to vector<128xf32>
    %75 = vector.shape_cast %74 : vector<128xf32> to vector<1x1x128xf32>
    %76 = vector.broadcast %75 : vector<1x1x128xf32> to vector<4x4x128xf32>
    %77 = arith.mulf %72, %76 : vector<4x4x128xf32>
    %78 = arith.addf %71, %77 : vector<4x4x128xf32>
    %79 = vector.extract_strided_slice %21 {offsets = [0, 1, 0], sizes = [4, 4, 128], strides = [1, 1, 1]} : vector<6x6x128xf32> to vector<4x4x128xf32>
    %c8 = arith.constant 8 : index
    %c0_20 = arith.constant 0 : index
    %80 = vector.load %arg4[%c8, %c0_20] : memref<25x128xf32, #tpu.memory_space<vmem>>, vector<1x128xf32>
    %81 = vector.shape_cast %80 : vector<1x128xf32> to vector<128xf32>
    %82 = vector.shape_cast %81 : vector<128xf32> to vector<1x1x128xf32>
    %83 = vector.broadcast %82 : vector<1x1x128xf32> to vector<4x4x128xf32>
    %84 = arith.mulf %79, %83 : vector<4x4x128xf32>
    %85 = arith.addf %78, %84 : vector<4x4x128xf32>
    %86 = vector.extract_strided_slice %16 {offsets = [0, 2, 0], sizes = [4, 4, 128], strides = [1, 1, 1]} : vector<6x6x128xf32> to vector<4x4x128xf32>
    %c9 = arith.constant 9 : index
    %c0_21 = arith.constant 0 : index
    %87 = vector.load %arg4[%c9, %c0_21] : memref<25x128xf32, #tpu.memory_space<vmem>>, vector<1x128xf32>
    %88 = vector.shape_cast %87 : vector<1x128xf32> to vector<128xf32>
    %89 = vector.shape_cast %88 : vector<128xf32> to vector<1x1x128xf32>
    %90 = vector.broadcast %89 : vector<1x1x128xf32> to vector<4x4x128xf32>
    %91 = arith.mulf %86, %90 : vector<4x4x128xf32>
    %92 = arith.addf %85, %91 : vector<4x4x128xf32>
    %93 = vector.extract_strided_slice %6 {offsets = [1, 0, 0], sizes = [4, 4, 128], strides = [1, 1, 1]} : vector<6x6x128xf32> to vector<4x4x128xf32>
    %c10 = arith.constant 10 : index
    %c0_22 = arith.constant 0 : index
    %94 = vector.load %arg4[%c10, %c0_22] : memref<25x128xf32, #tpu.memory_space<vmem>>, vector<1x128xf32>
    %95 = vector.shape_cast %94 : vector<1x128xf32> to vector<128xf32>
    %96 = vector.shape_cast %95 : vector<128xf32> to vector<1x1x128xf32>
    %97 = vector.broadcast %96 : vector<1x1x128xf32> to vector<4x4x128xf32>
    %98 = arith.mulf %93, %97 : vector<4x4x128xf32>
    %99 = arith.addf %92, %98 : vector<4x4x128xf32>
    %100 = vector.extract_strided_slice %11 {offsets = [1, 0, 0], sizes = [4, 4, 128], strides = [1, 1, 1]} : vector<6x6x128xf32> to vector<4x4x128xf32>
    %c11 = arith.constant 11 : index
    %c0_23 = arith.constant 0 : index
    %101 = vector.load %arg4[%c11, %c0_23] : memref<25x128xf32, #tpu.memory_space<vmem>>, vector<1x128xf32>
    %102 = vector.shape_cast %101 : vector<1x128xf32> to vector<128xf32>
    %103 = vector.shape_cast %102 : vector<128xf32> to vector<1x1x128xf32>
    %104 = vector.broadcast %103 : vector<1x1x128xf32> to vector<4x4x128xf32>
    %105 = arith.mulf %100, %104 : vector<4x4x128xf32>
    %106 = arith.addf %99, %105 : vector<4x4x128xf32>
    %107 = vector.extract_strided_slice %6 {offsets = [1, 1, 0], sizes = [4, 4, 128], strides = [1, 1, 1]} : vector<6x6x128xf32> to vector<4x4x128xf32>
    %c12 = arith.constant 12 : index
    %c0_24 = arith.constant 0 : index
    %108 = vector.load %arg4[%c12, %c0_24] : memref<25x128xf32, #tpu.memory_space<vmem>>, vector<1x128xf32>
    %109 = vector.shape_cast %108 : vector<1x128xf32> to vector<128xf32>
    %110 = vector.shape_cast %109 : vector<128xf32> to vector<1x1x128xf32>
    %111 = vector.broadcast %110 : vector<1x1x128xf32> to vector<4x4x128xf32>
    %112 = arith.mulf %107, %111 : vector<4x4x128xf32>
    %113 = arith.addf %106, %112 : vector<4x4x128xf32>
    %114 = vector.extract_strided_slice %11 {offsets = [1, 1, 0], sizes = [4, 4, 128], strides = [1, 1, 1]} : vector<6x6x128xf32> to vector<4x4x128xf32>
    %c13 = arith.constant 13 : index
    %c0_25 = arith.constant 0 : index
    %115 = vector.load %arg4[%c13, %c0_25] : memref<25x128xf32, #tpu.memory_space<vmem>>, vector<1x128xf32>
    %116 = vector.shape_cast %115 : vector<1x128xf32> to vector<128xf32>
    %117 = vector.shape_cast %116 : vector<128xf32> to vector<1x1x128xf32>
    %118 = vector.broadcast %117 : vector<1x1x128xf32> to vector<4x4x128xf32>
    %119 = arith.mulf %114, %118 : vector<4x4x128xf32>
    %120 = arith.addf %113, %119 : vector<4x4x128xf32>
    %121 = vector.extract_strided_slice %6 {offsets = [1, 2, 0], sizes = [4, 4, 128], strides = [1, 1, 1]} : vector<6x6x128xf32> to vector<4x4x128xf32>
    %c14 = arith.constant 14 : index
    %c0_26 = arith.constant 0 : index
    %122 = vector.load %arg4[%c14, %c0_26] : memref<25x128xf32, #tpu.memory_space<vmem>>, vector<1x128xf32>
    %123 = vector.shape_cast %122 : vector<1x128xf32> to vector<128xf32>
    %124 = vector.shape_cast %123 : vector<128xf32> to vector<1x1x128xf32>
    %125 = vector.broadcast %124 : vector<1x1x128xf32> to vector<4x4x128xf32>
    %126 = arith.mulf %121, %125 : vector<4x4x128xf32>
    %127 = arith.addf %120, %126 : vector<4x4x128xf32>
    %128 = vector.extract_strided_slice %16 {offsets = [1, 0, 0], sizes = [4, 4, 128], strides = [1, 1, 1]} : vector<6x6x128xf32> to vector<4x4x128xf32>
    %c15 = arith.constant 15 : index
    %c0_27 = arith.constant 0 : index
    %129 = vector.load %arg4[%c15, %c0_27] : memref<25x128xf32, #tpu.memory_space<vmem>>, vector<1x128xf32>
    %130 = vector.shape_cast %129 : vector<1x128xf32> to vector<128xf32>
    %131 = vector.shape_cast %130 : vector<128xf32> to vector<1x1x128xf32>
    %132 = vector.broadcast %131 : vector<1x1x128xf32> to vector<4x4x128xf32>
    %133 = arith.mulf %128, %132 : vector<4x4x128xf32>
    %134 = arith.addf %127, %133 : vector<4x4x128xf32>
    %135 = vector.extract_strided_slice %21 {offsets = [1, 0, 0], sizes = [4, 4, 128], strides = [1, 1, 1]} : vector<6x6x128xf32> to vector<4x4x128xf32>
    %c16 = arith.constant 16 : index
    %c0_28 = arith.constant 0 : index
    %136 = vector.load %arg4[%c16, %c0_28] : memref<25x128xf32, #tpu.memory_space<vmem>>, vector<1x128xf32>
    %137 = vector.shape_cast %136 : vector<1x128xf32> to vector<128xf32>
    %138 = vector.shape_cast %137 : vector<128xf32> to vector<1x1x128xf32>
    %139 = vector.broadcast %138 : vector<1x1x128xf32> to vector<4x4x128xf32>
    %140 = arith.mulf %135, %139 : vector<4x4x128xf32>
    %141 = arith.addf %134, %140 : vector<4x4x128xf32>
    %142 = vector.extract_strided_slice %16 {offsets = [1, 1, 0], sizes = [4, 4, 128], strides = [1, 1, 1]} : vector<6x6x128xf32> to vector<4x4x128xf32>
    %c17 = arith.constant 17 : index
    %c0_29 = arith.constant 0 : index
    %143 = vector.load %arg4[%c17, %c0_29] : memref<25x128xf32, #tpu.memory_space<vmem>>, vector<1x128xf32>
    %144 = vector.shape_cast %143 : vector<1x128xf32> to vector<128xf32>
    %145 = vector.shape_cast %144 : vector<128xf32> to vector<1x1x128xf32>
    %146 = vector.broadcast %145 : vector<1x1x128xf32> to vector<4x4x128xf32>
    %147 = arith.mulf %142, %146 : vector<4x4x128xf32>
    %148 = arith.addf %141, %147 : vector<4x4x128xf32>
    %149 = vector.extract_strided_slice %21 {offsets = [1, 1, 0], sizes = [4, 4, 128], strides = [1, 1, 1]} : vector<6x6x128xf32> to vector<4x4x128xf32>
    %c18 = arith.constant 18 : index
    %c0_30 = arith.constant 0 : index
    %150 = vector.load %arg4[%c18, %c0_30] : memref<25x128xf32, #tpu.memory_space<vmem>>, vector<1x128xf32>
    %151 = vector.shape_cast %150 : vector<1x128xf32> to vector<128xf32>
    %152 = vector.shape_cast %151 : vector<128xf32> to vector<1x1x128xf32>
    %153 = vector.broadcast %152 : vector<1x1x128xf32> to vector<4x4x128xf32>
    %154 = arith.mulf %149, %153 : vector<4x4x128xf32>
    %155 = arith.addf %148, %154 : vector<4x4x128xf32>
    %156 = vector.extract_strided_slice %16 {offsets = [1, 2, 0], sizes = [4, 4, 128], strides = [1, 1, 1]} : vector<6x6x128xf32> to vector<4x4x128xf32>
    %c19 = arith.constant 19 : index
    %c0_31 = arith.constant 0 : index
    %157 = vector.load %arg4[%c19, %c0_31] : memref<25x128xf32, #tpu.memory_space<vmem>>, vector<1x128xf32>
    %158 = vector.shape_cast %157 : vector<1x128xf32> to vector<128xf32>
    %159 = vector.shape_cast %158 : vector<128xf32> to vector<1x1x128xf32>
    %160 = vector.broadcast %159 : vector<1x1x128xf32> to vector<4x4x128xf32>
    %161 = arith.mulf %156, %160 : vector<4x4x128xf32>
    %162 = arith.addf %155, %161 : vector<4x4x128xf32>
    %163 = vector.extract_strided_slice %6 {offsets = [2, 0, 0], sizes = [4, 4, 128], strides = [1, 1, 1]} : vector<6x6x128xf32> to vector<4x4x128xf32>
    %c20 = arith.constant 20 : index
    %c0_32 = arith.constant 0 : index
    %164 = vector.load %arg4[%c20, %c0_32] : memref<25x128xf32, #tpu.memory_space<vmem>>, vector<1x128xf32>
    %165 = vector.shape_cast %164 : vector<1x128xf32> to vector<128xf32>
    %166 = vector.shape_cast %165 : vector<128xf32> to vector<1x1x128xf32>
    %167 = vector.broadcast %166 : vector<1x1x128xf32> to vector<4x4x128xf32>
    %168 = arith.mulf %163, %167 : vector<4x4x128xf32>
    %169 = arith.addf %162, %168 : vector<4x4x128xf32>
    %170 = vector.extract_strided_slice %11 {offsets = [2, 0, 0], sizes = [4, 4, 128], strides = [1, 1, 1]} : vector<6x6x128xf32> to vector<4x4x128xf32>
    %c21 = arith.constant 21 : index
    %c0_33 = arith.constant 0 : index
    %171 = vector.load %arg4[%c21, %c0_33] : memref<25x128xf32, #tpu.memory_space<vmem>>, vector<1x128xf32>
    %172 = vector.shape_cast %171 : vector<1x128xf32> to vector<128xf32>
    %173 = vector.shape_cast %172 : vector<128xf32> to vector<1x1x128xf32>
    %174 = vector.broadcast %173 : vector<1x1x128xf32> to vector<4x4x128xf32>
    %175 = arith.mulf %170, %174 : vector<4x4x128xf32>
    %176 = arith.addf %169, %175 : vector<4x4x128xf32>
    %177 = vector.extract_strided_slice %6 {offsets = [2, 1, 0], sizes = [4, 4, 128], strides = [1, 1, 1]} : vector<6x6x128xf32> to vector<4x4x128xf32>
    %c22 = arith.constant 22 : index
    %c0_34 = arith.constant 0 : index
    %178 = vector.load %arg4[%c22, %c0_34] : memref<25x128xf32, #tpu.memory_space<vmem>>, vector<1x128xf32>
    %179 = vector.shape_cast %178 : vector<1x128xf32> to vector<128xf32>
    %180 = vector.shape_cast %179 : vector<128xf32> to vector<1x1x128xf32>
    %181 = vector.broadcast %180 : vector<1x1x128xf32> to vector<4x4x128xf32>
    %182 = arith.mulf %177, %181 : vector<4x4x128xf32>
    %183 = arith.addf %176, %182 : vector<4x4x128xf32>
    %184 = vector.extract_strided_slice %11 {offsets = [2, 1, 0], sizes = [4, 4, 128], strides = [1, 1, 1]} : vector<6x6x128xf32> to vector<4x4x128xf32>
    %c23 = arith.constant 23 : index
    %c0_35 = arith.constant 0 : index
    %185 = vector.load %arg4[%c23, %c0_35] : memref<25x128xf32, #tpu.memory_space<vmem>>, vector<1x128xf32>
    %186 = vector.shape_cast %185 : vector<1x128xf32> to vector<128xf32>
    %187 = vector.shape_cast %186 : vector<128xf32> to vector<1x1x128xf32>
    %188 = vector.broadcast %187 : vector<1x1x128xf32> to vector<4x4x128xf32>
    %189 = arith.mulf %184, %188 : vector<4x4x128xf32>
    %190 = arith.addf %183, %189 : vector<4x4x128xf32>
    %191 = vector.extract_strided_slice %6 {offsets = [2, 2, 0], sizes = [4, 4, 128], strides = [1, 1, 1]} : vector<6x6x128xf32> to vector<4x4x128xf32>
    %c24 = arith.constant 24 : index
    %c0_36 = arith.constant 0 : index
    %192 = vector.load %arg4[%c24, %c0_36] : memref<25x128xf32, #tpu.memory_space<vmem>>, vector<1x128xf32>
    %193 = vector.shape_cast %192 : vector<1x128xf32> to vector<128xf32>
    %194 = vector.shape_cast %193 : vector<128xf32> to vector<1x1x128xf32>
    %195 = vector.broadcast %194 : vector<1x1x128xf32> to vector<4x4x128xf32>
    %196 = arith.mulf %191, %195 : vector<4x4x128xf32>
    %197 = arith.addf %190, %196 : vector<4x4x128xf32>
    %c0_37 = arith.constant 0 : index
    %c0_38 = arith.constant 0 : index
    %198 = vector.load %arg5[%c0_37, %c0_38] : memref<1x128xf32, #tpu.memory_space<vmem>>, vector<1x128xf32>
    %199 = vector.shape_cast %198 : vector<1x128xf32> to vector<128xf32>
    %200 = vector.shape_cast %199 : vector<128xf32> to vector<1x1x128xf32>
    %201 = vector.broadcast %200 : vector<1x1x128xf32> to vector<4x4x128xf32>
    %202 = arith.addf %197, %201 : vector<4x4x128xf32>
    %cst_39 = arith.constant 0.000000e+00 : f32
    %203 = vector.broadcast %cst_39 : f32 to vector<4x4x128xf32>
    %204 = arith.maximumf %202, %203 : vector<4x4x128xf32>
    %205 = arith.truncf %204 : vector<4x4x128xf32> to vector<4x4x128xbf16>
    %c0_40 = arith.constant 0 : index
    %c0_41 = arith.constant 0 : index
    %c0_42 = arith.constant 0 : index
    %c0_43 = arith.constant 0 : index
    %206 = vector.load %arg6[%c0_40, %c0_41, %c0_42, %c0_43] : memref<1x4x4x128xbf16, #tpu.memory_space<vmem>>, vector<1x4x4x128xbf16>
    %207 = vector.shape_cast %206 : vector<1x4x4x128xbf16> to vector<4x4x128xbf16>
    %208 = vector.shape_cast %205 : vector<4x4x128xbf16> to vector<1x4x4x128xbf16>
    tpu.vector_store %arg6[%c0_40, %c0_41, %c0_42, %c0_43], %208 {strides = array<i32>} : memref<1x4x4x128xbf16, #tpu.memory_space<vmem>>, vector<1x4x4x128xbf16>,
    return
  }
  func.func @transform_0(%arg0: i32, %arg1: i32, %arg2: i32) -> (i32, i32, i32, i32) {
    %c0_i32 = arith.constant 0 : i32
    %c0_i32_0 = arith.constant 0 : i32
    %c0_i32_1 = arith.constant 0 : i32
    return %arg0, %c0_i32, %c0_i32_0, %arg1 : i32, i32, i32, i32
  }
  func.func @transform_1(%arg0: i32, %arg1: i32, %arg2: i32) -> (i32, i32) {
    %c0_i32 = arith.constant 0 : i32
    %c0_i32_0 = arith.constant 0 : i32
    return %c0_i32, %arg1 : i32, i32
  }
  func.func @transform_2(%arg0: i32, %arg1: i32, %arg2: i32) -> (i32, i32) {
    %c0_i32 = arith.constant 0 : i32
    %c0_i32_0 = arith.constant 0 : i32
    return %c0_i32, %arg1 : i32, i32
  }
  func.func @transform_3(%arg0: i32, %arg1: i32, %arg2: i32) -> (i32, i32, i32, i32) {
    %c0_i32 = arith.constant 0 : i32
    %c0_i32_0 = arith.constant 0 : i32
    return %arg0, %arg2, %c0_i32, %arg1 : i32, i32, i32, i32
  }
}

module attributes {stable_mosaic.version = 11 : i64} {
  func.func @_matmul_kernel(%arg0: i32, %arg1: memref<16x128xbf16, #tpu.memory_space<vmem>>, %arg2: memref<128x128xbf16, #tpu.memory_space<vmem>>, %arg3: memref<1x128xf32, #tpu.memory_space<vmem>>, %arg4: memref<16x128xbf16, #tpu.memory_space<vmem>>) attributes {dimension_semantics = [#tpu.dimension_semantics<parallel>], iteration_bounds = array<i64: 2>, scalar_prefetch = 0 : i64, scratch_operands = 0 : i64, tpu.core_type = #tpu.core_type<tc>, window_params = [{transform_indices = @transform_0, window_bounds = array<i64: 16, 128>}, {pipeline_mode = #tpu.pipeline_mode<synchronous>, transform_indices = @transform_1, window_bounds = array<i64: 128, 128>}, {pipeline_mode = #tpu.pipeline_mode<synchronous>, transform_indices = @transform_2, window_bounds = array<i64: 1, 128>}, {transform_indices = @transform_3, window_bounds = array<i64: 16, 128>}]} {
    %c0 = arith.constant 0 : index
    %c0_0 = arith.constant 0 : index
    %0 = vector.load %arg1[%c0, %c0_0] : memref<16x128xbf16, #tpu.memory_space<vmem>>, vector<16x128xbf16>
    %c0_1 = arith.constant 0 : index
    %c0_2 = arith.constant 0 : index
    %1 = vector.load %arg2[%c0_1, %c0_2] : memref<128x128xbf16, #tpu.memory_space<vmem>>, vector<128x128xbf16>
    %cst = arith.constant dense<0.000000e+00> : vector<16x128xf32>
    %2 = tpu.matmul %0, %1, %cst {dimension_numbers = #tpu.dot_dimension_numbers<[1], [0], [0], [1], [0, 0, 1, 1], [], []>} : vector<16x128xbf16>, vector<128x128xbf16>, vector<16x128xf32> -> vector<16x128xf32>
    %c0_3 = arith.constant 0 : index
    %c0_4 = arith.constant 0 : index
    %3 = vector.load %arg3[%c0_3, %c0_4] : memref<1x128xf32, #tpu.memory_space<vmem>>, vector<1x128xf32>
    %4 = vector.broadcast %3 : vector<1x128xf32> to vector<16x128xf32>
    %5 = arith.addf %2, %4 : vector<16x128xf32>
    %6 = arith.truncf %5 : vector<16x128xf32> to vector<16x128xbf16>
    %c0_5 = arith.constant 0 : index
    %c0_6 = arith.constant 0 : index
    %7 = vector.load %arg4[%c0_5, %c0_6] : memref<16x128xbf16, #tpu.memory_space<vmem>>, vector<16x128xbf16>
    tpu.vector_store %arg4[%c0_5, %c0_6], %6 {strides = array<i32>} : memref<16x128xbf16, #tpu.memory_space<vmem>>, vector<16x128xbf16>,
    return
  }
  func.func @transform_0(%arg0: i32) -> (i32, i32) {
    %c0_i32 = arith.constant 0 : i32
    %c0_i32_0 = arith.constant 0 : i32
    return %arg0, %c0_i32 : i32, i32
  }
  func.func @transform_1(%arg0: i32) -> (i32, i32) {
    %c0_i32 = arith.constant 0 : i32
    %c0_i32_0 = arith.constant 0 : i32
    %c0_i32_1 = arith.constant 0 : i32
    return %c0_i32, %c0_i32_0 : i32, i32
  }
  func.func @transform_2(%arg0: i32) -> (i32, i32) {
    %c0_i32 = arith.constant 0 : i32
    %c0_i32_0 = arith.constant 0 : i32
    %c0_i32_1 = arith.constant 0 : i32
    return %c0_i32, %c0_i32_0 : i32, i32
  }
  func.func @transform_3(%arg0: i32) -> (i32, i32) {
    %c0_i32 = arith.constant 0 : i32
    %c0_i32_0 = arith.constant 0 : i32
    return %arg0, %c0_i32 : i32, i32
  }
}

module attributes {stable_mosaic.version = 11 : i64} {
  func.func @_matmul_kernel(%arg0: i32, %arg1: memref<16x128xbf16, #tpu.memory_space<vmem>>, %arg2: memref<128x128xbf16, #tpu.memory_space<vmem>>, %arg3: memref<1x128xf32, #tpu.memory_space<vmem>>, %arg4: memref<16x128xbf16, #tpu.memory_space<vmem>>) attributes {dimension_semantics = [#tpu.dimension_semantics<parallel>], iteration_bounds = array<i64: 2>, scalar_prefetch = 0 : i64, scratch_operands = 0 : i64, tpu.core_type = #tpu.core_type<tc>, window_params = [{transform_indices = @transform_0, window_bounds = array<i64: 16, 128>}, {pipeline_mode = #tpu.pipeline_mode<synchronous>, transform_indices = @transform_1, window_bounds = array<i64: 128, 128>}, {pipeline_mode = #tpu.pipeline_mode<synchronous>, transform_indices = @transform_2, window_bounds = array<i64: 1, 128>}, {transform_indices = @transform_3, window_bounds = array<i64: 16, 128>}]} {
    %c0 = arith.constant 0 : index
    %c0_0 = arith.constant 0 : index
    %0 = vector.load %arg1[%c0, %c0_0] : memref<16x128xbf16, #tpu.memory_space<vmem>>, vector<16x128xbf16>
    %c0_1 = arith.constant 0 : index
    %c0_2 = arith.constant 0 : index
    %1 = vector.load %arg2[%c0_1, %c0_2] : memref<128x128xbf16, #tpu.memory_space<vmem>>, vector<128x128xbf16>
    %cst = arith.constant dense<0.000000e+00> : vector<16x128xf32>
    %2 = tpu.matmul %0, %1, %cst {dimension_numbers = #tpu.dot_dimension_numbers<[1], [0], [0], [1], [0, 0, 1, 1], [], []>} : vector<16x128xbf16>, vector<128x128xbf16>, vector<16x128xf32> -> vector<16x128xf32>
    %c0_3 = arith.constant 0 : index
    %c0_4 = arith.constant 0 : index
    %3 = vector.load %arg3[%c0_3, %c0_4] : memref<1x128xf32, #tpu.memory_space<vmem>>, vector<1x128xf32>
    %4 = vector.broadcast %3 : vector<1x128xf32> to vector<16x128xf32>
    %5 = arith.addf %2, %4 : vector<16x128xf32>
    %cst_5 = arith.constant 0.000000e+00 : f32
    %6 = vector.broadcast %cst_5 : f32 to vector<16x128xf32>
    %7 = arith.maximumf %5, %6 : vector<16x128xf32>
    %8 = arith.truncf %7 : vector<16x128xf32> to vector<16x128xbf16>
    %c0_6 = arith.constant 0 : index
    %c0_7 = arith.constant 0 : index
    %9 = vector.load %arg4[%c0_6, %c0_7] : memref<16x128xbf16, #tpu.memory_space<vmem>>, vector<16x128xbf16>
    tpu.vector_store %arg4[%c0_6, %c0_7], %8 {strides = array<i32>} : memref<16x128xbf16, #tpu.memory_space<vmem>>, vector<16x128xbf16>,
    return
  }
  func.func @transform_0(%arg0: i32) -> (i32, i32) {
    %c0_i32 = arith.constant 0 : i32
    %c0_i32_0 = arith.constant 0 : i32
    return %arg0, %c0_i32 : i32, i32
  }
  func.func @transform_1(%arg0: i32) -> (i32, i32) {
    %c0_i32 = arith.constant 0 : i32
    %c0_i32_0 = arith.constant 0 : i32
    %c0_i32_1 = arith.constant 0 : i32
    return %c0_i32, %c0_i32_0 : i32, i32
  }
  func.func @transform_2(%arg0: i32) -> (i32, i32) {
    %c0_i32 = arith.constant 0 : i32
    %c0_i32_0 = arith.constant 0 : i32
    %c0_i32_1 = arith.constant 0 : i32
    return %c0_i32, %c0_i32_0 : i32, i32
  }
  func.func @transform_3(%arg0: i32) -> (i32, i32) {
    %c0_i32 = arith.constant 0 : i32
    %c0_i32_0 = arith.constant 0 : i32
    return %arg0, %c0_i32 : i32, i32
  }
}

module attributes {stable_mosaic.version = 11 : i64} {
  func.func @_dwconv_kernel(%arg0: i32, %arg1: i32, %arg2: i32, %arg3: memref<1x8x8x128xbf16, #tpu.memory_space<vmem>>, %arg4: memref<25x128xf32, #tpu.memory_space<vmem>>, %arg5: memref<1x128xf32, #tpu.memory_space<vmem>>, %arg6: memref<1x4x4x128xbf16, #tpu.memory_space<vmem>>) attributes {dimension_semantics = [#tpu.dimension_semantics<parallel>, #tpu.dimension_semantics<parallel>, #tpu.dimension_semantics<arbitrary>], iteration_bounds = array<i64: 2, 1, 1>, scalar_prefetch = 0 : i64, scratch_operands = 0 : i64, tpu.core_type = #tpu.core_type<tc>, window_params = [{transform_indices = @transform_0, window_bounds = array<i64: 1, 8, 8, 128>}, {transform_indices = @transform_1, window_bounds = array<i64: 25, 128>}, {transform_indices = @transform_2, window_bounds = array<i64: 1, 128>}, {transform_indices = @transform_3, window_bounds = array<i64: 1, 4, 4, 128>}]} {
    %c4_i32 = arith.constant 4 : i32
    %0 = arith.muli %arg2, %c4_i32 : i32
    %1 = tpu.assume_multiple %0, 4 : i32
    %c0_i32 = arith.constant 0 : i32
    %2 = arith.addi %c0_i32, %1 : i32
    %c0 = arith.constant 0 : index
    %3 = arith.index_cast %2 : i32 to index
    %c0_0 = arith.constant 0 : index
    %c0_1 = arith.constant 0 : index
    %4 = vector.load %arg3[%c0, %3, %c0_0, %c0_1] : memref<1x8x8x128xbf16, #tpu.memory_space<vmem>>, vector<1x8x8x128xbf16>
    %5 = vector.shape_cast %4 : vector<1x8x8x128xbf16> to vector<8x8x128xbf16>
    %6 = arith.extf %5 : vector<8x8x128xbf16> to vector<8x8x128xf32>
    %cst = arith.constant 0.000000e+00 : f32
    %7 = vector.broadcast %cst : f32 to vector<4x4x128xf32>
    %8 = vector.extract_strided_slice %6 {offsets = [0, 0, 0], sizes = [4, 4, 128], strides = [1, 1, 1]} : vector<8x8x128xf32> to vector<4x4x128xf32>
    %c0_2 = arith.constant 0 : index
    %c0_3 = arith.constant 0 : index
    %9 = vector.load %arg4[%c0_2, %c0_3] : memref<25x128xf32, #tpu.memory_space<vmem>>, vector<1x128xf32>
    %10 = vector.shape_cast %9 : vector<1x128xf32> to vector<128xf32>
    %11 = vector.shape_cast %10 : vector<128xf32> to vector<1x1x128xf32>
    %12 = vector.broadcast %11 : vector<1x1x128xf32> to vector<4x4x128xf32>
    %13 = arith.mulf %8, %12 : vector<4x4x128xf32>
    %14 = arith.addf %7, %13 : vector<4x4x128xf32>
    %15 = vector.extract_strided_slice %6 {offsets = [0, 1, 0], sizes = [4, 4, 128], strides = [1, 1, 1]} : vector<8x8x128xf32> to vector<4x4x128xf32>
    %c1 = arith.constant 1 : index
    %c0_4 = arith.constant 0 : index
    %16 = vector.load %arg4[%c1, %c0_4] : memref<25x128xf32, #tpu.memory_space<vmem>>, vector<1x128xf32>
    %17 = vector.shape_cast %16 : vector<1x128xf32> to vector<128xf32>
    %18 = vector.shape_cast %17 : vector<128xf32> to vector<1x1x128xf32>
    %19 = vector.broadcast %18 : vector<1x1x128xf32> to vector<4x4x128xf32>
    %20 = arith.mulf %15, %19 : vector<4x4x128xf32>
    %21 = arith.addf %14, %20 : vector<4x4x128xf32>
    %22 = vector.extract_strided_slice %6 {offsets = [0, 2, 0], sizes = [4, 4, 128], strides = [1, 1, 1]} : vector<8x8x128xf32> to vector<4x4x128xf32>
    %c2 = arith.constant 2 : index
    %c0_5 = arith.constant 0 : index
    %23 = vector.load %arg4[%c2, %c0_5] : memref<25x128xf32, #tpu.memory_space<vmem>>, vector<1x128xf32>
    %24 = vector.shape_cast %23 : vector<1x128xf32> to vector<128xf32>
    %25 = vector.shape_cast %24 : vector<128xf32> to vector<1x1x128xf32>
    %26 = vector.broadcast %25 : vector<1x1x128xf32> to vector<4x4x128xf32>
    %27 = arith.mulf %22, %26 : vector<4x4x128xf32>
    %28 = arith.addf %21, %27 : vector<4x4x128xf32>
    %29 = vector.extract_strided_slice %6 {offsets = [0, 3, 0], sizes = [4, 4, 128], strides = [1, 1, 1]} : vector<8x8x128xf32> to vector<4x4x128xf32>
    %c3 = arith.constant 3 : index
    %c0_6 = arith.constant 0 : index
    %30 = vector.load %arg4[%c3, %c0_6] : memref<25x128xf32, #tpu.memory_space<vmem>>, vector<1x128xf32>
    %31 = vector.shape_cast %30 : vector<1x128xf32> to vector<128xf32>
    %32 = vector.shape_cast %31 : vector<128xf32> to vector<1x1x128xf32>
    %33 = vector.broadcast %32 : vector<1x1x128xf32> to vector<4x4x128xf32>
    %34 = arith.mulf %29, %33 : vector<4x4x128xf32>
    %35 = arith.addf %28, %34 : vector<4x4x128xf32>
    %36 = vector.extract_strided_slice %6 {offsets = [0, 4, 0], sizes = [4, 4, 128], strides = [1, 1, 1]} : vector<8x8x128xf32> to vector<4x4x128xf32>
    %c4 = arith.constant 4 : index
    %c0_7 = arith.constant 0 : index
    %37 = vector.load %arg4[%c4, %c0_7] : memref<25x128xf32, #tpu.memory_space<vmem>>, vector<1x128xf32>
    %38 = vector.shape_cast %37 : vector<1x128xf32> to vector<128xf32>
    %39 = vector.shape_cast %38 : vector<128xf32> to vector<1x1x128xf32>
    %40 = vector.broadcast %39 : vector<1x1x128xf32> to vector<4x4x128xf32>
    %41 = arith.mulf %36, %40 : vector<4x4x128xf32>
    %42 = arith.addf %35, %41 : vector<4x4x128xf32>
    %43 = vector.extract_strided_slice %6 {offsets = [1, 0, 0], sizes = [4, 4, 128], strides = [1, 1, 1]} : vector<8x8x128xf32> to vector<4x4x128xf32>
    %c5 = arith.constant 5 : index
    %c0_8 = arith.constant 0 : index
    %44 = vector.load %arg4[%c5, %c0_8] : memref<25x128xf32, #tpu.memory_space<vmem>>, vector<1x128xf32>
    %45 = vector.shape_cast %44 : vector<1x128xf32> to vector<128xf32>
    %46 = vector.shape_cast %45 : vector<128xf32> to vector<1x1x128xf32>
    %47 = vector.broadcast %46 : vector<1x1x128xf32> to vector<4x4x128xf32>
    %48 = arith.mulf %43, %47 : vector<4x4x128xf32>
    %49 = arith.addf %42, %48 : vector<4x4x128xf32>
    %50 = vector.extract_strided_slice %6 {offsets = [1, 1, 0], sizes = [4, 4, 128], strides = [1, 1, 1]} : vector<8x8x128xf32> to vector<4x4x128xf32>
    %c6 = arith.constant 6 : index
    %c0_9 = arith.constant 0 : index
    %51 = vector.load %arg4[%c6, %c0_9] : memref<25x128xf32, #tpu.memory_space<vmem>>, vector<1x128xf32>
    %52 = vector.shape_cast %51 : vector<1x128xf32> to vector<128xf32>
    %53 = vector.shape_cast %52 : vector<128xf32> to vector<1x1x128xf32>
    %54 = vector.broadcast %53 : vector<1x1x128xf32> to vector<4x4x128xf32>
    %55 = arith.mulf %50, %54 : vector<4x4x128xf32>
    %56 = arith.addf %49, %55 : vector<4x4x128xf32>
    %57 = vector.extract_strided_slice %6 {offsets = [1, 2, 0], sizes = [4, 4, 128], strides = [1, 1, 1]} : vector<8x8x128xf32> to vector<4x4x128xf32>
    %c7 = arith.constant 7 : index
    %c0_10 = arith.constant 0 : index
    %58 = vector.load %arg4[%c7, %c0_10] : memref<25x128xf32, #tpu.memory_space<vmem>>, vector<1x128xf32>
    %59 = vector.shape_cast %58 : vector<1x128xf32> to vector<128xf32>
    %60 = vector.shape_cast %59 : vector<128xf32> to vector<1x1x128xf32>
    %61 = vector.broadcast %60 : vector<1x1x128xf32> to vector<4x4x128xf32>
    %62 = arith.mulf %57, %61 : vector<4x4x128xf32>
    %63 = arith.addf %56, %62 : vector<4x4x128xf32>
    %64 = vector.extract_strided_slice %6 {offsets = [1, 3, 0], sizes = [4, 4, 128], strides = [1, 1, 1]} : vector<8x8x128xf32> to vector<4x4x128xf32>
    %c8 = arith.constant 8 : index
    %c0_11 = arith.constant 0 : index
    %65 = vector.load %arg4[%c8, %c0_11] : memref<25x128xf32, #tpu.memory_space<vmem>>, vector<1x128xf32>
    %66 = vector.shape_cast %65 : vector<1x128xf32> to vector<128xf32>
    %67 = vector.shape_cast %66 : vector<128xf32> to vector<1x1x128xf32>
    %68 = vector.broadcast %67 : vector<1x1x128xf32> to vector<4x4x128xf32>
    %69 = arith.mulf %64, %68 : vector<4x4x128xf32>
    %70 = arith.addf %63, %69 : vector<4x4x128xf32>
    %71 = vector.extract_strided_slice %6 {offsets = [1, 4, 0], sizes = [4, 4, 128], strides = [1, 1, 1]} : vector<8x8x128xf32> to vector<4x4x128xf32>
    %c9 = arith.constant 9 : index
    %c0_12 = arith.constant 0 : index
    %72 = vector.load %arg4[%c9, %c0_12] : memref<25x128xf32, #tpu.memory_space<vmem>>, vector<1x128xf32>
    %73 = vector.shape_cast %72 : vector<1x128xf32> to vector<128xf32>
    %74 = vector.shape_cast %73 : vector<128xf32> to vector<1x1x128xf32>
    %75 = vector.broadcast %74 : vector<1x1x128xf32> to vector<4x4x128xf32>
    %76 = arith.mulf %71, %75 : vector<4x4x128xf32>
    %77 = arith.addf %70, %76 : vector<4x4x128xf32>
    %78 = vector.extract_strided_slice %6 {offsets = [2, 0, 0], sizes = [4, 4, 128], strides = [1, 1, 1]} : vector<8x8x128xf32> to vector<4x4x128xf32>
    %c10 = arith.constant 10 : index
    %c0_13 = arith.constant 0 : index
    %79 = vector.load %arg4[%c10, %c0_13] : memref<25x128xf32, #tpu.memory_space<vmem>>, vector<1x128xf32>
    %80 = vector.shape_cast %79 : vector<1x128xf32> to vector<128xf32>
    %81 = vector.shape_cast %80 : vector<128xf32> to vector<1x1x128xf32>
    %82 = vector.broadcast %81 : vector<1x1x128xf32> to vector<4x4x128xf32>
    %83 = arith.mulf %78, %82 : vector<4x4x128xf32>
    %84 = arith.addf %77, %83 : vector<4x4x128xf32>
    %85 = vector.extract_strided_slice %6 {offsets = [2, 1, 0], sizes = [4, 4, 128], strides = [1, 1, 1]} : vector<8x8x128xf32> to vector<4x4x128xf32>
    %c11 = arith.constant 11 : index
    %c0_14 = arith.constant 0 : index
    %86 = vector.load %arg4[%c11, %c0_14] : memref<25x128xf32, #tpu.memory_space<vmem>>, vector<1x128xf32>
    %87 = vector.shape_cast %86 : vector<1x128xf32> to vector<128xf32>
    %88 = vector.shape_cast %87 : vector<128xf32> to vector<1x1x128xf32>
    %89 = vector.broadcast %88 : vector<1x1x128xf32> to vector<4x4x128xf32>
    %90 = arith.mulf %85, %89 : vector<4x4x128xf32>
    %91 = arith.addf %84, %90 : vector<4x4x128xf32>
    %92 = vector.extract_strided_slice %6 {offsets = [2, 2, 0], sizes = [4, 4, 128], strides = [1, 1, 1]} : vector<8x8x128xf32> to vector<4x4x128xf32>
    %c12 = arith.constant 12 : index
    %c0_15 = arith.constant 0 : index
    %93 = vector.load %arg4[%c12, %c0_15] : memref<25x128xf32, #tpu.memory_space<vmem>>, vector<1x128xf32>
    %94 = vector.shape_cast %93 : vector<1x128xf32> to vector<128xf32>
    %95 = vector.shape_cast %94 : vector<128xf32> to vector<1x1x128xf32>
    %96 = vector.broadcast %95 : vector<1x1x128xf32> to vector<4x4x128xf32>
    %97 = arith.mulf %92, %96 : vector<4x4x128xf32>
    %98 = arith.addf %91, %97 : vector<4x4x128xf32>
    %99 = vector.extract_strided_slice %6 {offsets = [2, 3, 0], sizes = [4, 4, 128], strides = [1, 1, 1]} : vector<8x8x128xf32> to vector<4x4x128xf32>
    %c13 = arith.constant 13 : index
    %c0_16 = arith.constant 0 : index
    %100 = vector.load %arg4[%c13, %c0_16] : memref<25x128xf32, #tpu.memory_space<vmem>>, vector<1x128xf32>
    %101 = vector.shape_cast %100 : vector<1x128xf32> to vector<128xf32>
    %102 = vector.shape_cast %101 : vector<128xf32> to vector<1x1x128xf32>
    %103 = vector.broadcast %102 : vector<1x1x128xf32> to vector<4x4x128xf32>
    %104 = arith.mulf %99, %103 : vector<4x4x128xf32>
    %105 = arith.addf %98, %104 : vector<4x4x128xf32>
    %106 = vector.extract_strided_slice %6 {offsets = [2, 4, 0], sizes = [4, 4, 128], strides = [1, 1, 1]} : vector<8x8x128xf32> to vector<4x4x128xf32>
    %c14 = arith.constant 14 : index
    %c0_17 = arith.constant 0 : index
    %107 = vector.load %arg4[%c14, %c0_17] : memref<25x128xf32, #tpu.memory_space<vmem>>, vector<1x128xf32>
    %108 = vector.shape_cast %107 : vector<1x128xf32> to vector<128xf32>
    %109 = vector.shape_cast %108 : vector<128xf32> to vector<1x1x128xf32>
    %110 = vector.broadcast %109 : vector<1x1x128xf32> to vector<4x4x128xf32>
    %111 = arith.mulf %106, %110 : vector<4x4x128xf32>
    %112 = arith.addf %105, %111 : vector<4x4x128xf32>
    %113 = vector.extract_strided_slice %6 {offsets = [3, 0, 0], sizes = [4, 4, 128], strides = [1, 1, 1]} : vector<8x8x128xf32> to vector<4x4x128xf32>
    %c15 = arith.constant 15 : index
    %c0_18 = arith.constant 0 : index
    %114 = vector.load %arg4[%c15, %c0_18] : memref<25x128xf32, #tpu.memory_space<vmem>>, vector<1x128xf32>
    %115 = vector.shape_cast %114 : vector<1x128xf32> to vector<128xf32>
    %116 = vector.shape_cast %115 : vector<128xf32> to vector<1x1x128xf32>
    %117 = vector.broadcast %116 : vector<1x1x128xf32> to vector<4x4x128xf32>
    %118 = arith.mulf %113, %117 : vector<4x4x128xf32>
    %119 = arith.addf %112, %118 : vector<4x4x128xf32>
    %120 = vector.extract_strided_slice %6 {offsets = [3, 1, 0], sizes = [4, 4, 128], strides = [1, 1, 1]} : vector<8x8x128xf32> to vector<4x4x128xf32>
    %c16 = arith.constant 16 : index
    %c0_19 = arith.constant 0 : index
    %121 = vector.load %arg4[%c16, %c0_19] : memref<25x128xf32, #tpu.memory_space<vmem>>, vector<1x128xf32>
    %122 = vector.shape_cast %121 : vector<1x128xf32> to vector<128xf32>
    %123 = vector.shape_cast %122 : vector<128xf32> to vector<1x1x128xf32>
    %124 = vector.broadcast %123 : vector<1x1x128xf32> to vector<4x4x128xf32>
    %125 = arith.mulf %120, %124 : vector<4x4x128xf32>
    %126 = arith.addf %119, %125 : vector<4x4x128xf32>
    %127 = vector.extract_strided_slice %6 {offsets = [3, 2, 0], sizes = [4, 4, 128], strides = [1, 1, 1]} : vector<8x8x128xf32> to vector<4x4x128xf32>
    %c17 = arith.constant 17 : index
    %c0_20 = arith.constant 0 : index
    %128 = vector.load %arg4[%c17, %c0_20] : memref<25x128xf32, #tpu.memory_space<vmem>>, vector<1x128xf32>
    %129 = vector.shape_cast %128 : vector<1x128xf32> to vector<128xf32>
    %130 = vector.shape_cast %129 : vector<128xf32> to vector<1x1x128xf32>
    %131 = vector.broadcast %130 : vector<1x1x128xf32> to vector<4x4x128xf32>
    %132 = arith.mulf %127, %131 : vector<4x4x128xf32>
    %133 = arith.addf %126, %132 : vector<4x4x128xf32>
    %134 = vector.extract_strided_slice %6 {offsets = [3, 3, 0], sizes = [4, 4, 128], strides = [1, 1, 1]} : vector<8x8x128xf32> to vector<4x4x128xf32>
    %c18 = arith.constant 18 : index
    %c0_21 = arith.constant 0 : index
    %135 = vector.load %arg4[%c18, %c0_21] : memref<25x128xf32, #tpu.memory_space<vmem>>, vector<1x128xf32>
    %136 = vector.shape_cast %135 : vector<1x128xf32> to vector<128xf32>
    %137 = vector.shape_cast %136 : vector<128xf32> to vector<1x1x128xf32>
    %138 = vector.broadcast %137 : vector<1x1x128xf32> to vector<4x4x128xf32>
    %139 = arith.mulf %134, %138 : vector<4x4x128xf32>
    %140 = arith.addf %133, %139 : vector<4x4x128xf32>
    %141 = vector.extract_strided_slice %6 {offsets = [3, 4, 0], sizes = [4, 4, 128], strides = [1, 1, 1]} : vector<8x8x128xf32> to vector<4x4x128xf32>
    %c19 = arith.constant 19 : index
    %c0_22 = arith.constant 0 : index
    %142 = vector.load %arg4[%c19, %c0_22] : memref<25x128xf32, #tpu.memory_space<vmem>>, vector<1x128xf32>
    %143 = vector.shape_cast %142 : vector<1x128xf32> to vector<128xf32>
    %144 = vector.shape_cast %143 : vector<128xf32> to vector<1x1x128xf32>
    %145 = vector.broadcast %144 : vector<1x1x128xf32> to vector<4x4x128xf32>
    %146 = arith.mulf %141, %145 : vector<4x4x128xf32>
    %147 = arith.addf %140, %146 : vector<4x4x128xf32>
    %148 = vector.extract_strided_slice %6 {offsets = [4, 0, 0], sizes = [4, 4, 128], strides = [1, 1, 1]} : vector<8x8x128xf32> to vector<4x4x128xf32>
    %c20 = arith.constant 20 : index
    %c0_23 = arith.constant 0 : index
    %149 = vector.load %arg4[%c20, %c0_23] : memref<25x128xf32, #tpu.memory_space<vmem>>, vector<1x128xf32>
    %150 = vector.shape_cast %149 : vector<1x128xf32> to vector<128xf32>
    %151 = vector.shape_cast %150 : vector<128xf32> to vector<1x1x128xf32>
    %152 = vector.broadcast %151 : vector<1x1x128xf32> to vector<4x4x128xf32>
    %153 = arith.mulf %148, %152 : vector<4x4x128xf32>
    %154 = arith.addf %147, %153 : vector<4x4x128xf32>
    %155 = vector.extract_strided_slice %6 {offsets = [4, 1, 0], sizes = [4, 4, 128], strides = [1, 1, 1]} : vector<8x8x128xf32> to vector<4x4x128xf32>
    %c21 = arith.constant 21 : index
    %c0_24 = arith.constant 0 : index
    %156 = vector.load %arg4[%c21, %c0_24] : memref<25x128xf32, #tpu.memory_space<vmem>>, vector<1x128xf32>
    %157 = vector.shape_cast %156 : vector<1x128xf32> to vector<128xf32>
    %158 = vector.shape_cast %157 : vector<128xf32> to vector<1x1x128xf32>
    %159 = vector.broadcast %158 : vector<1x1x128xf32> to vector<4x4x128xf32>
    %160 = arith.mulf %155, %159 : vector<4x4x128xf32>
    %161 = arith.addf %154, %160 : vector<4x4x128xf32>
    %162 = vector.extract_strided_slice %6 {offsets = [4, 2, 0], sizes = [4, 4, 128], strides = [1, 1, 1]} : vector<8x8x128xf32> to vector<4x4x128xf32>
    %c22 = arith.constant 22 : index
    %c0_25 = arith.constant 0 : index
    %163 = vector.load %arg4[%c22, %c0_25] : memref<25x128xf32, #tpu.memory_space<vmem>>, vector<1x128xf32>
    %164 = vector.shape_cast %163 : vector<1x128xf32> to vector<128xf32>
    %165 = vector.shape_cast %164 : vector<128xf32> to vector<1x1x128xf32>
    %166 = vector.broadcast %165 : vector<1x1x128xf32> to vector<4x4x128xf32>
    %167 = arith.mulf %162, %166 : vector<4x4x128xf32>
    %168 = arith.addf %161, %167 : vector<4x4x128xf32>
    %169 = vector.extract_strided_slice %6 {offsets = [4, 3, 0], sizes = [4, 4, 128], strides = [1, 1, 1]} : vector<8x8x128xf32> to vector<4x4x128xf32>
    %c23 = arith.constant 23 : index
    %c0_26 = arith.constant 0 : index
    %170 = vector.load %arg4[%c23, %c0_26] : memref<25x128xf32, #tpu.memory_space<vmem>>, vector<1x128xf32>
    %171 = vector.shape_cast %170 : vector<1x128xf32> to vector<128xf32>
    %172 = vector.shape_cast %171 : vector<128xf32> to vector<1x1x128xf32>
    %173 = vector.broadcast %172 : vector<1x1x128xf32> to vector<4x4x128xf32>
    %174 = arith.mulf %169, %173 : vector<4x4x128xf32>
    %175 = arith.addf %168, %174 : vector<4x4x128xf32>
    %176 = vector.extract_strided_slice %6 {offsets = [4, 4, 0], sizes = [4, 4, 128], strides = [1, 1, 1]} : vector<8x8x128xf32> to vector<4x4x128xf32>
    %c24 = arith.constant 24 : index
    %c0_27 = arith.constant 0 : index
    %177 = vector.load %arg4[%c24, %c0_27] : memref<25x128xf32, #tpu.memory_space<vmem>>, vector<1x128xf32>
    %178 = vector.shape_cast %177 : vector<1x128xf32> to vector<128xf32>
    %179 = vector.shape_cast %178 : vector<128xf32> to vector<1x1x128xf32>
    %180 = vector.broadcast %179 : vector<1x1x128xf32> to vector<4x4x128xf32>
    %181 = arith.mulf %176, %180 : vector<4x4x128xf32>
    %182 = arith.addf %175, %181 : vector<4x4x128xf32>
    %c0_28 = arith.constant 0 : index
    %c0_29 = arith.constant 0 : index
    %183 = vector.load %arg5[%c0_28, %c0_29] : memref<1x128xf32, #tpu.memory_space<vmem>>, vector<1x128xf32>
    %184 = vector.shape_cast %183 : vector<1x128xf32> to vector<128xf32>
    %185 = vector.shape_cast %184 : vector<128xf32> to vector<1x1x128xf32>
    %186 = vector.broadcast %185 : vector<1x1x128xf32> to vector<4x4x128xf32>
    %187 = arith.addf %182, %186 : vector<4x4x128xf32>
    %cst_30 = arith.constant 0.000000e+00 : f32
    %188 = vector.broadcast %cst_30 : f32 to vector<4x4x128xf32>
    %189 = arith.maximumf %187, %188 : vector<4x4x128xf32>
    %190 = arith.truncf %189 : vector<4x4x128xf32> to vector<4x4x128xbf16>
    %c0_31 = arith.constant 0 : index
    %c0_32 = arith.constant 0 : index
    %c0_33 = arith.constant 0 : index
    %c0_34 = arith.constant 0 : index
    %191 = vector.load %arg6[%c0_31, %c0_32, %c0_33, %c0_34] : memref<1x4x4x128xbf16, #tpu.memory_space<vmem>>, vector<1x4x4x128xbf16>
    %192 = vector.shape_cast %191 : vector<1x4x4x128xbf16> to vector<4x4x128xbf16>
    %193 = vector.shape_cast %190 : vector<4x4x128xbf16> to vector<1x4x4x128xbf16>
    tpu.vector_store %arg6[%c0_31, %c0_32, %c0_33, %c0_34], %193 {strides = array<i32>} : memref<1x4x4x128xbf16, #tpu.memory_space<vmem>>, vector<1x4x4x128xbf16>,
    return
  }
  func.func @transform_0(%arg0: i32, %arg1: i32, %arg2: i32) -> (i32, i32, i32, i32) {
    %c0_i32 = arith.constant 0 : i32
    %c0_i32_0 = arith.constant 0 : i32
    %c0_i32_1 = arith.constant 0 : i32
    return %arg0, %c0_i32, %c0_i32_0, %arg1 : i32, i32, i32, i32
  }
  func.func @transform_1(%arg0: i32, %arg1: i32, %arg2: i32) -> (i32, i32) {
    %c0_i32 = arith.constant 0 : i32
    %c0_i32_0 = arith.constant 0 : i32
    return %c0_i32, %arg1 : i32, i32
  }
  func.func @transform_2(%arg0: i32, %arg1: i32, %arg2: i32) -> (i32, i32) {
    %c0_i32 = arith.constant 0 : i32
    %c0_i32_0 = arith.constant 0 : i32
    return %c0_i32, %arg1 : i32, i32
  }
  func.func @transform_3(%arg0: i32, %arg1: i32, %arg2: i32) -> (i32, i32, i32, i32) {
    %c0_i32 = arith.constant 0 : i32
    %c0_i32_0 = arith.constant 0 : i32
    return %arg0, %arg2, %c0_i32, %arg1 : i32, i32, i32, i32
  }
}

module attributes {stable_mosaic.version = 11 : i64} {
  func.func @_matmul_kernel(%arg0: i32, %arg1: memref<16x128xbf16, #tpu.memory_space<vmem>>, %arg2: memref<128x128xbf16, #tpu.memory_space<vmem>>, %arg3: memref<1x128xf32, #tpu.memory_space<vmem>>, %arg4: memref<16x128xbf16, #tpu.memory_space<vmem>>, %arg5: memref<16x128xbf16, #tpu.memory_space<vmem>>) attributes {dimension_semantics = [#tpu.dimension_semantics<parallel>], iteration_bounds = array<i64: 2>, scalar_prefetch = 0 : i64, scratch_operands = 0 : i64, tpu.core_type = #tpu.core_type<tc>, window_params = [{transform_indices = @transform_0, window_bounds = array<i64: 16, 128>}, {pipeline_mode = #tpu.pipeline_mode<synchronous>, transform_indices = @transform_1, window_bounds = array<i64: 128, 128>}, {pipeline_mode = #tpu.pipeline_mode<synchronous>, transform_indices = @transform_2, window_bounds = array<i64: 1, 128>}, {transform_indices = @transform_3, window_bounds = array<i64: 16, 128>}, {transform_indices = @transform_4, window_bounds = array<i64: 16, 128>}]} {
    %c0 = arith.constant 0 : index
    %c0_0 = arith.constant 0 : index
    %0 = vector.load %arg1[%c0, %c0_0] : memref<16x128xbf16, #tpu.memory_space<vmem>>, vector<16x128xbf16>
    %c0_1 = arith.constant 0 : index
    %c0_2 = arith.constant 0 : index
    %1 = vector.load %arg2[%c0_1, %c0_2] : memref<128x128xbf16, #tpu.memory_space<vmem>>, vector<128x128xbf16>
    %cst = arith.constant dense<0.000000e+00> : vector<16x128xf32>
    %2 = tpu.matmul %0, %1, %cst {dimension_numbers = #tpu.dot_dimension_numbers<[1], [0], [0], [1], [0, 0, 1, 1], [], []>} : vector<16x128xbf16>, vector<128x128xbf16>, vector<16x128xf32> -> vector<16x128xf32>
    %c0_3 = arith.constant 0 : index
    %c0_4 = arith.constant 0 : index
    %3 = vector.load %arg3[%c0_3, %c0_4] : memref<1x128xf32, #tpu.memory_space<vmem>>, vector<1x128xf32>
    %4 = vector.broadcast %3 : vector<1x128xf32> to vector<16x128xf32>
    %5 = arith.addf %2, %4 : vector<16x128xf32>
    %c0_5 = arith.constant 0 : index
    %c0_6 = arith.constant 0 : index
    %6 = vector.load %arg4[%c0_5, %c0_6] : memref<16x128xbf16, #tpu.memory_space<vmem>>, vector<16x128xbf16>
    %7 = arith.extf %6 : vector<16x128xbf16> to vector<16x128xf32>
    %8 = arith.addf %5, %7 : vector<16x128xf32>
    %9 = arith.truncf %8 : vector<16x128xf32> to vector<16x128xbf16>
    %c0_7 = arith.constant 0 : index
    %c0_8 = arith.constant 0 : index
    %10 = vector.load %arg5[%c0_7, %c0_8] : memref<16x128xbf16, #tpu.memory_space<vmem>>, vector<16x128xbf16>
    tpu.vector_store %arg5[%c0_7, %c0_8], %9 {strides = array<i32>} : memref<16x128xbf16, #tpu.memory_space<vmem>>, vector<16x128xbf16>,
    return
  }
  func.func @transform_0(%arg0: i32) -> (i32, i32) {
    %c0_i32 = arith.constant 0 : i32
    %c0_i32_0 = arith.constant 0 : i32
    return %arg0, %c0_i32 : i32, i32
  }
  func.func @transform_1(%arg0: i32) -> (i32, i32) {
    %c0_i32 = arith.constant 0 : i32
    %c0_i32_0 = arith.constant 0 : i32
    %c0_i32_1 = arith.constant 0 : i32
    return %c0_i32, %c0_i32_0 : i32, i32
  }
  func.func @transform_2(%arg0: i32) -> (i32, i32) {
    %c0_i32 = arith.constant 0 : i32
    %c0_i32_0 = arith.constant 0 : i32
    %c0_i32_1 = arith.constant 0 : i32
    return %c0_i32, %c0_i32_0 : i32, i32
  }
  func.func @transform_3(%arg0: i32) -> (i32, i32) {
    %c0_i32 = arith.constant 0 : i32
    %c0_i32_0 = arith.constant 0 : i32
    return %arg0, %c0_i32 : i32, i32
  }
  func.func @transform_4(%arg0: i32) -> (i32, i32) {
    %c0_i32 = arith.constant 0 : i32
    %c0_i32_0 = arith.constant 0 : i32
    return %arg0, %c0_i32 : i32, i32
  }
}

module attributes {stable_mosaic.version = 11 : i64} {
  func.func @_matmul_kernel(%arg0: i32, %arg1: memref<16x128xbf16, #tpu.memory_space<vmem>>, %arg2: memref<128x256xbf16, #tpu.memory_space<vmem>>, %arg3: memref<1x256xf32, #tpu.memory_space<vmem>>, %arg4: memref<16x256xbf16, #tpu.memory_space<vmem>>) attributes {dimension_semantics = [#tpu.dimension_semantics<parallel>], iteration_bounds = array<i64: 2>, scalar_prefetch = 0 : i64, scratch_operands = 0 : i64, tpu.core_type = #tpu.core_type<tc>, window_params = [{transform_indices = @transform_0, window_bounds = array<i64: 16, 128>}, {pipeline_mode = #tpu.pipeline_mode<synchronous>, transform_indices = @transform_1, window_bounds = array<i64: 128, 256>}, {pipeline_mode = #tpu.pipeline_mode<synchronous>, transform_indices = @transform_2, window_bounds = array<i64: 1, 256>}, {transform_indices = @transform_3, window_bounds = array<i64: 16, 256>}]} {
    %c0 = arith.constant 0 : index
    %c0_0 = arith.constant 0 : index
    %0 = vector.load %arg1[%c0, %c0_0] : memref<16x128xbf16, #tpu.memory_space<vmem>>, vector<16x128xbf16>
    %c0_1 = arith.constant 0 : index
    %c0_2 = arith.constant 0 : index
    %1 = vector.load %arg2[%c0_1, %c0_2] : memref<128x256xbf16, #tpu.memory_space<vmem>>, vector<128x256xbf16>
    %cst = arith.constant dense<0.000000e+00> : vector<16x256xf32>
    %2 = tpu.matmul %0, %1, %cst {dimension_numbers = #tpu.dot_dimension_numbers<[1], [0], [0], [1], [0, 0, 1, 1], [], []>} : vector<16x128xbf16>, vector<128x256xbf16>, vector<16x256xf32> -> vector<16x256xf32>
    %c0_3 = arith.constant 0 : index
    %c0_4 = arith.constant 0 : index
    %3 = vector.load %arg3[%c0_3, %c0_4] : memref<1x256xf32, #tpu.memory_space<vmem>>, vector<1x256xf32>
    %4 = vector.broadcast %3 : vector<1x256xf32> to vector<16x256xf32>
    %5 = arith.addf %2, %4 : vector<16x256xf32>
    %cst_5 = arith.constant 0.000000e+00 : f32
    %6 = vector.broadcast %cst_5 : f32 to vector<16x256xf32>
    %7 = arith.maximumf %5, %6 : vector<16x256xf32>
    %8 = arith.truncf %7 : vector<16x256xf32> to vector<16x256xbf16>
    %c0_6 = arith.constant 0 : index
    %c0_7 = arith.constant 0 : index
    %9 = vector.load %arg4[%c0_6, %c0_7] : memref<16x256xbf16, #tpu.memory_space<vmem>>, vector<16x256xbf16>
    tpu.vector_store %arg4[%c0_6, %c0_7], %8 {strides = array<i32>} : memref<16x256xbf16, #tpu.memory_space<vmem>>, vector<16x256xbf16>,
    return
  }
  func.func @transform_0(%arg0: i32) -> (i32, i32) {
    %c0_i32 = arith.constant 0 : i32
    %c0_i32_0 = arith.constant 0 : i32
    return %arg0, %c0_i32 : i32, i32
  }
  func.func @transform_1(%arg0: i32) -> (i32, i32) {
    %c0_i32 = arith.constant 0 : i32
    %c0_i32_0 = arith.constant 0 : i32
    %c0_i32_1 = arith.constant 0 : i32
    return %c0_i32, %c0_i32_0 : i32, i32
  }
  func.func @transform_2(%arg0: i32) -> (i32, i32) {
    %c0_i32 = arith.constant 0 : i32
    %c0_i32_0 = arith.constant 0 : i32
    %c0_i32_1 = arith.constant 0 : i32
    return %c0_i32, %c0_i32_0 : i32, i32
  }
  func.func @transform_3(%arg0: i32) -> (i32, i32) {
    %c0_i32 = arith.constant 0 : i32
    %c0_i32_0 = arith.constant 0 : i32
    return %arg0, %c0_i32 : i32, i32
  }
}

module attributes {stable_mosaic.version = 11 : i64} {
  func.func @_dwconv_kernel(%arg0: i32, %arg1: i32, %arg2: i32, %arg3: memref<1x12x3x128xbf16, #tpu.memory_space<vmem>>, %arg4: memref<9x128xf32, #tpu.memory_space<vmem>>, %arg5: memref<1x128xf32, #tpu.memory_space<vmem>>, %arg6: memref<1x2x2x128xbf16, #tpu.memory_space<vmem>>, %arg7: memref<1x1x128xf32, #tpu.memory_space<vmem>>) attributes {dimension_semantics = [#tpu.dimension_semantics<parallel>, #tpu.dimension_semantics<parallel>, #tpu.dimension_semantics<arbitrary>], iteration_bounds = array<i64: 2, 2, 1>, scalar_prefetch = 0 : i64, scratch_operands = 0 : i64, tpu.core_type = #tpu.core_type<tc>, window_params = [{transform_indices = @transform_0, window_bounds = array<i64: 1, 12, 3, 128>}, {transform_indices = @transform_1, window_bounds = array<i64: 9, 128>}, {transform_indices = @transform_2, window_bounds = array<i64: 1, 128>}, {transform_indices = @transform_3, window_bounds = array<i64: 1, 2, 2, 128>}, {transform_indices = @transform_4, window_bounds = array<i64: 1, 1, 128>}]} {
    %c2_i32 = arith.constant 2 : i32
    %0 = arith.muli %arg2, %c2_i32 : i32
    %1 = tpu.assume_multiple %0, 2 : i32
    %c0_i32 = arith.constant 0 : i32
    %2 = arith.addi %c0_i32, %1 : i32
    %c0 = arith.constant 0 : index
    %3 = arith.index_cast %2 : i32 to index
    %c0_0 = arith.constant 0 : index
    %c0_1 = arith.constant 0 : index
    %4 = vector.load %arg3[%c0, %3, %c0_0, %c0_1] : memref<1x12x3x128xbf16, #tpu.memory_space<vmem>>, vector<1x3x3x128xbf16>
    %5 = vector.shape_cast %4 : vector<1x3x3x128xbf16> to vector<3x3x128xbf16>
    %6 = arith.extf %5 : vector<3x3x128xbf16> to vector<3x3x128xf32>
    %c3_i32 = arith.constant 3 : i32
    %7 = arith.addi %c3_i32, %1 : i32
    %c0_2 = arith.constant 0 : index
    %8 = arith.index_cast %7 : i32 to index
    %c0_3 = arith.constant 0 : index
    %c0_4 = arith.constant 0 : index
    %9 = vector.load %arg3[%c0_2, %8, %c0_3, %c0_4] : memref<1x12x3x128xbf16, #tpu.memory_space<vmem>>, vector<1x3x3x128xbf16>
    %10 = vector.shape_cast %9 : vector<1x3x3x128xbf16> to vector<3x3x128xbf16>
    %11 = arith.extf %10 : vector<3x3x128xbf16> to vector<3x3x128xf32>
    %c6_i32 = arith.constant 6 : i32
    %12 = arith.addi %c6_i32, %1 : i32
    %c0_5 = arith.constant 0 : index
    %13 = arith.index_cast %12 : i32 to index
    %c0_6 = arith.constant 0 : index
    %c0_7 = arith.constant 0 : index
    %14 = vector.load %arg3[%c0_5, %13, %c0_6, %c0_7] : memref<1x12x3x128xbf16, #tpu.memory_space<vmem>>, vector<1x3x3x128xbf16>
    %15 = vector.shape_cast %14 : vector<1x3x3x128xbf16> to vector<3x3x128xbf16>
    %16 = arith.extf %15 : vector<3x3x128xbf16> to vector<3x3x128xf32>
    %c9_i32 = arith.constant 9 : i32
    %17 = arith.addi %c9_i32, %1 : i32
    %c0_8 = arith.constant 0 : index
    %18 = arith.index_cast %17 : i32 to index
    %c0_9 = arith.constant 0 : index
    %c0_10 = arith.constant 0 : index
    %19 = vector.load %arg3[%c0_8, %18, %c0_9, %c0_10] : memref<1x12x3x128xbf16, #tpu.memory_space<vmem>>, vector<1x3x3x128xbf16>
    %20 = vector.shape_cast %19 : vector<1x3x3x128xbf16> to vector<3x3x128xbf16>
    %21 = arith.extf %20 : vector<3x3x128xbf16> to vector<3x3x128xf32>
    %cst = arith.constant 0.000000e+00 : f32
    %22 = vector.broadcast %cst : f32 to vector<2x2x128xf32>
    %23 = vector.extract_strided_slice %6 {offsets = [0, 0, 0], sizes = [2, 2, 128], strides = [1, 1, 1]} : vector<3x3x128xf32> to vector<2x2x128xf32>
    %c0_11 = arith.constant 0 : index
    %c0_12 = arith.constant 0 : index
    %24 = vector.load %arg4[%c0_11, %c0_12] : memref<9x128xf32, #tpu.memory_space<vmem>>, vector<1x128xf32>
    %25 = vector.shape_cast %24 : vector<1x128xf32> to vector<128xf32>
    %26 = vector.shape_cast %25 : vector<128xf32> to vector<1x1x128xf32>
    %27 = vector.broadcast %26 : vector<1x1x128xf32> to vector<2x2x128xf32>
    %28 = arith.mulf %23, %27 : vector<2x2x128xf32>
    %29 = arith.addf %22, %28 : vector<2x2x128xf32>
    %30 = vector.extract_strided_slice %11 {offsets = [0, 0, 0], sizes = [2, 2, 128], strides = [1, 1, 1]} : vector<3x3x128xf32> to vector<2x2x128xf32>
    %c1 = arith.constant 1 : index
    %c0_13 = arith.constant 0 : index
    %31 = vector.load %arg4[%c1, %c0_13] : memref<9x128xf32, #tpu.memory_space<vmem>>, vector<1x128xf32>
    %32 = vector.shape_cast %31 : vector<1x128xf32> to vector<128xf32>
    %33 = vector.shape_cast %32 : vector<128xf32> to vector<1x1x128xf32>
    %34 = vector.broadcast %33 : vector<1x1x128xf32> to vector<2x2x128xf32>
    %35 = arith.mulf %30, %34 : vector<2x2x128xf32>
    %36 = arith.addf %29, %35 : vector<2x2x128xf32>
    %37 = vector.extract_strided_slice %6 {offsets = [0, 1, 0], sizes = [2, 2, 128], strides = [1, 1, 1]} : vector<3x3x128xf32> to vector<2x2x128xf32>
    %c2 = arith.constant 2 : index
    %c0_14 = arith.constant 0 : index
    %38 = vector.load %arg4[%c2, %c0_14] : memref<9x128xf32, #tpu.memory_space<vmem>>, vector<1x128xf32>
    %39 = vector.shape_cast %38 : vector<1x128xf32> to vector<128xf32>
    %40 = vector.shape_cast %39 : vector<128xf32> to vector<1x1x128xf32>
    %41 = vector.broadcast %40 : vector<1x1x128xf32> to vector<2x2x128xf32>
    %42 = arith.mulf %37, %41 : vector<2x2x128xf32>
    %43 = arith.addf %36, %42 : vector<2x2x128xf32>
    %44 = vector.extract_strided_slice %16 {offsets = [0, 0, 0], sizes = [2, 2, 128], strides = [1, 1, 1]} : vector<3x3x128xf32> to vector<2x2x128xf32>
    %c3 = arith.constant 3 : index
    %c0_15 = arith.constant 0 : index
    %45 = vector.load %arg4[%c3, %c0_15] : memref<9x128xf32, #tpu.memory_space<vmem>>, vector<1x128xf32>
    %46 = vector.shape_cast %45 : vector<1x128xf32> to vector<128xf32>
    %47 = vector.shape_cast %46 : vector<128xf32> to vector<1x1x128xf32>
    %48 = vector.broadcast %47 : vector<1x1x128xf32> to vector<2x2x128xf32>
    %49 = arith.mulf %44, %48 : vector<2x2x128xf32>
    %50 = arith.addf %43, %49 : vector<2x2x128xf32>
    %51 = vector.extract_strided_slice %21 {offsets = [0, 0, 0], sizes = [2, 2, 128], strides = [1, 1, 1]} : vector<3x3x128xf32> to vector<2x2x128xf32>
    %c4 = arith.constant 4 : index
    %c0_16 = arith.constant 0 : index
    %52 = vector.load %arg4[%c4, %c0_16] : memref<9x128xf32, #tpu.memory_space<vmem>>, vector<1x128xf32>
    %53 = vector.shape_cast %52 : vector<1x128xf32> to vector<128xf32>
    %54 = vector.shape_cast %53 : vector<128xf32> to vector<1x1x128xf32>
    %55 = vector.broadcast %54 : vector<1x1x128xf32> to vector<2x2x128xf32>
    %56 = arith.mulf %51, %55 : vector<2x2x128xf32>
    %57 = arith.addf %50, %56 : vector<2x2x128xf32>
    %58 = vector.extract_strided_slice %16 {offsets = [0, 1, 0], sizes = [2, 2, 128], strides = [1, 1, 1]} : vector<3x3x128xf32> to vector<2x2x128xf32>
    %c5 = arith.constant 5 : index
    %c0_17 = arith.constant 0 : index
    %59 = vector.load %arg4[%c5, %c0_17] : memref<9x128xf32, #tpu.memory_space<vmem>>, vector<1x128xf32>
    %60 = vector.shape_cast %59 : vector<1x128xf32> to vector<128xf32>
    %61 = vector.shape_cast %60 : vector<128xf32> to vector<1x1x128xf32>
    %62 = vector.broadcast %61 : vector<1x1x128xf32> to vector<2x2x128xf32>
    %63 = arith.mulf %58, %62 : vector<2x2x128xf32>
    %64 = arith.addf %57, %63 : vector<2x2x128xf32>
    %65 = vector.extract_strided_slice %6 {offsets = [1, 0, 0], sizes = [2, 2, 128], strides = [1, 1, 1]} : vector<3x3x128xf32> to vector<2x2x128xf32>
    %c6 = arith.constant 6 : index
    %c0_18 = arith.constant 0 : index
    %66 = vector.load %arg4[%c6, %c0_18] : memref<9x128xf32, #tpu.memory_space<vmem>>, vector<1x128xf32>
    %67 = vector.shape_cast %66 : vector<1x128xf32> to vector<128xf32>
    %68 = vector.shape_cast %67 : vector<128xf32> to vector<1x1x128xf32>
    %69 = vector.broadcast %68 : vector<1x1x128xf32> to vector<2x2x128xf32>
    %70 = arith.mulf %65, %69 : vector<2x2x128xf32>
    %71 = arith.addf %64, %70 : vector<2x2x128xf32>
    %72 = vector.extract_strided_slice %11 {offsets = [1, 0, 0], sizes = [2, 2, 128], strides = [1, 1, 1]} : vector<3x3x128xf32> to vector<2x2x128xf32>
    %c7 = arith.constant 7 : index
    %c0_19 = arith.constant 0 : index
    %73 = vector.load %arg4[%c7, %c0_19] : memref<9x128xf32, #tpu.memory_space<vmem>>, vector<1x128xf32>
    %74 = vector.shape_cast %73 : vector<1x128xf32> to vector<128xf32>
    %75 = vector.shape_cast %74 : vector<128xf32> to vector<1x1x128xf32>
    %76 = vector.broadcast %75 : vector<1x1x128xf32> to vector<2x2x128xf32>
    %77 = arith.mulf %72, %76 : vector<2x2x128xf32>
    %78 = arith.addf %71, %77 : vector<2x2x128xf32>
    %79 = vector.extract_strided_slice %6 {offsets = [1, 1, 0], sizes = [2, 2, 128], strides = [1, 1, 1]} : vector<3x3x128xf32> to vector<2x2x128xf32>
    %c8 = arith.constant 8 : index
    %c0_20 = arith.constant 0 : index
    %80 = vector.load %arg4[%c8, %c0_20] : memref<9x128xf32, #tpu.memory_space<vmem>>, vector<1x128xf32>
    %81 = vector.shape_cast %80 : vector<1x128xf32> to vector<128xf32>
    %82 = vector.shape_cast %81 : vector<128xf32> to vector<1x1x128xf32>
    %83 = vector.broadcast %82 : vector<1x1x128xf32> to vector<2x2x128xf32>
    %84 = arith.mulf %79, %83 : vector<2x2x128xf32>
    %85 = arith.addf %78, %84 : vector<2x2x128xf32>
    %c0_21 = arith.constant 0 : index
    %c0_22 = arith.constant 0 : index
    %86 = vector.load %arg5[%c0_21, %c0_22] : memref<1x128xf32, #tpu.memory_space<vmem>>, vector<1x128xf32>
    %87 = vector.shape_cast %86 : vector<1x128xf32> to vector<128xf32>
    %88 = vector.shape_cast %87 : vector<128xf32> to vector<1x1x128xf32>
    %89 = vector.broadcast %88 : vector<1x1x128xf32> to vector<2x2x128xf32>
    %90 = arith.addf %85, %89 : vector<2x2x128xf32>
    %cst_23 = arith.constant 0.000000e+00 : f32
    %91 = vector.broadcast %cst_23 : f32 to vector<2x2x128xf32>
    %92 = arith.maximumf %90, %91 : vector<2x2x128xf32>
    %93 = arith.truncf %92 : vector<2x2x128xf32> to vector<2x2x128xbf16>
    %c0_24 = arith.constant 0 : index
    %c0_25 = arith.constant 0 : index
    %c0_26 = arith.constant 0 : index
    %c0_27 = arith.constant 0 : index
    %94 = vector.load %arg6[%c0_24, %c0_25, %c0_26, %c0_27] : memref<1x2x2x128xbf16, #tpu.memory_space<vmem>>, vector<1x2x2x128xbf16>
    %95 = vector.shape_cast %94 : vector<1x2x2x128xbf16> to vector<2x2x128xbf16>
    %96 = vector.shape_cast %93 : vector<2x2x128xbf16> to vector<1x2x2x128xbf16>
    tpu.vector_store %arg6[%c0_24, %c0_25, %c0_26, %c0_27], %96 {strides = array<i32>} : memref<1x2x2x128xbf16, #tpu.memory_space<vmem>>, vector<1x2x2x128xbf16>,
    %c0_i32_28 = arith.constant 0 : i32
    %97 = arith.cmpi eq, %arg2, %c0_i32_28 : i32
    %98 = arith.extui %97 : i1 to i32
    %c0_i32_29 = arith.constant 0 : i32
    %99 = arith.cmpi ne, %98, %c0_i32_29 : i32
    scf.if %99 {
      %cst_37 = arith.constant 0.000000e+00 : f32
      %105 = vector.broadcast %cst_37 : f32 to vector<1x1x128xf32>
      %c0_38 = arith.constant 0 : index
      %c0_39 = arith.constant 0 : index
      %c0_40 = arith.constant 0 : index
      %106 = vector.load %arg7[%c0_38, %c0_39, %c0_40] : memref<1x1x128xf32, #tpu.memory_space<vmem>>, vector<1x1x128xf32>
      tpu.vector_store %arg7[%c0_38, %c0_39, %c0_40], %105 {strides = array<i32>} : memref<1x1x128xf32, #tpu.memory_space<vmem>>, vector<1x1x128xf32>,
    } else {
    }
    %c0_30 = arith.constant 0 : index
    %c0_31 = arith.constant 0 : index
    %c0_32 = arith.constant 0 : index
    %100 = vector.load %arg7[%c0_30, %c0_31, %c0_32] : memref<1x1x128xf32, #tpu.memory_space<vmem>>, vector<1x1x128xf32>
    %cst_33 = arith.constant dense<0.000000e+00> : vector<128xf32>
    %101 = vector.multi_reduction <add>, %92, %cst_33 [0, 1] : vector<2x2x128xf32> to vector<128xf32>
    %102 = vector.shape_cast %101 : vector<128xf32> to vector<1x1x128xf32>
    %103 = arith.addf %100, %102 : vector<1x1x128xf32>
    %c0_34 = arith.constant 0 : index
    %c0_35 = arith.constant 0 : index
    %c0_36 = arith.constant 0 : index
    %104 = vector.load %arg7[%c0_34, %c0_35, %c0_36] : memref<1x1x128xf32, #tpu.memory_space<vmem>>, vector<1x1x128xf32>
    tpu.vector_store %arg7[%c0_34, %c0_35, %c0_36], %103 {strides = array<i32>} : memref<1x1x128xf32, #tpu.memory_space<vmem>>, vector<1x1x128xf32>,
    return
  }
  func.func @transform_0(%arg0: i32, %arg1: i32, %arg2: i32) -> (i32, i32, i32, i32) {
    %c0_i32 = arith.constant 0 : i32
    %c0_i32_0 = arith.constant 0 : i32
    %c0_i32_1 = arith.constant 0 : i32
    return %arg0, %c0_i32, %c0_i32_0, %arg1 : i32, i32, i32, i32
  }
  func.func @transform_1(%arg0: i32, %arg1: i32, %arg2: i32) -> (i32, i32) {
    %c0_i32 = arith.constant 0 : i32
    %c0_i32_0 = arith.constant 0 : i32
    return %c0_i32, %arg1 : i32, i32
  }
  func.func @transform_2(%arg0: i32, %arg1: i32, %arg2: i32) -> (i32, i32) {
    %c0_i32 = arith.constant 0 : i32
    %c0_i32_0 = arith.constant 0 : i32
    return %c0_i32, %arg1 : i32, i32
  }
  func.func @transform_3(%arg0: i32, %arg1: i32, %arg2: i32) -> (i32, i32, i32, i32) {
    %c0_i32 = arith.constant 0 : i32
    %c0_i32_0 = arith.constant 0 : i32
    return %arg0, %arg2, %c0_i32, %arg1 : i32, i32, i32, i32
  }
  func.func @transform_4(%arg0: i32, %arg1: i32, %arg2: i32) -> (i32, i32, i32) {
    %c0_i32 = arith.constant 0 : i32
    %c0_i32_0 = arith.constant 0 : i32
    return %arg0, %c0_i32, %arg1 : i32, i32, i32
  }
}

module attributes {stable_mosaic.version = 11 : i64} {
  func.func @_se_gate_kernel(%arg0: i32, %arg1: memref<8x256xf32, #tpu.memory_space<vmem>>, %arg2: memref<256x128xbf16, #tpu.memory_space<vmem>>, %arg3: memref<1x128xf32, #tpu.memory_space<vmem>>, %arg4: memref<128x256xbf16, #tpu.memory_space<vmem>>, %arg5: memref<1x256xf32, #tpu.memory_space<vmem>>, %arg6: memref<8x256xf32, #tpu.memory_space<vmem>>) attributes {dimension_semantics = [#tpu.dimension_semantics<arbitrary>], iteration_bounds = array<i64: 1>, scalar_prefetch = 0 : i64, scratch_operands = 0 : i64, tpu.core_type = #tpu.core_type<tc>, window_params = [{pipeline_mode = #tpu.pipeline_mode<synchronous>, transform_indices = @transform_0, window_bounds = array<i64: 8, 256>}, {pipeline_mode = #tpu.pipeline_mode<synchronous>, transform_indices = @transform_1, window_bounds = array<i64: 256, 128>}, {pipeline_mode = #tpu.pipeline_mode<synchronous>, transform_indices = @transform_2, window_bounds = array<i64: 1, 128>}, {pipeline_mode = #tpu.pipeline_mode<synchronous>, transform_indices = @transform_3, window_bounds = array<i64: 128, 256>}, {pipeline_mode = #tpu.pipeline_mode<synchronous>, transform_indices = @transform_4, window_bounds = array<i64: 1, 256>}, {pipeline_mode = #tpu.pipeline_mode<synchronous>, transform_indices = @transform_5, window_bounds = array<i64: 8, 256>}]} {
    %c0 = arith.constant 0 : index
    %c0_0 = arith.constant 0 : index
    %0 = vector.load %arg1[%c0, %c0_0] : memref<8x256xf32, #tpu.memory_space<vmem>>, vector<8x256xf32>
    %cst = arith.constant 2.500000e-01 : f32
    %1 = vector.broadcast %cst : f32 to vector<8x256xf32>
    %2 = arith.mulf %0, %1 : vector<8x256xf32>
    %3 = arith.truncf %2 : vector<8x256xf32> to vector<8x256xbf16>
    %c0_1 = arith.constant 0 : index
    %c0_2 = arith.constant 0 : index
    %4 = vector.load %arg2[%c0_1, %c0_2] : memref<256x128xbf16, #tpu.memory_space<vmem>>, vector<256x128xbf16>
    %cst_3 = arith.constant dense<0.000000e+00> : vector<8x128xf32>
    %5 = tpu.matmul %3, %4, %cst_3 {dimension_numbers = #tpu.dot_dimension_numbers<[1], [0], [0], [1], [0, 0, 1, 1], [], []>} : vector<8x256xbf16>, vector<256x128xbf16>, vector<8x128xf32> -> vector<8x128xf32>
    %c0_4 = arith.constant 0 : index
    %c0_5 = arith.constant 0 : index
    %6 = vector.load %arg3[%c0_4, %c0_5] : memref<1x128xf32, #tpu.memory_space<vmem>>, vector<1x128xf32>
    %7 = vector.broadcast %6 : vector<1x128xf32> to vector<8x128xf32>
    %8 = arith.addf %5, %7 : vector<8x128xf32>
    %cst_6 = arith.constant 0.000000e+00 : f32
    %9 = vector.broadcast %cst_6 : f32 to vector<8x128xf32>
    %10 = arith.maximumf %8, %9 : vector<8x128xf32>
    %11 = arith.truncf %10 : vector<8x128xf32> to vector<8x128xbf16>
    %c0_7 = arith.constant 0 : index
    %c0_8 = arith.constant 0 : index
    %12 = vector.load %arg4[%c0_7, %c0_8] : memref<128x256xbf16, #tpu.memory_space<vmem>>, vector<128x256xbf16>
    %cst_9 = arith.constant dense<0.000000e+00> : vector<8x256xf32>
    %13 = tpu.matmul %11, %12, %cst_9 {dimension_numbers = #tpu.dot_dimension_numbers<[1], [0], [0], [1], [0, 0, 1, 1], [], []>} : vector<8x128xbf16>, vector<128x256xbf16>, vector<8x256xf32> -> vector<8x256xf32>
    %c0_10 = arith.constant 0 : index
    %c0_11 = arith.constant 0 : index
    %14 = vector.load %arg5[%c0_10, %c0_11] : memref<1x256xf32, #tpu.memory_space<vmem>>, vector<1x256xf32>
    %15 = vector.broadcast %14 : vector<1x256xf32> to vector<8x256xf32>
    %16 = arith.addf %13, %15 : vector<8x256xf32>
    %17 = arith.negf %16 : vector<8x256xf32>
    %18 = math.exp %17 : vector<8x256xf32>
    %cst_12 = arith.constant 1.000000e+00 : f32
    %19 = vector.broadcast %cst_12 : f32 to vector<8x256xf32>
    %20 = arith.addf %19, %18 : vector<8x256xf32>
    %21 = arith.divf %19, %20 : vector<8x256xf32>
    %c0_13 = arith.constant 0 : index
    %c0_14 = arith.constant 0 : index
    %22 = vector.load %arg6[%c0_13, %c0_14] : memref<8x256xf32, #tpu.memory_space<vmem>>, vector<8x256xf32>
    tpu.vector_store %arg6[%c0_13, %c0_14], %21 {strides = array<i32>} : memref<8x256xf32, #tpu.memory_space<vmem>>, vector<8x256xf32>,
    return
  }
  func.func @transform_0(%arg0: i32) -> (i32, i32) {
    %c0_i32 = arith.constant 0 : i32
    %c0_i32_0 = arith.constant 0 : i32
    %c0_i32_1 = arith.constant 0 : i32
    return %c0_i32, %c0_i32_0 : i32, i32
  }
  func.func @transform_1(%arg0: i32) -> (i32, i32) {
    %c0_i32 = arith.constant 0 : i32
    %c0_i32_0 = arith.constant 0 : i32
    %c0_i32_1 = arith.constant 0 : i32
    return %c0_i32, %c0_i32_0 : i32, i32
  }
  func.func @transform_2(%arg0: i32) -> (i32, i32) {
    %c0_i32 = arith.constant 0 : i32
    %c0_i32_0 = arith.constant 0 : i32
    %c0_i32_1 = arith.constant 0 : i32
    return %c0_i32, %c0_i32_0 : i32, i32
  }
  func.func @transform_3(%arg0: i32) -> (i32, i32) {
    %c0_i32 = arith.constant 0 : i32
    %c0_i32_0 = arith.constant 0 : i32
    %c0_i32_1 = arith.constant 0 : i32
    return %c0_i32, %c0_i32_0 : i32, i32
  }
  func.func @transform_4(%arg0: i32) -> (i32, i32) {
    %c0_i32 = arith.constant 0 : i32
    %c0_i32_0 = arith.constant 0 : i32
    %c0_i32_1 = arith.constant 0 : i32
    return %c0_i32, %c0_i32_0 : i32, i32
  }
  func.func @transform_5(%arg0: i32) -> (i32, i32) {
    %c0_i32 = arith.constant 0 : i32
    %c0_i32_0 = arith.constant 0 : i32
    %c0_i32_1 = arith.constant 0 : i32
    return %c0_i32, %c0_i32_0 : i32, i32
  }
}

module attributes {stable_mosaic.version = 11 : i64} {
  func.func @_gated_matmul_kernel(%arg0: i32, %arg1: i32, %arg2: memref<1x8x256xbf16, #tpu.memory_space<vmem>>, %arg3: memref<1x1x256xf32, #tpu.memory_space<vmem>>, %arg4: memref<256x128xbf16, #tpu.memory_space<vmem>>, %arg5: memref<1x128xf32, #tpu.memory_space<vmem>>, %arg6: memref<1x8x128xbf16, #tpu.memory_space<vmem>>) attributes {dimension_semantics = [#tpu.dimension_semantics<parallel>, #tpu.dimension_semantics<parallel>], iteration_bounds = array<i64: 2, 1>, scalar_prefetch = 0 : i64, scratch_operands = 0 : i64, tpu.core_type = #tpu.core_type<tc>, window_params = [{transform_indices = @transform_0, window_bounds = array<i64: 1, 8, 256>}, {transform_indices = @transform_1, window_bounds = array<i64: 1, 1, 256>}, {pipeline_mode = #tpu.pipeline_mode<synchronous>, transform_indices = @transform_2, window_bounds = array<i64: 256, 128>}, {pipeline_mode = #tpu.pipeline_mode<synchronous>, transform_indices = @transform_3, window_bounds = array<i64: 1, 128>}, {transform_indices = @transform_4, window_bounds = array<i64: 1, 8, 128>}]} {
    %c0 = arith.constant 0 : index
    %c0_0 = arith.constant 0 : index
    %c0_1 = arith.constant 0 : index
    %0 = vector.load %arg2[%c0, %c0_0, %c0_1] : memref<1x8x256xbf16, #tpu.memory_space<vmem>>, vector<1x8x256xbf16>
    %1 = vector.shape_cast %0 : vector<1x8x256xbf16> to vector<8x256xbf16>
    %2 = arith.extf %1 : vector<8x256xbf16> to vector<8x256xf32>
    %c0_2 = arith.constant 0 : index
    %c0_3 = arith.constant 0 : index
    %c0_4 = arith.constant 0 : index
    %3 = vector.load %arg3[%c0_2, %c0_3, %c0_4] : memref<1x1x256xf32, #tpu.memory_space<vmem>>, vector<1x1x256xf32>
    %4 = vector.shape_cast %3 : vector<1x1x256xf32> to vector<1x256xf32>
    %5 = vector.broadcast %4 : vector<1x256xf32> to vector<8x256xf32>
    %6 = arith.mulf %2, %5 : vector<8x256xf32>
    %7 = arith.truncf %6 : vector<8x256xf32> to vector<8x256xbf16>
    %c0_5 = arith.constant 0 : index
    %c0_6 = arith.constant 0 : index
    %8 = vector.load %arg4[%c0_5, %c0_6] : memref<256x128xbf16, #tpu.memory_space<vmem>>, vector<256x128xbf16>
    %cst = arith.constant dense<0.000000e+00> : vector<8x128xf32>
    %9 = tpu.matmul %7, %8, %cst {dimension_numbers = #tpu.dot_dimension_numbers<[1], [0], [0], [1], [0, 0, 1, 1], [], []>} : vector<8x256xbf16>, vector<256x128xbf16>, vector<8x128xf32> -> vector<8x128xf32>
    %c0_7 = arith.constant 0 : index
    %c0_8 = arith.constant 0 : index
    %10 = vector.load %arg5[%c0_7, %c0_8] : memref<1x128xf32, #tpu.memory_space<vmem>>, vector<1x128xf32>
    %11 = vector.broadcast %10 : vector<1x128xf32> to vector<8x128xf32>
    %12 = arith.addf %9, %11 : vector<8x128xf32>
    %13 = arith.truncf %12 : vector<8x128xf32> to vector<8x128xbf16>
    %c0_9 = arith.constant 0 : index
    %c0_10 = arith.constant 0 : index
    %c0_11 = arith.constant 0 : index
    %14 = vector.load %arg6[%c0_9, %c0_10, %c0_11] : memref<1x8x128xbf16, #tpu.memory_space<vmem>>, vector<1x8x128xbf16>
    %15 = vector.shape_cast %14 : vector<1x8x128xbf16> to vector<8x128xbf16>
    %16 = vector.shape_cast %13 : vector<8x128xbf16> to vector<1x8x128xbf16>
    tpu.vector_store %arg6[%c0_9, %c0_10, %c0_11], %16 {strides = array<i32>} : memref<1x8x128xbf16, #tpu.memory_space<vmem>>, vector<1x8x128xbf16>,
    return
  }
  func.func @transform_0(%arg0: i32, %arg1: i32) -> (i32, i32, i32) {
    %c0_i32 = arith.constant 0 : i32
    %c0_i32_0 = arith.constant 0 : i32
    return %arg0, %arg1, %c0_i32 : i32, i32, i32
  }
  func.func @transform_1(%arg0: i32, %arg1: i32) -> (i32, i32, i32) {
    %c0_i32 = arith.constant 0 : i32
    %c0_i32_0 = arith.constant 0 : i32
    %c0_i32_1 = arith.constant 0 : i32
    return %arg0, %c0_i32, %c0_i32_0 : i32, i32, i32
  }
  func.func @transform_2(%arg0: i32, %arg1: i32) -> (i32, i32) {
    %c0_i32 = arith.constant 0 : i32
    %c0_i32_0 = arith.constant 0 : i32
    %c0_i32_1 = arith.constant 0 : i32
    return %c0_i32, %c0_i32_0 : i32, i32
  }
  func.func @transform_3(%arg0: i32, %arg1: i32) -> (i32, i32) {
    %c0_i32 = arith.constant 0 : i32
    %c0_i32_0 = arith.constant 0 : i32
    %c0_i32_1 = arith.constant 0 : i32
    return %c0_i32, %c0_i32_0 : i32, i32
  }
  func.func @transform_4(%arg0: i32, %arg1: i32) -> (i32, i32, i32) {
    %c0_i32 = arith.constant 0 : i32
    %c0_i32_0 = arith.constant 0 : i32
    return %arg0, %arg1, %c0_i32 : i32, i32, i32
  }
}

module attributes {stable_mosaic.version = 11 : i64} {
  func.func @_matmul_kernel(%arg0: i32, %arg1: memref<8x128xbf16, #tpu.memory_space<vmem>>, %arg2: memref<128x512xbf16, #tpu.memory_space<vmem>>, %arg3: memref<1x512xf32, #tpu.memory_space<vmem>>, %arg4: memref<8x512xbf16, #tpu.memory_space<vmem>>) attributes {dimension_semantics = [#tpu.dimension_semantics<parallel>], iteration_bounds = array<i64: 1>, scalar_prefetch = 0 : i64, scratch_operands = 0 : i64, tpu.core_type = #tpu.core_type<tc>, window_params = [{transform_indices = @transform_0, window_bounds = array<i64: 8, 128>}, {pipeline_mode = #tpu.pipeline_mode<synchronous>, transform_indices = @transform_1, window_bounds = array<i64: 128, 512>}, {pipeline_mode = #tpu.pipeline_mode<synchronous>, transform_indices = @transform_2, window_bounds = array<i64: 1, 512>}, {transform_indices = @transform_3, window_bounds = array<i64: 8, 512>}]} {
    %c0 = arith.constant 0 : index
    %c0_0 = arith.constant 0 : index
    %0 = vector.load %arg1[%c0, %c0_0] : memref<8x128xbf16, #tpu.memory_space<vmem>>, vector<8x128xbf16>
    %c0_1 = arith.constant 0 : index
    %c0_2 = arith.constant 0 : index
    %1 = vector.load %arg2[%c0_1, %c0_2] : memref<128x512xbf16, #tpu.memory_space<vmem>>, vector<128x512xbf16>
    %cst = arith.constant dense<0.000000e+00> : vector<8x512xf32>
    %2 = tpu.matmul %0, %1, %cst {dimension_numbers = #tpu.dot_dimension_numbers<[1], [0], [0], [1], [0, 0, 1, 1], [], []>} : vector<8x128xbf16>, vector<128x512xbf16>, vector<8x512xf32> -> vector<8x512xf32>
    %c0_3 = arith.constant 0 : index
    %c0_4 = arith.constant 0 : index
    %3 = vector.load %arg3[%c0_3, %c0_4] : memref<1x512xf32, #tpu.memory_space<vmem>>, vector<1x512xf32>
    %4 = vector.broadcast %3 : vector<1x512xf32> to vector<8x512xf32>
    %5 = arith.addf %2, %4 : vector<8x512xf32>
    %cst_5 = arith.constant 0.000000e+00 : f32
    %6 = vector.broadcast %cst_5 : f32 to vector<8x512xf32>
    %7 = arith.maximumf %5, %6 : vector<8x512xf32>
    %8 = arith.truncf %7 : vector<8x512xf32> to vector<8x512xbf16>
    %c0_6 = arith.constant 0 : index
    %c0_7 = arith.constant 0 : index
    %9 = vector.load %arg4[%c0_6, %c0_7] : memref<8x512xbf16, #tpu.memory_space<vmem>>, vector<8x512xbf16>
    tpu.vector_store %arg4[%c0_6, %c0_7], %8 {strides = array<i32>} : memref<8x512xbf16, #tpu.memory_space<vmem>>, vector<8x512xbf16>,
    return
  }
  func.func @transform_0(%arg0: i32) -> (i32, i32) {
    %c0_i32 = arith.constant 0 : i32
    %c0_i32_0 = arith.constant 0 : i32
    return %arg0, %c0_i32 : i32, i32
  }
  func.func @transform_1(%arg0: i32) -> (i32, i32) {
    %c0_i32 = arith.constant 0 : i32
    %c0_i32_0 = arith.constant 0 : i32
    %c0_i32_1 = arith.constant 0 : i32
    return %c0_i32, %c0_i32_0 : i32, i32
  }
  func.func @transform_2(%arg0: i32) -> (i32, i32) {
    %c0_i32 = arith.constant 0 : i32
    %c0_i32_0 = arith.constant 0 : i32
    %c0_i32_1 = arith.constant 0 : i32
    return %c0_i32, %c0_i32_0 : i32, i32
  }
  func.func @transform_3(%arg0: i32) -> (i32, i32) {
    %c0_i32 = arith.constant 0 : i32
    %c0_i32_0 = arith.constant 0 : i32
    return %arg0, %c0_i32 : i32, i32
  }
}

module attributes {stable_mosaic.version = 11 : i64} {
  func.func @_dwconv_kernel(%arg0: i32, %arg1: i32, %arg2: i32, %arg3: memref<1x4x4x128xbf16, #tpu.memory_space<vmem>>, %arg4: memref<9x128xf32, #tpu.memory_space<vmem>>, %arg5: memref<1x128xf32, #tpu.memory_space<vmem>>, %arg6: memref<1x2x2x128xbf16, #tpu.memory_space<vmem>>, %arg7: memref<1x1x128xf32, #tpu.memory_space<vmem>>) attributes {dimension_semantics = [#tpu.dimension_semantics<parallel>, #tpu.dimension_semantics<parallel>, #tpu.dimension_semantics<arbitrary>], iteration_bounds = array<i64: 2, 4, 1>, scalar_prefetch = 0 : i64, scratch_operands = 0 : i64, tpu.core_type = #tpu.core_type<tc>, window_params = [{transform_indices = @transform_0, window_bounds = array<i64: 1, 4, 4, 128>}, {transform_indices = @transform_1, window_bounds = array<i64: 9, 128>}, {transform_indices = @transform_2, window_bounds = array<i64: 1, 128>}, {transform_indices = @transform_3, window_bounds = array<i64: 1, 2, 2, 128>}, {transform_indices = @transform_4, window_bounds = array<i64: 1, 1, 128>}]} {
    %c2_i32 = arith.constant 2 : i32
    %0 = arith.muli %arg2, %c2_i32 : i32
    %1 = tpu.assume_multiple %0, 2 : i32
    %c0_i32 = arith.constant 0 : i32
    %2 = arith.addi %c0_i32, %1 : i32
    %c0 = arith.constant 0 : index
    %3 = arith.index_cast %2 : i32 to index
    %c0_0 = arith.constant 0 : index
    %c0_1 = arith.constant 0 : index
    %4 = vector.load %arg3[%c0, %3, %c0_0, %c0_1] : memref<1x4x4x128xbf16, #tpu.memory_space<vmem>>, vector<1x4x4x128xbf16>
    %5 = vector.shape_cast %4 : vector<1x4x4x128xbf16> to vector<4x4x128xbf16>
    %6 = arith.extf %5 : vector<4x4x128xbf16> to vector<4x4x128xf32>
    %cst = arith.constant 0.000000e+00 : f32
    %7 = vector.broadcast %cst : f32 to vector<2x2x128xf32>
    %8 = vector.extract_strided_slice %6 {offsets = [0, 0, 0], sizes = [2, 2, 128], strides = [1, 1, 1]} : vector<4x4x128xf32> to vector<2x2x128xf32>
    %c0_2 = arith.constant 0 : index
    %c0_3 = arith.constant 0 : index
    %9 = vector.load %arg4[%c0_2, %c0_3] : memref<9x128xf32, #tpu.memory_space<vmem>>, vector<1x128xf32>
    %10 = vector.shape_cast %9 : vector<1x128xf32> to vector<128xf32>
    %11 = vector.shape_cast %10 : vector<128xf32> to vector<1x1x128xf32>
    %12 = vector.broadcast %11 : vector<1x1x128xf32> to vector<2x2x128xf32>
    %13 = arith.mulf %8, %12 : vector<2x2x128xf32>
    %14 = arith.addf %7, %13 : vector<2x2x128xf32>
    %15 = vector.extract_strided_slice %6 {offsets = [0, 1, 0], sizes = [2, 2, 128], strides = [1, 1, 1]} : vector<4x4x128xf32> to vector<2x2x128xf32>
    %c1 = arith.constant 1 : index
    %c0_4 = arith.constant 0 : index
    %16 = vector.load %arg4[%c1, %c0_4] : memref<9x128xf32, #tpu.memory_space<vmem>>, vector<1x128xf32>
    %17 = vector.shape_cast %16 : vector<1x128xf32> to vector<128xf32>
    %18 = vector.shape_cast %17 : vector<128xf32> to vector<1x1x128xf32>
    %19 = vector.broadcast %18 : vector<1x1x128xf32> to vector<2x2x128xf32>
    %20 = arith.mulf %15, %19 : vector<2x2x128xf32>
    %21 = arith.addf %14, %20 : vector<2x2x128xf32>
    %22 = vector.extract_strided_slice %6 {offsets = [0, 2, 0], sizes = [2, 2, 128], strides = [1, 1, 1]} : vector<4x4x128xf32> to vector<2x2x128xf32>
    %c2 = arith.constant 2 : index
    %c0_5 = arith.constant 0 : index
    %23 = vector.load %arg4[%c2, %c0_5] : memref<9x128xf32, #tpu.memory_space<vmem>>, vector<1x128xf32>
    %24 = vector.shape_cast %23 : vector<1x128xf32> to vector<128xf32>
    %25 = vector.shape_cast %24 : vector<128xf32> to vector<1x1x128xf32>
    %26 = vector.broadcast %25 : vector<1x1x128xf32> to vector<2x2x128xf32>
    %27 = arith.mulf %22, %26 : vector<2x2x128xf32>
    %28 = arith.addf %21, %27 : vector<2x2x128xf32>
    %29 = vector.extract_strided_slice %6 {offsets = [1, 0, 0], sizes = [2, 2, 128], strides = [1, 1, 1]} : vector<4x4x128xf32> to vector<2x2x128xf32>
    %c3 = arith.constant 3 : index
    %c0_6 = arith.constant 0 : index
    %30 = vector.load %arg4[%c3, %c0_6] : memref<9x128xf32, #tpu.memory_space<vmem>>, vector<1x128xf32>
    %31 = vector.shape_cast %30 : vector<1x128xf32> to vector<128xf32>
    %32 = vector.shape_cast %31 : vector<128xf32> to vector<1x1x128xf32>
    %33 = vector.broadcast %32 : vector<1x1x128xf32> to vector<2x2x128xf32>
    %34 = arith.mulf %29, %33 : vector<2x2x128xf32>
    %35 = arith.addf %28, %34 : vector<2x2x128xf32>
    %36 = vector.extract_strided_slice %6 {offsets = [1, 1, 0], sizes = [2, 2, 128], strides = [1, 1, 1]} : vector<4x4x128xf32> to vector<2x2x128xf32>
    %c4 = arith.constant 4 : index
    %c0_7 = arith.constant 0 : index
    %37 = vector.load %arg4[%c4, %c0_7] : memref<9x128xf32, #tpu.memory_space<vmem>>, vector<1x128xf32>
    %38 = vector.shape_cast %37 : vector<1x128xf32> to vector<128xf32>
    %39 = vector.shape_cast %38 : vector<128xf32> to vector<1x1x128xf32>
    %40 = vector.broadcast %39 : vector<1x1x128xf32> to vector<2x2x128xf32>
    %41 = arith.mulf %36, %40 : vector<2x2x128xf32>
    %42 = arith.addf %35, %41 : vector<2x2x128xf32>
    %43 = vector.extract_strided_slice %6 {offsets = [1, 2, 0], sizes = [2, 2, 128], strides = [1, 1, 1]} : vector<4x4x128xf32> to vector<2x2x128xf32>
    %c5 = arith.constant 5 : index
    %c0_8 = arith.constant 0 : index
    %44 = vector.load %arg4[%c5, %c0_8] : memref<9x128xf32, #tpu.memory_space<vmem>>, vector<1x128xf32>
    %45 = vector.shape_cast %44 : vector<1x128xf32> to vector<128xf32>
    %46 = vector.shape_cast %45 : vector<128xf32> to vector<1x1x128xf32>
    %47 = vector.broadcast %46 : vector<1x1x128xf32> to vector<2x2x128xf32>
    %48 = arith.mulf %43, %47 : vector<2x2x128xf32>
    %49 = arith.addf %42, %48 : vector<2x2x128xf32>
    %50 = vector.extract_strided_slice %6 {offsets = [2, 0, 0], sizes = [2, 2, 128], strides = [1, 1, 1]} : vector<4x4x128xf32> to vector<2x2x128xf32>
    %c6 = arith.constant 6 : index
    %c0_9 = arith.constant 0 : index
    %51 = vector.load %arg4[%c6, %c0_9] : memref<9x128xf32, #tpu.memory_space<vmem>>, vector<1x128xf32>
    %52 = vector.shape_cast %51 : vector<1x128xf32> to vector<128xf32>
    %53 = vector.shape_cast %52 : vector<128xf32> to vector<1x1x128xf32>
    %54 = vector.broadcast %53 : vector<1x1x128xf32> to vector<2x2x128xf32>
    %55 = arith.mulf %50, %54 : vector<2x2x128xf32>
    %56 = arith.addf %49, %55 : vector<2x2x128xf32>
    %57 = vector.extract_strided_slice %6 {offsets = [2, 1, 0], sizes = [2, 2, 128], strides = [1, 1, 1]} : vector<4x4x128xf32> to vector<2x2x128xf32>
    %c7 = arith.constant 7 : index
    %c0_10 = arith.constant 0 : index
    %58 = vector.load %arg4[%c7, %c0_10] : memref<9x128xf32, #tpu.memory_space<vmem>>, vector<1x128xf32>
    %59 = vector.shape_cast %58 : vector<1x128xf32> to vector<128xf32>
    %60 = vector.shape_cast %59 : vector<128xf32> to vector<1x1x128xf32>
    %61 = vector.broadcast %60 : vector<1x1x128xf32> to vector<2x2x128xf32>
    %62 = arith.mulf %57, %61 : vector<2x2x128xf32>
    %63 = arith.addf %56, %62 : vector<2x2x128xf32>
    %64 = vector.extract_strided_slice %6 {offsets = [2, 2, 0], sizes = [2, 2, 128], strides = [1, 1, 1]} : vector<4x4x128xf32> to vector<2x2x128xf32>
    %c8 = arith.constant 8 : index
    %c0_11 = arith.constant 0 : index
    %65 = vector.load %arg4[%c8, %c0_11] : memref<9x128xf32, #tpu.memory_space<vmem>>, vector<1x128xf32>
    %66 = vector.shape_cast %65 : vector<1x128xf32> to vector<128xf32>
    %67 = vector.shape_cast %66 : vector<128xf32> to vector<1x1x128xf32>
    %68 = vector.broadcast %67 : vector<1x1x128xf32> to vector<2x2x128xf32>
    %69 = arith.mulf %64, %68 : vector<2x2x128xf32>
    %70 = arith.addf %63, %69 : vector<2x2x128xf32>
    %c0_12 = arith.constant 0 : index
    %c0_13 = arith.constant 0 : index
    %71 = vector.load %arg5[%c0_12, %c0_13] : memref<1x128xf32, #tpu.memory_space<vmem>>, vector<1x128xf32>
    %72 = vector.shape_cast %71 : vector<1x128xf32> to vector<128xf32>
    %73 = vector.shape_cast %72 : vector<128xf32> to vector<1x1x128xf32>
    %74 = vector.broadcast %73 : vector<1x1x128xf32> to vector<2x2x128xf32>
    %75 = arith.addf %70, %74 : vector<2x2x128xf32>
    %cst_14 = arith.constant 0.000000e+00 : f32
    %76 = vector.broadcast %cst_14 : f32 to vector<2x2x128xf32>
    %77 = arith.maximumf %75, %76 : vector<2x2x128xf32>
    %78 = arith.truncf %77 : vector<2x2x128xf32> to vector<2x2x128xbf16>
    %c0_15 = arith.constant 0 : index
    %c0_16 = arith.constant 0 : index
    %c0_17 = arith.constant 0 : index
    %c0_18 = arith.constant 0 : index
    %79 = vector.load %arg6[%c0_15, %c0_16, %c0_17, %c0_18] : memref<1x2x2x128xbf16, #tpu.memory_space<vmem>>, vector<1x2x2x128xbf16>
    %80 = vector.shape_cast %79 : vector<1x2x2x128xbf16> to vector<2x2x128xbf16>
    %81 = vector.shape_cast %78 : vector<2x2x128xbf16> to vector<1x2x2x128xbf16>
    tpu.vector_store %arg6[%c0_15, %c0_16, %c0_17, %c0_18], %81 {strides = array<i32>} : memref<1x2x2x128xbf16, #tpu.memory_space<vmem>>, vector<1x2x2x128xbf16>,
    %c0_i32_19 = arith.constant 0 : i32
    %82 = arith.cmpi eq, %arg2, %c0_i32_19 : i32
    %83 = arith.extui %82 : i1 to i32
    %c0_i32_20 = arith.constant 0 : i32
    %84 = arith.cmpi ne, %83, %c0_i32_20 : i32
    scf.if %84 {
      %cst_28 = arith.constant 0.000000e+00 : f32
      %90 = vector.broadcast %cst_28 : f32 to vector<1x1x128xf32>
      %c0_29 = arith.constant 0 : index
      %c0_30 = arith.constant 0 : index
      %c0_31 = arith.constant 0 : index
      %91 = vector.load %arg7[%c0_29, %c0_30, %c0_31] : memref<1x1x128xf32, #tpu.memory_space<vmem>>, vector<1x1x128xf32>
      tpu.vector_store %arg7[%c0_29, %c0_30, %c0_31], %90 {strides = array<i32>} : memref<1x1x128xf32, #tpu.memory_space<vmem>>, vector<1x1x128xf32>,
    } else {
    }
    %c0_21 = arith.constant 0 : index
    %c0_22 = arith.constant 0 : index
    %c0_23 = arith.constant 0 : index
    %85 = vector.load %arg7[%c0_21, %c0_22, %c0_23] : memref<1x1x128xf32, #tpu.memory_space<vmem>>, vector<1x1x128xf32>
    %cst_24 = arith.constant dense<0.000000e+00> : vector<128xf32>
    %86 = vector.multi_reduction <add>, %77, %cst_24 [0, 1] : vector<2x2x128xf32> to vector<128xf32>
    %87 = vector.shape_cast %86 : vector<128xf32> to vector<1x1x128xf32>
    %88 = arith.addf %85, %87 : vector<1x1x128xf32>
    %c0_25 = arith.constant 0 : index
    %c0_26 = arith.constant 0 : index
    %c0_27 = arith.constant 0 : index
    %89 = vector.load %arg7[%c0_25, %c0_26, %c0_27] : memref<1x1x128xf32, #tpu.memory_space<vmem>>, vector<1x1x128xf32>
    tpu.vector_store %arg7[%c0_25, %c0_26, %c0_27], %88 {strides = array<i32>} : memref<1x1x128xf32, #tpu.memory_space<vmem>>, vector<1x1x128xf32>,
    return
  }
  func.func @transform_0(%arg0: i32, %arg1: i32, %arg2: i32) -> (i32, i32, i32, i32) {
    %c0_i32 = arith.constant 0 : i32
    %c0_i32_0 = arith.constant 0 : i32
    %c0_i32_1 = arith.constant 0 : i32
    return %arg0, %c0_i32, %c0_i32_0, %arg1 : i32, i32, i32, i32
  }
  func.func @transform_1(%arg0: i32, %arg1: i32, %arg2: i32) -> (i32, i32) {
    %c0_i32 = arith.constant 0 : i32
    %c0_i32_0 = arith.constant 0 : i32
    return %c0_i32, %arg1 : i32, i32
  }
  func.func @transform_2(%arg0: i32, %arg1: i32, %arg2: i32) -> (i32, i32) {
    %c0_i32 = arith.constant 0 : i32
    %c0_i32_0 = arith.constant 0 : i32
    return %c0_i32, %arg1 : i32, i32
  }
  func.func @transform_3(%arg0: i32, %arg1: i32, %arg2: i32) -> (i32, i32, i32, i32) {
    %c0_i32 = arith.constant 0 : i32
    %c0_i32_0 = arith.constant 0 : i32
    return %arg0, %arg2, %c0_i32, %arg1 : i32, i32, i32, i32
  }
  func.func @transform_4(%arg0: i32, %arg1: i32, %arg2: i32) -> (i32, i32, i32) {
    %c0_i32 = arith.constant 0 : i32
    %c0_i32_0 = arith.constant 0 : i32
    return %arg0, %c0_i32, %arg1 : i32, i32, i32
  }
}

module attributes {stable_mosaic.version = 11 : i64} {
  func.func @_se_gate_kernel(%arg0: i32, %arg1: memref<8x512xf32, #tpu.memory_space<vmem>>, %arg2: memref<512x128xbf16, #tpu.memory_space<vmem>>, %arg3: memref<1x128xf32, #tpu.memory_space<vmem>>, %arg4: memref<128x512xbf16, #tpu.memory_space<vmem>>, %arg5: memref<1x512xf32, #tpu.memory_space<vmem>>, %arg6: memref<8x512xf32, #tpu.memory_space<vmem>>) attributes {dimension_semantics = [#tpu.dimension_semantics<arbitrary>], iteration_bounds = array<i64: 1>, scalar_prefetch = 0 : i64, scratch_operands = 0 : i64, tpu.core_type = #tpu.core_type<tc>, window_params = [{pipeline_mode = #tpu.pipeline_mode<synchronous>, transform_indices = @transform_0, window_bounds = array<i64: 8, 512>}, {pipeline_mode = #tpu.pipeline_mode<synchronous>, transform_indices = @transform_1, window_bounds = array<i64: 512, 128>}, {pipeline_mode = #tpu.pipeline_mode<synchronous>, transform_indices = @transform_2, window_bounds = array<i64: 1, 128>}, {pipeline_mode = #tpu.pipeline_mode<synchronous>, transform_indices = @transform_3, window_bounds = array<i64: 128, 512>}, {pipeline_mode = #tpu.pipeline_mode<synchronous>, transform_indices = @transform_4, window_bounds = array<i64: 1, 512>}, {pipeline_mode = #tpu.pipeline_mode<synchronous>, transform_indices = @transform_5, window_bounds = array<i64: 8, 512>}]} {
    %c0 = arith.constant 0 : index
    %c0_0 = arith.constant 0 : index
    %0 = vector.load %arg1[%c0, %c0_0] : memref<8x512xf32, #tpu.memory_space<vmem>>, vector<8x512xf32>
    %cst = arith.constant 2.500000e-01 : f32
    %1 = vector.broadcast %cst : f32 to vector<8x512xf32>
    %2 = arith.mulf %0, %1 : vector<8x512xf32>
    %3 = arith.truncf %2 : vector<8x512xf32> to vector<8x512xbf16>
    %c0_1 = arith.constant 0 : index
    %c0_2 = arith.constant 0 : index
    %4 = vector.load %arg2[%c0_1, %c0_2] : memref<512x128xbf16, #tpu.memory_space<vmem>>, vector<512x128xbf16>
    %cst_3 = arith.constant dense<0.000000e+00> : vector<8x128xf32>
    %5 = tpu.matmul %3, %4, %cst_3 {dimension_numbers = #tpu.dot_dimension_numbers<[1], [0], [0], [1], [0, 0, 1, 1], [], []>} : vector<8x512xbf16>, vector<512x128xbf16>, vector<8x128xf32> -> vector<8x128xf32>
    %c0_4 = arith.constant 0 : index
    %c0_5 = arith.constant 0 : index
    %6 = vector.load %arg3[%c0_4, %c0_5] : memref<1x128xf32, #tpu.memory_space<vmem>>, vector<1x128xf32>
    %7 = vector.broadcast %6 : vector<1x128xf32> to vector<8x128xf32>
    %8 = arith.addf %5, %7 : vector<8x128xf32>
    %cst_6 = arith.constant 0.000000e+00 : f32
    %9 = vector.broadcast %cst_6 : f32 to vector<8x128xf32>
    %10 = arith.maximumf %8, %9 : vector<8x128xf32>
    %11 = arith.truncf %10 : vector<8x128xf32> to vector<8x128xbf16>
    %c0_7 = arith.constant 0 : index
    %c0_8 = arith.constant 0 : index
    %12 = vector.load %arg4[%c0_7, %c0_8] : memref<128x512xbf16, #tpu.memory_space<vmem>>, vector<128x512xbf16>
    %cst_9 = arith.constant dense<0.000000e+00> : vector<8x512xf32>
    %13 = tpu.matmul %11, %12, %cst_9 {dimension_numbers = #tpu.dot_dimension_numbers<[1], [0], [0], [1], [0, 0, 1, 1], [], []>} : vector<8x128xbf16>, vector<128x512xbf16>, vector<8x512xf32> -> vector<8x512xf32>
    %c0_10 = arith.constant 0 : index
    %c0_11 = arith.constant 0 : index
    %14 = vector.load %arg5[%c0_10, %c0_11] : memref<1x512xf32, #tpu.memory_space<vmem>>, vector<1x512xf32>
    %15 = vector.broadcast %14 : vector<1x512xf32> to vector<8x512xf32>
    %16 = arith.addf %13, %15 : vector<8x512xf32>
    %17 = arith.negf %16 : vector<8x512xf32>
    %18 = math.exp %17 : vector<8x512xf32>
    %cst_12 = arith.constant 1.000000e+00 : f32
    %19 = vector.broadcast %cst_12 : f32 to vector<8x512xf32>
    %20 = arith.addf %19, %18 : vector<8x512xf32>
    %21 = arith.divf %19, %20 : vector<8x512xf32>
    %c0_13 = arith.constant 0 : index
    %c0_14 = arith.constant 0 : index
    %22 = vector.load %arg6[%c0_13, %c0_14] : memref<8x512xf32, #tpu.memory_space<vmem>>, vector<8x512xf32>
    tpu.vector_store %arg6[%c0_13, %c0_14], %21 {strides = array<i32>} : memref<8x512xf32, #tpu.memory_space<vmem>>, vector<8x512xf32>,
    return
  }
  func.func @transform_0(%arg0: i32) -> (i32, i32) {
    %c0_i32 = arith.constant 0 : i32
    %c0_i32_0 = arith.constant 0 : i32
    %c0_i32_1 = arith.constant 0 : i32
    return %c0_i32, %c0_i32_0 : i32, i32
  }
  func.func @transform_1(%arg0: i32) -> (i32, i32) {
    %c0_i32 = arith.constant 0 : i32
    %c0_i32_0 = arith.constant 0 : i32
    %c0_i32_1 = arith.constant 0 : i32
    return %c0_i32, %c0_i32_0 : i32, i32
  }
  func.func @transform_2(%arg0: i32) -> (i32, i32) {
    %c0_i32 = arith.constant 0 : i32
    %c0_i32_0 = arith.constant 0 : i32
    %c0_i32_1 = arith.constant 0 : i32
    return %c0_i32, %c0_i32_0 : i32, i32
  }
  func.func @transform_3(%arg0: i32) -> (i32, i32) {
    %c0_i32 = arith.constant 0 : i32
    %c0_i32_0 = arith.constant 0 : i32
    %c0_i32_1 = arith.constant 0 : i32
    return %c0_i32, %c0_i32_0 : i32, i32
  }
  func.func @transform_4(%arg0: i32) -> (i32, i32) {
    %c0_i32 = arith.constant 0 : i32
    %c0_i32_0 = arith.constant 0 : i32
    %c0_i32_1 = arith.constant 0 : i32
    return %c0_i32, %c0_i32_0 : i32, i32
  }
  func.func @transform_5(%arg0: i32) -> (i32, i32) {
    %c0_i32 = arith.constant 0 : i32
    %c0_i32_0 = arith.constant 0 : i32
    %c0_i32_1 = arith.constant 0 : i32
    return %c0_i32, %c0_i32_0 : i32, i32
  }
}

module attributes {stable_mosaic.version = 11 : i64} {
  func.func @_gated_matmul_kernel(%arg0: i32, %arg1: i32, %arg2: memref<1x8x512xbf16, #tpu.memory_space<vmem>>, %arg3: memref<1x1x512xf32, #tpu.memory_space<vmem>>, %arg4: memref<512x128xbf16, #tpu.memory_space<vmem>>, %arg5: memref<1x128xf32, #tpu.memory_space<vmem>>, %arg6: memref<1x8x128xbf16, #tpu.memory_space<vmem>>, %arg7: memref<1x8x128xbf16, #tpu.memory_space<vmem>>) attributes {dimension_semantics = [#tpu.dimension_semantics<parallel>, #tpu.dimension_semantics<parallel>], iteration_bounds = array<i64: 2, 1>, scalar_prefetch = 0 : i64, scratch_operands = 0 : i64, tpu.core_type = #tpu.core_type<tc>, window_params = [{transform_indices = @transform_0, window_bounds = array<i64: 1, 8, 512>}, {transform_indices = @transform_1, window_bounds = array<i64: 1, 1, 512>}, {pipeline_mode = #tpu.pipeline_mode<synchronous>, transform_indices = @transform_2, window_bounds = array<i64: 512, 128>}, {pipeline_mode = #tpu.pipeline_mode<synchronous>, transform_indices = @transform_3, window_bounds = array<i64: 1, 128>}, {transform_indices = @transform_4, window_bounds = array<i64: 1, 8, 128>}, {transform_indices = @transform_5, window_bounds = array<i64: 1, 8, 128>}]} {
    %c0 = arith.constant 0 : index
    %c0_0 = arith.constant 0 : index
    %c0_1 = arith.constant 0 : index
    %0 = vector.load %arg2[%c0, %c0_0, %c0_1] : memref<1x8x512xbf16, #tpu.memory_space<vmem>>, vector<1x8x512xbf16>
    %1 = vector.shape_cast %0 : vector<1x8x512xbf16> to vector<8x512xbf16>
    %2 = arith.extf %1 : vector<8x512xbf16> to vector<8x512xf32>
    %c0_2 = arith.constant 0 : index
    %c0_3 = arith.constant 0 : index
    %c0_4 = arith.constant 0 : index
    %3 = vector.load %arg3[%c0_2, %c0_3, %c0_4] : memref<1x1x512xf32, #tpu.memory_space<vmem>>, vector<1x1x512xf32>
    %4 = vector.shape_cast %3 : vector<1x1x512xf32> to vector<1x512xf32>
    %5 = vector.broadcast %4 : vector<1x512xf32> to vector<8x512xf32>
    %6 = arith.mulf %2, %5 : vector<8x512xf32>
    %7 = arith.truncf %6 : vector<8x512xf32> to vector<8x512xbf16>
    %c0_5 = arith.constant 0 : index
    %c0_6 = arith.constant 0 : index
    %8 = vector.load %arg4[%c0_5, %c0_6] : memref<512x128xbf16, #tpu.memory_space<vmem>>, vector<512x128xbf16>
    %cst = arith.constant dense<0.000000e+00> : vector<8x128xf32>
    %9 = tpu.matmul %7, %8, %cst {dimension_numbers = #tpu.dot_dimension_numbers<[1], [0], [0], [1], [0, 0, 1, 1], [], []>} : vector<8x512xbf16>, vector<512x128xbf16>, vector<8x128xf32> -> vector<8x128xf32>
    %c0_7 = arith.constant 0 : index
    %c0_8 = arith.constant 0 : index
    %10 = vector.load %arg5[%c0_7, %c0_8] : memref<1x128xf32, #tpu.memory_space<vmem>>, vector<1x128xf32>
    %11 = vector.broadcast %10 : vector<1x128xf32> to vector<8x128xf32>
    %12 = arith.addf %9, %11 : vector<8x128xf32>
    %c0_9 = arith.constant 0 : index
    %c0_10 = arith.constant 0 : index
    %c0_11 = arith.constant 0 : index
    %13 = vector.load %arg6[%c0_9, %c0_10, %c0_11] : memref<1x8x128xbf16, #tpu.memory_space<vmem>>, vector<1x8x128xbf16>
    %14 = vector.shape_cast %13 : vector<1x8x128xbf16> to vector<8x128xbf16>
    %15 = arith.extf %14 : vector<8x128xbf16> to vector<8x128xf32>
    %16 = arith.addf %12, %15 : vector<8x128xf32>
    %17 = arith.truncf %16 : vector<8x128xf32> to vector<8x128xbf16>
    %c0_12 = arith.constant 0 : index
    %c0_13 = arith.constant 0 : index
    %c0_14 = arith.constant 0 : index
    %18 = vector.load %arg7[%c0_12, %c0_13, %c0_14] : memref<1x8x128xbf16, #tpu.memory_space<vmem>>, vector<1x8x128xbf16>
    %19 = vector.shape_cast %18 : vector<1x8x128xbf16> to vector<8x128xbf16>
    %20 = vector.shape_cast %17 : vector<8x128xbf16> to vector<1x8x128xbf16>
    tpu.vector_store %arg7[%c0_12, %c0_13, %c0_14], %20 {strides = array<i32>} : memref<1x8x128xbf16, #tpu.memory_space<vmem>>, vector<1x8x128xbf16>,
    return
  }
  func.func @transform_0(%arg0: i32, %arg1: i32) -> (i32, i32, i32) {
    %c0_i32 = arith.constant 0 : i32
    %c0_i32_0 = arith.constant 0 : i32
    return %arg0, %arg1, %c0_i32 : i32, i32, i32
  }
  func.func @transform_1(%arg0: i32, %arg1: i32) -> (i32, i32, i32) {
    %c0_i32 = arith.constant 0 : i32
    %c0_i32_0 = arith.constant 0 : i32
    %c0_i32_1 = arith.constant 0 : i32
    return %arg0, %c0_i32, %c0_i32_0 : i32, i32, i32
  }
  func.func @transform_2(%arg0: i32, %arg1: i32) -> (i32, i32) {
    %c0_i32 = arith.constant 0 : i32
    %c0_i32_0 = arith.constant 0 : i32
    %c0_i32_1 = arith.constant 0 : i32
    return %c0_i32, %c0_i32_0 : i32, i32
  }
  func.func @transform_3(%arg0: i32, %arg1: i32) -> (i32, i32) {
    %c0_i32 = arith.constant 0 : i32
    %c0_i32_0 = arith.constant 0 : i32
    %c0_i32_1 = arith.constant 0 : i32
    return %c0_i32, %c0_i32_0 : i32, i32
  }
  func.func @transform_4(%arg0: i32, %arg1: i32) -> (i32, i32, i32) {
    %c0_i32 = arith.constant 0 : i32
    %c0_i32_0 = arith.constant 0 : i32
    return %arg0, %arg1, %c0_i32 : i32, i32, i32
  }
  func.func @transform_5(%arg0: i32, %arg1: i32) -> (i32, i32, i32) {
    %c0_i32 = arith.constant 0 : i32
    %c0_i32_0 = arith.constant 0 : i32
    return %arg0, %arg1, %c0_i32 : i32, i32, i32
  }
}

</mosaic_0001>

<bundles_post_ra>
// kernel: _lambda_.23
= control target key start
LH: loop header
LB: loop body
LE: loop exit
PB: predicated region body
PF: predicated region fallthrough
CT: control target
= control target key end

     0   :  { %s1094_s12 = smov 0   ;;  %s1215_s0 = inlined_call_operand.vmem [shape: bf16[512,128], index: 0, kind: input, shape index: {}]   ;;  %s1216_s1 = inlined_call_operand.vmem [shape: bf16[128,128], index: 1, kind: input, shape index: {}]   ;;  %s1217_s2 = inlined_call_operand.vmem [shape: f32[1,128], index: 2, kind: input, shape index: {}]   ;;  %s1218_s3 = inlined_call_operand.vmem [shape: bf16[512,128], index: 3, kind: output, shape index: {}]  }
   0x1 LB: > { %s751_s13 = sadd.s32 4294967295, %s1072_s12   ;;  %p755_p0 = scmp.ge.s32.totalorder %s1072_s12, 1  ;;  %s1072_s12 = sphi %s1094_s12, %s13_s12  }
   0x2   : > { %p138_p1 = scmp.lt.s32.totalorder %s1072_s12, 3 }
   0x4   : > { %p139_p2 = pnand %p755_p0, %p138_p1 }
   0x5   : > { %v1042_v0 = vld [vmem:[%s1216_s1] sm:$0xff] (!%p139_p2)   ;;  %s756_s16 = sshll.u32 (!%p139_p2), %s751_s13, 5  ;;  %v1043_v1 = vld [vmem:[%s1216_s1 + $0x8] sm:$0xff] (!%p139_p2)   ;;  %v1044_v2 = vld [vmem:[%s1216_s1 + $0x10] sm:$0xff] (!%p139_p2)  }
   0x6   : > { %142 = sbr.rel (%p139_p2) target bundleno = 282 (0x11a), region = 32  ;;  %p163_p3 = scmp.lt.s32.totalorder (!%p139_p2), %s756_s16, 63  ;;  %970 = vmatprep.subr.bf16.mxu0 (!%p139_p2), %v1042_v0  ;;  %1018 = vmatprep.subr.bf16.mxu1 (!%p139_p2), %v1042_v0  ;;  %v1045_v3 = vld [vmem:[%s1216_s1 + $0x18] sm:$0xff] (!%p139_p2)   ;;  %v1046_v6 = vld [vmem:[%s1216_s1 + $0x20] sm:$0xff] (!%p139_p2)   ;;  %v1047_v7 = vld [vmem:[%s1216_s1 + $0x28] sm:$0xff] (!%p139_p2)  }
   0x7   : > { %971 = vmatpush3.bf16.msra.mxu0 (!%p139_p2), %v1042_v0  ;;  %1026 = vmatpush3.bf16.msra.mxu1 (!%p139_p2), %v1042_v0  ;;  %v1048_v8 = vld [vmem:[%s1216_s1 + $0x30] sm:$0xff] (!%p139_p2)   ;;  %v1049_v9 = vld [vmem:[%s1216_s1 + $0x38] sm:$0xff] (!%p139_p2)   ;;  %v1155_v25 = vld [vmem:[%s1217_s2] ss:$0 sm:$0xff] (!%p139_p2) }
   0x8   : > { %972 = vmatprep.subr.bf16.mxu0 (!%p139_p2), %v1043_v1  ;;  %1019 = vmatprep.subr.bf16.mxu1 (!%p139_p2), %v1043_v1 }
   0xb   : > { %973 = vmatpush3.bf16.msra.mxu0 (!%p139_p2), %v1043_v1  ;;  %1027 = vmatpush3.bf16.msra.mxu1 (!%p139_p2), %v1043_v1 }
   0xc   : > { %974 = vmatprep.subr.bf16.mxu0 (!%p139_p2), %v1044_v2  ;;  %1020 = vmatprep.subr.bf16.mxu1 (!%p139_p2), %v1044_v2 }
   0xd   : > { %s1220_s16 = smov (!%p163_p3, %s756_s16), 63 }
   0xe   : > { %s757_s21 = sshll.u32 %s1220_s16, 2 }
   0xf   : > { %s1119_s24 = scalar_lea.vmem %s1215_s0, %s757_s21  ;;  %975 = vmatpush3.bf16.msra.mxu0 %v1044_v2  ;;  %1028 = vmatpush3.bf16.msra.mxu1 %v1044_v2  ;;  %s1168_s13 = scalar_lea.vmem %s1218_s3, %s757_s21 }
  0x10   : > { %v1050_v4 = vld [vmem:[%s1119_s24] sm:$0xff]   ;;  %976 = vmatprep.subr.bf16.mxu0 %v1045_v3  ;;  %1021 = vmatprep.subr.bf16.mxu1 %v1045_v3  ;;  %v1052_v10 = vld [vmem:[%s1119_s24 + $0x8] sm:$0xff]   ;;  %v1054_v12 = vld [vmem:[%s1119_s24 + $0x10] sm:$0xff]  }
  0x11   : > { %v1051_v5 = vld [vmem:[%s1119_s24 + $0x40] sm:$0xff]   ;;  %986 = vmatprep.mubr.bf16.mxu0 %v1050_v4  ;;  %v1053_v11 = vld [vmem:[%s1119_s24 + $0x48] sm:$0xff]   ;;  %v1055_v13 = vld [vmem:[%s1119_s24 + $0x50] sm:$0xff]  }
  0x12   : > { %1002 = vmatprep.mubr.bf16.mxu1 %v1051_v5  ;;  %v1056_v14 = vld [vmem:[%s1119_s24 + $0x18] sm:$0xff]   ;;  %v1058_v16 = vld [vmem:[%s1119_s24 + $0x20] sm:$0xff]   ;;  %v1060_v18 = vld [vmem:[%s1119_s24 + $0x28] sm:$0xff]  }
  0x13   : > { %977 = vmatpush3.bf16.msra.mxu0 %v1045_v3  ;;  %1029 = vmatpush3.bf16.msra.mxu1 %v1045_v3  ;;  %v1057_v15 = vld [vmem:[%s1119_s24 + $0x58] sm:$0xff]   ;;  %v1059_v17 = vld [vmem:[%s1119_s24 + $0x60] sm:$0xff]   ;;  %v1061_v19 = vld [vmem:[%s1119_s24 + $0x68] sm:$0xff]  }
  0x14   : > { %978 = vmatprep.subr.bf16.mxu0 %v1046_v6  ;;  %1022 = vmatprep.subr.bf16.mxu1 %v1046_v6  ;;  %v1062_v20 = vld [vmem:[%s1119_s24 + $0x30] sm:$0xff]   ;;  %v1064_v22 = vld [vmem:[%s1119_s24 + $0x38] sm:$0xff]  }
  0x15   : > { %v1063_v21 = vld [vmem:[%s1119_s24 + $0x70] sm:$0xff]   ;;  %v1065_v23 = vld [vmem:[%s1119_s24 + $0x78] sm:$0xff]  }
  0x17   : > { %979 = vmatpush3.bf16.msra.mxu0 %v1046_v6  ;;  %1030 = vmatpush3.bf16.msra.mxu1 %v1046_v6 }
  0x18   : > { %980 = vmatprep.subr.bf16.mxu0 %v1047_v7  ;;  %1023 = vmatprep.subr.bf16.mxu1 %v1047_v7 }
  0x1b   : > { %981 = vmatpush3.bf16.msra.mxu0 %v1047_v7  ;;  %1031 = vmatpush3.bf16.msra.mxu1 %v1047_v7 }
  0x1c   : > { %982 = vmatprep.subr.bf16.mxu0 %v1048_v8  ;;  %1024 = vmatprep.subr.bf16.mxu1 %v1048_v8 }
  0x1f   : > { %983 = vmatpush3.bf16.msra.mxu0 %v1048_v8  ;;  %1032 = vmatpush3.bf16.msra.mxu1 %v1048_v8 }
  0x20   : > { %984 = vmatprep.subr.bf16.mxu0 %v1049_v9  ;;  %1025 = vmatprep.subr.bf16.mxu1 %v1049_v9 }
  0x23   : > { %985 = vmatpush3.bf16.msra.mxu0 %v1049_v9  ;;  %1033 = vmatpush3.bf16.msra.mxu1 %v1049_v9 }
  0x26   : > { %987 = vmatmul.mubr.bf16.vlgmr.msra.gmra.mrb[0].mxu0 %v1052_v10  ;;  %1003 = vmatmul.mubr.bf16.vlgmr.msra.gmra.mrb[0].mxu1 %v1053_v11 }
  0x27   : > { %990 = vmatprep.mubr.bf16.mxu0 %v1054_v12  ;;  %1006 = vmatprep.mubr.bf16.mxu1 %v1055_v13 }
  0x2e   : > { %991 = vmatmul.mubr.bf16.gmra.mrb[4].mxu0 %v1056_v14  ;;  %1007 = vmatmul.mubr.bf16.gmra.mrb[4].mxu1 %v1057_v15 }
  0x2f   : > { %994 = vmatprep.mubr.bf16.mxu0 %v1058_v16  ;;  %1010 = vmatprep.mubr.bf16.mxu1 %v1059_v17 }
  0x36   : > { %995 = vmatmul.mubr.bf16.gmra.mrb[8].mxu0 %v1060_v18  ;;  %1011 = vmatmul.mubr.bf16.gmra.mrb[8].mxu1 %v1061_v19 }
  0x37   : > { %998 = vmatprep.mubr.bf16.mxu0 %v1062_v20  ;;  %1014 = vmatprep.mubr.bf16.mxu1 %v1063_v21 }
  0x3e   : > { %999 = vmatmul.mubr.bf16.gmra.mrb[12].mxu0 %v1064_v22  ;;  %1015 = vmatmul.mubr.bf16.gmra.mrb[12].mxu1 %v1065_v23 }
  0xf9   : > { %v988_v24 = vpop.f32.mrb[0].mxu0  ;;  %v1004_v26 = vpop.f32.mrb[0].mxu1 }
  0xfa   : > { %v408_v27 = vpop.f32.mrb[1].mxu0  ;;  %v472_v28 = vpop.f32.mrb[1].mxu1  ;;  %v417_v31 = vadd.f32 %v988_v24, %v1155_v25  ;;  %v481_v32 = vadd.f32 %v1004_v26, %v1155_v25 }
  0xfb   : > { %v989_v29 = vpop.f32.mrb[2].mxu0  ;;  %v1005_v30 = vpop.f32.mrb[2].mxu1  ;;  %v409_v37 = vadd.f32 %v1155_v25, %v408_v27  ;;  %v473_v38 = vadd.f32 %v1155_v25, %v472_v28 }
  0xfc   : > { %v420_v33 = vadd.f32 %v989_v29, %v1155_v25  ;;  %v484_v34 = vadd.f32 %v1005_v30, %v1155_v25  ;;  %v411_v35 = vpop.f32.mrb[3].mxu0  ;;  %v475_v36 = vpop.f32.mrb[3].mxu1 }
  0xfd   : > { %v412_v39 = vadd.f32 %v1155_v25, %v411_v35  ;;  %v476_v40 = vadd.f32 %v1155_v25, %v475_v36 }
  0xfe   : > { %v859_v41 = vpack.c.bf16 %v420_v33, %v417_v31  ;;  %v899_v42 = vpack.c.bf16 %v484_v34, %v481_v32 }
  0xff   : > { %v854_v43 = vpack.c.bf16 %v412_v39, %v409_v37  ;;  %v894_v44 = vpack.c.bf16 %v476_v40, %v473_v38 }
 0x100   : > { %931 = vst [vmem:[%s1168_s13 + $0x8] sm:$0xff] %v859_v41   ;;  %939 = vst [vmem:[%s1168_s13 + $0x48] sm:$0xff] %v899_v42  }
 0x101   : > { %855 = vst [vmem:[%s1168_s13] sm:$0xff] %v854_v43   ;;  %938 = vst [vmem:[%s1168_s13 + $0x40] sm:$0xff] %v894_v44   ;;  %v992_v45 = vpop.f32.mrb[4].mxu0  ;;  %v1008_v46 = vpop.f32.mrb[4].mxu1 }
 0x102   : > { %v424_v47 = vpop.f32.mrb[5].mxu0  ;;  %v488_v48 = vpop.f32.mrb[5].mxu1  ;;  %v433_v51 = vadd.f32 %v992_v45, %v1155_v25  ;;  %v497_v52 = vadd.f32 %v1008_v46, %v1155_v25 }
 0x103   : > { %v993_v49 = vpop.f32.mrb[6].mxu0  ;;  %v1009_v50 = vpop.f32.mrb[6].mxu1  ;;  %v425_v57 = vadd.f32 %v1155_v25, %v424_v47  ;;  %v489_v58 = vadd.f32 %v1155_v25, %v488_v48 }
 0x104   : > { %v436_v53 = vadd.f32 %v993_v49, %v1155_v25  ;;  %v500_v54 = vadd.f32 %v1009_v50, %v1155_v25  ;;  %v427_v55 = vpop.f32.mrb[7].mxu0  ;;  %v491_v56 = vpop.f32.mrb[7].mxu1 }
 0x105   : > { %v428_v59 = vadd.f32 %v1155_v25, %v427_v55  ;;  %v492_v60 = vadd.f32 %v1155_v25, %v491_v56 }
 0x106   : > { %v869_v61 = vpack.c.bf16 %v436_v53, %v433_v51  ;;  %v909_v62 = vpack.c.bf16 %v500_v54, %v497_v52 }
 0x107   : > { %v864_v63 = vpack.c.bf16 %v428_v59, %v425_v57  ;;  %v904_v0 = vpack.c.bf16 %v492_v60, %v489_v58 }
 0x108   : > { %933 = vst [vmem:[%s1168_s13 + $0x18] sm:$0xff] %v869_v61   ;;  %941 = vst [vmem:[%s1168_s13 + $0x58] sm:$0xff] %v909_v62  }
 0x109   : > { %932 = vst [vmem:[%s1168_s13 + $0x10] sm:$0xff] %v864_v63   ;;  %940 = vst [vmem:[%s1168_s13 + $0x50] sm:$0xff] %v904_v0   ;;  %v996_v1 = vpop.f32.mrb[8].mxu0  ;;  %v1012_v2 = vpop.f32.mrb[8].mxu1 }
 0x10a   : > { %v440_v3 = vpop.f32.mrb[9].mxu0  ;;  %v504_v4 = vpop.f32.mrb[9].mxu1  ;;  %v449_v7 = vadd.f32 %v996_v1, %v1155_v25  ;;  %v513_v8 = vadd.f32 %v1012_v2, %v1155_v25 }
 0x10b   : > { %v997_v5 = vpop.f32.mrb[10].mxu0  ;;  %v1013_v6 = vpop.f32.mrb[10].mxu1  ;;  %v441_v13 = vadd.f32 %v1155_v25, %v440_v3  ;;  %v505_v14 = vadd.f32 %v1155_v25, %v504_v4 }
 0x10c   : > { %v452_v9 = vadd.f32 %v997_v5, %v1155_v25  ;;  %v516_v10 = vadd.f32 %v1013_v6, %v1155_v25  ;;  %v443_v11 = vpop.f32.mrb[11].mxu0  ;;  %v507_v12 = vpop.f32.mrb[11].mxu1 }
 0x10d   : > { %v444_v15 = vadd.f32 %v1155_v25, %v443_v11  ;;  %v508_v16 = vadd.f32 %v1155_v25, %v507_v12 }
 0x10e   : > { %v879_v17 = vpack.c.bf16 %v452_v9, %v449_v7  ;;  %v919_v18 = vpack.c.bf16 %v516_v10, %v513_v8 }
 0x10f   : > { %v874_v19 = vpack.c.bf16 %v444_v15, %v441_v13  ;;  %v914_v20 = vpack.c.bf16 %v508_v16, %v505_v14 }
 0x110   : > { %935 = vst [vmem:[%s1168_s13 + $0x28] sm:$0xff] %v879_v17   ;;  %943 = vst [vmem:[%s1168_s13 + $0x68] sm:$0xff] %v919_v18  }
 0x111   : > { %934 = vst [vmem:[%s1168_s13 + $0x20] sm:$0xff] %v874_v19   ;;  %942 = vst [vmem:[%s1168_s13 + $0x60] sm:$0xff] %v914_v20   ;;  %v1000_v21 = vpop.f32.mrb[12].mxu0  ;;  %v1016_v22 = vpop.f32.mrb[12].mxu1 }
 0x112   : > { %v456_v23 = vpop.f32.mrb[13].mxu0  ;;  %v520_v24 = vpop.f32.mrb[13].mxu1  ;;  %v465_v28 = vadd.f32 %v1000_v21, %v1155_v25  ;;  %v529_v29 = vadd.f32 %v1016_v22, %v1155_v25 }
 0x113   : > { %v1001_v26 = vpop.f32.mrb[14].mxu0  ;;  %v1017_v27 = vpop.f32.mrb[14].mxu1  ;;  %v457_v34 = vadd.f32 %v1155_v25, %v456_v23  ;;  %v521_v35 = vadd.f32 %v1155_v25, %v520_v24 }
 0x114   : > { %v468_v30 = vadd.f32 %v1001_v26, %v1155_v25  ;;  %v532_v31 = vadd.f32 %v1017_v27, %v1155_v25  ;;  %v459_v32 = vpop.f32.mrb[15].mxu0  ;;  %v523_v33 = vpop.f32.mrb[15].mxu1 }
 0x115   : > { %v460_v36 = vadd.f32 %v1155_v25, %v459_v32  ;;  %v524_v37 = vadd.f32 %v1155_v25, %v523_v33 }
 0x116   : > { %v889_v38 = vpack.c.bf16 %v468_v30, %v465_v28  ;;  %v929_v39 = vpack.c.bf16 %v532_v31, %v529_v29 }
 0x117   : > { %v884_v40 = vpack.c.bf16 %v460_v36, %v457_v34  ;;  %v924_v41 = vpack.c.bf16 %v524_v37, %v521_v35 }
 0x118   : > { %937 = vst [vmem:[%s1168_s13 + $0x38] sm:$0xff] %v889_v38   ;;  %945 = vst [vmem:[%s1168_s13 + $0x78] sm:$0xff] %v929_v39  }
 0x119   : > { %936 = vst [vmem:[%s1168_s13 + $0x30] sm:$0xff] %v884_v40   ;;  %944 = vst [vmem:[%s1168_s13 + $0x70] sm:$0xff] %v924_v41  }
 0x11a PF: > { %s13_s12 = sadd.s32 1, %s1072_s12  }
 0x11b   : > { %p10_p4 = scmp.ge.s32.totalorder %s13_s12, 4  }
 0x11d   :  { %12 = sbr.rel (!%p10_p4) target bundleno = 1 (0x1), region = 62 }

// kernel: _lambda_.22
= control target key start
LH: loop header
LB: loop body
LE: loop exit
PB: predicated region body
PF: predicated region fallthrough
CT: control target
= control target key end

     0   :  { %s1669_s12 = smov 0   ;;  %s1671_s13 = smov 0   ;;  %s2435_s0 = inlined_call_operand.vmem [shape: bf16[2,18,18,128], index: 0, kind: input, shape index: {}]   ;;  %s2436_s1 = inlined_call_operand.vmem [shape: f32[9,128], index: 1, kind: input, shape index: {}]   ;;  %s2437_s2 = inlined_call_operand.vmem [shape: f32[1,128], index: 2, kind: input, shape index: {}]   ;;  %s2438_s3 = inlined_call_operand.vmem [shape: bf16[2,16,16,128], index: 3, kind: output, shape index: {}]  }
   0x1   :  { %s1673_s14 = smov 0   ;;  %s1675_s15 = smov 0  }
   0x2   :  { %s1677_s16 = smov 0  }
   0x3 LB: > { %s25_s17 = sadd.s32 1, %s1639_s14  ;;  %s32_s18 = sadd.s32 1, %s1643_s15  ;;  %s1647_s16 = sphi %s1677_s16, %s13_s16   ;;  %s1643_s15 = sphi %s1675_s15, %s2610_s15   ;;  %s1639_s14 = sphi %s1673_s14, %s2609_s14   ;;  %s1635_s13 = sphi %s1671_s13, %s2608_s13   ;;  %s1631_s12 = sphi %s1669_s12, %s2607_s12  }
   0x4   : > { %p26_p0 = scmp.ge.s32.totalorder %s25_s17, 2  ;;  %p1443_p1 = scmp.ge.s32.totalorder %s1647_s16, 1 }
   0x5   : > { %p182_p2 = scmp.lt.s32.totalorder %s1647_s16, 5 }
   0x6   : > { %s2612_s17 = smov (%p26_p0, %s25_s17), 0  ;;  %s2614_s18 = smov (!%p26_p0, %s32_s18), %s1643_s15 }
   0x7   : > { %p183_p3 = pnand %p1443_p1, %p182_p2  ;;  %p34_p4 = scmp.ge.s32.totalorder %s2614_s18, 2 }
   0x9   : > { %s2616_s18 = smov (%p34_p4, %s2614_s18), 0  ;;  %186 = sbr.rel (%p183_p3) target bundleno = 188 (0xbc), region = 32 }
  0x10   : > { %p224_p5 = scmp.lt.s32.totalorder %s1635_s13, 1  ;;  %s1480_s19 = smul.u32 96, %s1631_s12  ;;  %v1452_v24 = vld [vmem:[%s2436_s1] ss:$0 sm:$0xff]  ;;  %v1453_v57 = vld [vmem:[%s2436_s1 + $0x1] ss:$0 sm:$0xff] }
  0x11   : > { %vm407_vm0 = vcmask 1046528   ;;  %vm533_vm1 = vcmask 1045504  }
  0x12   : > { %s2618_s13 = smov (!%p224_p5, %s1635_s13), 1 }
  0x13   : > { %s1568_s20 = smul.u32 216, %s2618_s13  ;;  %s1447_s27 = sshll.u32 %s2618_s13, 5 }
  0x15   : > { %s231_s23 = scalar_lea.vmem %s2435_s0, %s1568_s20 }
  0x16   : > { %s1708_s24 = scalar_lea.vmem %s231_s23, %s1480_s19  ;;  %s1445_s23 = sshll.u32 %s1631_s12, 3 }
  0x17   : > { %v1498_v0 = vld [vmem:[%s1708_s24] sm:$0xff]   ;;  %v1712_v1 = vld [vmem:[%s1708_s24 + $0x8] sm:$0x1]  ;;  %v260_v2 = vld [vmem:[%s1708_s24 + $0xc] sm:$0xff]   ;;  %p2374_p6 = scmp.lt.s32.totalorder %s1445_s23, 15 }
  0x18   : > { %v1715_v3 = vunpack.c.l.bf16 %v1498_v0  ;;  %v1717_v4 = vunpack.c.h.bf16 %v1498_v0  ;;  %v262_v5 = vld [vmem:[%s1708_s24 + $0x14] sm:$0x1]  ;;  %v1557_v6 = vld [vmem:[%s1708_s24 + $0x18] sm:$0xff]   ;;  %v265_v7 = vld [vmem:[%s1708_s24 + $0x20] sm:$0x1]  ;;  %v2439_v8 = vunpack.c.l.bf16 %v1712_v1  ;;  %v1723_v9 = vunpack.c.l.bf16 %v260_v2 }
  0x19   : > { %v1725_v10 = vunpack.c.l.bf16 %v1557_v6  ;;  %v1727_v11 = vunpack.c.h.bf16 %v1557_v6  ;;  %v266_v12 = vld [vmem:[%s1708_s24 + $0x24] sm:$0xff]   ;;  %v268_v13 = vld [vmem:[%s1708_s24 + $0x2c] sm:$0x1]  ;;  %v1558_v14 = vld [vmem:[%s1708_s24 + $0x30] sm:$0xff]   ;;  %v1732_v15 = vunpack.c.h.bf16 %v260_v2  ;;  %v1734_v16 = vunpack.c.l.bf16 %v262_v5  ;;  %s2620_s23 = smov (!%p2374_p6, %s1445_s23), 15 }
  0x1a   : > { %v1736_v17 = vunpack.c.l.bf16 %v1558_v14  ;;  %v1738_v18 = vunpack.c.h.bf16 %v1558_v14  ;;  %v271_v19 = vld [vmem:[%s1708_s24 + $0x38] sm:$0x1]  ;;  %v272_v20 = vld [vmem:[%s1708_s24 + $0x3c] sm:$0xff]   ;;  %v274_v21 = vld [vmem:[%s1708_s24 + $0x44] sm:$0x1]  ;;  %v1743_v22 = vunpack.c.l.bf16 %v265_v7  ;;  %v1745_v23 = vunpack.c.l.bf16 %v266_v12  ;;  %s1446_s26 = sshll.u32 %s2620_s23, 1 }
  0x1b   : > { %2504 = vst [vmem:[#allocation2_spill] sm:$0xff] %v1734_v16  ;;  %v1559_v25 = vld [vmem:[%s1708_s24 + $0x48] sm:$0xff]   ;;  %v277_v26 = vld [vmem:[%s1708_s24 + $0x50] sm:$0x1]  ;;  %v278_v27 = vld [vmem:[%s1708_s24 + $0x54] sm:$0xff]   ;;  %v1753_v28 = vunpack.c.h.bf16 %v266_v12  ;;  %v1755_v29 = vunpack.c.l.bf16 %v268_v13  ;;  %v1757_v30 = vunpack.c.l.bf16 %v271_v19  ;;  %v1759_v31 = vunpack.c.l.bf16 %v272_v20  ;;  %s249_s13 = sadd.s32 %s1447_s27, %s1446_s26 }
  0x1c   : > { %2505 = vst [vmem:[#allocation3_spill] sm:$0xff] %v1736_v17  ;;  %2506 = vst [vmem:[#allocation4_spill] sm:$0xff] %v1738_v18  ;;  %v1761_v32 = vunpack.c.l.bf16 %v1559_v25  ;;  %v1763_v33 = vunpack.c.h.bf16 %v1559_v25  ;;  %v280_v34 = vld [vmem:[%s1708_s24 + $0x5c] sm:$0x1]  ;;  %v1560_v35 = vld [vmem:[%s1708_s24 + $0x60] sm:$0xff]   ;;  %v1768_v37 = vunpack.c.h.bf16 %v272_v20  ;;  %v1770_v38 = vunpack.c.l.bf16 %v274_v21  ;;  %s1448_s28 = sshll.u32 %s249_s13, 2 }
  0x1d   : > { %2507 = vst [vmem:[#allocation5_spill] sm:$0xff] %v1743_v22  ;;  %2508 = vst [vmem:[#allocation6_spill] sm:$0xff] %v1745_v23  ;;  %v283_v36 = vld [vmem:[%s1708_s24 + $0x68] sm:$0x1]  ;;  %v1772_v39 = vunpack.c.l.bf16 %v1560_v35  ;;  %v1774_v40 = vunpack.c.h.bf16 %v1560_v35  ;;  %v284_v41 = vld [vmem:[%s1708_s24 + $0x6c] sm:$0xff]   ;;  %v1780_v43 = vunpack.c.l.bf16 %v277_v26  ;;  %v1782_v44 = vunpack.c.l.bf16 %v278_v27  ;;  %s251_s4 = scalar_lea.vmem %s2438_s3, %s1448_s28 }
  0x1e   : > { %2509 = vst [vmem:[#allocation7_spill] sm:$0xff] %v1753_v28  ;;  %2510 = vst [vmem:[#allocation8_spill] sm:$0xff] %v1755_v29  ;;  %v1778_v42 = vld [vmem:[%s1708_s24 + $0x74] sm:$0x1]  ;;  %v1784_v45 = vunpack.c.h.bf16 %v278_v27  ;;  %v1786_v46 = vunpack.c.l.bf16 %v280_v34  ;;  %v1788_v47 = vunpack.c.l.bf16 %v283_v36  ;;  %v1790_v48 = vunpack.c.l.bf16 %v284_v41 }
  0x1f   : > { %2511 = vst [vmem:[#allocation9_spill] sm:$0xff] %v1757_v30  ;;  %2512 = vst [vmem:[#allocation10_spill] sm:$0xff] %v1759_v31  ;;  %v1792_v49 = vunpack.c.h.bf16 %v284_v41  ;;  %v1796_v51 = vmul.f32 %v1715_v3, %v1452_v24  ;;  %v1799_v52 = vmul.f32 %v1717_v4, %v1452_v24  ;;  %v1802_v53 = vmul.f32 %v1452_v24, %v1723_v9 }
  0x20   : > { %2513 = vst [vmem:[#allocation11_spill] sm:$0xff] %v1761_v32  ;;  %2514 = vst [vmem:[#allocation12_spill] sm:$0xff] %v1763_v33  ;;  %v1805_v54 = vmul.f32 %v1452_v24, %v1732_v15  ;;  %v1808_v55 = vmul.f32 %v1725_v10, %v1452_v24  ;;  %v1811_v56 = vmul.f32 %v1727_v11, %v1452_v24 }
  0x21   : > { %2515 = vst [vmem:[#allocation13_spill] sm:$0xff] %v1768_v37  ;;  %2516 = vst [vmem:[#allocation14_spill] sm:$0xff] %v1770_v38  ;;  %v1817_v58 = vmul.f32 %v1452_v24, %v1745_v23  ;;  %v1820_v59 = vmul.f32 %v1452_v24, %v1753_v28  ;;  %v1823_v60 = vmul.f32 %v1736_v17, %v1452_v24 }
  0x22   : > { %2517 = vst [vmem:[#allocation15_spill] sm:$0xff] %v1772_v39  ;;  %2518 = vst [vmem:[#allocation16_spill] sm:$0xff] %v1774_v40  ;;  %v1826_v61 = vmul.f32 %v1738_v18, %v1452_v24  ;;  %v1829_v62 = vmul.f32 %v1452_v24, %v1759_v31  ;;  %v1832_v63 = vmul.f32 %v1452_v24, %v1768_v37 }
  0x23   : > { %2519 = vst [vmem:[#allocation17_spill] sm:$0xff] %v1778_v42  ;;  %2520 = vst [vmem:[#allocation18_spill] sm:$0xff] %v1780_v43  ;;  %v1835_v0 = vmul.f32 %v1761_v32, %v1452_v24  ;;  %v1838_v2 = vmul.f32 %v1763_v33, %v1452_v24  ;;  %v1841_v5 = vmul.f32 %v1452_v24, %v1782_v44 }
  0x24   : > { %2521 = vst [vmem:[#allocation19_spill] sm:$0xff] %v1782_v44  ;;  %2522 = vst [vmem:[#allocation20_spill] sm:$0xff] %v1784_v45  ;;  %v1844_v6 = vmul.f32 %v1452_v24, %v1784_v45  ;;  %v359_v7 = vmul.f32 %v1715_v3, %v1453_v57  ;;  %v360_v12 = vmul.f32 %v1717_v4, %v1453_v57 }
  0x25   : > { %2523 = vst [vmem:[#allocation21_spill] sm:$0xff] %v1786_v46  ;;  %2524 = vst [vmem:[#allocation22_spill] sm:$0xff] %v1788_v47  ;;  %v361_v13 = vmul.f32 %v1453_v57, %v2439_v8  ;;  %v362_v14 = vmul.f32 %v1453_v57, %v1723_v9  ;;  %v363_v19 = vmul.f32 %v1453_v57, %v1732_v15 }
  0x26   : > { %2525 = vst [vmem:[#allocation23_spill] sm:$0xff] %v1790_v48  ;;  %2526 = vst [vmem:[#allocation24_spill] sm:$0xff] %v1792_v49  ;;  %v364_v20 = vmul.f32 %v1453_v57, %v1734_v16  ;;  %v365_v21 = vmul.f32 %v1725_v10, %v1453_v57  ;;  %v366_v25 = vmul.f32 %v1727_v11, %v1453_v57 }
  0x27   : > { %v367_v24 = vmul.f32 %v1453_v57, %v1743_v22  ;;  %v368_v26 = vmul.f32 %v1453_v57, %v1745_v23  ;;  %v369_v27 = vmul.f32 %v1453_v57, %v1753_v28  ;;  %v370_v34 = vmul.f32 %v1453_v57, %v1755_v29 }
  0x28   : > { %v371_v35 = vmul.f32 %v1736_v17, %v1453_v57  ;;  %v372_v36 = vmul.f32 %v1738_v18, %v1453_v57  ;;  %v373_v41 = vmul.f32 %v1453_v57, %v1757_v30  ;;  %v374_v50 = vmul.f32 %v1453_v57, %v1759_v31 }
  0x29   : > { %v375_v8 = vmul.f32 %v1453_v57, %v1768_v37  ;;  %v376_v42 = vmul.f32 %v1453_v57, %v1770_v38  ;;  %v377_v49 = vmul.f32 %v1761_v32, %v1453_v57  ;;  %v378_v48 = vmul.f32 %v1763_v33, %v1453_v57 }
  0x2a   : > { %v379_v47 = vmul.f32 %v1453_v57, %v1780_v43  ;;  %v380_v40 = vmul.f32 %v1453_v57, %v1782_v44  ;;  %v381_v39 = vmul.f32 %v1453_v57, %v1784_v45  ;;  %v382_v18 = vmul.f32 %v1453_v57, %v1786_v46 }
  0x2b   : > { %v408_v17 = vrot.slane %v359_v7, 1  ;;  %v409_v30 = vrot.slane %v360_v12, 1  ;;  %v411_v29 = vrot.slane %v361_v13, 1  ;;  %v413_v31 = vrot.slane %v362_v14, 1 }
  0x2c   : > { %v414_v28 = vrot.slane %v363_v19, 1  ;;  %v416_v37 = vrot.slane %v364_v20, 1  ;;  %v418_v23 = vrot.slane %v365_v21, 1  ;;  %v419_v32 = vrot.slane %v366_v25, 1 }
  0x2d   : > { %v410_v38 = vsel %vm407_vm0, %v408_v17, %v409_v30  ;;  %v421_v22 = vrot.slane %v367_v24, 1  ;;  %v412_v33 = vsel %vm407_vm0, %v409_v30, %v411_v29  ;;  %v423_v45 = vrot.slane %v368_v26, 1 }
  0x2e   : > { %v415_v43 = vsel %vm407_vm0, %v413_v31, %v414_v28  ;;  %v417_v44 = vsel %vm407_vm0, %v414_v28, %v416_v37  ;;  %v420_v57 = vsel %vm407_vm0, %v418_v23, %v419_v32  ;;  %v424_v12 = vrot.slane %v369_v27, 1 }
  0x2f   : > { %v422_v7 = vsel %vm407_vm0, %v419_v32, %v421_v22  ;;  %v426_v13 = vrot.slane %v370_v34, 1  ;;  %v428_v14 = vrot.slane %v371_v35, 1  ;;  %v429_v19 = vrot.slane %v372_v36, 1  ;;  %v2528_v36 = vld [vmem:[#allocation5_spill] sm:$0xff] }
  0x30   : > { %v431_v20 = vrot.slane %v373_v41, 1  ;;  %v433_v17 = vrot.slane %v374_v50, 1  ;;  %v425_v21 = vsel %vm407_vm0, %v423_v45, %v424_v12  ;;  %v434_v29 = vrot.slane %v375_v8, 1  ;;  %v2529_v41 = vld [vmem:[#allocation6_spill] sm:$0xff] }
  0x31   : > { %v427_v25 = vsel %vm407_vm0, %v424_v12, %v426_v13  ;;  %v436_v30 = vrot.slane %v376_v42, 1  ;;  %v430_v31 = vsel %vm407_vm0, %v428_v14, %v429_v19  ;;  %v438_v37 = vrot.slane %v377_v49, 1  ;;  %v2533_v14 = vld [vmem:[#allocation4_spill] sm:$0xff] }
  0x32   : > { %v432_v28 = vsel %vm407_vm0, %v429_v19, %v431_v20  ;;  %v439_v23 = vrot.slane %v378_v48, 1  ;;  %v435_v22 = vsel %vm407_vm0, %v433_v17, %v434_v29  ;;  %v441_v24 = vrot.slane %v379_v47, 1  ;;  %v2534_v20 = vld [vmem:[#allocation9_spill] sm:$0xff] }
  0x33   : > { %v437_v32 = vsel %vm407_vm0, %v434_v29, %v436_v30  ;;  %v443_v26 = vrot.slane %v380_v40, 1  ;;  %v444_v27 = vrot.slane %v381_v39, 1  ;;  %v446_v45 = vrot.slane %v382_v18, 1  ;;  %v2536_v29 = vld [vmem:[#allocation13_spill] sm:$0xff] }
  0x34   : > { %v440_v50 = vsel %vm407_vm0, %v438_v37, %v439_v23  ;;  %v1885_v34 = vadd.f32 %v410_v38, %v1796_v51  ;;  %v442_v8 = vsel %vm407_vm0, %v439_v23, %v441_v24  ;;  %v1889_v42 = vadd.f32 %v412_v33, %v1799_v52  ;;  %v1454_v33 = vld [vmem:[%s2436_s1 + $0x2] ss:$0 sm:$0xff]  ;;  %v2538_v37 = vld [vmem:[#allocation11_spill] sm:$0xff] }
  0x35   : > { %v1892_v48 = vadd.f32 %v415_v43, %v1802_v53  ;;  %v1895_v49 = vadd.f32 %v417_v44, %v1805_v54  ;;  %v445_v40 = vsel %vm407_vm0, %v443_v26, %v444_v27  ;;  %v447_v47 = vsel %vm407_vm0, %v444_v27, %v446_v45  ;;  %v2540_v24 = vld [vmem:[#allocation18_spill] sm:$0xff]  ;;  %v2542_v45 = vld [vmem:[#allocation20_spill] sm:$0xff] }
  0x36   : > { %v1900_v18 = vadd.f32 %v420_v57, %v1808_v55  ;;  %v1903_v38 = vadd.f32 %v422_v7, %v1811_v56  ;;  %v1909_v39 = vadd.f32 %v425_v21, %v1817_v58  ;;  %v1912_v43 = vadd.f32 %v427_v25, %v1820_v59  ;;  %v2535_v21 = vld [vmem:[#allocation10_spill] sm:$0xff] }
  0x37   : > { %v1915_v44 = vadd.f32 %v430_v31, %v1823_v60  ;;  %v1918_v51 = vadd.f32 %v432_v28, %v1826_v61  ;;  %v1921_v52 = vadd.f32 %v435_v22, %v1829_v62  ;;  %v1924_v53 = vadd.f32 %v437_v32, %v1832_v63  ;;  %v2537_v31 = vld [vmem:[#allocation14_spill] sm:$0xff]  ;;  %v2539_v22 = vld [vmem:[#allocation12_spill] sm:$0xff] }
  0x38   : > { %v1927_v54 = vadd.f32 %v440_v50, %v1835_v0  ;;  %v1930_v55 = vadd.f32 %v442_v8, %v1838_v2  ;;  %v1933_v56 = vadd.f32 %v445_v40, %v1841_v5  ;;  %v1936_v58 = vadd.f32 %v447_v47, %v1844_v6  ;;  %v2541_v50 = vld [vmem:[#allocation19_spill] sm:$0xff] }
  0x39   : > { %v485_v59 = vmul.f32 %v1715_v3, %v1454_v33  ;;  %v486_v60 = vmul.f32 %v1717_v4, %v1454_v33  ;;  %v2527_v61 = vunpack.c.l.bf16 %v1712_v1  ;;  %v488_v63 = vmul.f32 %v1454_v33, %v1723_v9  ;;  %v2530_v3 = vld [vmem:[#allocation7_spill] sm:$0xff]  ;;  %v2531_v4 = vld [vmem:[#allocation8_spill] sm:$0xff] }
  0x3a   : > { %v489_v0 = vmul.f32 %v1454_v33, %v1732_v15  ;;  %v490_v2 = vmul.f32 %v1454_v33, %v1734_v16  ;;  %v491_v35 = vmul.f32 %v1725_v10, %v1454_v33  ;;  %v492_v5 = vmul.f32 %v1727_v11, %v1454_v33  ;;  %v2532_v1 = vld [vmem:[#allocation3_spill] sm:$0xff] }
  0x3b   : > { %v487_v62 = vmul.f32 %v1454_v33, %v2527_v61  ;;  %v493_v6 = vmul.f32 %v1454_v33, %v2528_v36  ;;  %v494_v57 = vmul.f32 %v1454_v33, %v2529_v41  ;;  %v495_v7 = vmul.f32 %v1454_v33, %v2530_v3 }
  0x3c   : > { %v496_v12 = vmul.f32 %v1454_v33, %v2531_v4  ;;  %v497_v13 = vmul.f32 %v2532_v1, %v1454_v33  ;;  %v498_v19 = vmul.f32 %v2533_v14, %v1454_v33  ;;  %v499_v17 = vmul.f32 %v1454_v33, %v2534_v20 }
  0x3d   : > { %v500_v25 = vmul.f32 %v1454_v33, %v2535_v21  ;;  %v501_v30 = vmul.f32 %v1454_v33, %v2536_v29  ;;  %v502_v28 = vmul.f32 %v1454_v33, %v2537_v31  ;;  %v503_v23 = vmul.f32 %v2538_v37, %v1454_v33 }
  0x3e   : > { %v504_v32 = vmul.f32 %v2539_v22, %v1454_v33  ;;  %v505_v26 = vmul.f32 %v1454_v33, %v2540_v24  ;;  %v506_v27 = vmul.f32 %v1454_v33, %v2541_v50  ;;  %v507_v8 = vmul.f32 %v1454_v33, %v2542_v45 }
  0x3f   : > { %v508_v40 = vmul.f32 %v1454_v33, %v1786_v46  ;;  %v534_v47 = vrot.slane %v485_v59, 2  ;;  %v535_v61 = vrot.slane %v486_v60, 2  ;;  %v537_v20 = vrot.slane %v487_v62, 2 }
  0x40   : > { %v539_v4 = vrot.slane %v488_v63, 2  ;;  %v540_v36 = vrot.slane %v489_v0, 2  ;;  %v542_v16 = vrot.slane %v490_v2, 2  ;;  %v544_v29 = vrot.slane %v491_v35, 2 }
  0x41   : > { %v536_v31 = vsel %vm533_vm1, %v534_v47, %v535_v61  ;;  %v545_v37 = vrot.slane %v492_v5, 2  ;;  %v547_v21 = vrot.slane %v493_v6, 2  ;;  %v538_v22 = vsel %vm533_vm1, %v535_v61, %v537_v20  ;;  %v2544_v61 = vld [vmem:[#allocation13_spill] sm:$0xff] }
  0x42   : > { %v541_v24 = vsel %vm533_vm1, %v539_v4, %v540_v36  ;;  %v543_v50 = vsel %vm533_vm1, %v540_v36, %v542_v16  ;;  %v549_v45 = vrot.slane %v494_v57, 2  ;;  %v550_v60 = vrot.slane %v495_v7, 2 }
  0x43   : > { %v546_v33 = vsel %vm533_vm1, %v544_v29, %v545_v37  ;;  %v548_v59 = vsel %vm533_vm1, %v545_v37, %v547_v21  ;;  %v552_v62 = vrot.slane %v496_v12, 2  ;;  %v554_v63 = vrot.slane %v497_v13, 2 }
  0x44   : > { %v555_v0 = vrot.slane %v498_v19, 2  ;;  %v557_v2 = vrot.slane %v499_v17, 2  ;;  %v559_v47 = vrot.slane %v500_v25, 2  ;;  %v551_v35 = vsel %vm533_vm1, %v549_v45, %v550_v60 }
  0x45   : > { %v553_v5 = vsel %vm533_vm1, %v550_v60, %v552_v62  ;;  %v560_v6 = vrot.slane %v501_v30, 2  ;;  %v562_v20 = vrot.slane %v502_v28, 2  ;;  %v564_v36 = vrot.slane %v503_v23, 2  ;;  %v2546_v60 = vld [vmem:[#allocation12_spill] sm:$0xff] }
  0x46   : > { %v556_v4 = vsel %vm533_vm1, %v554_v63, %v555_v0  ;;  %v558_v16 = vsel %vm533_vm1, %v555_v0, %v557_v2  ;;  %v565_v57 = vrot.slane %v504_v32, 2  ;;  %v567_v12 = vrot.slane %v505_v26, 2  ;;  %v2547_v63 = vld [vmem:[#allocation19_spill] sm:$0xff]  ;;  %v2548_v2 = vld [vmem:[#allocation20_spill] sm:$0xff] }
  0x47   : > { %v561_v21 = vsel %vm533_vm1, %v559_v47, %v560_v6  ;;  %v563_v7 = vsel %vm533_vm1, %v560_v6, %v562_v20  ;;  %v569_v13 = vrot.slane %v506_v27, 2  ;;  %v570_v17 = vrot.slane %v507_v8, 2  ;;  %v2550_v6 = vld [vmem:[#allocation16_spill] sm:$0xff] }
  0x48   : > { %v566_v19 = vsel %vm533_vm1, %v564_v36, %v565_v57  ;;  %v572_v25 = vrot.slane %v508_v40, 2  ;;  %v590_v29 = vadd.f32 %v536_v31, %v1885_v34  ;;  %v568_v30 = vsel %vm533_vm1, %v565_v57, %v567_v12  ;;  %v1455_v34 = vld [vmem:[%s2436_s1 + $0x3] ss:$0 sm:$0xff]  ;;  %v1456_v12 = vld [vmem:[%s2436_s1 + $0x4] ss:$0 sm:$0xff] }
  0x49   : > { %v591_v28 = vadd.f32 %v538_v22, %v1889_v42  ;;  %v592_v37 = vadd.f32 %v541_v24, %v1892_v48  ;;  %v593_v23 = vadd.f32 %v543_v50, %v1895_v49  ;;  %v571_v32 = vsel %vm533_vm1, %v569_v13, %v570_v17  ;;  %v2543_v40 = vld [vmem:[#allocation10_spill] sm:$0xff] }
  0x4a   : > { %v573_v45 = vsel %vm533_vm1, %v570_v17, %v572_v25  ;;  %v594_v26 = vadd.f32 %v546_v33, %v1900_v18  ;;  %v595_v27 = vadd.f32 %v548_v59, %v1903_v38  ;;  %v596_v31 = vadd.f32 %v551_v35, %v1909_v39  ;;  %v2545_v33 = vld [vmem:[#allocation11_spill] sm:$0xff] }
  0x4b   : > { %v597_v42 = vadd.f32 %v553_v5, %v1912_v43  ;;  %v598_v48 = vadd.f32 %v556_v4, %v1915_v44  ;;  %v599_v49 = vadd.f32 %v558_v16, %v1918_v51  ;;  %v600_v22 = vadd.f32 %v561_v21, %v1921_v52  ;;  %v2549_v35 = vld [vmem:[#allocation15_spill] sm:$0xff] }
  0x4c   : > { %v601_v24 = vadd.f32 %v563_v7, %v1924_v53  ;;  %v602_v18 = vadd.f32 %v566_v19, %v1927_v54  ;;  %v603_v38 = vadd.f32 %v568_v30, %v1930_v55  ;;  %v604_v50 = vadd.f32 %v571_v32, %v1933_v56 }
  0x4d   : > { %v605_v8 = vadd.f32 %v573_v45, %v1936_v58  ;;  %v611_v39 = vmul.f32 %v1455_v34, %v1723_v9  ;;  %v612_v43 = vmul.f32 %v1455_v34, %v1732_v15  ;;  %v613_v44 = vmul.f32 %v1725_v10, %v1455_v34 }
  0x4e   : > { %v614_v51 = vmul.f32 %v1727_v11, %v1455_v34  ;;  %v615_v52 = vmul.f32 %v1455_v34, %v2529_v41  ;;  %v616_v53 = vmul.f32 %v1455_v34, %v2530_v3  ;;  %v617_v54 = vmul.f32 %v2532_v1, %v1455_v34 }
  0x4f   : > { %v618_v55 = vmul.f32 %v2533_v14, %v1455_v34  ;;  %v619_v56 = vmul.f32 %v1455_v34, %v2543_v40  ;;  %v620_v58 = vmul.f32 %v1455_v34, %v2544_v61  ;;  %v621_v59 = vmul.f32 %v2545_v33, %v1455_v34 }
  0x50   : > { %v622_v62 = vmul.f32 %v2546_v60, %v1455_v34  ;;  %v623_v0 = vmul.f32 %v1455_v34, %v2547_v63  ;;  %v624_v47 = vmul.f32 %v1455_v34, %v2548_v2  ;;  %v625_v5 = vmul.f32 %v2549_v35, %v1455_v34 }
  0x51   : > { %v626_v20 = vmul.f32 %v2550_v6, %v1455_v34  ;;  %v2014_v4 = vadd.f32 %v611_v39, %v590_v29  ;;  %v2016_v16 = vadd.f32 %v612_v43, %v591_v28  ;;  %v2018_v36 = vadd.f32 %v613_v44, %v592_v37  ;;  %v2554_v39 = vld [vmem:[#allocation9_spill] sm:$0xff] }
  0x52   : > { %v2020_v57 = vadd.f32 %v614_v51, %v593_v23  ;;  %v2022_v21 = vadd.f32 %v615_v52, %v594_v26  ;;  %v2024_v7 = vadd.f32 %v616_v53, %v595_v27  ;;  %v2029_v13 = vadd.f32 %v617_v54, %v596_v31  ;;  %v2551_v27 = vld [vmem:[#allocation2_spill] sm:$0xff] }
  0x53   : > { %v2031_v19 = vadd.f32 %v618_v55, %v597_v42  ;;  %v2033_v17 = vadd.f32 %v619_v56, %v598_v48  ;;  %v2035_v25 = vadd.f32 %v620_v58, %v599_v49  ;;  %v2037_v29 = vadd.f32 %v621_v59, %v600_v22  ;;  %v2552_v48 = vld [vmem:[#allocation5_spill] sm:$0xff]  ;;  %v2555_v52 = vld [vmem:[#allocation14_spill] sm:$0xff] }
  0x54   : > { %v2039_v30 = vadd.f32 %v622_v62, %v601_v24  ;;  %v2041_v28 = vadd.f32 %v623_v0, %v602_v18  ;;  %v2043_v37 = vadd.f32 %v624_v47, %v603_v38  ;;  %v2045_v23 = vadd.f32 %v625_v5, %v604_v50  ;;  %v2553_v18 = vld [vmem:[#allocation8_spill] sm:$0xff]  ;;  %v2556_v56 = vld [vmem:[#allocation18_spill] sm:$0xff] }
  0x55   : > { %v2047_v32 = vadd.f32 %v626_v20, %v605_v8  ;;  %v648_v45 = vmul.f32 %v1456_v12, %v1723_v9  ;;  %v649_v26 = vmul.f32 %v1456_v12, %v1732_v15  ;;  %v650_v34 = vmul.f32 %v1456_v12, %v2551_v27  ;;  %v2557_v20 = vld [vmem:[#allocation22_spill] sm:$0xff] }
  0x56   : > { %v651_v31 = vmul.f32 %v1725_v10, %v1456_v12  ;;  %v652_v42 = vmul.f32 %v1727_v11, %v1456_v12  ;;  %v653_v49 = vmul.f32 %v1456_v12, %v2552_v48  ;;  %v654_v22 = vmul.f32 %v1456_v12, %v2529_v41 }
  0x57   : > { %v655_v24 = vmul.f32 %v1456_v12, %v2530_v3  ;;  %v656_v38 = vmul.f32 %v1456_v12, %v2553_v18  ;;  %v657_v50 = vmul.f32 %v2532_v1, %v1456_v12  ;;  %v658_v8 = vmul.f32 %v2533_v14, %v1456_v12 }
  0x58   : > { %v659_v43 = vmul.f32 %v1456_v12, %v2554_v39  ;;  %v660_v44 = vmul.f32 %v1456_v12, %v2543_v40  ;;  %v661_v51 = vmul.f32 %v1456_v12, %v2544_v61  ;;  %v662_v53 = vmul.f32 %v1456_v12, %v2555_v52 }
  0x59   : > { %v663_v54 = vmul.f32 %v2545_v33, %v1456_v12  ;;  %v664_v55 = vmul.f32 %v2546_v60, %v1456_v12  ;;  %v665_v58 = vmul.f32 %v1456_v12, %v2556_v56  ;;  %v666_v59 = vmul.f32 %v1456_v12, %v2547_v63 }
  0x5a   : > { %v667_v62 = vmul.f32 %v1456_v12, %v2548_v2  ;;  %v668_v0 = vmul.f32 %v1456_v12, %v1786_v46  ;;  %v669_v47 = vmul.f32 %v2549_v35, %v1456_v12  ;;  %v670_v5 = vmul.f32 %v2550_v6, %v1456_v12 }
  0x5b   : > { %v671_v61 = vmul.f32 %v1456_v12, %v2557_v20  ;;  %v696_v40 = vrot.slane %v648_v45, 1  ;;  %v697_v52 = vrot.slane %v649_v26, 1  ;;  %v699_v39 = vrot.slane %v650_v34, 1 }
  0x5c   : > { %v701_v33 = vrot.slane %v651_v31, 1  ;;  %v702_v14 = vrot.slane %v652_v42, 1  ;;  %v704_v60 = vrot.slane %v653_v49, 1  ;;  %v706_v1 = vrot.slane %v654_v22, 1 }
  0x5d   : > { %v698_v56 = vsel %vm407_vm0, %v696_v40, %v697_v52  ;;  %v707_v63 = vrot.slane %v655_v24, 1  ;;  %v709_v18 = vrot.slane %v656_v38, 1  ;;  %v700_v2 = vsel %vm407_vm0, %v697_v52, %v699_v39 }
  0x5e   : > { %v703_v46 = vsel %vm407_vm0, %v701_v33, %v702_v14  ;;  %v705_v35 = vsel %vm407_vm0, %v702_v14, %v704_v60  ;;  %v711_v6 = vrot.slane %v657_v50, 1  ;;  %v712_v26 = vrot.slane %v658_v8, 1 }
  0x5f   : > { %v708_v12 = vsel %vm407_vm0, %v706_v1, %v707_v63  ;;  %v710_v45 = vsel %vm407_vm0, %v707_v63, %v709_v18  ;;  %v714_v34 = vrot.slane %v659_v43, 1  ;;  %v716_v31 = vrot.slane %v660_v44, 1 }
  0x60   : > { %v717_v42 = vrot.slane %v661_v51, 1  ;;  %v719_v49 = vrot.slane %v662_v53, 1  ;;  %v721_v40 = vrot.slane %v663_v54, 1  ;;  %v713_v22 = vsel %vm407_vm0, %v711_v6, %v712_v26 }
  0x61   : > { %v715_v24 = vsel %vm407_vm0, %v712_v26, %v714_v34  ;;  %v722_v38 = vrot.slane %v664_v55, 1  ;;  %v724_v39 = vrot.slane %v665_v58, 1  ;;  %v726_v60 = vrot.slane %v666_v59, 1  ;;  %v2562_v26 = vld [vmem:[#allocation10_spill] sm:$0xff]  ;;  %v2563_v34 = vld [vmem:[#allocation13_spill] sm:$0xff] }
  0x62   : > { %v718_v33 = vsel %vm407_vm0, %v716_v31, %v717_v42  ;;  %v720_v14 = vsel %vm407_vm0, %v717_v42, %v719_v49  ;;  %v727_v1 = vrot.slane %v667_v62, 1  ;;  %v729_v50 = vrot.slane %v668_v0, 1  ;;  %v2558_v0 = vld [vmem:[#allocation8_spill] sm:$0xff]  ;;  %v2564_v42 = vld [vmem:[#allocation14_spill] sm:$0xff] }
  0x63   : > { %v723_v63 = vsel %vm407_vm0, %v721_v40, %v722_v38  ;;  %v725_v18 = vsel %vm407_vm0, %v722_v38, %v724_v39  ;;  %v731_v8 = vrot.slane %v669_v47, 1  ;;  %v732_v44 = vrot.slane %v670_v5, 1  ;;  %v2565_v40 = vld [vmem:[#allocation11_spill] sm:$0xff]  ;;  %v2567_v39 = vld [vmem:[#allocation18_spill] sm:$0xff] }
  0x64   : > { %v728_v43 = vsel %vm407_vm0, %v726_v60, %v727_v1  ;;  %v734_v6 = vrot.slane %v671_v61, 1  ;;  %v2087_v51 = vadd.f32 %v698_v56, %v2014_v4  ;;  %v730_v52 = vsel %vm407_vm0, %v727_v1, %v729_v50  ;;  %v2569_v1 = vld [vmem:[#allocation20_spill] sm:$0xff] }
  0x65   : > { %v2091_v53 = vadd.f32 %v700_v2, %v2016_v16  ;;  %v2094_v54 = vadd.f32 %v703_v46, %v2018_v36  ;;  %v2097_v55 = vadd.f32 %v705_v35, %v2020_v57  ;;  %v733_v58 = vsel %vm407_vm0, %v731_v8, %v732_v44  ;;  %v1457_v2 = vld [vmem:[%s2436_s1 + $0x5] ss:$0 sm:$0xff]  ;;  %v2571_v8 = vld [vmem:[#allocation15_spill] sm:$0xff] }
  0x66   : > { %v735_v59 = vsel %vm407_vm0, %v732_v44, %v734_v6  ;;  %v2102_v61 = vadd.f32 %v708_v12, %v2022_v21  ;;  %v2105_v4 = vadd.f32 %v710_v45, %v2024_v7  ;;  %v2111_v46 = vadd.f32 %v713_v22, %v2029_v13  ;;  %v2560_v12 = vld [vmem:[#allocation4_spill] sm:$0xff]  ;;  %v2561_v45 = vld [vmem:[#allocation9_spill] sm:$0xff] }
  0x67   : > { %v2114_v35 = vadd.f32 %v715_v24, %v2031_v19  ;;  %v2117_v16 = vadd.f32 %v718_v33, %v2033_v17  ;;  %v2120_v36 = vadd.f32 %v720_v14, %v2035_v25  ;;  %v2123_v57 = vadd.f32 %v723_v63, %v2037_v29  ;;  %v2566_v24 = vld [vmem:[#allocation12_spill] sm:$0xff]  ;;  %v2568_v14 = vld [vmem:[#allocation19_spill] sm:$0xff] }
  0x68   : > { %v2126_v21 = vadd.f32 %v725_v18, %v2039_v30  ;;  %v2129_v7 = vadd.f32 %v728_v43, %v2041_v28  ;;  %v2132_v13 = vadd.f32 %v730_v52, %v2043_v37  ;;  %v2135_v19 = vadd.f32 %v733_v58, %v2045_v23  ;;  %v2570_v18 = vld [vmem:[#allocation21_spill] sm:$0xff]  ;;  %v2572_v44 = vld [vmem:[#allocation16_spill] sm:$0xff] }
  0x69   : > { %v2138_v17 = vadd.f32 %v735_v59, %v2047_v32  ;;  %v773_v25 = vmul.f32 %v1457_v2, %v1723_v9  ;;  %v774_v29 = vmul.f32 %v1457_v2, %v1732_v15  ;;  %v775_v56 = vmul.f32 %v1457_v2, %v2551_v27  ;;  %v2559_v32 = vld [vmem:[#allocation3_spill] sm:$0xff] }
  0x6a   : > { %v776_v30 = vmul.f32 %v1725_v10, %v1457_v2  ;;  %v777_v28 = vmul.f32 %v1727_v11, %v1457_v2  ;;  %v778_v62 = vmul.f32 %v1457_v2, %v2552_v48  ;;  %v779_v37 = vmul.f32 %v1457_v2, %v2529_v41 }
  0x6b   : > { %v780_v23 = vmul.f32 %v1457_v2, %v2530_v3  ;;  %v781_v47 = vmul.f32 %v1457_v2, %v2558_v0  ;;  %v782_v5 = vmul.f32 %v2559_v32, %v1457_v2  ;;  %v783_v9 = vmul.f32 %v2560_v12, %v1457_v2 }
  0x6c   : > { %v784_v15 = vmul.f32 %v1457_v2, %v2561_v45  ;;  %v785_v27 = vmul.f32 %v1457_v2, %v2562_v26  ;;  %v786_v31 = vmul.f32 %v1457_v2, %v2563_v34  ;;  %v787_v49 = vmul.f32 %v1457_v2, %v2564_v42 }
  0x6d   : > { %v788_v22 = vmul.f32 %v2565_v40, %v1457_v2  ;;  %v789_v38 = vmul.f32 %v2566_v24, %v1457_v2  ;;  %v790_v33 = vmul.f32 %v1457_v2, %v2567_v39  ;;  %v791_v60 = vmul.f32 %v1457_v2, %v2568_v14 }
  0x6e   : > { %v792_v63 = vmul.f32 %v1457_v2, %v2569_v1  ;;  %v793_v50 = vmul.f32 %v1457_v2, %v2570_v18  ;;  %v794_v43 = vmul.f32 %v2571_v8, %v1457_v2  ;;  %v795_v6 = vmul.f32 %v2572_v44, %v1457_v2 }
  0x6f   : > { %v796_v52 = vmul.f32 %v1457_v2, %v2557_v20  ;;  %v821_v58 = vrot.slane %v773_v25, 2  ;;  %v822_v59 = vrot.slane %v774_v29, 2  ;;  %v824_v42 = vrot.slane %v775_v56, 2 }
  0x70   : > { %v826_v45 = vrot.slane %v776_v30, 2  ;;  %v827_v0 = vrot.slane %v777_v28, 2  ;;  %v829_v48 = vrot.slane %v778_v62, 2  ;;  %v831_v24 = vrot.slane %v779_v37, 2 }
  0x71   : > { %v823_v39 = vsel %vm533_vm1, %v821_v58, %v822_v59  ;;  %v832_v14 = vrot.slane %v780_v23, 2  ;;  %v834_v40 = vrot.slane %v781_v47, 2  ;;  %v825_v1 = vsel %vm533_vm1, %v822_v59, %v824_v42  ;;  %v2574_v59 = vld [vmem:[#allocation12_spill] sm:$0xff] }
  0x72   : > { %v828_v18 = vsel %vm533_vm1, %v826_v45, %v827_v0  ;;  %v830_v8 = vsel %vm533_vm1, %v827_v0, %v829_v48  ;;  %v836_v44 = vrot.slane %v782_v5, 2  ;;  %v837_v29 = vrot.slane %v783_v9, 2 }
  0x73   : > { %v833_v2 = vsel %vm533_vm1, %v831_v24, %v832_v14  ;;  %v835_v25 = vsel %vm533_vm1, %v832_v14, %v834_v40  ;;  %v839_v56 = vrot.slane %v784_v15, 2  ;;  %v841_v30 = vrot.slane %v785_v27, 2 }
  0x74   : > { %v842_v28 = vrot.slane %v786_v31, 2  ;;  %v844_v62 = vrot.slane %v787_v49, 2  ;;  %v846_v58 = vrot.slane %v788_v22, 2  ;;  %v838_v37 = vsel %vm533_vm1, %v836_v44, %v837_v29 }
  0x75   : > { %v840_v23 = vsel %vm533_vm1, %v837_v29, %v839_v56  ;;  %v847_v47 = vrot.slane %v789_v38, 2  ;;  %v849_v42 = vrot.slane %v790_v33, 2  ;;  %v851_v0 = vrot.slane %v791_v60, 2  ;;  %v2576_v29 = vld [vmem:[#allocation20_spill] sm:$0xff] }
  0x76   : > { %v843_v45 = vsel %vm533_vm1, %v841_v30, %v842_v28  ;;  %v845_v48 = vsel %vm533_vm1, %v842_v28, %v844_v62  ;;  %v852_v5 = vrot.slane %v792_v63, 2  ;;  %v854_v15 = vrot.slane %v793_v50, 2  ;;  %v2577_v30 = vld [vmem:[#allocation15_spill] sm:$0xff]  ;;  %v2578_v62 = vld [vmem:[#allocation16_spill] sm:$0xff] }
  0x77   : > { %v848_v40 = vsel %vm533_vm1, %v846_v58, %v847_v47  ;;  %v850_v9 = vsel %vm533_vm1, %v847_v47, %v849_v42  ;;  %v856_v27 = vrot.slane %v794_v43, 2  ;;  %v857_v49 = vrot.slane %v795_v6, 2  ;;  %v2580_v47 = vld [vmem:[#allocation24_spill] sm:$0xff] }
  0x78   : > { %v853_v31 = vsel %vm533_vm1, %v851_v0, %v852_v5  ;;  %v859_v22 = vrot.slane %v796_v52, 2  ;;  %v877_v24 = vadd.f32 %v823_v39, %v2087_v51  ;;  %v855_v38 = vsel %vm533_vm1, %v852_v5, %v854_v15  ;;  %v1458_v51 = vld [vmem:[%s2436_s1 + $0x6] ss:$0 sm:$0xff]  ;;  %v2573_v52 = vld [vmem:[#allocation11_spill] sm:$0xff]  ;;  %v1459_v15 = vld [vmem:[%s2436_s1 + $0x7] ss:$0 sm:$0xff] }
  0x79   : > { %v878_v33 = vadd.f32 %v825_v1, %v2091_v53  ;;  %v879_v14 = vadd.f32 %v828_v18, %v2094_v54  ;;  %v880_v60 = vadd.f32 %v830_v8, %v2097_v55  ;;  %v858_v63 = vsel %vm533_vm1, %v856_v27, %v857_v49 }
  0x7a   : > { %v860_v44 = vsel %vm533_vm1, %v857_v49, %v859_v22  ;;  %v881_v50 = vadd.f32 %v833_v2, %v2102_v61  ;;  %v882_v43 = vadd.f32 %v835_v25, %v2105_v4  ;;  %v883_v39 = vadd.f32 %v838_v37, %v2111_v46  ;;  %v2575_v2 = vld [vmem:[#allocation19_spill] sm:$0xff] }
  0x7b   : > { %v884_v53 = vadd.f32 %v840_v23, %v2114_v35  ;;  %v885_v54 = vadd.f32 %v843_v45, %v2117_v16  ;;  %v886_v55 = vadd.f32 %v845_v48, %v2120_v36  ;;  %v887_v1 = vadd.f32 %v848_v40, %v2123_v57  ;;  %v2579_v37 = vld [vmem:[#allocation23_spill] sm:$0xff] }
  0x7c   : > { %v888_v18 = vadd.f32 %v850_v9, %v2126_v21  ;;  %v889_v61 = vadd.f32 %v853_v31, %v2129_v7  ;;  %v890_v4 = vadd.f32 %v855_v38, %v2132_v13  ;;  %v891_v8 = vadd.f32 %v858_v63, %v2135_v19 }
  0x7d   : > { %v892_v6 = vadd.f32 %v860_v44, %v2138_v17  ;;  %v898_v46 = vmul.f32 %v1725_v10, %v1458_v51  ;;  %v899_v35 = vmul.f32 %v1727_v11, %v1458_v51  ;;  %v900_v16 = vmul.f32 %v1458_v51, %v2529_v41 }
  0x7e   : > { %v901_v36 = vmul.f32 %v1458_v51, %v2530_v3  ;;  %v902_v57 = vmul.f32 %v2559_v32, %v1458_v51  ;;  %v903_v21 = vmul.f32 %v2560_v12, %v1458_v51  ;;  %v904_v7 = vmul.f32 %v1458_v51, %v2562_v26 }
  0x7f   : > { %v905_v13 = vmul.f32 %v1458_v51, %v2563_v34  ;;  %v906_v19 = vmul.f32 %v2573_v52, %v1458_v51  ;;  %v907_v17 = vmul.f32 %v2574_v59, %v1458_v51  ;;  %v908_v25 = vmul.f32 %v1458_v51, %v2575_v2 }
  0x80   : > { %v909_v56 = vmul.f32 %v1458_v51, %v2576_v29  ;;  %v910_v28 = vmul.f32 %v2577_v30, %v1458_v51  ;;  %v911_v58 = vmul.f32 %v2578_v62, %v1458_v51  ;;  %v912_v23 = vmul.f32 %v1458_v51, %v2579_v37 }
  0x81   : > { %v913_v42 = vmul.f32 %v1458_v51, %v2580_v47  ;;  %v2215_v45 = vadd.f32 %v898_v46, %v877_v24  ;;  %v2217_v48 = vadd.f32 %v899_v35, %v878_v33  ;;  %v2219_v0 = vadd.f32 %v900_v16, %v879_v14  ;;  %v2584_v46 = vld [vmem:[#allocation14_spill] sm:$0xff] }
  0x82   : > { %v2221_v5 = vadd.f32 %v901_v36, %v880_v60  ;;  %v2223_v40 = vadd.f32 %v902_v57, %v881_v50  ;;  %v2225_v9 = vadd.f32 %v903_v21, %v882_v43  ;;  %v2230_v27 = vadd.f32 %v904_v7, %v883_v39  ;;  %v2581_v43 = vld [vmem:[#allocation5_spill] sm:$0xff]  ;;  %v2585_v57 = vld [vmem:[#allocation18_spill] sm:$0xff] }
  0x83   : > { %v2232_v31 = vadd.f32 %v905_v13, %v884_v53  ;;  %v2234_v49 = vadd.f32 %v906_v19, %v885_v54  ;;  %v2236_v22 = vadd.f32 %v907_v17, %v886_v55  ;;  %v2238_v24 = vadd.f32 %v908_v25, %v887_v1  ;;  %v2582_v54 = vld [vmem:[#allocation8_spill] sm:$0xff]  ;;  %v2586_v19 = vld [vmem:[#allocation21_spill] sm:$0xff] }
  0x84   : > { %v2240_v38 = vadd.f32 %v909_v56, %v888_v18  ;;  %v2242_v33 = vadd.f32 %v910_v28, %v889_v61  ;;  %v2244_v14 = vadd.f32 %v911_v58, %v890_v4  ;;  %v2246_v60 = vadd.f32 %v912_v23, %v891_v8  ;;  %v2583_v61 = vld [vmem:[#allocation9_spill] sm:$0xff] }
  0x85   : > { %v2248_v63 = vadd.f32 %v913_v42, %v892_v6  ;;  %v935_v44 = vmul.f32 %v1725_v10, %v1459_v15  ;;  %v936_v50 = vmul.f32 %v1727_v11, %v1459_v15  ;;  %v937_v51 = vmul.f32 %v1459_v15, %v2581_v43  ;;  %v2587_v42 = vld [vmem:[#allocation17_spill] sm:$0xff] }
  0x86   : > { %v938_v39 = vmul.f32 %v1459_v15, %v2529_v41  ;;  %v939_v53 = vmul.f32 %v1459_v15, %v2530_v3  ;;  %v940_v55 = vmul.f32 %v1459_v15, %v2582_v54  ;;  %v941_v1 = vmul.f32 %v2559_v32, %v1459_v15 }
  0x87   : > { %v942_v18 = vmul.f32 %v2560_v12, %v1459_v15  ;;  %v943_v4 = vmul.f32 %v1459_v15, %v2583_v61  ;;  %v944_v8 = vmul.f32 %v1459_v15, %v2562_v26  ;;  %v945_v6 = vmul.f32 %v1459_v15, %v2563_v34 }
  0x88   : > { %v946_v35 = vmul.f32 %v1459_v15, %v2584_v46  ;;  %v947_v16 = vmul.f32 %v2573_v52, %v1459_v15  ;;  %v948_v36 = vmul.f32 %v2574_v59, %v1459_v15  ;;  %v949_v21 = vmul.f32 %v1459_v15, %v2585_v57 }
  0x89   : > { %v950_v7 = vmul.f32 %v1459_v15, %v2575_v2  ;;  %v951_v13 = vmul.f32 %v1459_v15, %v2576_v29  ;;  %v952_v17 = vmul.f32 %v1459_v15, %v2586_v19  ;;  %v953_v25 = vmul.f32 %v2577_v30, %v1459_v15 }
  0x8a   : > { %v954_v56 = vmul.f32 %v2578_v62, %v1459_v15  ;;  %v955_v28 = vmul.f32 %v1459_v15, %v2557_v20  ;;  %v956_v58 = vmul.f32 %v1459_v15, %v2579_v37  ;;  %v957_v23 = vmul.f32 %v1459_v15, %v2580_v47 }
  0x8b   : > { %v2588_v59 = vunpack.c.l.bf16 %v2587_v42  ;;  %v983_v57 = vrot.slane %v935_v44, 1  ;;  %v984_v46 = vrot.slane %v936_v50, 1  ;;  %v986_v2 = vrot.slane %v937_v51, 1 }
  0x8c   : > { %v988_v34 = vrot.slane %v938_v39, 1  ;;  %v989_v29 = vrot.slane %v939_v53, 1  ;;  %v991_v26 = vrot.slane %v940_v55, 1  ;;  %v993_v30 = vrot.slane %v941_v1, 1 }
  0x8d   : > { %v958_v52 = vmul.f32 %v1459_v15, %v2588_v59  ;;  %v985_v19 = vsel %vm407_vm0, %v983_v57, %v984_v46  ;;  %v994_v61 = vrot.slane %v942_v18, 1  ;;  %v996_v62 = vrot.slane %v943_v4, 1 }
  0x8e   : > { %v987_v20 = vsel %vm407_vm0, %v984_v46, %v986_v2  ;;  %v990_v37 = vsel %vm407_vm0, %v988_v34, %v989_v29  ;;  %v992_v47 = vsel %vm407_vm0, %v989_v29, %v991_v26  ;;  %v998_v12 = vrot.slane %v944_v8, 1 }
  0x8f   : > { %v995_v59 = vsel %vm407_vm0, %v993_v30, %v994_v61  ;;  %v997_v15 = vsel %vm407_vm0, %v994_v61, %v996_v62  ;;  %v999_v44 = vrot.slane %v945_v6, 1  ;;  %v1001_v50 = vrot.slane %v946_v35, 1 }
  0x90   : > { %v1003_v51 = vrot.slane %v947_v16, 1  ;;  %v1004_v39 = vrot.slane %v948_v36, 1  ;;  %v1006_v53 = vrot.slane %v949_v21, 1  ;;  %v1008_v55 = vrot.slane %v950_v7, 1 }
  0x91   : > { %v1000_v1 = vsel %vm407_vm0, %v998_v12, %v999_v44  ;;  %v1002_v18 = vsel %vm407_vm0, %v999_v44, %v1001_v50  ;;  %v1009_v2 = vrot.slane %v951_v13, 1  ;;  %v1011_v4 = vrot.slane %v952_v17, 1 }
  0x92   : > { %v1005_v34 = vsel %vm407_vm0, %v1003_v51, %v1004_v39  ;;  %v1007_v26 = vsel %vm407_vm0, %v1004_v39, %v1006_v53  ;;  %v1013_v29 = vrot.slane %v953_v25, 1  ;;  %v1014_v30 = vrot.slane %v954_v56, 1  ;;  %v2589_v56 = vld [vmem:[#allocation4_spill] sm:$0xff] }
  0x93   : > { %v1010_v62 = vsel %vm407_vm0, %v1008_v55, %v1009_v2  ;;  %v1012_v61 = vsel %vm407_vm0, %v1009_v2, %v1011_v4  ;;  %v1016_v8 = vrot.slane %v955_v28, 1  ;;  %v1018_v6 = vrot.slane %v956_v58, 1  ;;  %v2590_v28 = vld [vmem:[#allocation9_spill] sm:$0xff]  ;;  %v2601_v4 = vld [vmem:[#allocation16_spill] sm:$0xff] }
  0x94   : > { %v1015_v46 = vsel %vm407_vm0, %v1013_v29, %v1014_v30  ;;  %v1019_v35 = vrot.slane %v957_v23, 1  ;;  %v1021_v12 = vrot.slane %v958_v52, 1  ;;  %v2289_v16 = vadd.f32 %v985_v19, %v2215_v45  ;;  %v2599_v55 = vld [vmem:[#allocation21_spill] sm:$0xff] }
  0x95   : > { %v1017_v36 = vsel %vm407_vm0, %v1014_v30, %v1016_v8  ;;  %v2293_v57 = vadd.f32 %v987_v20, %v2217_v48  ;;  %v2296_v21 = vadd.f32 %v990_v37, %v2219_v0  ;;  %v2299_v7 = vadd.f32 %v992_v47, %v2221_v5  ;;  %v1460_v20 = vld [vmem:[%s2436_s1 + $0x8] ss:$0 sm:$0xff] }
  0x96   : > { %v1020_v13 = vsel %vm407_vm0, %v1018_v6, %v1019_v35  ;;  %v1022_v17 = vsel %vm407_vm0, %v1019_v35, %v1021_v12  ;;  %v2304_v52 = vadd.f32 %v995_v59, %v2223_v40  ;;  %v2307_v45 = vadd.f32 %v997_v15, %v2225_v9  ;;  %v2592_v59 = vld [vmem:[#allocation13_spill] sm:$0xff]  ;;  %v2593_v15 = vld [vmem:[#allocation14_spill] sm:$0xff]  ;;  %v2603_v30 = vld [vmem:[#allocation23_spill] sm:$0xff] }
  0x97   : > { %v2313_v37 = vadd.f32 %v1000_v1, %v2230_v27  ;;  %v2316_v47 = vadd.f32 %v1002_v18, %v2232_v31  ;;  %v2319_v48 = vadd.f32 %v1005_v34, %v2234_v49  ;;  %v2322_v0 = vadd.f32 %v1007_v26, %v2236_v22  ;;  %v2600_v18 = vld [vmem:[#allocation15_spill] sm:$0xff]  ;;  %v2602_v26 = vld [vmem:[#allocation22_spill] sm:$0xff] }
  0x98   : > { %v2325_v5 = vadd.f32 %v1010_v62, %v2238_v24  ;;  %v2328_v40 = vadd.f32 %v1012_v61, %v2240_v38  ;;  %v2331_v9 = vadd.f32 %v1015_v46, %v2242_v33  ;;  %v2334_v27 = vadd.f32 %v1017_v36, %v2244_v14  ;;  %v2604_v61 = vld [vmem:[#allocation24_spill] sm:$0xff] }
  0x99   : > { %v2337_v31 = vadd.f32 %v1020_v13, %v2246_v60  ;;  %v2340_v49 = vadd.f32 %v1022_v17, %v2248_v63  ;;  %v1060_v22 = vmul.f32 %v1725_v10, %v1460_v20  ;;  %v1061_v24 = vmul.f32 %v1727_v11, %v1460_v20  ;;  %v2591_v63 = vld [vmem:[#allocation10_spill] sm:$0xff] }
  0x9a   : > { %v1062_v19 = vmul.f32 %v1460_v20, %v2581_v43  ;;  %v1063_v38 = vmul.f32 %v1460_v20, %v2529_v41  ;;  %v1064_v33 = vmul.f32 %v1460_v20, %v2530_v3  ;;  %v1065_v25 = vmul.f32 %v1460_v20, %v2582_v54  ;;  %v2594_v43 = vld [vmem:[#allocation11_spill] sm:$0xff]  ;;  %v2595_v41 = vld [vmem:[#allocation12_spill] sm:$0xff]  ;;  %v2596_v3 = vld [vmem:[#allocation18_spill] sm:$0xff] }
  0x9b   : > { %v1066_v14 = vmul.f32 %v2559_v32, %v1460_v20  ;;  %v1067_v60 = vmul.f32 %v2589_v56, %v1460_v20  ;;  %v1068_v58 = vmul.f32 %v1460_v20, %v2590_v28  ;;  %v1069_v23 = vmul.f32 %v1460_v20, %v2591_v63  ;;  %v2597_v54 = vld [vmem:[#allocation19_spill] sm:$0xff]  ;;  %v2598_v32 = vld [vmem:[#allocation20_spill] sm:$0xff] }
  0x9c   : > { %v1070_v10 = vmul.f32 %v1460_v20, %v2592_v59  ;;  %v1071_v11 = vmul.f32 %v1460_v20, %v2593_v15  ;;  %v1072_v44 = vmul.f32 %v2594_v43, %v1460_v20  ;;  %v1073_v50 = vmul.f32 %v2595_v41, %v1460_v20 }
  0x9d   : > { %v1074_v51 = vmul.f32 %v1460_v20, %v2596_v3  ;;  %v1075_v39 = vmul.f32 %v1460_v20, %v2597_v54  ;;  %v1076_v53 = vmul.f32 %v1460_v20, %v2598_v32  ;;  %v1077_v1 = vmul.f32 %v1460_v20, %v2599_v55 }
  0x9e   : > { %v1078_v2 = vmul.f32 %v2600_v18, %v1460_v20  ;;  %v1079_v34 = vmul.f32 %v2601_v4, %v1460_v20  ;;  %v1080_v29 = vmul.f32 %v1460_v20, %v2602_v26  ;;  %v1081_v62 = vmul.f32 %v1460_v20, %v2603_v30 }
  0x9f   : > { %v1082_v8 = vmul.f32 %v1460_v20, %v2604_v61  ;;  %v2605_v6 = vunpack.c.l.bf16 %v2587_v42  ;;  %v1108_v35 = vrot.slane %v1060_v22, 2  ;;  %v1109_v12 = vrot.slane %v1061_v24, 2 }
  0xa0   : > { %v1111_v36 = vrot.slane %v1062_v19, 2  ;;  %v1113_v13 = vrot.slane %v1063_v38, 2  ;;  %v1114_v17 = vrot.slane %v1064_v33, 2  ;;  %v1116_v56 = vrot.slane %v1065_v25, 2 }
  0xa1   : > { %v1083_v46 = vmul.f32 %v1460_v20, %v2605_v6  ;;  %v1110_v28 = vsel %vm533_vm1, %v1108_v35, %v1109_v12  ;;  %v1118_v63 = vrot.slane %v1066_v14, 2  ;;  %v1119_v59 = vrot.slane %v1067_v60, 2 }
  0xa2   : > { %v1121_v15 = vrot.slane %v1068_v58, 2  ;;  %v1112_v43 = vsel %vm533_vm1, %v1109_v12, %v1111_v36  ;;  %v1115_v41 = vsel %vm533_vm1, %v1113_v13, %v1114_v17  ;;  %v1117_v42 = vsel %vm533_vm1, %v1114_v17, %v1116_v56 }
  0xa3   : > { %v1123_v20 = vrot.slane %v1069_v23, 2  ;;  %v1120_v22 = vsel %vm533_vm1, %v1118_v63, %v1119_v59  ;;  %v1124_v19 = vrot.slane %v1070_v10, 2  ;;  %v1126_v38 = vrot.slane %v1071_v11, 2 }
  0xa4   : > { %v1122_v24 = vsel %vm533_vm1, %v1119_v59, %v1121_v15  ;;  %v1128_v33 = vrot.slane %v1072_v44, 2  ;;  %v1129_v25 = vrot.slane %v1073_v50, 2  ;;  %v1131_v14 = vrot.slane %v1074_v51, 2 }
  0xa5   : > { %v1133_v60 = vrot.slane %v1075_v39, 2  ;;  %v1125_v58 = vsel %vm533_vm1, %v1123_v20, %v1124_v19  ;;  %v1127_v23 = vsel %vm533_vm1, %v1124_v19, %v1126_v38  ;;  %v1134_v3 = vrot.slane %v1076_v53, 2 }
  0xa6   : > { %v1136_v54 = vrot.slane %v1077_v1, 2  ;;  %v1130_v32 = vsel %vm533_vm1, %v1128_v33, %v1129_v25  ;;  %v1132_v55 = vsel %vm533_vm1, %v1129_v25, %v1131_v14  ;;  %v1138_v18 = vrot.slane %v1078_v2, 2 }
  0xa7   : > { %v1139_v4 = vrot.slane %v1079_v34, 2  ;;  %v1135_v10 = vsel %vm533_vm1, %v1133_v60, %v1134_v3  ;;  %v1141_v44 = vrot.slane %v1080_v29, 2  ;;  %v1143_v50 = vrot.slane %v1081_v62, 2 }
  0xa8   : > { %v1137_v11 = vsel %vm533_vm1, %v1134_v3, %v1136_v54  ;;  %v1144_v39 = vrot.slane %v1082_v8, 2  ;;  %v1146_v53 = vrot.slane %v1083_v46, 2  ;;  %v1164_v1 = vadd.f32 %v1110_v28, %v2289_v16  ;;  %v1461_v16 = vld [vmem:[%s2437_s2] ss:$0 sm:$0xff] }
  0xa9   : > { %v1140_v51 = vsel %vm533_vm1, %v1138_v18, %v1139_v4  ;;  %v1142_v2 = vsel %vm533_vm1, %v1139_v4, %v1141_v44  ;;  %v1165_v34 = vadd.f32 %v1112_v43, %v2293_v57  ;;  %v1166_v26 = vadd.f32 %v1115_v41, %v2296_v21 }
  0xaa   : > { %v1167_v30 = vadd.f32 %v1117_v42, %v2299_v7  ;;  %v1145_v61 = vsel %vm533_vm1, %v1143_v50, %v1144_v39  ;;  %v1147_v29 = vsel %vm533_vm1, %v1144_v39, %v1146_v53  ;;  %v1168_v62 = vadd.f32 %v1120_v22, %v2304_v52 }
  0xab   : > { %v1169_v6 = vadd.f32 %v1122_v24, %v2307_v45  ;;  %v1170_v57 = vadd.f32 %v1125_v58, %v2313_v37  ;;  %v1171_v21 = vadd.f32 %v1127_v23, %v2316_v47  ;;  %v1172_v7 = vadd.f32 %v1130_v32, %v2319_v48 }
  0xac   : > { %v1173_v8 = vadd.f32 %v1132_v55, %v2322_v0  ;;  %v1174_v46 = vadd.f32 %v1135_v10, %v2325_v5  ;;  %v1175_v52 = vadd.f32 %v1137_v11, %v2328_v40  ;;  %v1176_v45 = vadd.f32 %v1140_v51, %v2331_v9 }
  0xad   : > { %v1177_v35 = vadd.f32 %v1142_v2, %v2334_v27  ;;  %v1178_v12 = vadd.f32 %v1145_v61, %v2337_v31  ;;  %v1179_v36 = vadd.f32 %v1147_v29, %v2340_v49  ;;  %v1187_v13 = vadd.f32 %v1461_v16, %v1164_v1 }
  0xae   : > { %v1188_v37 = vadd.f32 %v1461_v16, %v1165_v34  ;;  %v1189_v47 = vadd.f32 %v1461_v16, %v1166_v26  ;;  %v1190_v17 = vadd.f32 %v1461_v16, %v1167_v30  ;;  %v1191_v48 = vadd.f32 %v1461_v16, %v1168_v62 }
  0xaf   : > { %v1192_v56 = vadd.f32 %v1461_v16, %v1169_v6  ;;  %v1193_v0 = vadd.f32 %v1461_v16, %v1170_v57  ;;  %v1194_v28 = vadd.f32 %v1461_v16, %v1171_v21  ;;  %v1195_v5 = vadd.f32 %v1461_v16, %v1172_v7 }
  0xb0   : > { %v1196_v63 = vadd.f32 %v1461_v16, %v1173_v8  ;;  %v1197_v40 = vadd.f32 %v1461_v16, %v1174_v46  ;;  %v1198_v59 = vadd.f32 %v1461_v16, %v1175_v52  ;;  %v1199_v9 = vadd.f32 %v1461_v16, %v1176_v45 }
  0xb1   : > { %v1200_v15 = vadd.f32 %v1461_v16, %v1177_v35  ;;  %v1201_v27 = vadd.f32 %v1461_v16, %v1178_v12  ;;  %v1202_v31 = vadd.f32 %v1461_v16, %v1179_v36  ;;  %v1203_v43 = vmax.f32 %v1187_v13, 0.0 }
  0xb2   : > { %v1204_v49 = vmax.f32 %v1188_v37, 0.0  ;;  %v1205_v41 = vmax.f32 %v1189_v47, 0.0  ;;  %v1206_v42 = vmax.f32 %v1190_v17, 0.0  ;;  %v1207_v20 = vmax.f32 %v1191_v48, 0.0 }
  0xb3   : > { %v1208_v22 = vmax.f32 %v1192_v56, 0.0  ;;  %v1209_v24 = vmax.f32 %v1193_v0, 0.0  ;;  %v1210_v19 = vmax.f32 %v1194_v28, 0.0  ;;  %v1211_v38 = vmax.f32 %v1195_v5, 0.0 }
  0xb4   : > { %v1212_v33 = vmax.f32 %v1196_v63, 0.0  ;;  %v1213_v25 = vmax.f32 %v1197_v40, 0.0  ;;  %v1214_v14 = vmax.f32 %v1198_v59, 0.0  ;;  %v1215_v60 = vmax.f32 %v1199_v9, 0.0 }
  0xb5   : > { %v1216_v58 = vmax.f32 %v1200_v15, 0.0  ;;  %v1217_v23 = vmax.f32 %v1201_v27, 0.0  ;;  %v1218_v3 = vmax.f32 %v1202_v31, 0.0  ;;  %v1520_v54 = vpack.c.bf16 %v1204_v49, %v1203_v43 }
  0xb6   : > { %v1525_v32 = vpack.c.bf16 %v1206_v42, %v1205_v41  ;;  %v1530_v55 = vpack.c.bf16 %v1208_v22, %v1207_v20  ;;  %v1535_v18 = vpack.c.bf16 %v1210_v19, %v1209_v24  ;;  %v1540_v4 = vpack.c.bf16 %v1212_v33, %v1211_v38 }
  0xb7   : > { %v1545_v10 = vpack.c.bf16 %v1214_v14, %v1213_v25  ;;  %1521 = vst [vmem:[%s251_s4] sm:$0xff] %v1520_v54   ;;  %v1550_v11 = vpack.c.bf16 %v1216_v58, %v1215_v60  ;;  %v1555_v44 = vpack.c.bf16 %v1218_v3, %v1217_v23 }
  0xb8   : > { %1561 = vst [vmem:[%s251_s4 + $0x8] sm:$0xff] %v1525_v32   ;;  %1562 = vst [vmem:[%s251_s4 + $0x10] sm:$0xff] %v1530_v55  }
  0xb9   : > { %1563 = vst [vmem:[%s251_s4 + $0x18] sm:$0xff] %v1535_v18   ;;  %1564 = vst [vmem:[%s251_s4 + $0x20] sm:$0xff] %v1540_v4  }
  0xba   : > { %1565 = vst [vmem:[%s251_s4 + $0x28] sm:$0xff] %v1545_v10   ;;  %1566 = vst [vmem:[%s251_s4 + $0x30] sm:$0xff] %v1550_v11  }
  0xbb   : > { %1567 = vst [vmem:[%s251_s4 + $0x38] sm:$0xff] %v1555_v44  }
  0xbc PF: > { %s13_s16 = sadd.s32 1, %s1647_s16   ;;  %s2607_s12 = smov %s1639_s14 }
  0xbd   : > { %p10_p7 = scmp.ge.s32.totalorder %s13_s16, 6   ;;  %s2608_s13 = smov %s1643_s15 }
  0xbe   : > { %s2609_s14 = smov %s2612_s17  ;;  %s2610_s15 = smov %s2616_s18 }
  0xbf   :  { %12 = sbr.rel (!%p10_p7) target bundleno = 3 (0x3), region = 69 }

// kernel: _lambda_.24
= control target key start
LH: loop header
LB: loop body
LE: loop exit
PB: predicated region body
PF: predicated region fallthrough
CT: control target
= control target key end

     0   :  { %s1126_s12 = smov 0   ;;  %s1247_s0 = inlined_call_operand.vmem [shape: bf16[512,128], index: 0, kind: input, shape index: {}]   ;;  %s1248_s1 = inlined_call_operand.vmem [shape: bf16[128,128], index: 1, kind: input, shape index: {}]   ;;  %s1249_s2 = inlined_call_operand.vmem [shape: f32[1,128], index: 2, kind: input, shape index: {}]   ;;  %s1250_s3 = inlined_call_operand.vmem [shape: bf16[512,128], index: 3, kind: output, shape index: {}]  }
   0x1 LB: > { %s783_s13 = sadd.s32 4294967295, %s1104_s12   ;;  %p787_p0 = scmp.ge.s32.totalorder %s1104_s12, 1  ;;  %s1104_s12 = sphi %s1126_s12, %s13_s12  }
   0x2   : > { %p138_p1 = scmp.lt.s32.totalorder %s1104_s12, 3 }
   0x4   : > { %p139_p2 = pnand %p787_p0, %p138_p1 }
   0x5   : > { %v1074_v0 = vld [vmem:[%s1248_s1] sm:$0xff] (!%p139_p2)   ;;  %s788_s16 = sshll.u32 (!%p139_p2), %s783_s13, 5  ;;  %v1075_v1 = vld [vmem:[%s1248_s1 + $0x8] sm:$0xff] (!%p139_p2)   ;;  %v1076_v2 = vld [vmem:[%s1248_s1 + $0x10] sm:$0xff] (!%p139_p2)  }
   0x6   : > { %142 = sbr.rel (%p139_p2) target bundleno = 284 (0x11c), region = 32  ;;  %p163_p3 = scmp.lt.s32.totalorder (!%p139_p2), %s788_s16, 63  ;;  %1002 = vmatprep.subr.bf16.mxu0 (!%p139_p2), %v1074_v0  ;;  %1050 = vmatprep.subr.bf16.mxu1 (!%p139_p2), %v1074_v0  ;;  %v1077_v3 = vld [vmem:[%s1248_s1 + $0x18] sm:$0xff] (!%p139_p2)   ;;  %v1078_v6 = vld [vmem:[%s1248_s1 + $0x20] sm:$0xff] (!%p139_p2)   ;;  %v1079_v7 = vld [vmem:[%s1248_s1 + $0x28] sm:$0xff] (!%p139_p2)  }
   0x7   : > { %1003 = vmatpush3.bf16.msra.mxu0 (!%p139_p2), %v1074_v0  ;;  %1058 = vmatpush3.bf16.msra.mxu1 (!%p139_p2), %v1074_v0  ;;  %v1080_v8 = vld [vmem:[%s1248_s1 + $0x30] sm:$0xff] (!%p139_p2)   ;;  %v1081_v9 = vld [vmem:[%s1248_s1 + $0x38] sm:$0xff] (!%p139_p2)   ;;  %v1187_v24 = vld [vmem:[%s1249_s2] ss:$0 sm:$0xff] (!%p139_p2) }
   0x8   : > { %1004 = vmatprep.subr.bf16.mxu0 (!%p139_p2), %v1075_v1  ;;  %1051 = vmatprep.subr.bf16.mxu1 (!%p139_p2), %v1075_v1 }
   0xb   : > { %1005 = vmatpush3.bf16.msra.mxu0 (!%p139_p2), %v1075_v1  ;;  %1059 = vmatpush3.bf16.msra.mxu1 (!%p139_p2), %v1075_v1 }
   0xc   : > { %1006 = vmatprep.subr.bf16.mxu0 (!%p139_p2), %v1076_v2  ;;  %1052 = vmatprep.subr.bf16.mxu1 (!%p139_p2), %v1076_v2 }
   0xd   : > { %s1252_s16 = smov (!%p163_p3, %s788_s16), 63 }
   0xe   : > { %s789_s21 = sshll.u32 %s1252_s16, 2 }
   0xf   : > { %s1151_s24 = scalar_lea.vmem %s1247_s0, %s789_s21  ;;  %1007 = vmatpush3.bf16.msra.mxu0 %v1076_v2  ;;  %1060 = vmatpush3.bf16.msra.mxu1 %v1076_v2  ;;  %s1202_s13 = scalar_lea.vmem %s1250_s3, %s789_s21 }
  0x10   : > { %v1082_v4 = vld [vmem:[%s1151_s24] sm:$0xff]   ;;  %1008 = vmatprep.subr.bf16.mxu0 %v1077_v3  ;;  %1053 = vmatprep.subr.bf16.mxu1 %v1077_v3  ;;  %v1084_v10 = vld [vmem:[%s1151_s24 + $0x8] sm:$0xff]   ;;  %v1086_v12 = vld [vmem:[%s1151_s24 + $0x10] sm:$0xff]  }
  0x11   : > { %v1083_v5 = vld [vmem:[%s1151_s24 + $0x40] sm:$0xff]   ;;  %1018 = vmatprep.mubr.bf16.mxu0 %v1082_v4  ;;  %v1085_v11 = vld [vmem:[%s1151_s24 + $0x48] sm:$0xff]   ;;  %v1087_v13 = vld [vmem:[%s1151_s24 + $0x50] sm:$0xff]  }
  0x12   : > { %1034 = vmatprep.mubr.bf16.mxu1 %v1083_v5  ;;  %v1088_v14 = vld [vmem:[%s1151_s24 + $0x18] sm:$0xff]   ;;  %v1090_v16 = vld [vmem:[%s1151_s24 + $0x20] sm:$0xff]   ;;  %v1092_v18 = vld [vmem:[%s1151_s24 + $0x28] sm:$0xff]  }
  0x13   : > { %1009 = vmatpush3.bf16.msra.mxu0 %v1077_v3  ;;  %1061 = vmatpush3.bf16.msra.mxu1 %v1077_v3  ;;  %v1089_v15 = vld [vmem:[%s1151_s24 + $0x58] sm:$0xff]   ;;  %v1091_v17 = vld [vmem:[%s1151_s24 + $0x60] sm:$0xff]   ;;  %v1093_v19 = vld [vmem:[%s1151_s24 + $0x68] sm:$0xff]  }
  0x14   : > { %1010 = vmatprep.subr.bf16.mxu0 %v1078_v6  ;;  %1054 = vmatprep.subr.bf16.mxu1 %v1078_v6  ;;  %v1094_v20 = vld [vmem:[%s1151_s24 + $0x30] sm:$0xff]   ;;  %v1096_v22 = vld [vmem:[%s1151_s24 + $0x38] sm:$0xff]  }
  0x15   : > { %v1095_v21 = vld [vmem:[%s1151_s24 + $0x70] sm:$0xff]   ;;  %v1097_v23 = vld [vmem:[%s1151_s24 + $0x78] sm:$0xff]  }
  0x17   : > { %1011 = vmatpush3.bf16.msra.mxu0 %v1078_v6  ;;  %1062 = vmatpush3.bf16.msra.mxu1 %v1078_v6 }
  0x18   : > { %1012 = vmatprep.subr.bf16.mxu0 %v1079_v7  ;;  %1055 = vmatprep.subr.bf16.mxu1 %v1079_v7 }
  0x1b   : > { %1013 = vmatpush3.bf16.msra.mxu0 %v1079_v7  ;;  %1063 = vmatpush3.bf16.msra.mxu1 %v1079_v7 }
  0x1c   : > { %1014 = vmatprep.subr.bf16.mxu0 %v1080_v8  ;;  %1056 = vmatprep.subr.bf16.mxu1 %v1080_v8 }
  0x1f   : > { %1015 = vmatpush3.bf16.msra.mxu0 %v1080_v8  ;;  %1064 = vmatpush3.bf16.msra.mxu1 %v1080_v8 }
  0x20   : > { %1016 = vmatprep.subr.bf16.mxu0 %v1081_v9  ;;  %1057 = vmatprep.subr.bf16.mxu1 %v1081_v9 }
  0x23   : > { %1017 = vmatpush3.bf16.msra.mxu0 %v1081_v9  ;;  %1065 = vmatpush3.bf16.msra.mxu1 %v1081_v9 }
  0x26   : > { %1019 = vmatmul.mubr.bf16.vlgmr.msra.gmra.mrb[0].mxu0 %v1084_v10  ;;  %1035 = vmatmul.mubr.bf16.vlgmr.msra.gmra.mrb[0].mxu1 %v1085_v11 }
  0x27   : > { %1022 = vmatprep.mubr.bf16.mxu0 %v1086_v12  ;;  %1038 = vmatprep.mubr.bf16.mxu1 %v1087_v13 }
  0x2e   : > { %1023 = vmatmul.mubr.bf16.gmra.mrb[4].mxu0 %v1088_v14  ;;  %1039 = vmatmul.mubr.bf16.gmra.mrb[4].mxu1 %v1089_v15 }
  0x2f   : > { %1026 = vmatprep.mubr.bf16.mxu0 %v1090_v16  ;;  %1042 = vmatprep.mubr.bf16.mxu1 %v1091_v17 }
  0x36   : > { %1027 = vmatmul.mubr.bf16.gmra.mrb[8].mxu0 %v1092_v18  ;;  %1043 = vmatmul.mubr.bf16.gmra.mrb[8].mxu1 %v1093_v19 }
  0x37   : > { %1030 = vmatprep.mubr.bf16.mxu0 %v1094_v20  ;;  %1046 = vmatprep.mubr.bf16.mxu1 %v1095_v21 }
  0x3e   : > { %1031 = vmatmul.mubr.bf16.gmra.mrb[12].mxu0 %v1096_v22  ;;  %1047 = vmatmul.mubr.bf16.gmra.mrb[12].mxu1 %v1097_v23 }
  0xf9   : > { %v1020_v25 = vpop.f32.mrb[0].mxu0  ;;  %v1036_v26 = vpop.f32.mrb[0].mxu1 }
  0xfa   : > { %v417_v27 = vadd.f32 %v1020_v25, %v1187_v24  ;;  %v481_v28 = vadd.f32 %v1036_v26, %v1187_v24  ;;  %v408_v29 = vpop.f32.mrb[1].mxu0  ;;  %v472_v30 = vpop.f32.mrb[1].mxu1 }
  0xfb   : > { %v409_v31 = vadd.f32 %v1187_v24, %v408_v29  ;;  %v473_v32 = vadd.f32 %v1187_v24, %v472_v30  ;;  %v1021_v33 = vpop.f32.mrb[2].mxu0  ;;  %v1037_v34 = vpop.f32.mrb[2].mxu1 }
  0xfc   : > { %v420_v35 = vadd.f32 %v1021_v33, %v1187_v24  ;;  %v484_v36 = vadd.f32 %v1037_v34, %v1187_v24  ;;  %v411_v37 = vpop.f32.mrb[3].mxu0  ;;  %v475_v38 = vpop.f32.mrb[3].mxu1  ;;  %v537_v41 = vmax.f32 %v417_v27, 0.0  ;;  %v553_v42 = vmax.f32 %v481_v28, 0.0 }
  0xfd   : > { %v412_v39 = vadd.f32 %v1187_v24, %v411_v37  ;;  %v476_v40 = vadd.f32 %v1187_v24, %v475_v38  ;;  %v535_v45 = vmax.f32 %v409_v31, 0.0  ;;  %v551_v46 = vmax.f32 %v473_v32, 0.0 }
  0xfe   : > { %v538_v43 = vmax.f32 %v420_v35, 0.0  ;;  %v554_v44 = vmax.f32 %v484_v36, 0.0 }
  0xff   : > { %v536_v47 = vmax.f32 %v412_v39, 0.0  ;;  %v552_v48 = vmax.f32 %v476_v40, 0.0 }
 0x100   : > { %v891_v49 = vpack.c.bf16 %v538_v43, %v537_v41  ;;  %v931_v50 = vpack.c.bf16 %v554_v44, %v553_v42 }
 0x101   : > { %v886_v51 = vpack.c.bf16 %v536_v47, %v535_v45  ;;  %v926_v52 = vpack.c.bf16 %v552_v48, %v551_v46  ;;  %v1024_v53 = vpop.f32.mrb[4].mxu0  ;;  %v1040_v54 = vpop.f32.mrb[4].mxu1 }
 0x102   : > { %963 = vst [vmem:[%s1202_s13 + $0x8] sm:$0xff] %v891_v49   ;;  %971 = vst [vmem:[%s1202_s13 + $0x48] sm:$0xff] %v931_v50   ;;  %v433_v55 = vadd.f32 %v1024_v53, %v1187_v24  ;;  %v497_v56 = vadd.f32 %v1040_v54, %v1187_v24  ;;  %v424_v57 = vpop.f32.mrb[5].mxu0  ;;  %v488_v58 = vpop.f32.mrb[5].mxu1 }
 0x103   : > { %887 = vst [vmem:[%s1202_s13] sm:$0xff] %v886_v51   ;;  %970 = vst [vmem:[%s1202_s13 + $0x40] sm:$0xff] %v926_v52   ;;  %v425_v59 = vadd.f32 %v1187_v24, %v424_v57  ;;  %v489_v60 = vadd.f32 %v1187_v24, %v488_v58  ;;  %v1025_v61 = vpop.f32.mrb[6].mxu0  ;;  %v1041_v62 = vpop.f32.mrb[6].mxu1 }
 0x104   : > { %v436_v63 = vadd.f32 %v1025_v61, %v1187_v24  ;;  %v500_v0 = vadd.f32 %v1041_v62, %v1187_v24  ;;  %v427_v1 = vpop.f32.mrb[7].mxu0  ;;  %v491_v2 = vpop.f32.mrb[7].mxu1  ;;  %v541_v5 = vmax.f32 %v433_v55, 0.0  ;;  %v557_v6 = vmax.f32 %v497_v56, 0.0 }
 0x105   : > { %v428_v3 = vadd.f32 %v1187_v24, %v427_v1  ;;  %v492_v4 = vadd.f32 %v1187_v24, %v491_v2  ;;  %v539_v9 = vmax.f32 %v425_v59, 0.0  ;;  %v555_v10 = vmax.f32 %v489_v60, 0.0 }
 0x106   : > { %v542_v7 = vmax.f32 %v436_v63, 0.0  ;;  %v558_v8 = vmax.f32 %v500_v0, 0.0 }
 0x107   : > { %v540_v11 = vmax.f32 %v428_v3, 0.0  ;;  %v556_v12 = vmax.f32 %v492_v4, 0.0 }
 0x108   : > { %v901_v13 = vpack.c.bf16 %v542_v7, %v541_v5  ;;  %v941_v14 = vpack.c.bf16 %v558_v8, %v557_v6 }
 0x109   : > { %v896_v15 = vpack.c.bf16 %v540_v11, %v539_v9  ;;  %v936_v16 = vpack.c.bf16 %v556_v12, %v555_v10  ;;  %v1028_v17 = vpop.f32.mrb[8].mxu0  ;;  %v1044_v18 = vpop.f32.mrb[8].mxu1 }
 0x10a   : > { %965 = vst [vmem:[%s1202_s13 + $0x18] sm:$0xff] %v901_v13   ;;  %973 = vst [vmem:[%s1202_s13 + $0x58] sm:$0xff] %v941_v14   ;;  %v449_v19 = vadd.f32 %v1028_v17, %v1187_v24  ;;  %v513_v20 = vadd.f32 %v1044_v18, %v1187_v24  ;;  %v440_v21 = vpop.f32.mrb[9].mxu0  ;;  %v504_v22 = vpop.f32.mrb[9].mxu1 }
 0x10b   : > { %964 = vst [vmem:[%s1202_s13 + $0x10] sm:$0xff] %v896_v15   ;;  %972 = vst [vmem:[%s1202_s13 + $0x50] sm:$0xff] %v936_v16   ;;  %v441_v23 = vadd.f32 %v1187_v24, %v440_v21  ;;  %v505_v25 = vadd.f32 %v1187_v24, %v504_v22  ;;  %v1029_v26 = vpop.f32.mrb[10].mxu0  ;;  %v1045_v27 = vpop.f32.mrb[10].mxu1 }
 0x10c   : > { %v452_v28 = vadd.f32 %v1029_v26, %v1187_v24  ;;  %v516_v29 = vadd.f32 %v1045_v27, %v1187_v24  ;;  %v443_v30 = vpop.f32.mrb[11].mxu0  ;;  %v507_v31 = vpop.f32.mrb[11].mxu1  ;;  %v545_v34 = vmax.f32 %v449_v19, 0.0  ;;  %v561_v35 = vmax.f32 %v513_v20, 0.0 }
 0x10d   : > { %v444_v32 = vadd.f32 %v1187_v24, %v443_v30  ;;  %v508_v33 = vadd.f32 %v1187_v24, %v507_v31  ;;  %v543_v38 = vmax.f32 %v441_v23, 0.0  ;;  %v559_v39 = vmax.f32 %v505_v25, 0.0 }
 0x10e   : > { %v546_v36 = vmax.f32 %v452_v28, 0.0  ;;  %v562_v37 = vmax.f32 %v516_v29, 0.0 }
 0x10f   : > { %v544_v40 = vmax.f32 %v444_v32, 0.0  ;;  %v560_v41 = vmax.f32 %v508_v33, 0.0 }
 0x110   : > { %v911_v42 = vpack.c.bf16 %v546_v36, %v545_v34  ;;  %v951_v43 = vpack.c.bf16 %v562_v37, %v561_v35 }
 0x111   : > { %v906_v44 = vpack.c.bf16 %v544_v40, %v543_v38  ;;  %v946_v45 = vpack.c.bf16 %v560_v41, %v559_v39  ;;  %v1032_v46 = vpop.f32.mrb[12].mxu0  ;;  %v1048_v47 = vpop.f32.mrb[12].mxu1 }
 0x112   : > { %967 = vst [vmem:[%s1202_s13 + $0x28] sm:$0xff] %v911_v42   ;;  %975 = vst [vmem:[%s1202_s13 + $0x68] sm:$0xff] %v951_v43   ;;  %v465_v48 = vadd.f32 %v1032_v46, %v1187_v24  ;;  %v529_v49 = vadd.f32 %v1048_v47, %v1187_v24  ;;  %v456_v50 = vpop.f32.mrb[13].mxu0  ;;  %v520_v51 = vpop.f32.mrb[13].mxu1 }
 0x113   : > { %966 = vst [vmem:[%s1202_s13 + $0x20] sm:$0xff] %v906_v44   ;;  %974 = vst [vmem:[%s1202_s13 + $0x60] sm:$0xff] %v946_v45   ;;  %v457_v52 = vadd.f32 %v1187_v24, %v456_v50  ;;  %v521_v53 = vadd.f32 %v1187_v24, %v520_v51  ;;  %v1033_v54 = vpop.f32.mrb[14].mxu0  ;;  %v1049_v55 = vpop.f32.mrb[14].mxu1 }
 0x114   : > { %v468_v56 = vadd.f32 %v1033_v54, %v1187_v24  ;;  %v532_v57 = vadd.f32 %v1049_v55, %v1187_v24  ;;  %v459_v58 = vpop.f32.mrb[15].mxu0  ;;  %v523_v59 = vpop.f32.mrb[15].mxu1  ;;  %v549_v62 = vmax.f32 %v465_v48, 0.0  ;;  %v565_v63 = vmax.f32 %v529_v49, 0.0 }
 0x115   : > { %v460_v60 = vadd.f32 %v1187_v24, %v459_v58  ;;  %v524_v61 = vadd.f32 %v1187_v24, %v523_v59  ;;  %v547_v2 = vmax.f32 %v457_v52, 0.0  ;;  %v563_v3 = vmax.f32 %v521_v53, 0.0 }
 0x116   : > { %v550_v0 = vmax.f32 %v468_v56, 0.0  ;;  %v566_v1 = vmax.f32 %v532_v57, 0.0 }
 0x117   : > { %v548_v4 = vmax.f32 %v460_v60, 0.0  ;;  %v564_v5 = vmax.f32 %v524_v61, 0.0 }
 0x118   : > { %v921_v6 = vpack.c.bf16 %v550_v0, %v549_v62  ;;  %v961_v7 = vpack.c.bf16 %v566_v1, %v565_v63 }
 0x119   : > { %v916_v8 = vpack.c.bf16 %v548_v4, %v547_v2  ;;  %v956_v9 = vpack.c.bf16 %v564_v5, %v563_v3 }
 0x11a   : > { %969 = vst [vmem:[%s1202_s13 + $0x38] sm:$0xff] %v921_v6   ;;  %977 = vst [vmem:[%s1202_s13 + $0x78] sm:$0xff] %v961_v7  }
 0x11b   : > { %968 = vst [vmem:[%s1202_s13 + $0x30] sm:$0xff] %v916_v8   ;;  %976 = vst [vmem:[%s1202_s13 + $0x70] sm:$0xff] %v956_v9  }
 0x11c PF: > { %s13_s12 = sadd.s32 1, %s1104_s12  }
 0x11d   : > { %p10_p4 = scmp.ge.s32.totalorder %s13_s12, 4  }
 0x11f   :  { %12 = sbr.rel (!%p10_p4) target bundleno = 1 (0x1), region = 62 }

// kernel: _lambda_.25
= control target key start
LH: loop header
LB: loop body
LE: loop exit
PB: predicated region body
PF: predicated region fallthrough
CT: control target
= control target key end

     0   :  { %s856_s12 = smov 0   ;;  %s858_s13 = smov 0   ;;  %s1105_s0 = inlined_call_operand.vmem [shape: bf16[2,36,9,128], index: 0, kind: input, shape index: {}]   ;;  %s1106_s1 = inlined_call_operand.vmem [shape: f32[9,128], index: 1, kind: input, shape index: {}]   ;;  %s1107_s2 = inlined_call_operand.vmem [shape: f32[1,128], index: 2, kind: input, shape index: {}]   ;;  %s1108_s3 = inlined_call_operand.vmem [shape: bf16[2,8,8,128], index: 3, kind: output, shape index: {}]  }
   0x1   :  { %s860_s14 = smov 0   ;;  %s862_s15 = smov 0  }
   0x2   :  { %s864_s16 = smov 0  }
   0x3 LB: > { %s25_s17 = sadd.s32 1, %s826_s14  ;;  %s32_s18 = sadd.s32 1, %s830_s15  ;;  %s834_s16 = sphi %s864_s16, %s13_s16   ;;  %s830_s15 = sphi %s862_s15, %s1116_s15   ;;  %s826_s14 = sphi %s860_s14, %s1115_s14   ;;  %s822_s13 = sphi %s858_s13, %s1114_s13   ;;  %s818_s12 = sphi %s856_s12, %s1113_s12  }
   0x4   : > { %p26_p0 = scmp.ge.s32.totalorder %s25_s17, 2  ;;  %p696_p1 = scmp.ge.s32.totalorder %s834_s16, 1 }
   0x5   : > { %p182_p2 = scmp.lt.s32.totalorder %s834_s16, 5 }
   0x6   : > { %s1118_s17 = smov (%p26_p0, %s25_s17), 0  ;;  %s1120_s18 = smov (!%p26_p0, %s32_s18), %s830_s15 }
   0x7   : > { %p183_p3 = pnand %p696_p1, %p182_p2  ;;  %p34_p4 = scmp.ge.s32.totalorder %s1120_s18, 2 }
   0x8   : > { %p223_p5 = scmp.lt.s32.totalorder (!%p183_p3), %s822_s13, 1  ;;  %s740_s20 = sshll.u32 (!%p183_p3), %s818_s12, 5  ;;  %v727_v17 = vld [vmem:[%s1106_s1] ss:$0 sm:$0xff] (!%p183_p3)  ;;  %v728_v25 = vld [vmem:[%s1106_s1 + $0x1] ss:$0 sm:$0xff] (!%p183_p3) }
   0x9   : > { %s1122_s18 = smov (%p34_p4, %s1120_s18), 0  ;;  %186 = sbr.rel (%p183_p3) target bundleno = 69 (0x45), region = 32 }
   0xa   : > { %vm368_vm0 = vcmask (!%p183_p3), 1046528   ;;  %v729_v44 = vld [vmem:[%s1106_s1 + $0x2] ss:$0 sm:$0xff] (!%p183_p3) }
  0x10   : > { %s1124_s13 = smov (!%p223_p5, %s822_s13), 1 }
  0x11   : > { %s755_s19 = smul.u32 288, %s1124_s13  ;;  %s699_s25 = sshll.u32 %s1124_s13, 3 }
  0x13   : > { %s230_s23 = scalar_lea.vmem %s1105_s0, %s755_s19  ;;  %s698_s19 = sshll.u32 %s818_s12, 2 }
  0x14   : > { %s895_s24 = scalar_lea.vmem %s230_s23, %s740_s20  ;;  %p1048_p6 = scmp.lt.s32.totalorder %s698_s19, 7 }
  0x15   : > { %v255_v0 = vld [vmem:[%s895_s24] ss:$8 sps:$4 sm:$0xff]   ;;  %v256_v1 = vld [vmem:[%s895_s24 + $0x4] sm:$0x1]  ;;  %v900_v2 = vld [vmem:[%s895_s24 + $0xc] sm:$0x1] }
  0x16   : > { %v259_v3 = vld [vmem:[%s895_s24 + $0x10] ss:$8 sps:$4 sm:$0xff]   ;;  %v904_v4 = vld [vmem:[%s895_s24 + $0x14] sm:$0x1]  ;;  %v907_v5 = vld [vmem:[%s895_s24 + $0x1c] sm:$0x1]  ;;  %v265_v6 = vunpack.c.l.bf16 %v255_v0  ;;  %v266_v7 = vunpack.c.l.bf16 %v256_v1  ;;  %v909_v8 = vunpack.c.h.bf16 %v255_v0  ;;  %v268_v9 = vunpack.c.l.bf16 %v900_v2 }
  0x17   : > { %v913_v10 = vld [vmem:[%s895_s24 + $0x20] ss:$40 sps:$4 sm:$0xff]   ;;  %v916_v11 = vld [vmem:[%s895_s24 + $0x24] sm:$0x1]  ;;  %v918_v12 = vunpack.c.l.bf16 %v259_v3  ;;  %v270_v13 = vunpack.c.l.bf16 %v904_v4  ;;  %v921_v14 = vunpack.c.h.bf16 %v259_v3  ;;  %v1109_v15 = vunpack.c.l.bf16 %v907_v5  ;;  %v925_v16 = vld [vmem:[%s895_s24 + $0x50] ss:$8 sps:$4 sm:$0xff]  }
  0x18   : > { %v273_v18 = vunpack.c.l.bf16 %v913_v10  ;;  %v933_v20 = vld [vmem:[%s895_s24 + $0x60] ss:$8 sps:$4 sm:$0xff]   ;;  %v284_v21 = vunpack.c.h.bf16 %v913_v10  ;;  %v285_v22 = vunpack.c.l.bf16 %v925_v16  ;;  %v938_v23 = vld [vmem:[%s895_s24 + $0x90] ss:$8 sps:$4 sm:$0xff]   ;;  %v941_v24 = vld [vmem:[%s895_s24 + $0x94] sm:$0x1]  ;;  %v286_v26 = vunpack.c.h.bf16 %v925_v16 }
  0x19   : > { %v287_v27 = vunpack.c.l.bf16 %v933_v20  ;;  %v288_v28 = vunpack.c.h.bf16 %v933_v20  ;;  %v950_v29 = vld [vmem:[%s895_s24 + $0x9c] sm:$0x1]  ;;  %v953_v30 = vld [vmem:[%s895_s24 + $0xa0] ss:$8 sps:$4 sm:$0xff]   ;;  %v956_v31 = vld [vmem:[%s895_s24 + $0xa4] sm:$0x1]  ;;  %v301_v32 = vunpack.c.l.bf16 %v938_v23  ;;  %v302_v34 = vunpack.c.l.bf16 %v941_v24 }
  0x1a   : > { %v960_v33 = vld [vmem:[%s895_s24 + $0xac] sm:$0x1]  ;;  %v303_v35 = vunpack.c.h.bf16 %v938_v23  ;;  %v304_v36 = vunpack.c.l.bf16 %v950_v29  ;;  %v305_v37 = vunpack.c.l.bf16 %v953_v30  ;;  %v723_v38 = vld [vmem:[%s895_s24 + $0xd8] ss:$8 sps:$4 sm:$0xff]   ;;  %v725_v39 = vld [vmem:[%s895_s24 + $0xe8] ss:$8 sps:$4 sm:$0xff]   ;;  %v306_v40 = vunpack.c.l.bf16 %v956_v31 }
  0x1b   : > { %v307_v41 = vunpack.c.h.bf16 %v953_v30  ;;  %v308_v42 = vunpack.c.l.bf16 %v960_v33  ;;  %v317_v43 = vunpack.c.l.bf16 %v723_v38  ;;  %v318_v45 = vunpack.c.h.bf16 %v723_v38  ;;  %v730_v1 = vld [vmem:[%s1106_s1 + $0x3] ss:$0 sm:$0xff]  ;;  %v734_v30 = vld [vmem:[%s1106_s1 + $0x7] ss:$0 sm:$0xff]  ;;  %s1126_s19 = smov (!%p1048_p6, %s698_s19), 7 }
  0x1c   : > { %v319_v46 = vunpack.c.l.bf16 %v725_v39  ;;  %v320_v47 = vunpack.c.h.bf16 %v725_v39  ;;  %v326_v48 = vmul.f32 %v727_v17, %v265_v6  ;;  %v327_v49 = vmul.f32 %v727_v17, %v909_v8  ;;  %s247_s12 = sadd.s32 %s699_s25, %s1126_s19  ;;  %v736_v10 = vld [vmem:[%s1107_s2] ss:$0 sm:$0xff] }
  0x1d   : > { %v328_v50 = vmul.f32 %v727_v17, %v918_v12  ;;  %v329_v51 = vmul.f32 %v727_v17, %v921_v14  ;;  %v339_v52 = vmul.f32 %v728_v25, %v284_v21  ;;  %v340_v53 = vmul.f32 %v728_v25, %v285_v22  ;;  %s700_s27 = sshll.u32 %s247_s12, 2 }
  0x1e   : > { %v341_v54 = vmul.f32 %v728_v25, %v286_v26  ;;  %v342_v55 = vmul.f32 %v728_v25, %v287_v27  ;;  %v352_v56 = vmul.f32 %v729_v44, %v265_v6  ;;  %v353_v58 = vmul.f32 %v729_v44, %v266_v7  ;;  %s249_s30 = scalar_lea.vmem %s1108_s3, %s700_s27 }
  0x1f   : > { %v343_v57 = vadd.f32 %v339_v52, %v326_v48  ;;  %v354_v59 = vmul.f32 %v729_v44, %v909_v8  ;;  %v355_v60 = vmul.f32 %v729_v44, %v268_v9  ;;  %v344_v61 = vadd.f32 %v340_v53, %v327_v49  ;;  %v731_v52 = vld [vmem:[%s1106_s1 + $0x4] ss:$0 sm:$0xff] }
  0x20   : > { %v345_v62 = vadd.f32 %v341_v54, %v328_v50  ;;  %v346_v63 = vadd.f32 %v342_v55, %v329_v51  ;;  %v356_v0 = vmul.f32 %v729_v44, %v918_v12  ;;  %v357_v3 = vmul.f32 %v729_v44, %v270_v13 }
  0x21   : > { %v358_v6 = vmul.f32 %v729_v44, %v921_v14  ;;  %v359_v7 = vmul.f32 %v729_v44, %v1109_v15  ;;  %v369_v17 = vrot.slane %v352_v56, 1  ;;  %v370_v21 = vrot.slane %v353_v58, 1 }
  0x22   : > { %v372_v25 = vrot.slane %v354_v59, 1  ;;  %v373_v38 = vrot.slane %v355_v60, 1  ;;  %v375_v39 = vrot.slane %v356_v0, 1  ;;  %v376_v48 = vrot.slane %v357_v3, 1  ;;  %v732_v0 = vld [vmem:[%s1106_s1 + $0x5] ss:$0 sm:$0xff] }
  0x23   : > { %v378_v49 = vrot.slane %v358_v6, 1  ;;  %v379_v50 = vrot.slane %v359_v7, 1  ;;  %v394_v51 = vmul.f32 %v730_v1, %v301_v32  ;;  %v371_v53 = vsel %vm368_vm0, %v369_v17, %v370_v21 }
  0x24   : > { %v374_v54 = vsel %vm368_vm0, %v372_v25, %v373_v38  ;;  %v395_v44 = vmul.f32 %v730_v1, %v303_v35  ;;  %v396_v55 = vmul.f32 %v730_v1, %v305_v37  ;;  %v377_v56 = vsel %vm368_vm0, %v375_v39, %v376_v48 }
  0x25   : > { %v380_v58 = vsel %vm368_vm0, %v378_v49, %v379_v50  ;;  %v385_v59 = vadd.f32 %v371_v53, %v343_v57  ;;  %v386_v60 = vadd.f32 %v374_v54, %v344_v61  ;;  %v387_v3 = vadd.f32 %v377_v56, %v345_v62 }
  0x26   : > { %v388_v6 = vadd.f32 %v380_v58, %v346_v63  ;;  %v397_v7 = vmul.f32 %v730_v1, %v307_v41  ;;  %v407_v17 = vmul.f32 %v731_v52, %v317_v43  ;;  %v408_v38 = vmul.f32 %v731_v52, %v318_v45 }
  0x27   : > { %v398_v21 = vadd.f32 %v394_v51, %v385_v59  ;;  %v399_v25 = vadd.f32 %v395_v44, %v386_v60  ;;  %v409_v19 = vmul.f32 %v731_v52, %v319_v46  ;;  %v400_v15 = vadd.f32 %v396_v55, %v387_v3  ;;  %v735_v44 = vld [vmem:[%s1106_s1 + $0x8] ss:$0 sm:$0xff] }
  0x28   : > { %v401_v39 = vadd.f32 %v397_v7, %v388_v6  ;;  %v410_v48 = vmul.f32 %v731_v52, %v320_v47  ;;  %v420_v57 = vmul.f32 %v732_v0, %v301_v32  ;;  %v421_v62 = vmul.f32 %v732_v0, %v302_v34  ;;  %v733_v32 = vld [vmem:[%s1106_s1 + $0x6] ss:$0 sm:$0xff] }
  0x29   : > { %v411_v61 = vadd.f32 %v407_v17, %v398_v21  ;;  %v412_v49 = vadd.f32 %v408_v38, %v399_v25  ;;  %v422_v63 = vmul.f32 %v732_v0, %v303_v35  ;;  %v413_v43 = vadd.f32 %v409_v19, %v400_v15 }
  0x2a   : > { %v414_v1 = vadd.f32 %v410_v48, %v401_v39  ;;  %v423_v45 = vmul.f32 %v732_v0, %v304_v36  ;;  %v424_v46 = vmul.f32 %v732_v0, %v305_v37  ;;  %v425_v24 = vmul.f32 %v732_v0, %v306_v40 }
  0x2b   : > { %v426_v34 = vmul.f32 %v732_v0, %v307_v41  ;;  %v427_v15 = vmul.f32 %v732_v0, %v308_v42  ;;  %v436_v19 = vrot.slane %v420_v57, 1  ;;  %v437_v23 = vrot.slane %v421_v62, 1 }
  0x2c   : > { %v439_v29 = vrot.slane %v422_v63, 1  ;;  %v440_v35 = vrot.slane %v423_v45, 1  ;;  %v442_v36 = vrot.slane %v424_v46, 1  ;;  %v443_v37 = vrot.slane %v425_v24, 1 }
  0x2d   : > { %v445_v47 = vrot.slane %v426_v34, 1  ;;  %v446_v50 = vrot.slane %v427_v15, 1  ;;  %v461_v51 = vmul.f32 %v733_v32, %v909_v8  ;;  %v438_v31 = vsel %vm368_vm0, %v436_v19, %v437_v23 }
  0x2e   : > { %v441_v33 = vsel %vm368_vm0, %v439_v29, %v440_v35  ;;  %v462_v40 = vmul.f32 %v733_v32, %v918_v12  ;;  %v463_v41 = vmul.f32 %v733_v32, %v921_v14  ;;  %v444_v42 = vsel %vm368_vm0, %v442_v36, %v443_v37 }
  0x2f   : > { %v447_v52 = vsel %vm368_vm0, %v445_v47, %v446_v50  ;;  %v452_v53 = vadd.f32 %v438_v31, %v411_v61  ;;  %v453_v54 = vadd.f32 %v441_v33, %v412_v49  ;;  %v454_v55 = vadd.f32 %v444_v42, %v413_v43 }
  0x30   : > { %v455_v56 = vadd.f32 %v447_v52, %v414_v1  ;;  %v464_v58 = vmul.f32 %v733_v32, %v273_v18  ;;  %v474_v59 = vmul.f32 %v734_v30, %v285_v22  ;;  %v475_v3 = vmul.f32 %v734_v30, %v286_v26 }
  0x31   : > { %v465_v60 = vadd.f32 %v461_v51, %v452_v53  ;;  %v466_v0 = vadd.f32 %v462_v40, %v453_v54  ;;  %v476_v6 = vmul.f32 %v734_v30, %v287_v27  ;;  %v467_v7 = vadd.f32 %v463_v41, %v454_v55 }
  0x32   : > { %v468_v17 = vadd.f32 %v464_v58, %v455_v56  ;;  %v477_v21 = vmul.f32 %v734_v30, %v288_v28  ;;  %v487_v25 = vmul.f32 %v735_v44, %v909_v8  ;;  %v488_v22 = vmul.f32 %v735_v44, %v268_v9 }
  0x33   : > { %v478_v38 = vadd.f32 %v474_v59, %v465_v60  ;;  %v479_v39 = vadd.f32 %v475_v3, %v466_v0  ;;  %v489_v48 = vmul.f32 %v735_v44, %v918_v12  ;;  %v480_v16 = vadd.f32 %v476_v6, %v467_v7 }
  0x34   : > { %v481_v26 = vadd.f32 %v477_v21, %v468_v17  ;;  %v490_v27 = vmul.f32 %v735_v44, %v270_v13  ;;  %v491_v20 = vmul.f32 %v735_v44, %v921_v14  ;;  %v1111_v8 = vunpack.c.l.bf16 %v907_v5 }
  0x35   : > { %v493_v2 = vmul.f32 %v735_v44, %v273_v18  ;;  %v1112_v9 = vunpack.c.l.bf16 %v916_v11  ;;  %v503_v57 = vrot.slane %v487_v25, 1  ;;  %v504_v61 = vrot.slane %v488_v22, 1 }
  0x36   : > { %v492_v28 = vmul.f32 %v735_v44, %v1111_v8  ;;  %v506_v49 = vrot.slane %v489_v48, 1  ;;  %v507_v62 = vrot.slane %v490_v27, 1  ;;  %v509_v63 = vrot.slane %v491_v20, 1 }
  0x37   : > { %v494_v12 = vmul.f32 %v735_v44, %v1112_v9  ;;  %v512_v4 = vrot.slane %v493_v2, 1  ;;  %v505_v14 = vsel %vm368_vm0, %v503_v57, %v504_v61 }
  0x38   : > { %v510_v43 = vrot.slane %v492_v28, 1  ;;  %v508_v5 = vsel %vm368_vm0, %v506_v49, %v507_v62  ;;  %v519_v1 = vadd.f32 %v505_v14, %v478_v38 }
  0x39   : > { %v513_v13 = vrot.slane %v494_v12, 1  ;;  %v520_v45 = vadd.f32 %v508_v5, %v479_v39 }
  0x3a   : > { %v511_v11 = vsel %vm368_vm0, %v509_v63, %v510_v43  ;;  %v530_v24 = vadd.f32 %v736_v10, %v519_v1 }
  0x3b   : > { %v514_v18 = vsel %vm368_vm0, %v512_v4, %v513_v13  ;;  %v521_v46 = vadd.f32 %v511_v11, %v480_v16  ;;  %v531_v34 = vadd.f32 %v736_v10, %v520_v45 }
  0x3c   : > { %v522_v32 = vadd.f32 %v514_v18, %v481_v26  ;;  %v534_v23 = vmax.f32 %v530_v24, 0.0 }
  0x3d   : > { %v532_v15 = vadd.f32 %v736_v10, %v521_v46  ;;  %v535_v29 = vmax.f32 %v531_v34, 0.0 }
  0x3e   : > { %v533_v19 = vadd.f32 %v736_v10, %v522_v32 }
  0x3f   : > { %v536_v35 = vmax.f32 %v532_v15, 0.0  ;;  %v747_v37 = vpack.c.bf16 %v535_v29, %v534_v23 }
  0x40   : > { %v537_v36 = vmax.f32 %v533_v19, 0.0 }
  0x41   : > { %748 = vst [vmem:[%s249_s30] sm:$0xff] %v747_v37  }
  0x42   : > { %v752_v47 = vpack.c.bf16 %v537_v36, %v536_v35 }
  0x44   : > { %754 = vst [vmem:[%s249_s30 + $0x8] sm:$0xff] %v752_v47  }
  0x45 PF: > { %s13_s16 = sadd.s32 1, %s834_s16   ;;  %s1113_s12 = smov %s826_s14 }
  0x46   : > { %p10_p7 = scmp.ge.s32.totalorder %s13_s16, 6   ;;  %s1114_s13 = smov %s830_s15 }
  0x47   : > { %s1115_s14 = smov %s1118_s17  ;;  %s1116_s15 = smov %s1122_s18 }
  0x48   :  { %12 = sbr.rel (!%p10_p7) target bundleno = 3 (0x3), region = 72 }

// kernel: _lambda_.26
= control target key start
LH: loop header
LB: loop body
LE: loop exit
PB: predicated region body
PF: predicated region fallthrough
CT: control target
= control target key end

     0   :  { %s602_s12 = smov 0   ;;  %s659_s0 = inlined_call_operand.vmem [shape: bf16[128,128], index: 0, kind: input, shape index: {}]   ;;  %s660_s1 = inlined_call_operand.vmem [shape: bf16[128,128], index: 1, kind: input, shape index: {}]   ;;  %s661_s2 = inlined_call_operand.vmem [shape: f32[1,128], index: 2, kind: input, shape index: {}]   ;;  %s662_s3 = inlined_call_operand.vmem [shape: bf16[128,128], index: 3, kind: output, shape index: {}]  }
   0x1 LB: > { %s439_s13 = sadd.s32 4294967295, %s580_s12   ;;  %p443_p0 = scmp.ge.s32.totalorder %s580_s12, 1  ;;  %s580_s12 = sphi %s602_s12, %s13_s12  }
   0x2   : > { %p138_p1 = scmp.lt.s32.totalorder %s580_s12, 3 }
   0x4   : > { %p139_p2 = pnand %p443_p0, %p138_p1 }
   0x5   : > { %v562_v0 = vld [vmem:[%s660_s1] sm:$0xff] (!%p139_p2)   ;;  %s444_s16 = sshll.u32 (!%p139_p2), %s439_s13, 3  ;;  %v563_v1 = vld [vmem:[%s660_s1 + $0x8] sm:$0xff] (!%p139_p2)   ;;  %v564_v2 = vld [vmem:[%s660_s1 + $0x10] sm:$0xff] (!%p139_p2)  }
   0x6   : > { %142 = sbr.rel (%p139_p2) target bundleno = 258 (0x102), region = 32  ;;  %p163_p3 = scmp.lt.s32.totalorder (!%p139_p2), %s444_s16, 15  ;;  %514 = vmatprep.subr.bf16.mxu0 (!%p139_p2), %v562_v0  ;;  %538 = vmatprep.subr.bf16.mxu1 (!%p139_p2), %v562_v0  ;;  %v565_v3 = vld [vmem:[%s660_s1 + $0x18] sm:$0xff] (!%p139_p2)   ;;  %v566_v6 = vld [vmem:[%s660_s1 + $0x20] sm:$0xff] (!%p139_p2)   ;;  %v567_v7 = vld [vmem:[%s660_s1 + $0x28] sm:$0xff] (!%p139_p2)  }
   0x7   : > { %515 = vmatpush3.bf16.msra.mxu0 (!%p139_p2), %v562_v0  ;;  %546 = vmatpush3.bf16.msra.mxu1 (!%p139_p2), %v562_v0  ;;  %v568_v8 = vld [vmem:[%s660_s1 + $0x30] sm:$0xff] (!%p139_p2)   ;;  %v569_v9 = vld [vmem:[%s660_s1 + $0x38] sm:$0xff] (!%p139_p2)   ;;  %v448_v13 = vld [vmem:[%s661_s2] ss:$0 sm:$0xff] (!%p139_p2) }
   0x8   : > { %516 = vmatprep.subr.bf16.mxu0 (!%p139_p2), %v563_v1  ;;  %539 = vmatprep.subr.bf16.mxu1 (!%p139_p2), %v563_v1 }
   0xb   : > { %517 = vmatpush3.bf16.msra.mxu0 (!%p139_p2), %v563_v1  ;;  %547 = vmatpush3.bf16.msra.mxu1 (!%p139_p2), %v563_v1 }
   0xc   : > { %518 = vmatprep.subr.bf16.mxu0 (!%p139_p2), %v564_v2  ;;  %540 = vmatprep.subr.bf16.mxu1 (!%p139_p2), %v564_v2 }
   0xd   : > { %s664_s16 = smov (!%p163_p3, %s444_s16), 15 }
   0xe   : > { %s445_s21 = sshll.u32 %s664_s16, 2 }
   0xf   : > { %s627_s24 = scalar_lea.vmem %s659_s0, %s445_s21  ;;  %519 = vmatpush3.bf16.msra.mxu0 %v564_v2  ;;  %548 = vmatpush3.bf16.msra.mxu1 %v564_v2  ;;  %s172_s13 = scalar_lea.vmem %s662_s3, %s445_s21 }
  0x10   : > { %v570_v4 = vld [vmem:[%s627_s24] sm:$0xff]   ;;  %v571_v5 = vld [vmem:[%s627_s24 + $0x10] sm:$0xff]   ;;  %520 = vmatprep.subr.bf16.mxu0 %v565_v3  ;;  %541 = vmatprep.subr.bf16.mxu1 %v565_v3  ;;  %v572_v10 = vld [vmem:[%s627_s24 + $0x8] sm:$0xff]  }
  0x11   : > { %530 = vmatprep.mubr.bf16.mxu0 %v570_v4  ;;  %534 = vmatprep.mubr.bf16.mxu1 %v571_v5  ;;  %v573_v11 = vld [vmem:[%s627_s24 + $0x18] sm:$0xff]  }
  0x13   : > { %521 = vmatpush3.bf16.msra.mxu0 %v565_v3  ;;  %549 = vmatpush3.bf16.msra.mxu1 %v565_v3 }
  0x14   : > { %522 = vmatprep.subr.bf16.mxu0 %v566_v6  ;;  %542 = vmatprep.subr.bf16.mxu1 %v566_v6 }
  0x17   : > { %523 = vmatpush3.bf16.msra.mxu0 %v566_v6  ;;  %550 = vmatpush3.bf16.msra.mxu1 %v566_v6 }
  0x18   : > { %524 = vmatprep.subr.bf16.mxu0 %v567_v7  ;;  %543 = vmatprep.subr.bf16.mxu1 %v567_v7 }
  0x1b   : > { %525 = vmatpush3.bf16.msra.mxu0 %v567_v7  ;;  %551 = vmatpush3.bf16.msra.mxu1 %v567_v7 }
  0x1c   : > { %526 = vmatprep.subr.bf16.mxu0 %v568_v8  ;;  %544 = vmatprep.subr.bf16.mxu1 %v568_v8 }
  0x1f   : > { %527 = vmatpush3.bf16.msra.mxu0 %v568_v8  ;;  %552 = vmatpush3.bf16.msra.mxu1 %v568_v8 }
  0x20   : > { %528 = vmatprep.subr.bf16.mxu0 %v569_v9  ;;  %545 = vmatprep.subr.bf16.mxu1 %v569_v9 }
  0x23   : > { %529 = vmatpush3.bf16.msra.mxu0 %v569_v9  ;;  %553 = vmatpush3.bf16.msra.mxu1 %v569_v9 }
  0x26   : > { %531 = vmatmul.mubr.bf16.vlgmr.msra.gmra.mrb[0].mxu0 %v572_v10  ;;  %535 = vmatmul.mubr.bf16.vlgmr.msra.gmra.mrb[0].mxu1 %v573_v11 }
  0xf9   : > { %v532_v12 = vpop.f32.mrb[0].mxu0  ;;  %v536_v14 = vpop.f32.mrb[0].mxu1 }
  0xfa   : > { %v312_v15 = vpop.f32.mrb[1].mxu0  ;;  %v328_v16 = vpop.f32.mrb[1].mxu1  ;;  %v321_v19 = vadd.f32 %v532_v12, %v448_v13  ;;  %v337_v20 = vadd.f32 %v536_v14, %v448_v13 }
  0xfb   : > { %v533_v17 = vpop.f32.mrb[2].mxu0  ;;  %v537_v18 = vpop.f32.mrb[2].mxu1  ;;  %v313_v25 = vadd.f32 %v448_v13, %v312_v15  ;;  %v329_v26 = vadd.f32 %v448_v13, %v328_v16 }
  0xfc   : > { %v324_v21 = vadd.f32 %v533_v17, %v448_v13  ;;  %v340_v22 = vadd.f32 %v537_v18, %v448_v13  ;;  %v315_v23 = vpop.f32.mrb[3].mxu0  ;;  %v331_v24 = vpop.f32.mrb[3].mxu1 }
  0xfd   : > { %v316_v27 = vadd.f32 %v448_v13, %v315_v23  ;;  %v332_v28 = vadd.f32 %v448_v13, %v331_v24 }
  0xfe   : > { %v487_v29 = vpack.c.bf16 %v324_v21, %v321_v19  ;;  %v497_v30 = vpack.c.bf16 %v340_v22, %v337_v20 }
  0xff   : > { %v482_v31 = vpack.c.bf16 %v316_v27, %v313_v25  ;;  %v492_v32 = vpack.c.bf16 %v332_v28, %v329_v26 }
 0x100   : > { %499 = vst [vmem:[%s172_s13 + $0x8] sm:$0xff] %v487_v29   ;;  %501 = vst [vmem:[%s172_s13 + $0x18] sm:$0xff] %v497_v30  }
 0x101   : > { %483 = vst [vmem:[%s172_s13] sm:$0xff] %v482_v31   ;;  %500 = vst [vmem:[%s172_s13 + $0x10] sm:$0xff] %v492_v32  }
 0x102 PF: > { %s13_s12 = sadd.s32 1, %s580_s12  }
 0x103   : > { %p10_p4 = scmp.ge.s32.totalorder %s13_s12, 4  }
 0x105   :  { %12 = sbr.rel (!%p10_p4) target bundleno = 1 (0x1), region = 62 }

// kernel: _lambda_.27
= control target key start
LH: loop header
LB: loop body
LE: loop exit
PB: predicated region body
PF: predicated region fallthrough
CT: control target
= control target key end

     0   :  { %s651_s12 = smov 0   ;;  %s739_s0 = inlined_call_operand.vmem [shape: bf16[128,128], index: 0, kind: input, shape index: {}]   ;;  %s740_s1 = inlined_call_operand.vmem [shape: bf16[128,256], index: 1, kind: input, shape index: {}]   ;;  %s741_s2 = inlined_call_operand.vmem [shape: f32[1,256], index: 2, kind: input, shape index: {}]   ;;  %s742_s3 = inlined_call_operand.vmem [shape: bf16[128,256], index: 3, kind: output, shape index: {}]  }
   0x1 LB: > { %s520_s13 = sadd.s32 4294967295, %s628_s12   ;;  %p524_p0 = scmp.ge.s32.totalorder %s628_s12, 1  ;;  %s628_s12 = sphi %s651_s12, %s13_s12  }
   0x2   : > { %p138_p1 = scmp.lt.s32.totalorder %s628_s12, 3 }
   0x4   : > { %p139_p2 = pnand %p524_p0, %p138_p1 }
   0x5   : > { %v594_v0 = vld [vmem:[%s740_s1 + $0x4] ss:$8 sps:$4 sm:$0xff] (!%p139_p2)   ;;  %s525_s16 = sshll.u32 (!%p139_p2), %s520_s13, 3  ;;  %v596_v1 = vld [vmem:[%s740_s1] ss:$8 sps:$4 sm:$0xff] (!%p139_p2)   ;;  %v630_v2 = vmov (!%p139_p2), 0   ;;  %v203_v21 = vlaneseq (!%p139_p2) }
   0x6   : > { %142 = sbr.rel (%p139_p2) target bundleno = 269 (0x10d), region = 32  ;;  %349 = vmatprep.mubr.bf16.mxu0 (!%p139_p2), %v630_v2  ;;  %369 = vmatprep.mubr.bf16.mxu1 (!%p139_p2), %v630_v2  ;;  %p164_p3 = scmp.lt.s32.totalorder (!%p139_p2), %s525_s16, 15  ;;  %v597_v3 = vld [vmem:[%s740_s1 + $0x14] ss:$8 sps:$4 sm:$0xff] (!%p139_p2)   ;;  %v599_v4 = vld [vmem:[%s740_s1 + $0x10] ss:$8 sps:$4 sm:$0xff] (!%p139_p2)  }
   0x7   : > { %317 = vmatprep.subr.bf16.mxu0 (!%p139_p2), %v594_v0  ;;  %569 = vmatprep.subr.bf16.mxu1 (!%p139_p2), %v594_v0  ;;  %v600_v5 = vld [vmem:[%s740_s1 + $0x24] ss:$8 sps:$4 sm:$0xff] (!%p139_p2)   ;;  %v602_v6 = vld [vmem:[%s740_s1 + $0x20] ss:$8 sps:$4 sm:$0xff] (!%p139_p2)   ;;  %v603_v7 = vld [vmem:[%s740_s1 + $0x34] ss:$8 sps:$4 sm:$0xff] (!%p139_p2)  }
   0x8   : > { %318 = vmatpush1.bf16.msra.mxu0 (!%p139_p2), %v596_v1  ;;  %577 = vmatpush1.bf16.msra.mxu1 (!%p139_p2), %v596_v1  ;;  %v605_v8 = vld [vmem:[%s740_s1 + $0x30] ss:$8 sps:$4 sm:$0xff] (!%p139_p2)   ;;  %v606_v9 = vld [vmem:[%s740_s1 + $0x44] ss:$8 sps:$4 sm:$0xff] (!%p139_p2)   ;;  %v608_v10 = vld [vmem:[%s740_s1 + $0x40] ss:$8 sps:$4 sm:$0xff] (!%p139_p2)  }
   0x9   : > { %319 = vmatprep.subr.bf16.mxu0 (!%p139_p2), %v597_v3  ;;  %570 = vmatprep.subr.bf16.mxu1 (!%p139_p2), %v597_v3  ;;  %v609_v11 = vld [vmem:[%s740_s1 + $0x54] ss:$8 sps:$4 sm:$0xff] (!%p139_p2)   ;;  %v611_v12 = vld [vmem:[%s740_s1 + $0x50] ss:$8 sps:$4 sm:$0xff] (!%p139_p2)   ;;  %v612_v13 = vld [vmem:[%s740_s1 + $0x64] ss:$8 sps:$4 sm:$0xff] (!%p139_p2)  }
   0xa   : > { %v614_v14 = vld [vmem:[%s740_s1 + $0x60] ss:$8 sps:$4 sm:$0xff] (!%p139_p2)   ;;  %v615_v15 = vld [vmem:[%s740_s1 + $0x74] ss:$8 sps:$4 sm:$0xff] (!%p139_p2)   ;;  %v617_v16 = vld [vmem:[%s740_s1 + $0x70] ss:$8 sps:$4 sm:$0xff] (!%p139_p2)  }
   0xb   : > { %v204_v22 = vshrl.u32 (!%p139_p2), %v203_v21, 7  ;;  %v201_v24 = vld [vmem:[%s741_s2] sm:$0x3] (!%p139_p2) }
   0xc   : > { %320 = vmatpush1.bf16.msra.mxu0 (!%p139_p2), %v599_v4  ;;  %578 = vmatpush1.bf16.msra.mxu1 (!%p139_p2), %v599_v4 }
   0xd   : > { %s744_s16 = smov (!%p164_p3, %s525_s16), 15  ;;  %321 = vmatprep.subr.bf16.mxu0 %v600_v5  ;;  %571 = vmatprep.subr.bf16.mxu1 %v600_v5  ;;  %v205_v23 = vsub.s32 0, %v204_v22  ;;  %v209_v25 = vsub.s32 1, %v204_v22 }
   0xe   : > { %s526_s25 = sshll.u32 %s744_s16, 2  ;;  %s560_s28 = sshll.u32 %s744_s16, 3 }
   0xf   : > { %s686_s5 = scalar_lea.vmem %s739_s0, %s526_s25  ;;  %v206_v26 = vrot.slane %v201_v24, %v205_v23  ;;  %v210_v27 = vrot.slane %v201_v24, %v209_v25  ;;  %s726_s4 = scalar_lea.vmem %s742_s3, %s560_s28 }
  0x10   : > { %322 = vmatpush1.bf16.msra.mxu0 %v602_v6  ;;  %579 = vmatpush1.bf16.msra.mxu1 %v602_v6  ;;  %v618_v17 = vld [vmem:[%s686_s5] sm:$0xff]   ;;  %v619_v18 = vld [vmem:[%s686_s5 + $0x10] sm:$0xff]   ;;  %v620_v19 = vld [vmem:[%s686_s5 + $0x8] sm:$0xff]  }
  0x11   : > { %323 = vmatprep.subr.bf16.mxu0 %v603_v7  ;;  %572 = vmatprep.subr.bf16.mxu1 %v603_v7  ;;  %v621_v20 = vld [vmem:[%s686_s5 + $0x18] sm:$0xff]  }
  0x14   : > { %324 = vmatpush1.bf16.msra.mxu0 %v605_v8  ;;  %580 = vmatpush1.bf16.msra.mxu1 %v605_v8 }
  0x15   : > { %325 = vmatprep.subr.bf16.mxu0 %v606_v9  ;;  %573 = vmatprep.subr.bf16.mxu1 %v606_v9 }
  0x18   : > { %326 = vmatpush1.bf16.msra.mxu0 %v608_v10  ;;  %581 = vmatpush1.bf16.msra.mxu1 %v608_v10 }
  0x19   : > { %327 = vmatprep.subr.bf16.mxu0 %v609_v11  ;;  %574 = vmatprep.subr.bf16.mxu1 %v609_v11 }
  0x1c   : > { %328 = vmatpush1.bf16.msra.mxu0 %v611_v12  ;;  %582 = vmatpush1.bf16.msra.mxu1 %v611_v12 }
  0x1d   : > { %329 = vmatprep.subr.bf16.mxu0 %v612_v13  ;;  %575 = vmatprep.subr.bf16.mxu1 %v612_v13 }
  0x20   : > { %330 = vmatpush1.bf16.msra.mxu0 %v614_v14  ;;  %583 = vmatpush1.bf16.msra.mxu1 %v614_v14 }
  0x21   : > { %331 = vmatprep.subr.bf16.mxu0 %v615_v15  ;;  %576 = vmatprep.subr.bf16.mxu1 %v615_v15 }
  0x24   : > { %332 = vmatpush1.bf16.msra.mxu0 %v617_v16  ;;  %584 = vmatpush1.bf16.msra.mxu1 %v617_v16 }
  0x27   : > { %350 = vmatmul.mubr.bf16.vlgmr.msra.gmra.mrb[0].mxu0 %v618_v17  ;;  %370 = vmatmul.mubr.bf16.vlgmr.msra.gmra.mrb[0].mxu1 %v619_v18 }
  0x28   : > { %359 = vmatprep.mubr.bf16.mxu0 %v630_v2  ;;  %379 = vmatprep.mubr.bf16.mxu1 %v630_v2 }
  0x2f   : > { %360 = vmatmul.mubr.bf16.gmra.mrb[4].mxu0 %v620_v19  ;;  %380 = vmatmul.mubr.bf16.gmra.mrb[4].mxu1 %v621_v20 }
  0xfa   : > { %v351_v28 = vpop.f32.mrb[0].mxu0  ;;  %v371_v29 = vpop.f32.mrb[0].mxu1 }
  0xfb   : > { %v352_v30 = vadd.f32 %v351_v28, %v206_v26  ;;  %v372_v31 = vadd.f32 %v371_v29, %v206_v26  ;;  %v353_v32 = vpop.f32.mrb[1].mxu0  ;;  %v373_v33 = vpop.f32.mrb[1].mxu1 }
  0xfc   : > { %v354_v34 = vadd.f32 %v353_v32, %v210_v27  ;;  %v374_v35 = vadd.f32 %v373_v33, %v210_v27  ;;  %v355_v36 = vpop.f32.mrb[2].mxu0  ;;  %v375_v37 = vpop.f32.mrb[2].mxu1 }
  0xfd   : > { %v390_v38 = vmax.f32 %v352_v30, 0.0  ;;  %v398_v39 = vmax.f32 %v372_v31, 0.0  ;;  %v356_v40 = vadd.f32 %v355_v36, %v206_v26  ;;  %v376_v41 = vadd.f32 %v375_v37, %v206_v26  ;;  %v357_v42 = vpop.f32.mrb[3].mxu0  ;;  %v377_v43 = vpop.f32.mrb[3].mxu1 }
  0xfe   : > { %v391_v44 = vmax.f32 %v354_v34, 0.0  ;;  %v399_v45 = vmax.f32 %v374_v35, 0.0  ;;  %v358_v46 = vadd.f32 %v357_v42, %v210_v27  ;;  %v378_v47 = vadd.f32 %v377_v43, %v210_v27 }
  0xff   : > { %v392_v48 = vmax.f32 %v356_v40, 0.0  ;;  %v400_v49 = vmax.f32 %v376_v41, 0.0 }
 0x100   : > { %v561_v50 = vpack.c.bf16 %v391_v44, %v390_v38  ;;  %v565_v51 = vpack.c.bf16 %v399_v45, %v398_v39  ;;  %v393_v52 = vmax.f32 %v358_v46, 0.0  ;;  %v401_v53 = vmax.f32 %v378_v47, 0.0 }
 0x102   : > { %454 = vst [vmem:[%s726_s4] sm:$0xff] %v561_v50  ;;  %458 = vst [vmem:[%s726_s4 + $0x20] sm:$0xff] %v565_v51  ;;  %v562_v54 = vpack.c.bf16 %v393_v52, %v392_v48  ;;  %v566_v55 = vpack.c.bf16 %v401_v53, %v400_v49  ;;  %v361_v56 = vpop.f32.mrb[4].mxu0  ;;  %v381_v57 = vpop.f32.mrb[4].mxu1 }
 0x103   : > { %v362_v58 = vadd.f32 %v361_v56, %v206_v26  ;;  %v382_v59 = vadd.f32 %v381_v57, %v206_v26  ;;  %v363_v60 = vpop.f32.mrb[5].mxu0  ;;  %v383_v61 = vpop.f32.mrb[5].mxu1 }
 0x104   : > { %455 = vst [vmem:[%s726_s4 + $0x8] sm:$0xff] %v562_v54  ;;  %459 = vst [vmem:[%s726_s4 + $0x28] sm:$0xff] %v566_v55  ;;  %v364_v62 = vadd.f32 %v363_v60, %v210_v27  ;;  %v384_v63 = vadd.f32 %v383_v61, %v210_v27  ;;  %v365_v0 = vpop.f32.mrb[6].mxu0  ;;  %v385_v1 = vpop.f32.mrb[6].mxu1 }
 0x105   : > { %v394_v2 = vmax.f32 %v362_v58, 0.0  ;;  %v402_v3 = vmax.f32 %v382_v59, 0.0  ;;  %v366_v4 = vadd.f32 %v365_v0, %v206_v26  ;;  %v386_v5 = vadd.f32 %v385_v1, %v206_v26  ;;  %v367_v6 = vpop.f32.mrb[7].mxu0  ;;  %v387_v7 = vpop.f32.mrb[7].mxu1 }
 0x106   : > { %v395_v8 = vmax.f32 %v364_v62, 0.0  ;;  %v403_v9 = vmax.f32 %v384_v63, 0.0  ;;  %v368_v10 = vadd.f32 %v367_v6, %v210_v27  ;;  %v388_v11 = vadd.f32 %v387_v7, %v210_v27 }
 0x107   : > { %v396_v12 = vmax.f32 %v366_v4, 0.0  ;;  %v404_v13 = vmax.f32 %v386_v5, 0.0 }
 0x108   : > { %v563_v14 = vpack.c.bf16 %v395_v8, %v394_v2  ;;  %v567_v15 = vpack.c.bf16 %v403_v9, %v402_v3  ;;  %v397_v16 = vmax.f32 %v368_v10, 0.0  ;;  %v405_v17 = vmax.f32 %v388_v11, 0.0 }
 0x10a   : > { %456 = vst [vmem:[%s726_s4 + $0x10] sm:$0xff] %v563_v14  ;;  %460 = vst [vmem:[%s726_s4 + $0x30] sm:$0xff] %v567_v15  ;;  %v564_v18 = vpack.c.bf16 %v397_v16, %v396_v12  ;;  %v568_v19 = vpack.c.bf16 %v405_v17, %v404_v13 }
 0x10c   : > { %457 = vst [vmem:[%s726_s4 + $0x18] sm:$0xff] %v564_v18  ;;  %461 = vst [vmem:[%s726_s4 + $0x38] sm:$0xff] %v568_v19 }
 0x10d PF: > { %s13_s12 = sadd.s32 1, %s628_s12  }
 0x10e   : > { %p10_p4 = scmp.ge.s32.totalorder %s13_s12, 4  }
 0x110   :  { %12 = sbr.rel (!%p10_p4) target bundleno = 1 (0x1), region = 62 }

// kernel: _lambda_.30
= control target key start
LH: loop header
LB: loop body
LE: loop exit
PB: predicated region body
PF: predicated region fallthrough
CT: control target
= control target key end

     0   :  { %s610_s12 = smov 0   ;;  %s667_s0 = inlined_call_operand.vmem [shape: bf16[128,128], index: 0, kind: input, shape index: {}]   ;;  %s668_s1 = inlined_call_operand.vmem [shape: bf16[128,128], index: 1, kind: input, shape index: {}]   ;;  %s669_s2 = inlined_call_operand.vmem [shape: f32[1,128], index: 2, kind: input, shape index: {}]   ;;  %s670_s3 = inlined_call_operand.vmem [shape: bf16[128,128], index: 3, kind: output, shape index: {}]  }
   0x1 LB: > { %s447_s13 = sadd.s32 4294967295, %s588_s12   ;;  %p451_p0 = scmp.ge.s32.totalorder %s588_s12, 1  ;;  %s588_s12 = sphi %s610_s12, %s13_s12  }
   0x2   : > { %p138_p1 = scmp.lt.s32.totalorder %s588_s12, 3 }
   0x4   : > { %p139_p2 = pnand %p451_p0, %p138_p1 }
   0x5   : > { %v570_v0 = vld [vmem:[%s668_s1] sm:$0xff] (!%p139_p2)   ;;  %s452_s16 = sshll.u32 (!%p139_p2), %s447_s13, 3  ;;  %v571_v1 = vld [vmem:[%s668_s1 + $0x8] sm:$0xff] (!%p139_p2)   ;;  %v572_v2 = vld [vmem:[%s668_s1 + $0x10] sm:$0xff] (!%p139_p2)  }
   0x6   : > { %142 = sbr.rel (%p139_p2) target bundleno = 260 (0x104), region = 32  ;;  %p163_p3 = scmp.lt.s32.totalorder (!%p139_p2), %s452_s16, 15  ;;  %522 = vmatprep.subr.bf16.mxu0 (!%p139_p2), %v570_v0  ;;  %546 = vmatprep.subr.bf16.mxu1 (!%p139_p2), %v570_v0  ;;  %v573_v3 = vld [vmem:[%s668_s1 + $0x18] sm:$0xff] (!%p139_p2)   ;;  %v574_v6 = vld [vmem:[%s668_s1 + $0x20] sm:$0xff] (!%p139_p2)   ;;  %v575_v7 = vld [vmem:[%s668_s1 + $0x28] sm:$0xff] (!%p139_p2)  }
   0x7   : > { %523 = vmatpush3.bf16.msra.mxu0 (!%p139_p2), %v570_v0  ;;  %554 = vmatpush3.bf16.msra.mxu1 (!%p139_p2), %v570_v0  ;;  %v576_v8 = vld [vmem:[%s668_s1 + $0x30] sm:$0xff] (!%p139_p2)   ;;  %v577_v9 = vld [vmem:[%s668_s1 + $0x38] sm:$0xff] (!%p139_p2)   ;;  %v456_v12 = vld [vmem:[%s669_s2] ss:$0 sm:$0xff] (!%p139_p2) }
   0x8   : > { %524 = vmatprep.subr.bf16.mxu0 (!%p139_p2), %v571_v1  ;;  %547 = vmatprep.subr.bf16.mxu1 (!%p139_p2), %v571_v1 }
   0xb   : > { %525 = vmatpush3.bf16.msra.mxu0 (!%p139_p2), %v571_v1  ;;  %555 = vmatpush3.bf16.msra.mxu1 (!%p139_p2), %v571_v1 }
   0xc   : > { %526 = vmatprep.subr.bf16.mxu0 (!%p139_p2), %v572_v2  ;;  %548 = vmatprep.subr.bf16.mxu1 (!%p139_p2), %v572_v2 }
   0xd   : > { %s672_s16 = smov (!%p163_p3, %s452_s16), 15 }
   0xe   : > { %s453_s21 = sshll.u32 %s672_s16, 2 }
   0xf   : > { %s635_s24 = scalar_lea.vmem %s667_s0, %s453_s21  ;;  %527 = vmatpush3.bf16.msra.mxu0 %v572_v2  ;;  %556 = vmatpush3.bf16.msra.mxu1 %v572_v2  ;;  %s172_s13 = scalar_lea.vmem %s670_s3, %s453_s21 }
  0x10   : > { %v578_v4 = vld [vmem:[%s635_s24] sm:$0xff]   ;;  %v579_v5 = vld [vmem:[%s635_s24 + $0x10] sm:$0xff]   ;;  %528 = vmatprep.subr.bf16.mxu0 %v573_v3  ;;  %549 = vmatprep.subr.bf16.mxu1 %v573_v3  ;;  %v580_v10 = vld [vmem:[%s635_s24 + $0x8] sm:$0xff]  }
  0x11   : > { %538 = vmatprep.mubr.bf16.mxu0 %v578_v4  ;;  %542 = vmatprep.mubr.bf16.mxu1 %v579_v5  ;;  %v581_v11 = vld [vmem:[%s635_s24 + $0x18] sm:$0xff]  }
  0x13   : > { %529 = vmatpush3.bf16.msra.mxu0 %v573_v3  ;;  %557 = vmatpush3.bf16.msra.mxu1 %v573_v3 }
  0x14   : > { %530 = vmatprep.subr.bf16.mxu0 %v574_v6  ;;  %550 = vmatprep.subr.bf16.mxu1 %v574_v6 }
  0x17   : > { %531 = vmatpush3.bf16.msra.mxu0 %v574_v6  ;;  %558 = vmatpush3.bf16.msra.mxu1 %v574_v6 }
  0x18   : > { %532 = vmatprep.subr.bf16.mxu0 %v575_v7  ;;  %551 = vmatprep.subr.bf16.mxu1 %v575_v7 }
  0x1b   : > { %533 = vmatpush3.bf16.msra.mxu0 %v575_v7  ;;  %559 = vmatpush3.bf16.msra.mxu1 %v575_v7 }
  0x1c   : > { %534 = vmatprep.subr.bf16.mxu0 %v576_v8  ;;  %552 = vmatprep.subr.bf16.mxu1 %v576_v8 }
  0x1f   : > { %535 = vmatpush3.bf16.msra.mxu0 %v576_v8  ;;  %560 = vmatpush3.bf16.msra.mxu1 %v576_v8 }
  0x20   : > { %536 = vmatprep.subr.bf16.mxu0 %v577_v9  ;;  %553 = vmatprep.subr.bf16.mxu1 %v577_v9 }
  0x23   : > { %537 = vmatpush3.bf16.msra.mxu0 %v577_v9  ;;  %561 = vmatpush3.bf16.msra.mxu1 %v577_v9 }
  0x26   : > { %539 = vmatmul.mubr.bf16.vlgmr.msra.gmra.mrb[0].mxu0 %v580_v10  ;;  %543 = vmatmul.mubr.bf16.vlgmr.msra.gmra.mrb[0].mxu1 %v581_v11 }
  0xf9   : > { %v540_v13 = vpop.f32.mrb[0].mxu0  ;;  %v544_v14 = vpop.f32.mrb[0].mxu1 }
  0xfa   : > { %v321_v15 = vadd.f32 %v540_v13, %v456_v12  ;;  %v337_v16 = vadd.f32 %v544_v14, %v456_v12  ;;  %v312_v17 = vpop.f32.mrb[1].mxu0  ;;  %v328_v18 = vpop.f32.mrb[1].mxu1 }
  0xfb   : > { %v313_v19 = vadd.f32 %v456_v12, %v312_v17  ;;  %v329_v20 = vadd.f32 %v456_v12, %v328_v18  ;;  %v541_v21 = vpop.f32.mrb[2].mxu0  ;;  %v545_v22 = vpop.f32.mrb[2].mxu1 }
  0xfc   : > { %v324_v23 = vadd.f32 %v541_v21, %v456_v12  ;;  %v340_v24 = vadd.f32 %v545_v22, %v456_v12  ;;  %v315_v25 = vpop.f32.mrb[3].mxu0  ;;  %v331_v26 = vpop.f32.mrb[3].mxu1  ;;  %v345_v29 = vmax.f32 %v321_v15, 0.0  ;;  %v349_v30 = vmax.f32 %v337_v16, 0.0 }
  0xfd   : > { %v316_v27 = vadd.f32 %v456_v12, %v315_v25  ;;  %v332_v28 = vadd.f32 %v456_v12, %v331_v26  ;;  %v343_v33 = vmax.f32 %v313_v19, 0.0  ;;  %v347_v34 = vmax.f32 %v329_v20, 0.0 }
  0xfe   : > { %v346_v31 = vmax.f32 %v324_v23, 0.0  ;;  %v350_v32 = vmax.f32 %v340_v24, 0.0 }
  0xff   : > { %v344_v35 = vmax.f32 %v316_v27, 0.0  ;;  %v348_v36 = vmax.f32 %v332_v28, 0.0 }
 0x100   : > { %v495_v37 = vpack.c.bf16 %v346_v31, %v345_v29  ;;  %v505_v38 = vpack.c.bf16 %v350_v32, %v349_v30 }
 0x101   : > { %v490_v39 = vpack.c.bf16 %v344_v35, %v343_v33  ;;  %v500_v40 = vpack.c.bf16 %v348_v36, %v347_v34 }
 0x102   : > { %507 = vst [vmem:[%s172_s13 + $0x8] sm:$0xff] %v495_v37   ;;  %509 = vst [vmem:[%s172_s13 + $0x18] sm:$0xff] %v505_v38  }
 0x103   : > { %491 = vst [vmem:[%s172_s13] sm:$0xff] %v490_v39   ;;  %508 = vst [vmem:[%s172_s13 + $0x10] sm:$0xff] %v500_v40  }
 0x104 PF: > { %s13_s12 = sadd.s32 1, %s588_s12  }
 0x105   : > { %p10_p4 = scmp.ge.s32.totalorder %s13_s12, 4  }
 0x107   :  { %12 = sbr.rel (!%p10_p4) target bundleno = 1 (0x1), region = 62 }

// kernel: _lambda_.28
= control target key start
LH: loop header
LB: loop body
LE: loop exit
PB: predicated region body
PF: predicated region fallthrough
CT: control target
= control target key end

     0   :  { %s1527_s0 = inlined_call_operand.vmem [shape: bf16[2,10,10,256], index: 0, kind: input, shape index: {}]   ;;  %s1528_s1 = inlined_call_operand.vmem [shape: f32[9,256], index: 1, kind: input, shape index: {}]   ;;  %s1529_s2 = inlined_call_operand.vmem [shape: f32[1,256], index: 2, kind: input, shape index: {}]   ;;  %s1530_s3 = inlined_call_operand.vmem [shape: bf16[2,8,8,256], index: 3, kind: output, shape index: {}]  }
   0x1   :  { %1533 = sst [smem:[#allocation8_spill]] %s1529_s2 }
   0x2   :  { %1534 = sst [smem:[#allocation9_spill]] %s1530_s3 }
   0x3   :  { %s1169_s12 = smov 0   ;;  %s1171_s13 = smov 0  }
   0x4   :  { %s1173_s14 = smov 0   ;;  %s1175_s15 = smov 0  }
   0x5   :  { %s1177_s16 = smov 0   ;;  %s1179_s17 = smov 0  }
   0x6   :  { %s1181_s18 = smov 0   ;;  %s1183_s19 = smov 0  }
   0x7   :  { %s1185_s20 = smov 0   ;;  %s1187_s21 = smov 0  }
   0x8   :  { %s1189_s22 = smov 0   ;;  %s1191_s23 = smov 0  }
   0x9   :  { %s1193_s24 = smov 0  }
   0xa LB: > { %1535 = sst [smem:[#allocation5_spill]] %s1131_s20  ;;  %s25_s26 = sadd.s32 1, %s1135_s21  ;;  %s1147_s24 = sphi %s1193_s24, %s13_s24   ;;  %s1143_s23 = sphi %s1191_s23, %s1560_s23   ;;  %s1139_s22 = sphi %s1189_s22, %s1559_s22   ;;  %s1135_s21 = sphi %s1187_s21, %s1558_s21   ;;  %s1131_s20 = sphi %s1185_s20, %s1557_s20   ;;  %s1127_s19 = sphi %s1183_s19, %s1556_s19   ;;  %s1123_s18 = sphi %s1181_s18, %s1555_s18   ;;  %s1119_s17 = sphi %s1179_s17, %s1554_s17   ;;  %s1115_s16 = sphi %s1177_s16, %s1553_s16   ;;  %s1111_s15 = sphi %s1175_s15, %s1552_s15   ;;  %s1107_s14 = sphi %s1173_s14, %s1551_s14   ;;  %s1103_s13 = sphi %s1171_s13, %s1550_s13   ;;  %s1099_s12 = sphi %s1169_s12, %s1549_s12  }
   0xb   : > { %p26_p0 = scmp.ge.s32.totalorder %s25_s26, 2  ;;  %s28_s27 = sadd.s32 1, %s1139_s22 }
   0xc   : > { %s32_s28 = sadd.s32 1, %s1143_s23  ;;  %s41_s29 = sadd.s32 1, %s1119_s17 }
   0xd   : > { %s1562_s26 = smov (%p26_p0, %s25_s26), 0  ;;  %s1564_s27 = smov (!%p26_p0, %s28_s27), %s1139_s22 }
   0xe   : > { %1536 = sst [smem:[#allocation6_spill]] %s1562_s26  ;;  %p48_p1 = scmp.ne.s32.totalorder %s1119_s17, %s1115_s16 }
   0xf   : > { %p49_p2 = scmp.eq.s32.totalorder %s1147_s24, 0  ;;  %p30_p3 = scmp.ge.s32.totalorder %s1564_s27, 2 }
  0x10   : > { %s67_s30 = sadd.s32 1, %s1111_s15  ;;  %p74_p5 = scmp.ne.s32.totalorder %s1111_s15, %s1107_s14 }
  0x11   : > { %p1246_p4 = por %p49_p2, %p48_p1  ;;  %s1566_s27 = smov (%p30_p3, %s1564_s27), 0 }
  0x12   : > { %1538 = sst [smem:[#allocation7_spill]] %s1566_s27  ;;  %s1568_s28 = smov (!%p30_p3, %s32_s28), %s1143_s23 }
  0x13   : > { %s37_s5 = ssub.s32 %s1139_s22, %s1566_s27  ;;  %p1257_p6 = por %p74_p5, %p49_p2 }
  0x14   : > { %p34_p7 = scmp.ge.s32.totalorder %s1568_s28, 2  ;;  %p65_p8 = scmp.eq.s32.totalorder %s37_s5, 0 }
  0x15   : > { %s117_s7 = ssub.s32 %s1135_s21, %s1562_s26  ;;  %s123_s8 = sadd.s32 1, %s1103_s13 }
  0x16   : > { %s1570_s28 = smov (%p34_p7, %s1568_s28), 0  ;;  %p133_p9 = scmp.ne.s32.totalorder %s1103_s13, %s1099_s12 }
  0x17   : > { %s1267_s9 = scalar_select %p65_p8, %s1111_s15, %s67_s30  }
  0x18   : > { %s36_s10 = ssub.s32 %s1143_s23, %s1570_s28  ;;  %s1540_s3 = sadd.s32 4294967295, %s1147_s24  }
  0x19   : > { %s38_s11 = sor.u32 %s37_s5, %s36_s10  ;;  %s118_s25 = sor.u32 %s117_s7, %s36_s10 }
  0x1a   : > { %p39_p10 = scmp.eq.s32.totalorder %s38_s11, 0  ;;  %s120_s27 = sor.u32 %s118_s25, %s37_s5 }
  0x1b   : > { %p121_p11 = scmp.eq.s32.totalorder %s120_s27, 0  ;;  %p134_p12 = scmp.eq.s32.totalorder %s1540_s3, 7 }
  0x1c   : > { %s1276_s20 = scalar_select %p39_p10, %s1119_s17, %s41_s29  }
  0x1d   : > { %s1279_s2 = scalar_select %p121_p11, %s1103_s13, %s123_s8  }
  0x1e   : > { %p1281_p13 = por %p134_p12, %p133_p9  ;;  %p897_p0 = scmp.ge.s32.totalorder %s1147_s24, 8 }
  0x20   : > { %156 = sbr.rel (%p897_p0) target bundleno = 66 (0x42), region = 16 }
  0x27   : > { %159 = sbr.rel (!%p1246_p4) target bundleno = 59 (0x3b), region = 20  ;;  %s161_s25 = sand.u32 (%p1246_p4), 1, %s1119_s17  }
  0x28   : > { %s939_s27 = smul.u32 (%p1246_p4), 40, %s1143_s23 }
  0x29   : > { %s938_s3 = smul.u32 (%p1246_p4), 80, %s161_s25 }
  0x2a   : > { %s165_s29 = sadd.s32 (%p1246_p4), %s1139_s22, %s939_s27 }
  0x2b   : > { %s898_s30 = sshll.u32 (%p1246_p4), %s165_s29, 2  ;;  %s1299_s4 = scalar_lea.vmem (%p1246_p4), [#allocation2], %s938_s3 }
  0x2c   : > { %s1294_s8 = scalar_lea.vmem (%p1246_p4), %s1527_s0, %s898_s30 }
  0x2d   : > { %v183_v0 = vld [vmem:[%s1294_s8] sm:$0xf] (%p1246_p4)  ;;  %v185_v1 = vld [vmem:[%s1294_s8 + $0x8] sm:$0xf] (%p1246_p4)  ;;  %v187_v2 = vld [vmem:[%s1294_s8 + $0x10] sm:$0xf] (%p1246_p4) }
  0x2e   : > { %184 = vst [vmem:[%s1299_s4] sm:$0xf] %v183_v0  ;;  %186 = vst [vmem:[%s1299_s4 + $0x4] sm:$0xf] %v185_v1  ;;  %v189_v3 = vld [vmem:[%s1294_s8 + $0x18] sm:$0xf] }
  0x2f   : > { %188 = vst [vmem:[%s1299_s4 + $0x8] sm:$0xf] %v187_v2  ;;  %v191_v4 = vld [vmem:[%s1294_s8 + $0x20] sm:$0xf]  ;;  %v193_v5 = vld [vmem:[%s1294_s8 + $0x28] sm:$0xf] }
  0x30   : > { %190 = vst [vmem:[%s1299_s4 + $0xc] sm:$0xf] %v189_v3  ;;  %192 = vst [vmem:[%s1299_s4 + $0x10] sm:$0xf] %v191_v4  ;;  %v195_v6 = vld [vmem:[%s1294_s8 + $0x30] sm:$0xf] }
  0x31   : > { %194 = vst [vmem:[%s1299_s4 + $0x14] sm:$0xf] %v193_v5  ;;  %v197_v7 = vld [vmem:[%s1294_s8 + $0x38] sm:$0xf]  ;;  %v199_v8 = vld [vmem:[%s1294_s8 + $0x40] sm:$0xf] }
  0x32   : > { %196 = vst [vmem:[%s1299_s4 + $0x18] sm:$0xf] %v195_v6  ;;  %198 = vst [vmem:[%s1299_s4 + $0x1c] sm:$0xf] %v197_v7  ;;  %v201_v9 = vld [vmem:[%s1294_s8 + $0x48] sm:$0xf] }
  0x33   : > { %200 = vst [vmem:[%s1299_s4 + $0x20] sm:$0xf] %v199_v8  ;;  %v203_v10 = vld [vmem:[%s1294_s8 + $0x50] sm:$0xf]  ;;  %v205_v11 = vld [vmem:[%s1294_s8 + $0x58] sm:$0xf] }
  0x34   : > { %202 = vst [vmem:[%s1299_s4 + $0x24] sm:$0xf] %v201_v9  ;;  %204 = vst [vmem:[%s1299_s4 + $0x28] sm:$0xf] %v203_v10  ;;  %v207_v12 = vld [vmem:[%s1294_s8 + $0x60] sm:$0xf] }
  0x35   : > { %206 = vst [vmem:[%s1299_s4 + $0x2c] sm:$0xf] %v205_v11  ;;  %v209_v13 = vld [vmem:[%s1294_s8 + $0x68] sm:$0xf]  ;;  %v211_v14 = vld [vmem:[%s1294_s8 + $0x70] sm:$0xf] }
  0x36   : > { %208 = vst [vmem:[%s1299_s4 + $0x30] sm:$0xf] %v207_v12  ;;  %210 = vst [vmem:[%s1299_s4 + $0x34] sm:$0xf] %v209_v13  ;;  %v213_v15 = vld [vmem:[%s1294_s8 + $0x78] sm:$0xf] }
  0x37   : > { %212 = vst [vmem:[%s1299_s4 + $0x38] sm:$0xf] %v211_v14  ;;  %v215_v16 = vld [vmem:[%s1294_s8 + $0x80] sm:$0xf]  ;;  %v217_v17 = vld [vmem:[%s1294_s8 + $0x88] sm:$0xf] }
  0x38   : > { %214 = vst [vmem:[%s1299_s4 + $0x3c] sm:$0xf] %v213_v15  ;;  %216 = vst [vmem:[%s1299_s4 + $0x40] sm:$0xf] %v215_v16  ;;  %v219_v18 = vld [vmem:[%s1294_s8 + $0x90] sm:$0xf] }
  0x39   : > { %218 = vst [vmem:[%s1299_s4 + $0x44] sm:$0xf] %v217_v17  ;;  %v221_v19 = vld [vmem:[%s1294_s8 + $0x98] sm:$0xf]  ;;  %220 = vst [vmem:[%s1299_s4 + $0x48] sm:$0xf] %v219_v18 }
  0x3a   : > { %222 = vst [vmem:[%s1299_s4 + $0x4c] sm:$0xf] %v221_v19 }
  0x3b PF: > { %285 = sbr.rel (!%p1257_p6) target bundleno = 66 (0x42), region = 61  ;;  %s287_s10 = sand.u32 (%p1257_p6), 1, %s1111_s15  }
  0x3c   : > { %s900_s11 = sshll.u32 (%p1257_p6), %s1139_s22, 3  ;;  %s899_s25 = sshll.u32 (%p1257_p6), %s287_s10, 4 }
  0x3d   : > { %s291_s29 = scalar_lea.vmem (%p1257_p6), %s1528_s1, %s900_s11  ;;  %s289_s30 = scalar_lea.vmem (%p1257_p6), [#allocation3], %s899_s25 }
  0x3e   : > { %v321_v20 = vld [vmem:[%s291_s29] sm:$0xff] (%p1257_p6)  ;;  %v323_v21 = vld [vmem:[%s291_s29 + $0x10] sm:$0xff] (%p1257_p6) }
  0x3f   : > { %322 = vst [vmem:[%s289_s30] sm:$0xff] (%p1257_p6), %v321_v20  ;;  %324 = vst [vmem:[%s289_s30 + $0x8] sm:$0xff] (%p1257_p6), %v323_v21 }
  0x42 PF: > { %p901_p1 = scmp.ge.s32.totalorder %s1147_s24, 1  ;;  %p335_p2 = scmp.lt.s32.totalorder %s1147_s24, 9 }
  0x44   : > { %p336_p3 = pnand %p901_p1, %p335_p2 }
  0x45   : > { %s342_s6 = sand.u32 (!%p336_p3), 1, %s1115_s16   ;;  %s349_s5 = sand.u32 (!%p336_p3), 1, %s1107_s14   ;;  %vm444_vm0 = vcmask (!%p336_p3), 1046528   ;;  %vm486_vm1 = vcmask (!%p336_p3), 1045504  }
  0x46   : > { %339 = sbr.rel (%p336_p3) target bundleno = 138 (0x8a), region = 103  ;;  %s902_s8 = sshll.u32 (!%p336_p3), %s349_s5, 4 }
  0x47   : > { %s940_s7 = smul.u32 (!%p336_p3), 80, %s342_s6  ;;  %s925_s4 = sshll.u32 (!%p336_p3), %s1123_s18, 5 }
  0x48   : > { %s1350_s25 = scalar_lea.vmem (!%p336_p3), [#allocation3], %s902_s8  ;;  %p378_p4 = scmp.lt.s32.totalorder (!%p336_p3), %s1127_s19, 1 }
  0x49   : > { %s344_s10 = scalar_lea.vmem (!%p336_p3), [#allocation2], %s940_s7  ;;  %v907_v22 = vld [vmem:[%s1350_s25] ss:$0 sm:$0xff] (!%p336_p3)  ;;  %v908_v26 = vld [vmem:[%s1350_s25 + $0x1] ss:$0 sm:$0xff] (!%p336_p3)  ;;  %s1542_s3 = sld [smem:[#allocation8_spill]] (!%p336_p3) }
  0x4a   : > { %s385_s11 = scalar_lea.vmem (!%p336_p3), %s344_s10, %s925_s4 [#allocation2]  ;;  %v909_v57 = vld [vmem:[%s1350_s25 + $0x2] ss:$0 sm:$0xff] (!%p336_p3)  ;;  %v910_v18 = vld [vmem:[%s1350_s25 + $0x3] ss:$0 sm:$0xff] (!%p336_p3)  ;;  %s375_s30 = sand.u32 (!%p336_p3), 1, %s1099_s12  }
  0x4b   : > { %v386_v23 = vld [vmem:[%s385_s11] ss:$8 sps:$4 sm:$0xff] (!%p336_p3)   ;;  %v387_v24 = vld [vmem:[%s385_s11 + $0x4] sm:$0x1] (!%p336_p3)  ;;  %v389_v25 = vld [vmem:[%s385_s11 + $0xc] sm:$0x1] (!%p336_p3) }
  0x4c   : > { %v390_v27 = vld [vmem:[%s385_s11 + $0x10] ss:$8 sps:$4 sm:$0xff] (!%p336_p3)   ;;  %v391_v28 = vld [vmem:[%s385_s11 + $0x14] sm:$0x1] (!%p336_p3)  ;;  %v393_v29 = vld [vmem:[%s385_s11 + $0x1c] sm:$0x1] (!%p336_p3)  ;;  %v398_v30 = vunpack.c.l.bf16 (!%p336_p3), %v386_v23  ;;  %v399_v31 = vunpack.c.l.bf16 (!%p336_p3), %v387_v24  ;;  %v1354_v32 = vunpack.c.h.bf16 (!%p336_p3), %v386_v23  ;;  %v1356_v33 = vunpack.c.l.bf16 (!%p336_p3), %v389_v25 }
  0x4d   : > { %v394_v34 = vld [vmem:[%s385_s11 + $0x20] ss:$8 sps:$4 sm:$0xff]   ;;  %v395_v35 = vld [vmem:[%s385_s11 + $0x24] sm:$0x1]  ;;  %v1358_v36 = vld [vmem:[%s385_s11 + $0x2c] sm:$0x1]  ;;  %v1360_v37 = vunpack.c.l.bf16 %v390_v27  ;;  %v1362_v38 = vunpack.c.l.bf16 %v391_v28  ;;  %v1364_v39 = vunpack.c.h.bf16 %v390_v27  ;;  %v1366_v40 = vunpack.c.l.bf16 %v393_v29 }
  0x4e   : > { %v1368_v41 = vunpack.c.l.bf16 %v394_v34  ;;  %v1370_v42 = vunpack.c.l.bf16 %v395_v35  ;;  %v1372_v43 = vunpack.c.h.bf16 %v394_v34  ;;  %v409_v44 = vunpack.c.l.bf16 %v1358_v36  ;;  %s1450_s14 = scalar_select %p378_p4, %s1127_s19, 1 }
  0x4f   : > { %v415_v45 = vmul.f32 %v907_v22, %v398_v30  ;;  %v416_v46 = vmul.f32 %v907_v22, %v1354_v32  ;;  %v417_v47 = vmul.f32 %v907_v22, %v1360_v37  ;;  %v418_v48 = vmul.f32 %v907_v22, %v1364_v39  ;;  %s903_s6 = sshll.u32 %s375_s30, 4  ;;  %s1543_s5 = sld [smem:[#allocation5_spill]] (%p1281_p13) }
  0x50   : > { %v428_v49 = vmul.f32 %v908_v26, %v398_v30  ;;  %v429_v50 = vmul.f32 %v908_v26, %v399_v31  ;;  %v430_v51 = vmul.f32 %v908_v26, %v1354_v32  ;;  %v431_v52 = vmul.f32 %v908_v26, %v1356_v33  ;;  %s380_s29 = scalar_lea.vmem %s1542_s3, %s1450_s14  ;;  %s377_s12 = scalar_lea.vmem [#allocation4], %s903_s6 }
  0x51   : > { %v432_v53 = vmul.f32 %v908_v26, %v1360_v37  ;;  %v433_v54 = vmul.f32 %v908_v26, %v1362_v38  ;;  %v434_v55 = vmul.f32 %v908_v26, %v1364_v39  ;;  %v435_v56 = vmul.f32 %v908_v26, %v1366_v40  ;;  %s926_s7 = sshll.u32 (%p1281_p13), %s1123_s18, 3  ;;  %s1544_s16 = sld [smem:[#allocation9_spill]] (%p1281_p13) }
  0x52   : > { %v445_v58 = vrot.slane %v428_v49, 1  ;;  %v446_v59 = vrot.slane %v429_v50, 1  ;;  %v448_v60 = vrot.slane %v430_v51, 1  ;;  %v449_v61 = vrot.slane %v431_v52, 1  ;;  %s729_s4 = sadd.s32 (%p1281_p13), %s1127_s19, %s926_s7 }
  0x53   : > { %v451_v62 = vrot.slane %v432_v53, 1  ;;  %v452_v63 = vrot.slane %v433_v54, 1  ;;  %v454_v0 = vrot.slane %v434_v55, 1  ;;  %v455_v1 = vrot.slane %v435_v56, 1 }
  0x54   : > { %v447_v2 = vsel %vm444_vm0, %v445_v58, %v446_v59  ;;  %v450_v3 = vsel %vm444_vm0, %v448_v60, %v449_v61  ;;  %v470_v4 = vmul.f32 %v909_v57, %v398_v30  ;;  %v471_v5 = vmul.f32 %v909_v57, %v399_v31  ;;  %v911_v31 = vld [vmem:[%s1350_s25 + $0x4] ss:$0 sm:$0xff] }
  0x55   : > { %v453_v6 = vsel %vm444_vm0, %v451_v62, %v452_v63  ;;  %v456_v7 = vsel %vm444_vm0, %v454_v0, %v455_v1  ;;  %v461_v8 = vadd.f32 %v447_v2, %v415_v45  ;;  %v462_v9 = vadd.f32 %v450_v3, %v416_v46  ;;  %v912_v63 = vld [vmem:[%s1350_s25 + $0x5] ss:$0 sm:$0xff]  ;;  %s920_s8 = sshll.u32 (%p1281_p13), %s1543_s5, 4 }
  0x56   : > { %v463_v10 = vadd.f32 %v453_v6, %v417_v47  ;;  %v464_v11 = vadd.f32 %v456_v7, %v418_v48  ;;  %v472_v12 = vmul.f32 %v909_v57, %v1354_v32  ;;  %v473_v13 = vmul.f32 %v909_v57, %v1356_v33  ;;  %s731_s10 = sadd.s32 (%p1281_p13), %s920_s8, %s729_s4 }
  0x57   : > { %v474_v14 = vmul.f32 %v909_v57, %v1360_v37  ;;  %v475_v15 = vmul.f32 %v909_v57, %v1362_v38  ;;  %v476_v16 = vmul.f32 %v909_v57, %v1364_v39  ;;  %v477_v17 = vmul.f32 %v909_v57, %v1366_v40  ;;  %s921_s11 = sshll.u32 (%p1281_p13), %s731_s10, 2 }
  0x58   : > { %v487_v19 = vrot.slane %v470_v4, 2  ;;  %v488_v20 = vrot.slane %v471_v5, 2  ;;  %v490_v21 = vrot.slane %v472_v12, 2  ;;  %v491_v22 = vrot.slane %v473_v13, 2  ;;  %s733_s27 = scalar_lea.vmem (%p1281_p13), %s1544_s16, %s921_s11 }
  0x59   : > { %v493_v23 = vrot.slane %v474_v14, 2  ;;  %v494_v24 = vrot.slane %v475_v15, 2  ;;  %v496_v25 = vrot.slane %v476_v16, 2  ;;  %v497_v26 = vrot.slane %v477_v17, 2 }
  0x5a   : > { %v489_v27 = vsel %vm486_vm1, %v487_v19, %v488_v20  ;;  %v492_v28 = vsel %vm486_vm1, %v490_v21, %v491_v22  ;;  %v512_v29 = vmul.f32 %v910_v18, %v1354_v32  ;;  %v513_v30 = vmul.f32 %v910_v18, %v1360_v37  ;;  %v913_v22 = vld [vmem:[%s1350_s25 + $0x6] ss:$0 sm:$0xff] }
  0x5b   : > { %v495_v34 = vsel %vm486_vm1, %v493_v23, %v494_v24  ;;  %v498_v35 = vsel %vm486_vm1, %v496_v25, %v497_v26  ;;  %v503_v45 = vadd.f32 %v489_v27, %v461_v8  ;;  %v504_v46 = vadd.f32 %v492_v28, %v462_v9 }
  0x5c   : > { %v505_v47 = vadd.f32 %v495_v34, %v463_v10  ;;  %v506_v48 = vadd.f32 %v498_v35, %v464_v11  ;;  %v514_v49 = vmul.f32 %v910_v18, %v1364_v39  ;;  %v515_v50 = vmul.f32 %v910_v18, %v1368_v41 }
  0x5d   : > { %v516_v51 = vadd.f32 %v512_v29, %v503_v45  ;;  %v517_v52 = vadd.f32 %v513_v30, %v504_v46  ;;  %v525_v53 = vmul.f32 %v911_v31, %v1354_v32  ;;  %v526_v54 = vmul.f32 %v911_v31, %v1356_v33  ;;  %v914_v46 = vld [vmem:[%s1350_s25 + $0x7] ss:$0 sm:$0xff] }
  0x5e   : > { %v518_v55 = vadd.f32 %v514_v49, %v505_v47  ;;  %v519_v56 = vadd.f32 %v515_v50, %v506_v48  ;;  %v527_v57 = vmul.f32 %v911_v31, %v1360_v37  ;;  %v528_v58 = vmul.f32 %v911_v31, %v1362_v38 }
  0x5f   : > { %v529_v59 = vmul.f32 %v911_v31, %v1364_v39  ;;  %v530_v60 = vmul.f32 %v911_v31, %v1366_v40  ;;  %v531_v61 = vmul.f32 %v911_v31, %v1368_v41  ;;  %v532_v62 = vmul.f32 %v911_v31, %v1370_v42 }
  0x60   : > { %v541_v0 = vrot.slane %v525_v53, 1  ;;  %v542_v1 = vrot.slane %v526_v54, 1  ;;  %v544_v2 = vrot.slane %v527_v57, 1  ;;  %v545_v3 = vrot.slane %v528_v58, 1 }
  0x61   : > { %v547_v4 = vrot.slane %v529_v59, 1  ;;  %v548_v5 = vrot.slane %v530_v60, 1  ;;  %v550_v6 = vrot.slane %v531_v61, 1  ;;  %v551_v7 = vrot.slane %v532_v62, 1 }
  0x62   : > { %v543_v8 = vsel %vm444_vm0, %v541_v0, %v542_v1  ;;  %v546_v9 = vsel %vm444_vm0, %v544_v2, %v545_v3  ;;  %v566_v10 = vmul.f32 %v912_v63, %v1354_v32  ;;  %v567_v11 = vmul.f32 %v912_v63, %v1356_v33  ;;  %v915_v3 = vld [vmem:[%s1350_s25 + $0x8] ss:$0 sm:$0xff] }
  0x63   : > { %v549_v12 = vsel %vm444_vm0, %v547_v4, %v548_v5  ;;  %v552_v13 = vsel %vm444_vm0, %v550_v6, %v551_v7  ;;  %v557_v14 = vadd.f32 %v543_v8, %v516_v51  ;;  %v558_v15 = vadd.f32 %v546_v9, %v517_v52 }
  0x64   : > { %v559_v16 = vadd.f32 %v549_v12, %v518_v55  ;;  %v560_v17 = vadd.f32 %v552_v13, %v519_v56  ;;  %v568_v18 = vmul.f32 %v912_v63, %v1360_v37  ;;  %v569_v19 = vmul.f32 %v912_v63, %v1362_v38 }
  0x65   : > { %v570_v20 = vmul.f32 %v912_v63, %v1364_v39  ;;  %v571_v21 = vmul.f32 %v912_v63, %v1366_v40  ;;  %v572_v32 = vmul.f32 %v912_v63, %v1368_v41  ;;  %v573_v33 = vmul.f32 %v912_v63, %v1370_v42 }
  0x66   : > { %v582_v23 = vrot.slane %v566_v10, 2  ;;  %v583_v24 = vrot.slane %v567_v11, 2  ;;  %v585_v25 = vrot.slane %v568_v18, 2  ;;  %v586_v26 = vrot.slane %v569_v19, 2 }
  0x67   : > { %v588_v27 = vrot.slane %v570_v20, 2  ;;  %v589_v28 = vrot.slane %v571_v21, 2  ;;  %v591_v29 = vrot.slane %v572_v32, 2  ;;  %v592_v30 = vrot.slane %v573_v33, 2 }
  0x68   : > { %v584_v31 = vsel %vm486_vm1, %v582_v23, %v583_v24  ;;  %v587_v34 = vsel %vm486_vm1, %v585_v25, %v586_v26  ;;  %v607_v35 = vmul.f32 %v913_v22, %v1360_v37  ;;  %v608_v45 = vmul.f32 %v913_v22, %v1364_v39 }
  0x69   : > { %v590_v47 = vsel %vm486_vm1, %v588_v27, %v589_v28  ;;  %v593_v48 = vsel %vm486_vm1, %v591_v29, %v592_v30  ;;  %v598_v49 = vadd.f32 %v584_v31, %v557_v14  ;;  %v599_v50 = vadd.f32 %v587_v34, %v558_v15  ;;  %v916_v31 = vld [vmem:[%s380_s29] ss:$0 sm:$0xff] }
  0x6a   : > { %v600_v51 = vadd.f32 %v590_v47, %v559_v16  ;;  %v601_v52 = vadd.f32 %v593_v48, %v560_v17  ;;  %v609_v53 = vmul.f32 %v913_v22, %v1368_v41  ;;  %v610_v54 = vmul.f32 %v913_v22, %v1372_v43 }
  0x6b   : > { %v611_v55 = vadd.f32 %v607_v35, %v598_v49  ;;  %v612_v56 = vadd.f32 %v608_v45, %v599_v50  ;;  %v620_v57 = vmul.f32 %v914_v46, %v1360_v37  ;;  %v621_v58 = vmul.f32 %v914_v46, %v1362_v38 }
  0x6c   : > { %v613_v59 = vadd.f32 %v609_v53, %v600_v51  ;;  %v614_v60 = vadd.f32 %v610_v54, %v601_v52  ;;  %v622_v61 = vmul.f32 %v914_v46, %v1364_v39  ;;  %v623_v62 = vmul.f32 %v914_v46, %v1366_v40 }
  0x6d   : > { %v624_v63 = vmul.f32 %v914_v46, %v1368_v41  ;;  %v625_v0 = vmul.f32 %v914_v46, %v1370_v42  ;;  %v626_v1 = vmul.f32 %v914_v46, %v1372_v43  ;;  %v627_v2 = vmul.f32 %v914_v46, %v409_v44 }
  0x6e   : > { %v636_v4 = vrot.slane %v620_v57, 1  ;;  %v637_v5 = vrot.slane %v621_v58, 1  ;;  %v639_v6 = vrot.slane %v622_v61, 1  ;;  %v640_v7 = vrot.slane %v623_v62, 1 }
  0x6f   : > { %v642_v8 = vrot.slane %v624_v63, 1  ;;  %v643_v9 = vrot.slane %v625_v0, 1  ;;  %v645_v10 = vrot.slane %v626_v1, 1  ;;  %v646_v11 = vrot.slane %v627_v2, 1 }
  0x70   : > { %v638_v12 = vsel %vm444_vm0, %v636_v4, %v637_v5  ;;  %v641_v13 = vsel %vm444_vm0, %v639_v6, %v640_v7  ;;  %v661_v14 = vmul.f32 %v915_v3, %v1360_v37  ;;  %v662_v15 = vmul.f32 %v915_v3, %v1362_v38 }
  0x71   : > { %v644_v16 = vsel %vm444_vm0, %v642_v8, %v643_v9  ;;  %v647_v17 = vsel %vm444_vm0, %v645_v10, %v646_v11  ;;  %v652_v18 = vadd.f32 %v638_v12, %v611_v55  ;;  %v653_v19 = vadd.f32 %v641_v13, %v612_v56 }
  0x72   : > { %v654_v20 = vadd.f32 %v644_v16, %v613_v59  ;;  %v655_v21 = vadd.f32 %v647_v17, %v614_v60  ;;  %v663_v32 = vmul.f32 %v915_v3, %v1364_v39  ;;  %v664_v33 = vmul.f32 %v915_v3, %v1366_v40 }
  0x73   : > { %v665_v37 = vmul.f32 %v915_v3, %v1368_v41  ;;  %v666_v38 = vmul.f32 %v915_v3, %v1370_v42  ;;  %v667_v22 = vmul.f32 %v915_v3, %v1372_v43  ;;  %v668_v23 = vmul.f32 %v915_v3, %v409_v44 }
  0x74   : > { %v677_v24 = vrot.slane %v661_v14, 2  ;;  %v678_v25 = vrot.slane %v662_v15, 2  ;;  %v680_v26 = vrot.slane %v663_v32, 2  ;;  %v681_v27 = vrot.slane %v664_v33, 2 }
  0x75   : > { %v683_v39 = vrot.slane %v665_v37, 2  ;;  %v684_v28 = vrot.slane %v666_v38, 2  ;;  %v686_v40 = vrot.slane %v667_v22, 2  ;;  %v687_v29 = vrot.slane %v668_v23, 2 }
  0x76   : > { %v679_v30 = vsel %vm486_vm1, %v677_v24, %v678_v25  ;;  %v682_v41 = vsel %vm486_vm1, %v680_v26, %v681_v27 }
  0x77   : > { %v685_v42 = vsel %vm486_vm1, %v683_v39, %v684_v28  ;;  %v688_v43 = vsel %vm486_vm1, %v686_v40, %v687_v29  ;;  %v693_v36 = vadd.f32 %v679_v30, %v652_v18  ;;  %v694_v44 = vadd.f32 %v682_v41, %v653_v19 }
  0x78   : > { %v695_v34 = vadd.f32 %v685_v42, %v654_v20  ;;  %v696_v35 = vadd.f32 %v688_v43, %v655_v21 }
  0x79   : > { %v704_v45 = vadd.f32 %v916_v31, %v693_v36  ;;  %v705_v46 = vadd.f32 %v916_v31, %v694_v44 }
  0x7a   : > { %v706_v47 = vadd.f32 %v916_v31, %v695_v34  ;;  %v707_v48 = vadd.f32 %v916_v31, %v696_v35  ;;  %726 = sbr.rel (!%p1281_p13) target bundleno = 138 (0x8a), region = 115 }
  0x7b   : > { %v708_v49 = vmax.f32 %v704_v45, 0.0  ;;  %v709_v50 = vmax.f32 %v705_v46, 0.0 }
  0x7c   : > { %v710_v51 = vmax.f32 %v706_v47, 0.0  ;;  %v711_v52 = vmax.f32 %v707_v48, 0.0 }
  0x7d   : > { %v930_v53 = vpack.c.bf16 %v709_v50, %v708_v49 }
  0x7e   : > { %v935_v54 = vpack.c.bf16 %v711_v52, %v710_v51 }
  0x7f   : > { %931 = vst [vmem:[%s377_s12] sm:$0xff] %v930_v53  }
  0x80   : > { %937 = vst [vmem:[%s377_s12 + $0x8] sm:$0xff] %v935_v54  }
  0x86   : > { %v749_v55 = vld [vmem:[%s377_s12] sm:$0xf]  ;;  %v751_v56 = vld [vmem:[%s377_s12 + $0x4] sm:$0xf] }
  0x87   : > { %v753_v57 = vld [vmem:[%s377_s12 + $0x8] sm:$0xf]  ;;  %v755_v58 = vld [vmem:[%s377_s12 + $0xc] sm:$0xf]  ;;  %750 = vst [vmem:[%s733_s27] sm:$0xf] %v749_v55 }
  0x88   : > { %752 = vst [vmem:[%s733_s27 + $0x8] sm:$0xf] %v751_v56  ;;  %754 = vst [vmem:[%s733_s27 + $0x10] sm:$0xf] %v753_v57 }
  0x89   : > { %756 = vst [vmem:[%s733_s27 + $0x18] sm:$0xf] %v755_v58 }
  0x8a PF: > { %s13_s24 = sadd.s32 1, %s1147_s24   ;;  %s1546_s26 = sld [smem:[#allocation6_spill]] }
  0x8b   : > { %p1483_p5 = scmp.ge.s32.totalorder %s13_s24, 10   ;;  %s1547_s3 = sld [smem:[#allocation7_spill]] }
  0x8c   : > { %s1549_s12 = smov %s1103_s13  ;;  %s1550_s13 = smov %s1279_s2 }
  0x8d   : > { %s1551_s14 = smov %s1111_s15  ;;  %s1552_s15 = smov %s1267_s9 }
  0x8e   : > { %s1553_s16 = smov %s1119_s17  ;;  %s1554_s17 = smov %s1276_s20 }
  0x8f   : > { %s1555_s18 = smov %s1135_s21  ;;  %s1556_s19 = smov %s1139_s22 }
  0x90   : > { %s1557_s20 = smov %s1143_s23  ;;  %s1558_s21 = smov %s1546_s26 }
  0x91   : > { %s1559_s22 = smov %s1547_s3  ;;  %s1560_s23 = smov %s1570_s28 }
  0x92   :  { %12 = sbr.rel (!%p1483_p5) target bundleno = 10 (0xa), region = 199 }

// kernel: _lambda_.29
= control target key start
LH: loop header
LB: loop body
LE: loop exit
PB: predicated region body
PF: predicated region fallthrough
CT: control target
= control target key end

     0   :  { %s830_s15 = smov 0   ;;  %s925_s0 = inlined_call_operand.vmem [shape: bf16[128,256], index: 0, kind: input, shape index: {}]   ;;  %s926_s1 = inlined_call_operand.vmem [shape: bf16[256,128], index: 1, kind: input, shape index: {}]   ;;  %s927_s2 = inlined_call_operand.vmem [shape: f32[1,128], index: 2, kind: input, shape index: {}]   ;;  %s928_s3 = inlined_call_operand.vmem [shape: bf16[128,128], index: 3, kind: input, shape index: {}]   ;;  %s929_s4 = inlined_call_operand.vmem [shape: bf16[128,128], index: 4, kind: output, shape index: {}]  }
   0x1 LB: > { %s607_s16 = sadd.s32 4294967295, %s803_s15   ;;  %p611_p0 = scmp.ge.s32.totalorder %s803_s15, 1  ;;  %s803_s15 = sphi %s830_s15, %s14_s15  }
   0x2   : > { %p175_p1 = scmp.lt.s32.totalorder %s803_s15, 3 }
   0x4   : > { %p176_p2 = pnand %p611_p0, %p175_p1 }
   0x5   : > { %v769_v0 = vld [vmem:[%s926_s1 + $0x40] sm:$0xff] (!%p176_p2)   ;;  %s612_s19 = sshll.u32 (!%p176_p2), %s607_s16, 3  ;;  %v771_v2 = vld [vmem:[%s926_s1 + $0x48] sm:$0xff] (!%p176_p2)   ;;  %v773_v4 = vld [vmem:[%s926_s1 + $0x50] sm:$0xff] (!%p176_p2)  }
   0x6   : > { %179 = sbr.rel (%p176_p2) target bundleno = 271 (0x10f), region = 36  ;;  %v770_v1 = vld [vmem:[%s926_s1] sm:$0xff] (!%p176_p2)   ;;  %705 = vmatprep.subr.bf16.mxu0 (!%p176_p2), %v769_v0  ;;  %745 = vmatprep.subr.bf16.mxu1 (!%p176_p2), %v769_v0  ;;  %v772_v3 = vld [vmem:[%s926_s1 + $0x8] sm:$0xff] (!%p176_p2)   ;;  %p208_p3 = scmp.lt.s32.totalorder (!%p176_p2), %s612_s19, 15  ;;  %v774_v5 = vld [vmem:[%s926_s1 + $0x10] sm:$0xff] (!%p176_p2)  }
   0x7   : > { %706 = vmatpush3.bf16.msra.mxu0 (!%p176_p2), %v770_v1  ;;  %753 = vmatpush3.bf16.msra.mxu1 (!%p176_p2), %v770_v1  ;;  %v775_v6 = vld [vmem:[%s926_s1 + $0x58] sm:$0xff] (!%p176_p2)   ;;  %v777_v8 = vld [vmem:[%s926_s1 + $0x60] sm:$0xff] (!%p176_p2)   ;;  %v779_v10 = vld [vmem:[%s926_s1 + $0x68] sm:$0xff] (!%p176_p2)  }
   0x8   : > { %707 = vmatprep.subr.bf16.mxu0 (!%p176_p2), %v771_v2  ;;  %746 = vmatprep.subr.bf16.mxu1 (!%p176_p2), %v771_v2  ;;  %v776_v7 = vld [vmem:[%s926_s1 + $0x18] sm:$0xff] (!%p176_p2)   ;;  %v778_v9 = vld [vmem:[%s926_s1 + $0x20] sm:$0xff] (!%p176_p2)   ;;  %v780_v13 = vld [vmem:[%s926_s1 + $0x28] sm:$0xff] (!%p176_p2)  }
   0x9   : > { %v781_v14 = vld [vmem:[%s926_s1 + $0x70] sm:$0xff] (!%p176_p2)   ;;  %v783_v16 = vld [vmem:[%s926_s1 + $0x78] sm:$0xff] (!%p176_p2)   ;;  %v619_v28 = vld [vmem:[%s927_s2] ss:$0 sm:$0xff] (!%p176_p2) }
   0xa   : > { %v782_v15 = vld [vmem:[%s926_s1 + $0x30] sm:$0xff] (!%p176_p2)   ;;  %v784_v17 = vld [vmem:[%s926_s1 + $0x38] sm:$0xff] (!%p176_p2)  }
   0xb   : > { %708 = vmatpush3.bf16.msra.mxu0 (!%p176_p2), %v772_v3  ;;  %754 = vmatpush3.bf16.msra.mxu1 (!%p176_p2), %v772_v3 }
   0xc   : > { %709 = vmatprep.subr.bf16.mxu0 (!%p176_p2), %v773_v4  ;;  %747 = vmatprep.subr.bf16.mxu1 (!%p176_p2), %v773_v4 }
   0xd   : > { %s931_s19 = smov (!%p208_p3, %s612_s19), 15 }
   0xe   : > { %s654_s8 = sshll.u32 %s931_s19, 3  ;;  %s616_s30 = sshll.u32 %s931_s19, 2 }
   0xf   : > { %710 = vmatpush3.bf16.msra.mxu0 %v774_v5  ;;  %755 = vmatpush3.bf16.msra.mxu1 %v774_v5  ;;  %s871_s13 = scalar_lea.vmem %s925_s0, %s654_s8  ;;  %s908_s7 = scalar_lea.vmem %s928_s3, %s616_s30 }
  0x10   : > { %711 = vmatprep.subr.bf16.mxu0 %v775_v6  ;;  %748 = vmatprep.subr.bf16.mxu1 %v775_v6  ;;  %v787_v11 = vld [vmem:[%s871_s13 + $0x4] ss:$8 sps:$4 sm:$0xff]   ;;  %v785_v18 = vld [vmem:[%s871_s13] ss:$8 sps:$4 sm:$0xff]   ;;  %v791_v20 = vld [vmem:[%s871_s13 + $0x14] ss:$8 sps:$4 sm:$0xff]   ;;  %s224_s12 = scalar_lea.vmem %s929_s4, %s616_s30 }
  0x11   : > { %v790_v12 = vld [vmem:[%s871_s13 + $0x24] ss:$8 sps:$4 sm:$0xff]   ;;  %442 = vmatprep.mubr.bf16.mxu0 %v787_v11  ;;  %v788_v19 = vld [vmem:[%s871_s13 + $0x20] ss:$8 sps:$4 sm:$0xff]   ;;  %v793_v21 = vld [vmem:[%s871_s13 + $0x34] ss:$8 sps:$4 sm:$0xff]  }
  0x12   : > { %458 = vmatprep.mubr.bf16.mxu1 %v790_v12  ;;  %v795_v22 = vld [vmem:[%s871_s13 + $0x10] ss:$8 sps:$4 sm:$0xff]   ;;  %v664_v26 = vld [vmem:[%s908_s7] sm:$0xff]   ;;  %v699_v53 = vld [vmem:[%s908_s7 + $0x8] sm:$0xff]  }
  0x13   : > { %712 = vmatpush3.bf16.msra.mxu0 %v776_v7  ;;  %756 = vmatpush3.bf16.msra.mxu1 %v776_v7  ;;  %v796_v23 = vld [vmem:[%s871_s13 + $0x30] ss:$8 sps:$4 sm:$0xff]   ;;  %v665_v35 = vunpack.c.l.bf16 %v664_v26  ;;  %v666_v38 = vunpack.c.h.bf16 %v664_v26  ;;  %v669_v63 = vunpack.c.l.bf16 %v699_v53  ;;  %v670_v2 = vunpack.c.h.bf16 %v699_v53 }
  0x14   : > { %713 = vmatprep.subr.bf16.mxu0 %v777_v8  ;;  %749 = vmatprep.subr.bf16.mxu1 %v777_v8  ;;  %v700_v27 = vld [vmem:[%s908_s7 + $0x10] sm:$0xff]   ;;  %v701_v54 = vld [vmem:[%s908_s7 + $0x18] sm:$0xff]  }
  0x15   : > { %v673_v36 = vunpack.c.l.bf16 %v700_v27  ;;  %v674_v40 = vunpack.c.h.bf16 %v700_v27  ;;  %v677_v0 = vunpack.c.l.bf16 %v701_v54  ;;  %v678_v4 = vunpack.c.h.bf16 %v701_v54 }
  0x17   : > { %714 = vmatpush3.bf16.msra.mxu0 %v778_v9  ;;  %757 = vmatpush3.bf16.msra.mxu1 %v778_v9 }
  0x18   : > { %715 = vmatprep.subr.bf16.mxu0 %v779_v10  ;;  %750 = vmatprep.subr.bf16.mxu1 %v779_v10 }
  0x1b   : > { %716 = vmatpush3.bf16.msra.mxu0 %v780_v13  ;;  %758 = vmatpush3.bf16.msra.mxu1 %v780_v13 }
  0x1c   : > { %717 = vmatprep.subr.bf16.mxu0 %v781_v14  ;;  %751 = vmatprep.subr.bf16.mxu1 %v781_v14 }
  0x1f   : > { %718 = vmatpush3.bf16.msra.mxu0 %v782_v15  ;;  %759 = vmatpush3.bf16.msra.mxu1 %v782_v15 }
  0x20   : > { %719 = vmatprep.subr.bf16.mxu0 %v783_v16  ;;  %752 = vmatprep.subr.bf16.mxu1 %v783_v16 }
  0x23   : > { %720 = vmatpush3.bf16.msra.mxu0 %v784_v17  ;;  %760 = vmatpush3.bf16.msra.mxu1 %v784_v17 }
  0x26   : > { %443 = vmatmul.mubr.bf16.vlgmr.msra.gmra.mrb[0].mxu0 %v785_v18  ;;  %459 = vmatmul.mubr.bf16.vlgmr.msra.gmra.mrb[0].mxu1 %v788_v19 }
  0x27   : > { %450 = vmatprep.mubr.bf16.mxu0 %v791_v20  ;;  %466 = vmatprep.mubr.bf16.mxu1 %v793_v21 }
  0x2e   : > { %451 = vmatmul.mubr.bf16.gmra.mrb[4].mxu0 %v795_v22  ;;  %467 = vmatmul.mubr.bf16.gmra.mrb[4].mxu1 %v796_v23 }
  0xf9   : > { %v721_v24 = vpop.f32.mrb[0].mxu0  ;;  %v733_v25 = vpop.f32.mrb[0].mxu1 }
  0xfa   : > { %v722_v29 = vpop.f32.mrb[1].mxu0  ;;  %v734_v30 = vpop.f32.mrb[1].mxu1 }
  0xfb   : > { %v723_v31 = vadd.f32 %v722_v29, %v721_v24  ;;  %v735_v32 = vadd.f32 %v734_v30, %v733_v25  ;;  %v724_v33 = vpop.f32.mrb[2].mxu0  ;;  %v736_v34 = vpop.f32.mrb[2].mxu1 }
  0xfc   : > { %v725_v37 = vpop.f32.mrb[3].mxu0  ;;  %v737_v39 = vpop.f32.mrb[3].mxu1 }
  0xfd   : > { %v445_v41 = vadd.f32 %v723_v31, %v619_v28  ;;  %v461_v42 = vadd.f32 %v735_v32, %v619_v28  ;;  %v726_v43 = vadd.f32 %v725_v37, %v724_v33  ;;  %v738_v44 = vadd.f32 %v737_v39, %v736_v34 }
  0xff   : > { %v448_v45 = vadd.f32 %v726_v43, %v619_v28  ;;  %v464_v46 = vadd.f32 %v738_v44, %v619_v28  ;;  %v491_v47 = vadd.f32 %v665_v35, %v445_v41  ;;  %v495_v48 = vadd.f32 %v673_v36, %v461_v42 }
 0x101   : > { %v492_v49 = vadd.f32 %v666_v38, %v448_v45  ;;  %v496_v50 = vadd.f32 %v674_v40, %v464_v46  ;;  %v727_v51 = vpop.f32.mrb[4].mxu0  ;;  %v739_v52 = vpop.f32.mrb[4].mxu1 }
 0x102   : > { %v728_v55 = vpop.f32.mrb[5].mxu0  ;;  %v740_v56 = vpop.f32.mrb[5].mxu1 }
 0x103   : > { %v682_v57 = vpack.c.bf16 %v492_v49, %v491_v47  ;;  %v692_v58 = vpack.c.bf16 %v496_v50, %v495_v48  ;;  %v729_v59 = vadd.f32 %v728_v55, %v727_v51  ;;  %v741_v60 = vadd.f32 %v740_v56, %v739_v52  ;;  %v730_v61 = vpop.f32.mrb[6].mxu0  ;;  %v742_v62 = vpop.f32.mrb[6].mxu1 }
 0x104   : > { %v731_v1 = vpop.f32.mrb[7].mxu0  ;;  %v743_v3 = vpop.f32.mrb[7].mxu1 }
 0x105   : > { %683 = vst [vmem:[%s224_s12] sm:$0xff] %v682_v57   ;;  %703 = vst [vmem:[%s224_s12 + $0x10] sm:$0xff] %v692_v58   ;;  %v453_v5 = vadd.f32 %v729_v59, %v619_v28  ;;  %v469_v6 = vadd.f32 %v741_v60, %v619_v28  ;;  %v732_v7 = vadd.f32 %v731_v1, %v730_v61 }
 0x106   : > { %v744_v8 = vadd.f32 %v743_v3, %v742_v62 }
 0x107   : > { %v456_v9 = vadd.f32 %v732_v7, %v619_v28  ;;  %v493_v11 = vadd.f32 %v669_v63, %v453_v5  ;;  %v497_v12 = vadd.f32 %v677_v0, %v469_v6 }
 0x108   : > { %v472_v10 = vadd.f32 %v744_v8, %v619_v28 }
 0x109   : > { %v494_v13 = vadd.f32 %v670_v2, %v456_v9 }
 0x10a   : > { %v498_v14 = vadd.f32 %v678_v4, %v472_v10 }
 0x10b   : > { %v687_v15 = vpack.c.bf16 %v494_v13, %v493_v11 }
 0x10c   : > { %v697_v16 = vpack.c.bf16 %v498_v14, %v497_v12 }
 0x10d   : > { %702 = vst [vmem:[%s224_s12 + $0x8] sm:$0xff] %v687_v15  }
 0x10e   : > { %704 = vst [vmem:[%s224_s12 + $0x18] sm:$0xff] %v697_v16  }
 0x10f PF: > { %s14_s15 = sadd.s32 1, %s803_s15  }
 0x110   : > { %p11_p4 = scmp.ge.s32.totalorder %s14_s15, 4  }
 0x112   :  { %13 = sbr.rel (!%p11_p4) target bundleno = 1 (0x1), region = 69 }

// kernel: _lambda_.32
= control target key start
LH: loop header
LB: loop body
LE: loop exit
PB: predicated region body
PF: predicated region fallthrough
CT: control target
= control target key end

     0   :  { %s469_s12 = smov 0   ;;  %s516_s0 = inlined_call_operand.vmem [shape: bf16[32,128], index: 0, kind: input, shape index: {}]   ;;  %s517_s1 = inlined_call_operand.vmem [shape: bf16[128,128], index: 1, kind: input, shape index: {}]   ;;  %s518_s2 = inlined_call_operand.vmem [shape: f32[1,128], index: 2, kind: input, shape index: {}]   ;;  %s519_s3 = inlined_call_operand.vmem [shape: bf16[32,128], index: 3, kind: output, shape index: {}]  }
   0x1 LB: > { %s361_s13 = sadd.s32 4294967295, %s445_s12   ;;  %p365_p0 = scmp.ge.s32.totalorder %s445_s12, 1  ;;  %s445_s12 = sphi %s469_s12, %s13_s12  }
   0x2   : > { %p138_p1 = scmp.lt.s32.totalorder %s445_s12, 3 }
   0x4   : > { %p139_p2 = pnand %p365_p0, %p138_p1 }
   0x5   : > { %v430_v0 = vld [vmem:[%s517_s1] sm:$0xff] (!%p139_p2)   ;;  %v447_v1 = vmov (!%p139_p2), 0.0   ;;  %v431_v2 = vld [vmem:[%s517_s1 + $0x8] sm:$0xff] (!%p139_p2)   ;;  %vm448_vm0 = vmmov (!%p139_p2), 0   ;;  %s366_s18 = sshll.u32 (!%p139_p2), %s361_s13, 1  ;;  %v432_v3 = vld [vmem:[%s517_s1 + $0x10] sm:$0xff] (!%p139_p2)  }
   0x6   : > { %142 = sbr.rel (%p139_p2) target bundleno = 257 (0x101), region = 32  ;;  %400 = vmatprep.subr.bf16.mxu0 (!%p139_p2), %v447_v1  ;;  %416 = vmatprep.mubr.msk.bf16.mxu0 (!%p139_p2), %vm448_vm0, %v447_v1  ;;  %p163_p3 = scmp.lt.s32.totalorder (!%p139_p2), %s366_s18, 3  ;;  %v433_v4 = vld [vmem:[%s517_s1 + $0x18] sm:$0xff] (!%p139_p2)   ;;  %v434_v5 = vld [vmem:[%s517_s1 + $0x20] sm:$0xff] (!%p139_p2)   ;;  %v435_v6 = vld [vmem:[%s517_s1 + $0x28] sm:$0xff] (!%p139_p2)  }
   0x7   : > { %401 = vmatpush3.bf16.msra.mxu0 (!%p139_p2), %v430_v0  ;;  %v436_v7 = vld [vmem:[%s517_s1 + $0x30] sm:$0xff] (!%p139_p2)   ;;  %v437_v8 = vld [vmem:[%s517_s1 + $0x38] sm:$0xff] (!%p139_p2)   ;;  %v370_v10 = vld [vmem:[%s518_s2] ss:$0 sm:$0xff] (!%p139_p2) }
   0x8   : > { %402 = vmatprep.subr.bf16.mxu0 (!%p139_p2), %v447_v1 }
   0xb   : > { %403 = vmatpush3.bf16.msra.mxu0 (!%p139_p2), %v431_v2 }
   0xc   : > { %404 = vmatprep.subr.bf16.mxu0 (!%p139_p2), %v447_v1 }
   0xd   : > { %s521_s18 = smov (!%p163_p3, %s366_s18), 3 }
   0xe   : > { %s367_s21 = sshll.u32 %s521_s18, 2 }
   0xf   : > { %s166_s24 = scalar_lea.vmem %s516_s0, %s367_s21  ;;  %405 = vmatpush3.bf16.msra.mxu0 %v432_v3  ;;  %s172_s13 = scalar_lea.vmem %s519_s3, %s367_s21 }
  0x10   : > { %406 = vmatprep.subr.bf16.mxu0 %v447_v1  ;;  %v438_v9 = vld [vmem:[%s166_s24] sm:$0xff]  }
  0x13   : > { %407 = vmatpush3.bf16.msra.mxu0 %v433_v4 }
  0x14   : > { %408 = vmatprep.subr.bf16.mxu0 %v447_v1 }
  0x17   : > { %409 = vmatpush3.bf16.msra.mxu0 %v434_v5 }
  0x18   : > { %410 = vmatprep.subr.bf16.mxu0 %v447_v1 }
  0x1b   : > { %411 = vmatpush3.bf16.msra.mxu0 %v435_v6 }
  0x1c   : > { %412 = vmatprep.subr.bf16.mxu0 %v447_v1 }
  0x1f   : > { %413 = vmatpush3.bf16.msra.mxu0 %v436_v7 }
  0x20   : > { %414 = vmatprep.subr.bf16.mxu0 %v447_v1 }
  0x23   : > { %415 = vmatpush3.bf16.msra.mxu0 %v437_v8 }
  0x26   : > { %417 = vmatmul.mubr.bf16.vlgmr.msra.gmra.mrb[0].mxu0 %v438_v9 }
  0xf9   : > { %v288_v11 = vpop.f32.mrb[0].mxu0 }
  0xfa   : > { %v418_v12 = vpop.f32.mrb[1].mxu0  ;;  %v289_v14 = vadd.f32 %v370_v10, %v288_v11 }
  0xfb   : > { %v291_v13 = vpop.f32.mrb[2].mxu0 }
  0xfc   : > { %v292_v15 = vadd.f32 %v370_v10, %v291_v13  ;;  %v419_v16 = vpop.f32.mrb[3].mxu0 }
  0xfe   : > { %v389_v17 = vpack.c.bf16 %v292_v15, %v289_v14 }
 0x100   : > { %390 = vst [vmem:[%s172_s13] sm:$0xff] %v389_v17  }
 0x101 PF: > { %s13_s12 = sadd.s32 1, %s445_s12  }
 0x102   : > { %p10_p4 = scmp.ge.s32.totalorder %s13_s12, 4  }
 0x104   :  { %12 = sbr.rel (!%p10_p4) target bundleno = 1 (0x1), region = 62 }

// kernel: _lambda_.33
= control target key start
LH: loop header
LB: loop body
LE: loop exit
PB: predicated region body
PF: predicated region fallthrough
CT: control target
= control target key end

     0   :  { %s471_s12 = smov 0   ;;  %s522_s0 = inlined_call_operand.vmem [shape: bf16[32,128], index: 0, kind: input, shape index: {}]   ;;  %s523_s1 = inlined_call_operand.vmem [shape: bf16[128,128], index: 1, kind: input, shape index: {}]   ;;  %s524_s2 = inlined_call_operand.vmem [shape: f32[1,128], index: 2, kind: input, shape index: {}]   ;;  %s525_s3 = inlined_call_operand.vmem [shape: bf16[32,128], index: 3, kind: output, shape index: {}]  }
   0x1 LB: > { %s363_s13 = sadd.s32 4294967295, %s447_s12   ;;  %p367_p0 = scmp.ge.s32.totalorder %s447_s12, 1  ;;  %s447_s12 = sphi %s471_s12, %s13_s12  }
   0x2   : > { %p138_p1 = scmp.lt.s32.totalorder %s447_s12, 3 }
   0x4   : > { %p139_p2 = pnand %p367_p0, %p138_p1 }
   0x5   : > { %v432_v0 = vld [vmem:[%s523_s1] sm:$0xff] (!%p139_p2)   ;;  %v449_v1 = vmov (!%p139_p2), 0.0   ;;  %v433_v2 = vld [vmem:[%s523_s1 + $0x8] sm:$0xff] (!%p139_p2)   ;;  %vm450_vm0 = vmmov (!%p139_p2), 0   ;;  %s368_s18 = sshll.u32 (!%p139_p2), %s363_s13, 1  ;;  %v434_v3 = vld [vmem:[%s523_s1 + $0x10] sm:$0xff] (!%p139_p2)  }
   0x6   : > { %142 = sbr.rel (%p139_p2) target bundleno = 259 (0x103), region = 32  ;;  %402 = vmatprep.subr.bf16.mxu0 (!%p139_p2), %v449_v1  ;;  %418 = vmatprep.mubr.msk.bf16.mxu0 (!%p139_p2), %vm450_vm0, %v449_v1  ;;  %p163_p3 = scmp.lt.s32.totalorder (!%p139_p2), %s368_s18, 3  ;;  %v435_v4 = vld [vmem:[%s523_s1 + $0x18] sm:$0xff] (!%p139_p2)   ;;  %v436_v5 = vld [vmem:[%s523_s1 + $0x20] sm:$0xff] (!%p139_p2)   ;;  %v437_v6 = vld [vmem:[%s523_s1 + $0x28] sm:$0xff] (!%p139_p2)  }
   0x7   : > { %403 = vmatpush3.bf16.msra.mxu0 (!%p139_p2), %v432_v0  ;;  %v438_v7 = vld [vmem:[%s523_s1 + $0x30] sm:$0xff] (!%p139_p2)   ;;  %v439_v8 = vld [vmem:[%s523_s1 + $0x38] sm:$0xff] (!%p139_p2)   ;;  %v372_v10 = vld [vmem:[%s524_s2] ss:$0 sm:$0xff] (!%p139_p2) }
   0x8   : > { %404 = vmatprep.subr.bf16.mxu0 (!%p139_p2), %v449_v1 }
   0xb   : > { %405 = vmatpush3.bf16.msra.mxu0 (!%p139_p2), %v433_v2 }
   0xc   : > { %406 = vmatprep.subr.bf16.mxu0 (!%p139_p2), %v449_v1 }
   0xd   : > { %s527_s18 = smov (!%p163_p3, %s368_s18), 3 }
   0xe   : > { %s369_s21 = sshll.u32 %s527_s18, 2 }
   0xf   : > { %s166_s24 = scalar_lea.vmem %s522_s0, %s369_s21  ;;  %407 = vmatpush3.bf16.msra.mxu0 %v434_v3  ;;  %s172_s13 = scalar_lea.vmem %s525_s3, %s369_s21 }
  0x10   : > { %408 = vmatprep.subr.bf16.mxu0 %v449_v1  ;;  %v440_v9 = vld [vmem:[%s166_s24] sm:$0xff]  }
  0x13   : > { %409 = vmatpush3.bf16.msra.mxu0 %v435_v4 }
  0x14   : > { %410 = vmatprep.subr.bf16.mxu0 %v449_v1 }
  0x17   : > { %411 = vmatpush3.bf16.msra.mxu0 %v436_v5 }
  0x18   : > { %412 = vmatprep.subr.bf16.mxu0 %v449_v1 }
  0x1b   : > { %413 = vmatpush3.bf16.msra.mxu0 %v437_v6 }
  0x1c   : > { %414 = vmatprep.subr.bf16.mxu0 %v449_v1 }
  0x1f   : > { %415 = vmatpush3.bf16.msra.mxu0 %v438_v7 }
  0x20   : > { %416 = vmatprep.subr.bf16.mxu0 %v449_v1 }
  0x23   : > { %417 = vmatpush3.bf16.msra.mxu0 %v439_v8 }
  0x26   : > { %419 = vmatmul.mubr.bf16.vlgmr.msra.gmra.mrb[0].mxu0 %v440_v9 }
  0xf9   : > { %v288_v11 = vpop.f32.mrb[0].mxu0 }
  0xfa   : > { %v289_v12 = vadd.f32 %v372_v10, %v288_v11  ;;  %v420_v13 = vpop.f32.mrb[1].mxu0 }
  0xfb   : > { %v291_v14 = vpop.f32.mrb[2].mxu0 }
  0xfc   : > { %v292_v15 = vadd.f32 %v372_v10, %v291_v14  ;;  %v421_v16 = vpop.f32.mrb[3].mxu0  ;;  %v295_v17 = vmax.f32 %v289_v12, 0.0 }
  0xfe   : > { %v296_v18 = vmax.f32 %v292_v15, 0.0 }
 0x100   : > { %v391_v19 = vpack.c.bf16 %v296_v18, %v295_v17 }
 0x102   : > { %392 = vst [vmem:[%s172_s13] sm:$0xff] %v391_v19  }
 0x103 PF: > { %s13_s12 = sadd.s32 1, %s447_s12  }
 0x104   : > { %p10_p4 = scmp.ge.s32.totalorder %s13_s12, 4  }
 0x106   :  { %12 = sbr.rel (!%p10_p4) target bundleno = 1 (0x1), region = 62 }

// kernel: _lambda_.31
= control target key start
LH: loop header
LB: loop body
LE: loop exit
PB: predicated region body
PF: predicated region fallthrough
CT: control target
= control target key end

     0   :  { %s1100_s12 = smov 0   ;;  %s1102_s13 = smov 0   ;;  %s1388_s0 = inlined_call_operand.vmem [shape: bf16[2,24,6,128], index: 0, kind: input, shape index: {}]   ;;  %s1389_s1 = inlined_call_operand.vmem [shape: f32[25,128], index: 1, kind: input, shape index: {}]   ;;  %s1390_s2 = inlined_call_operand.vmem [shape: f32[1,128], index: 2, kind: input, shape index: {}]   ;;  %s1391_s3 = inlined_call_operand.vmem [shape: bf16[2,4,4,128], index: 3, kind: output, shape index: {}]  }
   0x1   :  { %s1104_s14 = smov 0  }
   0x2 LB: > { %s32_s15 = sadd.s32 1, %s1074_s13  ;;  %p982_p0 = scmp.ge.s32.totalorder %s1078_s14, 1  ;;  %s1078_s14 = sphi %s1104_s14, %s13_s14   ;;  %s1074_s13 = sphi %s1102_s13, %s1393_s13   ;;  %s1070_s12 = sphi %s1100_s12, %s1392_s12  }
   0x3   : > { %p34_p1 = scmp.ge.s32.totalorder %s32_s15, 2  ;;  %p182_p2 = scmp.lt.s32.totalorder %s1078_s14, 3 }
   0x5   : > { %s1395_s15 = smov (%p34_p1, %s32_s15), 0  ;;  %p183_p3 = pnand %p982_p0, %p182_p2 }
   0x6   : > { %p223_p4 = scmp.lt.s32.totalorder (!%p183_p3), %s1070_s12, 1  ;;  %v1002_v0 = vld [vmem:[%s1389_s1] ss:$0 sm:$0xff] (!%p183_p3)  ;;  %v1003_v16 = vld [vmem:[%s1389_s1 + $0x1] ss:$0 sm:$0xff] (!%p183_p3) }
   0x7   : > { %186 = sbr.rel (%p183_p3) target bundleno = 99 (0x63), region = 32  ;;  %v1004_v31 = vld [vmem:[%s1389_s1 + $0x2] ss:$0 sm:$0xff] (!%p183_p3)  ;;  %v1005_v55 = vld [vmem:[%s1389_s1 + $0x3] ss:$0 sm:$0xff] (!%p183_p3) }
   0xe   : > { %s1397_s12 = smov (!%p223_p4, %s1070_s12), 1 }
   0xf   : > { %s1031_s16 = smul.u32 96, %s1397_s12  ;;  %s1030_s26 = sshll.u32 %s1397_s12, 3 }
  0x10   : > { %s249_s29 = scalar_lea.vmem %s1391_s3, %s1030_s26 }
  0x11   : > { %s1124_s19 = scalar_lea.vmem %s1388_s0, %s1031_s16 }
  0x12   : > { %v254_v1 = vld [vmem:[%s1124_s19] sm:$0x7]  ;;  %v255_v2 = vld [vmem:[%s1124_s19 + $0x4] sm:$0x7]  ;;  %v256_v3 = vld [vmem:[%s1124_s19 + $0x8] sm:$0x7] }
  0x13   : > { %v257_v4 = vld [vmem:[%s1124_s19 + $0xc] sm:$0x7]  ;;  %v258_v5 = vld [vmem:[%s1124_s19 + $0x10] sm:$0x7]  ;;  %v259_v6 = vld [vmem:[%s1124_s19 + $0x14] sm:$0x7]  ;;  %v1135_v7 = vunpack.c.l.bf16 %v254_v1  ;;  %v1137_v8 = vunpack.c.l.bf16 %v255_v2  ;;  %v1139_v9 = vunpack.c.l.bf16 %v256_v3 }
  0x14   : > { %v1141_v10 = vunpack.c.l.bf16 %v257_v4  ;;  %v1143_v11 = vunpack.c.l.bf16 %v258_v5  ;;  %v1145_v12 = vunpack.c.l.bf16 %v259_v6  ;;  %v986_v13 = vld [vmem:[%s1124_s19 + $0x18] sm:$0x7]  ;;  %v987_v14 = vld [vmem:[%s1124_s19 + $0x1c] sm:$0x7]  ;;  %v988_v15 = vld [vmem:[%s1124_s19 + $0x20] sm:$0x7] }
  0x15   : > { %v989_v17 = vld [vmem:[%s1124_s19 + $0x24] sm:$0x7]  ;;  %v990_v18 = vld [vmem:[%s1124_s19 + $0x28] sm:$0x7]  ;;  %v1156_v19 = vld [vmem:[%s1124_s19 + $0x2c] sm:$0x7]  ;;  %v275_v20 = vunpack.c.l.bf16 %v986_v13  ;;  %v1158_v21 = vunpack.c.l.bf16 %v987_v14  ;;  %v1160_v22 = vunpack.c.l.bf16 %v988_v15  ;;  %v312_v23 = vmul.f32 %v1002_v0, %v1135_v7 }
  0x16   : > { %v1163_v24 = vunpack.c.l.bf16 %v989_v17  ;;  %v1165_v25 = vunpack.c.l.bf16 %v990_v18  ;;  %v280_v26 = vunpack.c.l.bf16 %v1156_v19  ;;  %v992_v27 = vld [vmem:[%s1124_s19 + $0x30] sm:$0x7]  ;;  %v993_v28 = vld [vmem:[%s1124_s19 + $0x34] sm:$0x7]  ;;  %v994_v29 = vld [vmem:[%s1124_s19 + $0x38] sm:$0x7]  ;;  %v313_v30 = vmul.f32 %v1002_v0, %v1137_v8 }
  0x17   : > { %v995_v32 = vld [vmem:[%s1124_s19 + $0x3c] sm:$0x7]  ;;  %v996_v33 = vld [vmem:[%s1124_s19 + $0x40] sm:$0x7]  ;;  %v1177_v34 = vunpack.c.l.bf16 %v992_v27  ;;  %v1179_v35 = vunpack.c.l.bf16 %v993_v28  ;;  %v1181_v36 = vunpack.c.l.bf16 %v994_v29  ;;  %v1184_v37 = vld [vmem:[%s1124_s19 + $0x48] sm:$0x7]  ;;  %v314_v38 = vmul.f32 %v1002_v0, %v1139_v9 }
  0x18   : > { %v1187_v39 = vunpack.c.l.bf16 %v995_v32  ;;  %v1189_v40 = vunpack.c.l.bf16 %v996_v33  ;;  %v998_v41 = vld [vmem:[%s1124_s19 + $0x4c] sm:$0x7]  ;;  %v999_v42 = vld [vmem:[%s1124_s19 + $0x50] sm:$0x7]  ;;  %v1000_v43 = vld [vmem:[%s1124_s19 + $0x54] sm:$0x7]  ;;  %v302_v44 = vunpack.c.l.bf16 %v1184_v37  ;;  %v315_v45 = vmul.f32 %v1002_v0, %v1141_v10 }
  0x19   : > { %v1197_v46 = vld [vmem:[%s1124_s19 + $0x58] sm:$0x7]  ;;  %v1199_v47 = vunpack.c.l.bf16 %v998_v41  ;;  %v1201_v48 = vunpack.c.l.bf16 %v999_v42  ;;  %v1203_v49 = vunpack.c.l.bf16 %v1000_v43  ;;  %v325_v50 = vmul.f32 %v1003_v16, %v275_v20  ;;  %v1006_v14 = vld [vmem:[%s1389_s1 + $0x4] ss:$0 sm:$0xff] }
  0x1a   : > { %v306_v51 = vunpack.c.l.bf16 %v1197_v46  ;;  %v326_v52 = vmul.f32 %v1003_v16, %v1158_v21  ;;  %v327_v53 = vmul.f32 %v1003_v16, %v1160_v22  ;;  %v328_v54 = vmul.f32 %v1003_v16, %v1163_v24 }
  0x1b   : > { %v329_v56 = vadd.f32 %v325_v50, %v312_v23  ;;  %v338_v57 = vmul.f32 %v1004_v31, %v1135_v7  ;;  %v339_v58 = vmul.f32 %v1004_v31, %v1137_v8  ;;  %v340_v59 = vmul.f32 %v1004_v31, %v1139_v9 }
  0x1c   : > { %v330_v60 = vadd.f32 %v326_v52, %v313_v30  ;;  %v331_v61 = vadd.f32 %v327_v53, %v314_v38  ;;  %v332_v62 = vadd.f32 %v328_v54, %v315_v45  ;;  %v341_v63 = vmul.f32 %v1004_v31, %v1141_v10  ;;  %v1008_v45 = vld [vmem:[%s1389_s1 + $0x6] ss:$0 sm:$0xff] }
  0x1d   : > { %v346_v0 = vrot.slane %v338_v57, 1  ;;  %v347_v1 = vrot.slane %v339_v58, 1  ;;  %v348_v2 = vrot.slane %v340_v59, 1  ;;  %v363_v3 = vmul.f32 %v1005_v55, %v275_v20  ;;  %v1007_v20 = vld [vmem:[%s1389_s1 + $0x5] ss:$0 sm:$0xff] }
  0x1e   : > { %v349_v4 = vrot.slane %v341_v63, 1  ;;  %v364_v5 = vmul.f32 %v1005_v55, %v1158_v21  ;;  %v365_v6 = vmul.f32 %v1005_v55, %v1160_v22  ;;  %v366_v13 = vmul.f32 %v1005_v55, %v1163_v24  ;;  %v1009_v58 = vld [vmem:[%s1389_s1 + $0x7] ss:$0 sm:$0xff] }
  0x1f   : > { %v354_v15 = vadd.f32 %v346_v0, %v329_v56  ;;  %v355_v16 = vadd.f32 %v347_v1, %v330_v60  ;;  %v356_v17 = vadd.f32 %v348_v2, %v331_v61  ;;  %v371_v18 = vrot.slane %v363_v3, 1 }
  0x20   : > { %v357_v23 = vadd.f32 %v349_v4, %v332_v62  ;;  %v372_v27 = vrot.slane %v364_v5, 1  ;;  %v373_v28 = vrot.slane %v365_v6, 1  ;;  %v374_v29 = vrot.slane %v366_v13, 1 }
  0x21   : > { %v379_v30 = vadd.f32 %v371_v18, %v354_v15  ;;  %v388_v31 = vmul.f32 %v1006_v14, %v1135_v7  ;;  %v389_v32 = vmul.f32 %v1006_v14, %v1137_v8  ;;  %v390_v33 = vmul.f32 %v1006_v14, %v1139_v9 }
  0x22   : > { %v380_v38 = vadd.f32 %v372_v27, %v355_v16  ;;  %v381_v41 = vadd.f32 %v373_v28, %v356_v17  ;;  %v382_v42 = vadd.f32 %v374_v29, %v357_v23  ;;  %v391_v43 = vmul.f32 %v1006_v14, %v1141_v10  ;;  %v1010_v17 = vld [vmem:[%s1389_s1 + $0x8] ss:$0 sm:$0xff] }
  0x23   : > { %v396_v50 = vrot.slane %v388_v31, 2  ;;  %v397_v52 = vrot.slane %v389_v32, 2  ;;  %v398_v53 = vrot.slane %v390_v33, 2  ;;  %v413_v54 = vmul.f32 %v1007_v20, %v1177_v34  ;;  %v1011_v32 = vld [vmem:[%s1389_s1 + $0x9] ss:$0 sm:$0xff] }
  0x24   : > { %v399_v55 = vrot.slane %v391_v43, 2  ;;  %v414_v7 = vmul.f32 %v1007_v20, %v1179_v35  ;;  %v415_v56 = vmul.f32 %v1007_v20, %v1181_v36  ;;  %v416_v57 = vmul.f32 %v1007_v20, %v1187_v39 }
  0x25   : > { %v404_v59 = vadd.f32 %v396_v50, %v379_v30  ;;  %v405_v60 = vadd.f32 %v397_v52, %v380_v38  ;;  %v406_v61 = vadd.f32 %v398_v53, %v381_v41  ;;  %v426_v62 = vmul.f32 %v1008_v45, %v302_v44 }
  0x26   : > { %v407_v63 = vadd.f32 %v399_v55, %v382_v42  ;;  %v427_v0 = vmul.f32 %v1008_v45, %v1199_v47  ;;  %v428_v1 = vmul.f32 %v1008_v45, %v1201_v48  ;;  %v429_v2 = vmul.f32 %v1008_v45, %v1203_v49 }
  0x27   : > { %v417_v3 = vadd.f32 %v413_v54, %v404_v59  ;;  %v418_v4 = vadd.f32 %v414_v7, %v405_v60  ;;  %v419_v5 = vadd.f32 %v415_v56, %v406_v61  ;;  %v439_v6 = vmul.f32 %v1009_v58, %v1177_v34 }
  0x28   : > { %v420_v13 = vadd.f32 %v416_v57, %v407_v63  ;;  %v440_v14 = vmul.f32 %v1009_v58, %v1179_v35  ;;  %v441_v15 = vmul.f32 %v1009_v58, %v1181_v36  ;;  %v442_v16 = vmul.f32 %v1009_v58, %v1187_v39  ;;  %v1012_v58 = vld [vmem:[%s1389_s1 + $0xa] ss:$0 sm:$0xff] }
  0x29   : > { %v430_v18 = vadd.f32 %v426_v62, %v417_v3  ;;  %v431_v23 = vadd.f32 %v427_v0, %v418_v4  ;;  %v432_v27 = vadd.f32 %v428_v1, %v419_v5  ;;  %v447_v28 = vrot.slane %v439_v6, 1 }
  0x2a   : > { %v433_v29 = vadd.f32 %v429_v2, %v420_v13  ;;  %v448_v20 = vrot.slane %v440_v14, 1  ;;  %v449_v30 = vrot.slane %v441_v15, 1  ;;  %v450_v31 = vrot.slane %v442_v16, 1 }
  0x2b   : > { %v455_v33 = vadd.f32 %v447_v28, %v430_v18  ;;  %v464_v38 = vmul.f32 %v1010_v17, %v302_v44  ;;  %v465_v41 = vmul.f32 %v1010_v17, %v1199_v47  ;;  %v466_v42 = vmul.f32 %v1010_v17, %v1201_v48 }
  0x2c   : > { %v456_v43 = vadd.f32 %v448_v20, %v431_v23  ;;  %v457_v45 = vadd.f32 %v449_v30, %v432_v27  ;;  %v458_v50 = vadd.f32 %v450_v31, %v433_v29  ;;  %v467_v52 = vmul.f32 %v1010_v17, %v1203_v49  ;;  %v1014_v17 = vld [vmem:[%s1389_s1 + $0xc] ss:$0 sm:$0xff] }
  0x2d   : > { %v472_v53 = vrot.slane %v464_v38, 1  ;;  %v473_v54 = vrot.slane %v465_v41, 1  ;;  %v474_v55 = vrot.slane %v466_v42, 1  ;;  %v489_v7 = vmul.f32 %v1011_v32, %v1177_v34  ;;  %v1013_v34 = vld [vmem:[%s1389_s1 + $0xb] ss:$0 sm:$0xff] }
  0x2e   : > { %v475_v56 = vrot.slane %v467_v52, 1  ;;  %v490_v57 = vmul.f32 %v1011_v32, %v1179_v35  ;;  %v491_v37 = vmul.f32 %v1011_v32, %v1181_v36  ;;  %v492_v44 = vmul.f32 %v1011_v32, %v1187_v39  ;;  %v1015_v32 = vld [vmem:[%s1389_s1 + $0xd] ss:$0 sm:$0xff] }
  0x2f   : > { %v480_v59 = vadd.f32 %v472_v53, %v455_v33  ;;  %v481_v60 = vadd.f32 %v473_v54, %v456_v43  ;;  %v482_v61 = vadd.f32 %v474_v55, %v457_v45  ;;  %v497_v62 = vrot.slane %v489_v7, 2 }
  0x30   : > { %v483_v63 = vadd.f32 %v475_v56, %v458_v50  ;;  %v498_v0 = vrot.slane %v490_v57, 2  ;;  %v499_v1 = vrot.slane %v491_v37, 2  ;;  %v500_v2 = vrot.slane %v492_v44, 2 }
  0x31   : > { %v505_v3 = vadd.f32 %v497_v62, %v480_v59  ;;  %v514_v4 = vmul.f32 %v1012_v58, %v1137_v8  ;;  %v515_v5 = vmul.f32 %v1012_v58, %v1139_v9  ;;  %v516_v6 = vmul.f32 %v1012_v58, %v1141_v10 }
  0x32   : > { %v506_v13 = vadd.f32 %v498_v0, %v481_v60  ;;  %v507_v14 = vadd.f32 %v499_v1, %v482_v61  ;;  %v508_v15 = vadd.f32 %v500_v2, %v483_v63  ;;  %v517_v16 = vmul.f32 %v1012_v58, %v1143_v11  ;;  %v1016_v58 = vld [vmem:[%s1389_s1 + $0xe] ss:$0 sm:$0xff] }
  0x33   : > { %v518_v18 = vadd.f32 %v514_v4, %v505_v3  ;;  %v527_v23 = vmul.f32 %v1013_v34, %v1158_v21  ;;  %v528_v27 = vmul.f32 %v1013_v34, %v1160_v22  ;;  %v529_v28 = vmul.f32 %v1013_v34, %v1163_v24 }
  0x34   : > { %v519_v29 = vadd.f32 %v515_v5, %v506_v13  ;;  %v520_v20 = vadd.f32 %v516_v6, %v507_v14  ;;  %v521_v30 = vadd.f32 %v517_v16, %v508_v15  ;;  %v530_v31 = vmul.f32 %v1013_v34, %v1165_v25  ;;  %v1018_v16 = vld [vmem:[%s1389_s1 + $0x10] ss:$0 sm:$0xff] }
  0x35   : > { %v531_v33 = vadd.f32 %v527_v23, %v518_v18  ;;  %v540_v38 = vmul.f32 %v1014_v17, %v1137_v8  ;;  %v541_v41 = vmul.f32 %v1014_v17, %v1139_v9  ;;  %v542_v42 = vmul.f32 %v1014_v17, %v1141_v10 }
  0x36   : > { %v532_v43 = vadd.f32 %v528_v27, %v519_v29  ;;  %v533_v45 = vadd.f32 %v529_v28, %v520_v20  ;;  %v534_v50 = vadd.f32 %v530_v31, %v521_v30  ;;  %v543_v52 = vmul.f32 %v1014_v17, %v1143_v11  ;;  %v1019_v30 = vld [vmem:[%s1389_s1 + $0x11] ss:$0 sm:$0xff] }
  0x37   : > { %v548_v53 = vrot.slane %v540_v38, 1  ;;  %v549_v54 = vrot.slane %v541_v41, 1  ;;  %v550_v55 = vrot.slane %v542_v42, 1  ;;  %v565_v7 = vmul.f32 %v1015_v32, %v1158_v21  ;;  %v1017_v21 = vld [vmem:[%s1389_s1 + $0xf] ss:$0 sm:$0xff] }
  0x38   : > { %v551_v56 = vrot.slane %v543_v52, 1  ;;  %v566_v57 = vmul.f32 %v1015_v32, %v1160_v22  ;;  %v567_v37 = vmul.f32 %v1015_v32, %v1163_v24  ;;  %v568_v44 = vmul.f32 %v1015_v32, %v1165_v25 }
  0x39   : > { %v556_v59 = vadd.f32 %v548_v53, %v531_v33  ;;  %v557_v60 = vadd.f32 %v549_v54, %v532_v43  ;;  %v558_v61 = vadd.f32 %v550_v55, %v533_v45  ;;  %v573_v62 = vrot.slane %v565_v7, 1 }
  0x3a   : > { %v559_v63 = vadd.f32 %v551_v56, %v534_v50  ;;  %v574_v0 = vrot.slane %v566_v57, 1  ;;  %v575_v1 = vrot.slane %v567_v37, 1  ;;  %v576_v2 = vrot.slane %v568_v44, 1  ;;  %v1020_v37 = vld [vmem:[%s1389_s1 + $0x12] ss:$0 sm:$0xff] }
  0x3b   : > { %v581_v34 = vadd.f32 %v573_v62, %v556_v59  ;;  %v590_v3 = vmul.f32 %v1016_v58, %v1137_v8  ;;  %v591_v4 = vmul.f32 %v1016_v58, %v1139_v9  ;;  %v592_v5 = vmul.f32 %v1016_v58, %v1141_v10 }
  0x3c   : > { %v582_v6 = vadd.f32 %v574_v0, %v557_v60  ;;  %v583_v13 = vadd.f32 %v575_v1, %v558_v61  ;;  %v584_v14 = vadd.f32 %v576_v2, %v559_v63  ;;  %v593_v15 = vmul.f32 %v1016_v58, %v1143_v11  ;;  %v1021_v1 = vld [vmem:[%s1389_s1 + $0x13] ss:$0 sm:$0xff] }
  0x3d   : > { %v598_v17 = vrot.slane %v590_v3, 2  ;;  %v599_v18 = vrot.slane %v591_v4, 2  ;;  %v600_v23 = vrot.slane %v592_v5, 2  ;;  %v615_v27 = vmul.f32 %v1017_v21, %v1179_v35 }
  0x3e   : > { %v601_v28 = vrot.slane %v593_v15, 2  ;;  %v616_v8 = vmul.f32 %v1017_v21, %v1181_v36  ;;  %v617_v29 = vmul.f32 %v1017_v21, %v1187_v39  ;;  %v618_v20 = vmul.f32 %v1017_v21, %v1189_v40 }
  0x3f   : > { %v606_v31 = vadd.f32 %v598_v17, %v581_v34  ;;  %v607_v32 = vadd.f32 %v599_v18, %v582_v6  ;;  %v608_v33 = vadd.f32 %v600_v23, %v583_v13  ;;  %v628_v38 = vmul.f32 %v1018_v16, %v1199_v47 }
  0x40   : > { %v609_v41 = vadd.f32 %v601_v28, %v584_v14  ;;  %v629_v42 = vmul.f32 %v1018_v16, %v1201_v48  ;;  %v630_v43 = vmul.f32 %v1018_v16, %v1203_v49  ;;  %v631_v45 = vmul.f32 %v1018_v16, %v306_v51 }
  0x41   : > { %v619_v50 = vadd.f32 %v615_v27, %v606_v31  ;;  %v620_v52 = vadd.f32 %v616_v8, %v607_v32  ;;  %v621_v53 = vadd.f32 %v617_v29, %v608_v33  ;;  %v641_v54 = vmul.f32 %v1019_v30, %v1179_v35 }
  0x42   : > { %v622_v55 = vadd.f32 %v618_v20, %v609_v41  ;;  %v642_v7 = vmul.f32 %v1019_v30, %v1181_v36  ;;  %v643_v56 = vmul.f32 %v1019_v30, %v1187_v39  ;;  %v644_v57 = vmul.f32 %v1019_v30, %v1189_v40 }
  0x43   : > { %v632_v44 = vadd.f32 %v628_v38, %v619_v50  ;;  %v633_v58 = vadd.f32 %v629_v42, %v620_v52  ;;  %v634_v59 = vadd.f32 %v630_v43, %v621_v53  ;;  %v649_v60 = vrot.slane %v641_v54, 1  ;;  %v1024_v42 = vld [vmem:[%s1389_s1 + $0x16] ss:$0 sm:$0xff] }
  0x44   : > { %v635_v61 = vadd.f32 %v631_v45, %v622_v55  ;;  %v650_v62 = vrot.slane %v642_v7, 1  ;;  %v651_v63 = vrot.slane %v643_v56, 1  ;;  %v652_v0 = vrot.slane %v644_v57, 1  ;;  %v1025_v56 = vld [vmem:[%s1389_s1 + $0x17] ss:$0 sm:$0xff] }
  0x45   : > { %v657_v2 = vadd.f32 %v649_v60, %v632_v44  ;;  %v666_v21 = vmul.f32 %v1020_v37, %v1199_v47  ;;  %v667_v34 = vmul.f32 %v1020_v37, %v1201_v48  ;;  %v668_v3 = vmul.f32 %v1020_v37, %v1203_v49  ;;  %v1022_v49 = vld [vmem:[%s1389_s1 + $0x14] ss:$0 sm:$0xff] }
  0x46   : > { %v658_v4 = vadd.f32 %v650_v62, %v633_v58  ;;  %v659_v5 = vadd.f32 %v651_v63, %v634_v59  ;;  %v660_v6 = vadd.f32 %v652_v0, %v635_v61  ;;  %v669_v13 = vmul.f32 %v1020_v37, %v306_v51 }
  0x47   : > { %v674_v14 = vrot.slane %v666_v21, 1  ;;  %v675_v15 = vrot.slane %v667_v34, 1  ;;  %v676_v16 = vrot.slane %v668_v3, 1  ;;  %v691_v17 = vmul.f32 %v1021_v1, %v1179_v35  ;;  %v1023_v35 = vld [vmem:[%s1389_s1 + $0x15] ss:$0 sm:$0xff] }
  0x48   : > { %v677_v18 = vrot.slane %v669_v13, 1  ;;  %v692_v23 = vmul.f32 %v1021_v1, %v1181_v36  ;;  %v693_v47 = vmul.f32 %v1021_v1, %v1187_v39  ;;  %v694_v48 = vmul.f32 %v1021_v1, %v1189_v40 }
  0x49   : > { %v682_v27 = vadd.f32 %v674_v14, %v657_v2  ;;  %v683_v28 = vadd.f32 %v675_v15, %v658_v4  ;;  %v684_v46 = vadd.f32 %v676_v16, %v659_v5  ;;  %v699_v51 = vrot.slane %v691_v17, 2  ;;  %v1026_v5 = vld [vmem:[%s1389_s1 + $0x18] ss:$0 sm:$0xff] }
  0x4a   : > { %v685_v8 = vadd.f32 %v677_v18, %v660_v6  ;;  %v700_v29 = vrot.slane %v692_v23, 2  ;;  %v701_v20 = vrot.slane %v693_v47, 2  ;;  %v702_v30 = vrot.slane %v694_v48, 2 }
  0x4b   : > { %v707_v36 = vadd.f32 %v699_v51, %v682_v27  ;;  %v716_v39 = vmul.f32 %v1022_v49, %v1139_v9  ;;  %v717_v40 = vmul.f32 %v1022_v49, %v1141_v10  ;;  %v718_v31 = vmul.f32 %v1022_v49, %v1143_v11 }
  0x4c   : > { %v708_v32 = vadd.f32 %v700_v29, %v683_v28  ;;  %v709_v33 = vadd.f32 %v701_v20, %v684_v46  ;;  %v710_v38 = vadd.f32 %v702_v30, %v685_v8  ;;  %v719_v41 = vmul.f32 %v1022_v49, %v1145_v12  ;;  %v1027_v8 = vld [vmem:[%s1390_s2] ss:$0 sm:$0xff] }
  0x4d   : > { %v720_v43 = vadd.f32 %v716_v39, %v707_v36  ;;  %v729_v45 = vmul.f32 %v1023_v35, %v1160_v22  ;;  %v730_v50 = vmul.f32 %v1023_v35, %v1163_v24  ;;  %v731_v52 = vmul.f32 %v1023_v35, %v1165_v25 }
  0x4e   : > { %v721_v53 = vadd.f32 %v717_v40, %v708_v32  ;;  %v722_v54 = vadd.f32 %v718_v31, %v709_v33  ;;  %v723_v55 = vadd.f32 %v719_v41, %v710_v38  ;;  %v732_v7 = vmul.f32 %v1023_v35, %v280_v26 }
  0x4f   : > { %v733_v57 = vadd.f32 %v729_v45, %v720_v43  ;;  %v742_v37 = vmul.f32 %v1024_v42, %v1139_v9  ;;  %v743_v44 = vmul.f32 %v1024_v42, %v1141_v10  ;;  %v744_v58 = vmul.f32 %v1024_v42, %v1143_v11 }
  0x50   : > { %v734_v59 = vadd.f32 %v730_v50, %v721_v53  ;;  %v735_v60 = vadd.f32 %v731_v52, %v722_v54  ;;  %v736_v61 = vadd.f32 %v732_v7, %v723_v55  ;;  %v745_v62 = vmul.f32 %v1024_v42, %v1145_v12 }
  0x51   : > { %v750_v63 = vrot.slane %v742_v37, 1  ;;  %v751_v0 = vrot.slane %v743_v44, 1  ;;  %v752_v1 = vrot.slane %v744_v58, 1  ;;  %v767_v2 = vmul.f32 %v1025_v56, %v1160_v22 }
  0x52   : > { %v753_v21 = vrot.slane %v745_v62, 1  ;;  %v768_v34 = vmul.f32 %v1025_v56, %v1163_v24  ;;  %v769_v3 = vmul.f32 %v1025_v56, %v1165_v25  ;;  %v770_v4 = vmul.f32 %v1025_v56, %v280_v26 }
  0x53   : > { %v758_v6 = vadd.f32 %v750_v63, %v733_v57  ;;  %v759_v13 = vadd.f32 %v751_v0, %v734_v59  ;;  %v760_v14 = vadd.f32 %v752_v1, %v735_v60  ;;  %v775_v15 = vrot.slane %v767_v2, 1 }
  0x54   : > { %v761_v16 = vadd.f32 %v753_v21, %v736_v61  ;;  %v776_v17 = vrot.slane %v768_v34, 1  ;;  %v777_v18 = vrot.slane %v769_v3, 1  ;;  %v778_v22 = vrot.slane %v770_v4, 1 }
  0x55   : > { %v783_v23 = vadd.f32 %v775_v15, %v758_v6  ;;  %v792_v24 = vmul.f32 %v1026_v5, %v1139_v9  ;;  %v793_v25 = vmul.f32 %v1026_v5, %v1141_v10  ;;  %v794_v19 = vmul.f32 %v1026_v5, %v1143_v11 }
  0x56   : > { %v784_v26 = vadd.f32 %v776_v17, %v759_v13  ;;  %v785_v47 = vadd.f32 %v777_v18, %v760_v14  ;;  %v786_v48 = vadd.f32 %v778_v22, %v761_v16  ;;  %v795_v49 = vmul.f32 %v1026_v5, %v1145_v12 }
  0x57   : > { %v800_v27 = vrot.slane %v792_v24, 2  ;;  %v801_v28 = vrot.slane %v793_v25, 2  ;;  %v802_v46 = vrot.slane %v794_v19, 2 }
  0x58   : > { %v803_v51 = vrot.slane %v795_v49, 2 }
  0x59   : > { %v808_v29 = vadd.f32 %v800_v27, %v783_v23  ;;  %v809_v9 = vadd.f32 %v801_v28, %v784_v26  ;;  %v810_v20 = vadd.f32 %v802_v46, %v785_v47 }
  0x5a   : > { %v811_v30 = vadd.f32 %v803_v51, %v786_v48 }
  0x5b   : > { %v819_v10 = vadd.f32 %v1027_v8, %v808_v29  ;;  %v820_v11 = vadd.f32 %v1027_v8, %v809_v9  ;;  %v821_v35 = vadd.f32 %v1027_v8, %v810_v20 }
  0x5c   : > { %v822_v36 = vadd.f32 %v1027_v8, %v811_v30 }
  0x5d   : > { %v823_v39 = vmax.f32 %v819_v10, 0.0  ;;  %v824_v40 = vmax.f32 %v820_v11, 0.0  ;;  %v825_v12 = vmax.f32 %v821_v35, 0.0 }
  0x5e   : > { %v826_v31 = vmax.f32 %v822_v36, 0.0 }
  0x5f   : > { %v827_v32 = vpack.c.bf16 %v823_v39, %v823_v39  ;;  %v828_v33 = vpack.c.bf16 %v824_v40, %v824_v40  ;;  %v829_v38 = vpack.c.bf16 %v825_v12, %v825_v12 }
  0x60   : > { %v830_v41 = vpack.c.bf16 %v826_v31, %v826_v31 }
  0x61   : > { %831 = vst [vmem:[%s249_s29] sm:$0x3] %v827_v32  ;;  %832 = vst [vmem:[%s249_s29 + $0x2] sm:$0x3] %v828_v33 }
  0x62   : > { %833 = vst [vmem:[%s249_s29 + $0x4] sm:$0x3] %v829_v38  ;;  %834 = vst [vmem:[%s249_s29 + $0x6] sm:$0x3] %v830_v41 }
  0x63 PF: > { %s13_s14 = sadd.s32 1, %s1078_s14   ;;  %s1392_s12 = smov %s1074_s13 }
  0x64   : > { %p10_p5 = scmp.ge.s32.totalorder %s13_s14, 4   ;;  %s1393_s13 = smov %s1395_s15 }
  0x66   :  { %12 = sbr.rel (!%p10_p5) target bundleno = 2 (0x2), region = 72 }

// kernel: _lambda_.34
= control target key start
LH: loop header
LB: loop body
LE: loop exit
PB: predicated region body
PF: predicated region fallthrough
CT: control target
= control target key end

     0   :  { %s1115_s12 = smov 0   ;;  %s1117_s13 = smov 0   ;;  %s1339_s0 = inlined_call_operand.vmem [shape: bf16[2,8,8,128], index: 0, kind: input, shape index: {}]   ;;  %s1340_s1 = inlined_call_operand.vmem [shape: f32[25,128], index: 1, kind: input, shape index: {}]   ;;  %s1341_s2 = inlined_call_operand.vmem [shape: f32[1,128], index: 2, kind: input, shape index: {}]   ;;  %s1342_s3 = inlined_call_operand.vmem [shape: bf16[2,4,4,128], index: 3, kind: output, shape index: {}]  }
   0x1   :  { %s1119_s14 = smov 0  }
   0x2 LB: > { %s32_s15 = sadd.s32 1, %s1089_s13  ;;  %p993_p0 = scmp.ge.s32.totalorder %s1093_s14, 1  ;;  %s1093_s14 = sphi %s1119_s14, %s13_s14   ;;  %s1089_s13 = sphi %s1117_s13, %s1344_s13   ;;  %s1085_s12 = sphi %s1115_s12, %s1343_s12  }
   0x3   : > { %p34_p1 = scmp.ge.s32.totalorder %s32_s15, 2  ;;  %p182_p2 = scmp.lt.s32.totalorder %s1093_s14, 3 }
   0x5   : > { %s1346_s15 = smov (%p34_p1, %s32_s15), 0  ;;  %p183_p3 = pnand %p993_p0, %p182_p2 }
   0x6   : > { %p223_p4 = scmp.lt.s32.totalorder (!%p183_p3), %s1085_s12, 1  ;;  %v998_v0 = vld [vmem:[%s1340_s1] ss:$0 sm:$0xff] (!%p183_p3)  ;;  %v999_v9 = vld [vmem:[%s1340_s1 + $0x1] ss:$0 sm:$0xff] (!%p183_p3) }
   0x7   : > { %186 = sbr.rel (%p183_p3) target bundleno = 99 (0x63), region = 32  ;;  %v1000_v14 = vld [vmem:[%s1340_s1 + $0x2] ss:$0 sm:$0xff] (!%p183_p3)  ;;  %v1001_v31 = vld [vmem:[%s1340_s1 + $0x3] ss:$0 sm:$0xff] (!%p183_p3) }
   0x8   : > { %v1002_v44 = vld [vmem:[%s1340_s1 + $0x4] ss:$0 sm:$0xff] (!%p183_p3)  ;;  %v1003_v57 = vld [vmem:[%s1340_s1 + $0x5] ss:$0 sm:$0xff] (!%p183_p3) }
   0xe   : > { %s1348_s12 = smov (!%p223_p4, %s1085_s12), 1 }
   0xf   : > { %s1026_s16 = sshll.u32 %s1348_s12, 5  ;;  %s1027_s26 = sshll.u32 %s1348_s12, 3 }
  0x10   : > { %s230_s19 = scalar_lea.vmem %s1339_s0, %s1026_s16  ;;  %s249_s29 = scalar_lea.vmem %s1342_s3, %s1027_s26 }
  0x11   : > { %v1029_v1 = vld [vmem:[%s230_s19] sm:$0xff]   ;;  %v1044_v2 = vld [vmem:[%s230_s19 + $0x8] sm:$0xff]   ;;  %v1045_v3 = vld [vmem:[%s230_s19 + $0x10] sm:$0xff]  }
  0x12   : > { %v1030_v4 = vunpack.c.l.bf16 %v1029_v1  ;;  %v1142_v5 = vunpack.c.h.bf16 %v1029_v1  ;;  %v1144_v6 = vunpack.c.l.bf16 %v1044_v2  ;;  %v1146_v7 = vunpack.c.h.bf16 %v1044_v2  ;;  %v1046_v8 = vld [vmem:[%s230_s19 + $0x18] sm:$0xff]   ;;  %v1004_v2 = vld [vmem:[%s1340_s1 + $0x6] ss:$0 sm:$0xff] }
  0x13   : > { %v1151_v10 = vunpack.c.l.bf16 %v1045_v3  ;;  %v1153_v11 = vunpack.c.h.bf16 %v1045_v3  ;;  %v1155_v12 = vunpack.c.l.bf16 %v1046_v8  ;;  %v1157_v13 = vunpack.c.h.bf16 %v1046_v8 }
  0x14   : > { %v275_v15 = vmul.f32 %v1030_v4, %v998_v0  ;;  %v276_v16 = vmul.f32 %v1142_v5, %v998_v0  ;;  %v277_v17 = vmul.f32 %v1144_v6, %v998_v0  ;;  %v278_v18 = vmul.f32 %v1146_v7, %v998_v0 }
  0x15   : > { %v288_v19 = vmul.f32 %v1030_v4, %v999_v9  ;;  %v289_v20 = vmul.f32 %v1142_v5, %v999_v9  ;;  %v290_v21 = vmul.f32 %v1144_v6, %v999_v9  ;;  %v291_v22 = vmul.f32 %v1146_v7, %v999_v9 }
  0x16   : > { %v313_v23 = vmul.f32 %v1030_v4, %v1000_v14  ;;  %v314_v24 = vmul.f32 %v1142_v5, %v1000_v14  ;;  %v315_v25 = vmul.f32 %v1144_v6, %v1000_v14  ;;  %v316_v26 = vmul.f32 %v1146_v7, %v1000_v14 }
  0x17   : > { %v296_v27 = vrot.slane %v288_v19, 1  ;;  %v297_v28 = vrot.slane %v289_v20, 1  ;;  %v298_v29 = vrot.slane %v290_v21, 1  ;;  %v299_v30 = vrot.slane %v291_v22, 1  ;;  %v1005_v22 = vld [vmem:[%s1340_s1 + $0x7] ss:$0 sm:$0xff] }
  0x18   : > { %v321_v32 = vrot.slane %v313_v23, 2  ;;  %v322_v33 = vrot.slane %v314_v24, 2  ;;  %v323_v34 = vrot.slane %v315_v25, 2  ;;  %v324_v35 = vrot.slane %v316_v26, 2 }
  0x19   : > { %v304_v36 = vadd.f32 %v296_v27, %v275_v15  ;;  %v305_v37 = vadd.f32 %v297_v28, %v276_v16  ;;  %v306_v38 = vadd.f32 %v298_v29, %v277_v17  ;;  %v307_v39 = vadd.f32 %v299_v30, %v278_v18 }
  0x1a   : > { %v338_v40 = vmul.f32 %v1030_v4, %v1001_v31  ;;  %v339_v41 = vmul.f32 %v1142_v5, %v1001_v31  ;;  %v340_v42 = vmul.f32 %v1144_v6, %v1001_v31  ;;  %v341_v43 = vmul.f32 %v1146_v7, %v1001_v31 }
  0x1b   : > { %v329_v45 = vadd.f32 %v321_v32, %v304_v36  ;;  %v330_v46 = vadd.f32 %v322_v33, %v305_v37  ;;  %v331_v47 = vadd.f32 %v323_v34, %v306_v38  ;;  %v332_v48 = vadd.f32 %v324_v35, %v307_v39  ;;  %v1006_v35 = vld [vmem:[%s1340_s1 + $0x8] ss:$0 sm:$0xff] }
  0x1c   : > { %v346_v49 = vrot.slane %v338_v40, 3  ;;  %v347_v50 = vrot.slane %v339_v41, 3  ;;  %v348_v51 = vrot.slane %v340_v42, 3  ;;  %v349_v52 = vrot.slane %v341_v43, 3 }
  0x1d   : > { %v363_v53 = vmul.f32 %v1030_v4, %v1002_v44  ;;  %v364_v54 = vmul.f32 %v1142_v5, %v1002_v44  ;;  %v365_v55 = vmul.f32 %v1144_v6, %v1002_v44  ;;  %v366_v56 = vmul.f32 %v1146_v7, %v1002_v44 }
  0x1e   : > { %v354_v58 = vadd.f32 %v346_v49, %v329_v45  ;;  %v355_v59 = vadd.f32 %v347_v50, %v330_v46  ;;  %v356_v60 = vadd.f32 %v348_v51, %v331_v47  ;;  %v357_v61 = vadd.f32 %v349_v52, %v332_v48  ;;  %v1007_v48 = vld [vmem:[%s1340_s1 + $0x9] ss:$0 sm:$0xff] }
  0x1f   : > { %v371_v62 = vrot.slane %v363_v53, 4  ;;  %v372_v63 = vrot.slane %v364_v54, 4  ;;  %v373_v0 = vrot.slane %v365_v55, 4  ;;  %v374_v1 = vrot.slane %v366_v56, 4 }
  0x20   : > { %v388_v3 = vmul.f32 %v1142_v5, %v1003_v57  ;;  %v389_v4 = vmul.f32 %v1144_v6, %v1003_v57  ;;  %v390_v8 = vmul.f32 %v1146_v7, %v1003_v57  ;;  %v391_v9 = vmul.f32 %v1151_v10, %v1003_v57 }
  0x21   : > { %v379_v14 = vadd.f32 %v371_v62, %v354_v58  ;;  %v380_v15 = vadd.f32 %v372_v63, %v355_v59  ;;  %v381_v16 = vadd.f32 %v373_v0, %v356_v60  ;;  %v382_v17 = vadd.f32 %v374_v1, %v357_v61  ;;  %v1008_v61 = vld [vmem:[%s1340_s1 + $0xa] ss:$0 sm:$0xff] }
  0x22   : > { %v401_v18 = vmul.f32 %v1142_v5, %v1004_v2  ;;  %v402_v19 = vmul.f32 %v1144_v6, %v1004_v2  ;;  %v403_v20 = vmul.f32 %v1146_v7, %v1004_v2  ;;  %v404_v21 = vmul.f32 %v1151_v10, %v1004_v2 }
  0x23   : > { %v392_v23 = vadd.f32 %v388_v3, %v379_v14  ;;  %v393_v24 = vadd.f32 %v389_v4, %v380_v15  ;;  %v394_v25 = vadd.f32 %v390_v8, %v381_v16  ;;  %v395_v26 = vadd.f32 %v391_v9, %v382_v17 }
  0x24   : > { %v409_v27 = vrot.slane %v401_v18, 1  ;;  %v410_v28 = vrot.slane %v402_v19, 1  ;;  %v411_v29 = vrot.slane %v403_v20, 1  ;;  %v412_v30 = vrot.slane %v404_v21, 1 }
  0x25   : > { %v426_v31 = vmul.f32 %v1142_v5, %v1005_v22  ;;  %v427_v32 = vmul.f32 %v1144_v6, %v1005_v22  ;;  %v428_v33 = vmul.f32 %v1146_v7, %v1005_v22  ;;  %v429_v34 = vmul.f32 %v1151_v10, %v1005_v22 }
  0x26   : > { %v417_v36 = vadd.f32 %v409_v27, %v392_v23  ;;  %v418_v37 = vadd.f32 %v410_v28, %v393_v24  ;;  %v419_v38 = vadd.f32 %v411_v29, %v394_v25  ;;  %v420_v39 = vadd.f32 %v412_v30, %v395_v26  ;;  %v1010_v25 = vld [vmem:[%s1340_s1 + $0xc] ss:$0 sm:$0xff] }
  0x27   : > { %v434_v40 = vrot.slane %v426_v31, 2  ;;  %v435_v41 = vrot.slane %v427_v32, 2  ;;  %v436_v42 = vrot.slane %v428_v33, 2  ;;  %v437_v43 = vrot.slane %v429_v34, 2 }
  0x28   : > { %v451_v44 = vmul.f32 %v1142_v5, %v1006_v35  ;;  %v452_v45 = vmul.f32 %v1144_v6, %v1006_v35  ;;  %v453_v46 = vmul.f32 %v1146_v7, %v1006_v35  ;;  %v454_v47 = vmul.f32 %v1151_v10, %v1006_v35 }
  0x29   : > { %v442_v49 = vadd.f32 %v434_v40, %v417_v36  ;;  %v443_v50 = vadd.f32 %v435_v41, %v418_v37  ;;  %v444_v51 = vadd.f32 %v436_v42, %v419_v38  ;;  %v445_v52 = vadd.f32 %v437_v43, %v420_v39  ;;  %v1011_v38 = vld [vmem:[%s1340_s1 + $0xd] ss:$0 sm:$0xff] }
  0x2a   : > { %v459_v53 = vrot.slane %v451_v44, 3  ;;  %v460_v54 = vrot.slane %v452_v45, 3  ;;  %v461_v55 = vrot.slane %v453_v46, 3  ;;  %v462_v56 = vrot.slane %v454_v47, 3 }
  0x2b   : > { %v476_v57 = vmul.f32 %v1142_v5, %v1007_v48  ;;  %v477_v58 = vmul.f32 %v1144_v6, %v1007_v48  ;;  %v478_v59 = vmul.f32 %v1146_v7, %v1007_v48  ;;  %v479_v60 = vmul.f32 %v1151_v10, %v1007_v48  ;;  %v1009_v5 = vld [vmem:[%s1340_s1 + $0xb] ss:$0 sm:$0xff] }
  0x2c   : > { %v467_v62 = vadd.f32 %v459_v53, %v442_v49  ;;  %v468_v63 = vadd.f32 %v460_v54, %v443_v50  ;;  %v469_v0 = vadd.f32 %v461_v55, %v444_v51  ;;  %v470_v1 = vadd.f32 %v462_v56, %v445_v52  ;;  %v1012_v51 = vld [vmem:[%s1340_s1 + $0xe] ss:$0 sm:$0xff] }
  0x2d   : > { %v484_v2 = vrot.slane %v476_v57, 4  ;;  %v485_v3 = vrot.slane %v477_v58, 4  ;;  %v486_v4 = vrot.slane %v478_v59, 4  ;;  %v487_v8 = vrot.slane %v479_v60, 4 }
  0x2e   : > { %v501_v9 = vmul.f32 %v1144_v6, %v1008_v61  ;;  %v502_v14 = vmul.f32 %v1146_v7, %v1008_v61  ;;  %v503_v15 = vmul.f32 %v1151_v10, %v1008_v61  ;;  %v504_v16 = vmul.f32 %v1153_v11, %v1008_v61 }
  0x2f   : > { %v492_v17 = vadd.f32 %v484_v2, %v467_v62  ;;  %v493_v18 = vadd.f32 %v485_v3, %v468_v63  ;;  %v494_v19 = vadd.f32 %v486_v4, %v469_v0  ;;  %v495_v20 = vadd.f32 %v487_v8, %v470_v1  ;;  %v1013_v0 = vld [vmem:[%s1340_s1 + $0xf] ss:$0 sm:$0xff] }
  0x30   : > { %v514_v21 = vmul.f32 %v1144_v6, %v1009_v5  ;;  %v515_v22 = vmul.f32 %v1146_v7, %v1009_v5  ;;  %v516_v23 = vmul.f32 %v1151_v10, %v1009_v5  ;;  %v517_v24 = vmul.f32 %v1153_v11, %v1009_v5 }
  0x31   : > { %v505_v26 = vadd.f32 %v501_v9, %v492_v17  ;;  %v506_v27 = vadd.f32 %v502_v14, %v493_v18  ;;  %v507_v28 = vadd.f32 %v503_v15, %v494_v19  ;;  %v508_v29 = vadd.f32 %v504_v16, %v495_v20 }
  0x32   : > { %v522_v30 = vrot.slane %v514_v21, 1  ;;  %v523_v31 = vrot.slane %v515_v22, 1  ;;  %v524_v32 = vrot.slane %v516_v23, 1  ;;  %v525_v33 = vrot.slane %v517_v24, 1 }
  0x33   : > { %v539_v34 = vmul.f32 %v1144_v6, %v1010_v25  ;;  %v540_v35 = vmul.f32 %v1146_v7, %v1010_v25  ;;  %v541_v36 = vmul.f32 %v1151_v10, %v1010_v25  ;;  %v542_v37 = vmul.f32 %v1153_v11, %v1010_v25 }
  0x34   : > { %v530_v39 = vadd.f32 %v522_v30, %v505_v26  ;;  %v531_v40 = vadd.f32 %v523_v31, %v506_v27  ;;  %v532_v41 = vadd.f32 %v524_v32, %v507_v28  ;;  %v533_v42 = vadd.f32 %v525_v33, %v508_v29  ;;  %v1015_v27 = vld [vmem:[%s1340_s1 + $0x11] ss:$0 sm:$0xff] }
  0x35   : > { %v547_v43 = vrot.slane %v539_v34, 2  ;;  %v548_v44 = vrot.slane %v540_v35, 2  ;;  %v549_v45 = vrot.slane %v541_v36, 2  ;;  %v550_v46 = vrot.slane %v542_v37, 2 }
  0x36   : > { %v564_v47 = vmul.f32 %v1144_v6, %v1011_v38  ;;  %v565_v48 = vmul.f32 %v1146_v7, %v1011_v38  ;;  %v566_v49 = vmul.f32 %v1151_v10, %v1011_v38  ;;  %v567_v50 = vmul.f32 %v1153_v11, %v1011_v38 }
  0x37   : > { %v555_v52 = vadd.f32 %v547_v43, %v530_v39  ;;  %v556_v53 = vadd.f32 %v548_v44, %v531_v40  ;;  %v557_v54 = vadd.f32 %v549_v45, %v532_v41  ;;  %v558_v55 = vadd.f32 %v550_v46, %v533_v42  ;;  %v1016_v40 = vld [vmem:[%s1340_s1 + $0x12] ss:$0 sm:$0xff] }
  0x38   : > { %v572_v56 = vrot.slane %v564_v47, 3  ;;  %v573_v57 = vrot.slane %v565_v48, 3  ;;  %v574_v58 = vrot.slane %v566_v49, 3  ;;  %v575_v59 = vrot.slane %v567_v50, 3 }
  0x39   : > { %v589_v60 = vmul.f32 %v1144_v6, %v1012_v51  ;;  %v590_v61 = vmul.f32 %v1146_v7, %v1012_v51  ;;  %v591_v62 = vmul.f32 %v1151_v10, %v1012_v51  ;;  %v592_v63 = vmul.f32 %v1153_v11, %v1012_v51  ;;  %v1014_v6 = vld [vmem:[%s1340_s1 + $0x10] ss:$0 sm:$0xff] }
  0x3a   : > { %v580_v1 = vadd.f32 %v572_v56, %v555_v52  ;;  %v581_v2 = vadd.f32 %v573_v57, %v556_v53  ;;  %v582_v3 = vadd.f32 %v574_v58, %v557_v54  ;;  %v583_v4 = vadd.f32 %v575_v59, %v558_v55  ;;  %v1017_v53 = vld [vmem:[%s1340_s1 + $0x13] ss:$0 sm:$0xff] }
  0x3b   : > { %v597_v8 = vrot.slane %v589_v60, 4  ;;  %v598_v5 = vrot.slane %v590_v61, 4  ;;  %v599_v9 = vrot.slane %v591_v62, 4  ;;  %v600_v14 = vrot.slane %v592_v63, 4 }
  0x3c   : > { %v614_v15 = vmul.f32 %v1146_v7, %v1013_v0  ;;  %v615_v16 = vmul.f32 %v1151_v10, %v1013_v0  ;;  %v616_v17 = vmul.f32 %v1153_v11, %v1013_v0  ;;  %v617_v18 = vmul.f32 %v1155_v12, %v1013_v0 }
  0x3d   : > { %v605_v19 = vadd.f32 %v597_v8, %v580_v1  ;;  %v606_v20 = vadd.f32 %v598_v5, %v581_v2  ;;  %v607_v21 = vadd.f32 %v599_v9, %v582_v3  ;;  %v608_v22 = vadd.f32 %v600_v14, %v583_v4  ;;  %v1018_v2 = vld [vmem:[%s1340_s1 + $0x14] ss:$0 sm:$0xff] }
  0x3e   : > { %v627_v23 = vmul.f32 %v1146_v7, %v1014_v6  ;;  %v628_v24 = vmul.f32 %v1151_v10, %v1014_v6  ;;  %v629_v25 = vmul.f32 %v1153_v11, %v1014_v6  ;;  %v630_v26 = vmul.f32 %v1155_v12, %v1014_v6 }
  0x3f   : > { %v618_v28 = vadd.f32 %v614_v15, %v605_v19  ;;  %v619_v29 = vadd.f32 %v615_v16, %v606_v20  ;;  %v620_v30 = vadd.f32 %v616_v17, %v607_v21  ;;  %v621_v31 = vadd.f32 %v617_v18, %v608_v22 }
  0x40   : > { %v635_v32 = vrot.slane %v627_v23, 1  ;;  %v636_v33 = vrot.slane %v628_v24, 1  ;;  %v637_v34 = vrot.slane %v629_v25, 1  ;;  %v638_v35 = vrot.slane %v630_v26, 1 }
  0x41   : > { %v652_v36 = vmul.f32 %v1146_v7, %v1015_v27  ;;  %v653_v37 = vmul.f32 %v1151_v10, %v1015_v27  ;;  %v654_v38 = vmul.f32 %v1153_v11, %v1015_v27  ;;  %v655_v39 = vmul.f32 %v1155_v12, %v1015_v27 }
  0x42   : > { %v643_v41 = vadd.f32 %v635_v32, %v618_v28  ;;  %v644_v42 = vadd.f32 %v636_v33, %v619_v29  ;;  %v645_v43 = vadd.f32 %v637_v34, %v620_v30  ;;  %v646_v44 = vadd.f32 %v638_v35, %v621_v31  ;;  %v1020_v28 = vld [vmem:[%s1340_s1 + $0x16] ss:$0 sm:$0xff] }
  0x43   : > { %v660_v45 = vrot.slane %v652_v36, 2  ;;  %v661_v46 = vrot.slane %v653_v37, 2  ;;  %v662_v47 = vrot.slane %v654_v38, 2  ;;  %v663_v48 = vrot.slane %v655_v39, 2 }
  0x44   : > { %v677_v49 = vmul.f32 %v1146_v7, %v1016_v40  ;;  %v678_v50 = vmul.f32 %v1151_v10, %v1016_v40  ;;  %v679_v51 = vmul.f32 %v1153_v11, %v1016_v40  ;;  %v680_v52 = vmul.f32 %v1155_v12, %v1016_v40 }
  0x45   : > { %v668_v54 = vadd.f32 %v660_v45, %v643_v41  ;;  %v669_v55 = vadd.f32 %v661_v46, %v644_v42  ;;  %v670_v56 = vadd.f32 %v662_v47, %v645_v43  ;;  %v671_v57 = vadd.f32 %v663_v48, %v646_v44  ;;  %v1021_v41 = vld [vmem:[%s1340_s1 + $0x17] ss:$0 sm:$0xff] }
  0x46   : > { %v685_v58 = vrot.slane %v677_v49, 3  ;;  %v686_v59 = vrot.slane %v678_v50, 3  ;;  %v687_v60 = vrot.slane %v679_v51, 3  ;;  %v688_v61 = vrot.slane %v680_v52, 3 }
  0x47   : > { %v702_v62 = vmul.f32 %v1146_v7, %v1017_v53  ;;  %v703_v63 = vmul.f32 %v1151_v10, %v1017_v53  ;;  %v704_v0 = vmul.f32 %v1153_v11, %v1017_v53  ;;  %v705_v1 = vmul.f32 %v1155_v12, %v1017_v53  ;;  %v1019_v7 = vld [vmem:[%s1340_s1 + $0x15] ss:$0 sm:$0xff] }
  0x48   : > { %v693_v3 = vadd.f32 %v685_v58, %v668_v54  ;;  %v694_v4 = vadd.f32 %v686_v59, %v669_v55  ;;  %v695_v8 = vadd.f32 %v687_v60, %v670_v56  ;;  %v696_v5 = vadd.f32 %v688_v61, %v671_v57  ;;  %v1022_v54 = vld [vmem:[%s1340_s1 + $0x18] ss:$0 sm:$0xff] }
  0x49   : > { %v710_v9 = vrot.slane %v702_v62, 4  ;;  %v711_v14 = vrot.slane %v703_v63, 4  ;;  %v712_v6 = vrot.slane %v704_v0, 4  ;;  %v713_v15 = vrot.slane %v705_v1, 4 }
  0x4a   : > { %v727_v16 = vmul.f32 %v1151_v10, %v1018_v2  ;;  %v728_v17 = vmul.f32 %v1153_v11, %v1018_v2  ;;  %v729_v18 = vmul.f32 %v1155_v12, %v1018_v2  ;;  %v730_v19 = vmul.f32 %v1157_v13, %v1018_v2 }
  0x4b   : > { %v718_v20 = vadd.f32 %v710_v9, %v693_v3  ;;  %v719_v21 = vadd.f32 %v711_v14, %v694_v4  ;;  %v720_v22 = vadd.f32 %v712_v6, %v695_v8  ;;  %v721_v23 = vadd.f32 %v713_v15, %v696_v5 }
  0x4c   : > { %v740_v24 = vmul.f32 %v1151_v10, %v1019_v7  ;;  %v741_v25 = vmul.f32 %v1153_v11, %v1019_v7  ;;  %v742_v26 = vmul.f32 %v1155_v12, %v1019_v7  ;;  %v743_v27 = vmul.f32 %v1157_v13, %v1019_v7  ;;  %v1023_v7 = vld [vmem:[%s1341_s2] ss:$0 sm:$0xff] }
  0x4d   : > { %v731_v29 = vadd.f32 %v727_v16, %v718_v20  ;;  %v732_v30 = vadd.f32 %v728_v17, %v719_v21  ;;  %v733_v31 = vadd.f32 %v729_v18, %v720_v22  ;;  %v734_v32 = vadd.f32 %v730_v19, %v721_v23 }
  0x4e   : > { %v748_v33 = vrot.slane %v740_v24, 1  ;;  %v749_v34 = vrot.slane %v741_v25, 1  ;;  %v750_v35 = vrot.slane %v742_v26, 1  ;;  %v751_v36 = vrot.slane %v743_v27, 1 }
  0x4f   : > { %v765_v37 = vmul.f32 %v1151_v10, %v1020_v28  ;;  %v766_v38 = vmul.f32 %v1153_v11, %v1020_v28  ;;  %v767_v39 = vmul.f32 %v1155_v12, %v1020_v28  ;;  %v768_v40 = vmul.f32 %v1157_v13, %v1020_v28 }
  0x50   : > { %v756_v42 = vadd.f32 %v748_v33, %v731_v29  ;;  %v757_v43 = vadd.f32 %v749_v34, %v732_v30  ;;  %v758_v44 = vadd.f32 %v750_v35, %v733_v31  ;;  %v759_v45 = vadd.f32 %v751_v36, %v734_v32 }
  0x51   : > { %v773_v46 = vrot.slane %v765_v37, 2  ;;  %v774_v47 = vrot.slane %v766_v38, 2  ;;  %v775_v48 = vrot.slane %v767_v39, 2  ;;  %v776_v49 = vrot.slane %v768_v40, 2 }
  0x52   : > { %v790_v50 = vmul.f32 %v1151_v10, %v1021_v41  ;;  %v791_v51 = vmul.f32 %v1153_v11, %v1021_v41  ;;  %v792_v52 = vmul.f32 %v1155_v12, %v1021_v41  ;;  %v793_v53 = vmul.f32 %v1157_v13, %v1021_v41 }
  0x53   : > { %v781_v55 = vadd.f32 %v773_v46, %v756_v42  ;;  %v782_v56 = vadd.f32 %v774_v47, %v757_v43  ;;  %v783_v57 = vadd.f32 %v775_v48, %v758_v44  ;;  %v784_v58 = vadd.f32 %v776_v49, %v759_v45 }
  0x54   : > { %v798_v59 = vrot.slane %v790_v50, 3  ;;  %v799_v60 = vrot.slane %v791_v51, 3  ;;  %v800_v61 = vrot.slane %v792_v52, 3  ;;  %v801_v62 = vrot.slane %v793_v53, 3 }
  0x55   : > { %v815_v63 = vmul.f32 %v1151_v10, %v1022_v54  ;;  %v816_v0 = vmul.f32 %v1153_v11, %v1022_v54  ;;  %v817_v1 = vmul.f32 %v1155_v12, %v1022_v54  ;;  %v818_v2 = vmul.f32 %v1157_v13, %v1022_v54 }
  0x56   : > { %v806_v3 = vadd.f32 %v798_v59, %v781_v55  ;;  %v807_v4 = vadd.f32 %v799_v60, %v782_v56  ;;  %v808_v8 = vadd.f32 %v800_v61, %v783_v57  ;;  %v809_v5 = vadd.f32 %v801_v62, %v784_v58 }
  0x57   : > { %v823_v9 = vrot.slane %v815_v63, 4  ;;  %v824_v14 = vrot.slane %v816_v0, 4  ;;  %v825_v6 = vrot.slane %v817_v1, 4  ;;  %v826_v15 = vrot.slane %v818_v2, 4 }
  0x59   : > { %v831_v10 = vadd.f32 %v823_v9, %v806_v3  ;;  %v832_v16 = vadd.f32 %v824_v14, %v807_v4  ;;  %v833_v11 = vadd.f32 %v825_v6, %v808_v8  ;;  %v834_v17 = vadd.f32 %v826_v15, %v809_v5 }
  0x5b   : > { %v842_v12 = vadd.f32 %v1023_v7, %v831_v10  ;;  %v843_v18 = vadd.f32 %v1023_v7, %v832_v16  ;;  %v844_v13 = vadd.f32 %v1023_v7, %v833_v11  ;;  %v845_v19 = vadd.f32 %v1023_v7, %v834_v17 }
  0x5d   : > { %v846_v20 = vmax.f32 %v842_v12, 0.0  ;;  %v847_v21 = vmax.f32 %v843_v18, 0.0  ;;  %v848_v22 = vmax.f32 %v844_v13, 0.0  ;;  %v849_v23 = vmax.f32 %v845_v19, 0.0 }
  0x5f   : > { %v850_v24 = vpack.c.bf16 %v846_v20, %v846_v20  ;;  %v851_v25 = vpack.c.bf16 %v847_v21, %v847_v21  ;;  %v852_v26 = vpack.c.bf16 %v848_v22, %v848_v22  ;;  %v853_v27 = vpack.c.bf16 %v849_v23, %v849_v23 }
  0x61   : > { %854 = vst [vmem:[%s249_s29] sm:$0x3] %v850_v24  ;;  %855 = vst [vmem:[%s249_s29 + $0x2] sm:$0x3] %v851_v25 }
  0x62   : > { %856 = vst [vmem:[%s249_s29 + $0x4] sm:$0x3] %v852_v26  ;;  %857 = vst [vmem:[%s249_s29 + $0x6] sm:$0x3] %v853_v27 }
  0x63 PF: > { %s13_s14 = sadd.s32 1, %s1093_s14   ;;  %s1343_s12 = smov %s1089_s13 }
  0x64   : > { %p10_p5 = scmp.ge.s32.totalorder %s13_s14, 4   ;;  %s1344_s13 = smov %s1346_s15 }
  0x66   :  { %12 = sbr.rel (!%p10_p5) target bundleno = 2 (0x2), region = 69 }

// kernel: _lambda_.35
= control target key start
LH: loop header
LB: loop body
LE: loop exit
PB: predicated region body
PF: predicated region fallthrough
CT: control target
= control target key end

     0   :  { %s547_s15 = smov 0   ;;  %s599_s0 = inlined_call_operand.vmem [shape: bf16[32,128], index: 0, kind: input, shape index: {}]   ;;  %s600_s1 = inlined_call_operand.vmem [shape: bf16[128,128], index: 1, kind: input, shape index: {}]   ;;  %s601_s2 = inlined_call_operand.vmem [shape: f32[1,128], index: 2, kind: input, shape index: {}]   ;;  %s602_s3 = inlined_call_operand.vmem [shape: bf16[32,128], index: 3, kind: input, shape index: {}]   ;;  %s603_s4 = inlined_call_operand.vmem [shape: bf16[32,128], index: 4, kind: output, shape index: {}]  }
   0x1 LB: > { %s428_s16 = sadd.s32 4294967295, %s518_s15   ;;  %p432_p0 = scmp.ge.s32.totalorder %s518_s15, 1  ;;  %s518_s15 = sphi %s547_s15, %s14_s15  }
   0x2   : > { %p174_p1 = scmp.lt.s32.totalorder %s518_s15, 3 }
   0x4   : > { %p175_p2 = pnand %p432_p0, %p174_p1 }
   0x5   : > { %v503_v0 = vld [vmem:[%s600_s1] sm:$0xff] (!%p175_p2)   ;;  %v520_v1 = vmov (!%p175_p2), 0.0   ;;  %v504_v2 = vld [vmem:[%s600_s1 + $0x8] sm:$0xff] (!%p175_p2)   ;;  %vm521_vm0 = vmmov (!%p175_p2), 0   ;;  %s433_s21 = sshll.u32 (!%p175_p2), %s428_s16, 1  ;;  %v505_v3 = vld [vmem:[%s600_s1 + $0x10] sm:$0xff] (!%p175_p2)  }
   0x6   : > { %178 = sbr.rel (%p175_p2) target bundleno = 259 (0x103), region = 36  ;;  %473 = vmatprep.subr.bf16.mxu0 (!%p175_p2), %v520_v1  ;;  %489 = vmatprep.mubr.msk.bf16.mxu0 (!%p175_p2), %vm521_vm0, %v520_v1  ;;  %p206_p3 = scmp.lt.s32.totalorder (!%p175_p2), %s433_s21, 3  ;;  %v506_v4 = vld [vmem:[%s600_s1 + $0x18] sm:$0xff] (!%p175_p2)   ;;  %v507_v5 = vld [vmem:[%s600_s1 + $0x20] sm:$0xff] (!%p175_p2)   ;;  %v508_v6 = vld [vmem:[%s600_s1 + $0x28] sm:$0xff] (!%p175_p2)  }
   0x7   : > { %474 = vmatpush3.bf16.msra.mxu0 (!%p175_p2), %v503_v0  ;;  %v509_v7 = vld [vmem:[%s600_s1 + $0x30] sm:$0xff] (!%p175_p2)   ;;  %v510_v8 = vld [vmem:[%s600_s1 + $0x38] sm:$0xff] (!%p175_p2)   ;;  %v439_v10 = vld [vmem:[%s601_s2] ss:$0 sm:$0xff] (!%p175_p2) }
   0x8   : > { %475 = vmatprep.subr.bf16.mxu0 (!%p175_p2), %v520_v1 }
   0xb   : > { %476 = vmatpush3.bf16.msra.mxu0 (!%p175_p2), %v504_v2 }
   0xc   : > { %477 = vmatprep.subr.bf16.mxu0 (!%p175_p2), %v520_v1 }
   0xd   : > { %s605_s21 = smov (!%p206_p3, %s433_s21), 3 }
   0xe   : > { %s564_s24 = sshll.u32 %s605_s21, 2 }
   0xf   : > { %s209_s27 = scalar_lea.vmem %s599_s0, %s564_s24  ;;  %478 = vmatpush3.bf16.msra.mxu0 %v505_v3  ;;  %s215_s14 = scalar_lea.vmem %s602_s3, %s564_s24 }
  0x10   : > { %479 = vmatprep.subr.bf16.mxu0 %v520_v1  ;;  %v511_v9 = vld [vmem:[%s209_s27] sm:$0xff]   ;;  %s221_s20 = scalar_lea.vmem %s603_s4, %s564_s24 }
  0x11   : > { %v456_v11 = vld [vmem:[%s215_s14] sm:$0xff]  }
  0x12   : > { %v457_v14 = vunpack.c.l.bf16 %v456_v11  ;;  %v458_v16 = vunpack.c.h.bf16 %v456_v11 }
  0x13   : > { %480 = vmatpush3.bf16.msra.mxu0 %v506_v4 }
  0x14   : > { %481 = vmatprep.subr.bf16.mxu0 %v520_v1 }
  0x17   : > { %482 = vmatpush3.bf16.msra.mxu0 %v507_v5 }
  0x18   : > { %483 = vmatprep.subr.bf16.mxu0 %v520_v1 }
  0x1b   : > { %484 = vmatpush3.bf16.msra.mxu0 %v508_v6 }
  0x1c   : > { %485 = vmatprep.subr.bf16.mxu0 %v520_v1 }
  0x1f   : > { %486 = vmatpush3.bf16.msra.mxu0 %v509_v7 }
  0x20   : > { %487 = vmatprep.subr.bf16.mxu0 %v520_v1 }
  0x23   : > { %488 = vmatpush3.bf16.msra.mxu0 %v510_v8 }
  0x26   : > { %490 = vmatmul.mubr.bf16.vlgmr.msra.gmra.mrb[0].mxu0 %v511_v9 }
  0xf9   : > { %v337_v12 = vpop.f32.mrb[0].mxu0 }
  0xfa   : > { %v338_v13 = vadd.f32 %v439_v10, %v337_v12  ;;  %v491_v15 = vpop.f32.mrb[1].mxu0 }
  0xfb   : > { %v340_v17 = vpop.f32.mrb[2].mxu0 }
  0xfc   : > { %v341_v18 = vadd.f32 %v439_v10, %v340_v17  ;;  %v492_v19 = vpop.f32.mrb[3].mxu0  ;;  %v348_v20 = vadd.f32 %v457_v14, %v338_v13 }
  0xfe   : > { %v349_v21 = vadd.f32 %v458_v16, %v341_v18 }
 0x100   : > { %v462_v22 = vpack.c.bf16 %v349_v21, %v348_v20 }
 0x102   : > { %463 = vst [vmem:[%s221_s20] sm:$0xff] %v462_v22  }
 0x103 PF: > { %s14_s15 = sadd.s32 1, %s518_s15  }
 0x104   : > { %p11_p4 = scmp.ge.s32.totalorder %s14_s15, 4  }
 0x106   :  { %13 = sbr.rel (!%p11_p4) target bundleno = 1 (0x1), region = 69 }

// kernel: _lambda_.36
= control target key start
LH: loop header
LB: loop body
LE: loop exit
PB: predicated region body
PF: predicated region fallthrough
CT: control target
= control target key end

     0   :  { %s509_s12 = smov 0   ;;  %s581_s0 = inlined_call_operand.vmem [shape: bf16[32,128], index: 0, kind: input, shape index: {}]   ;;  %s582_s1 = inlined_call_operand.vmem [shape: bf16[128,256], index: 1, kind: input, shape index: {}]   ;;  %s583_s2 = inlined_call_operand.vmem [shape: f32[1,256], index: 2, kind: input, shape index: {}]   ;;  %s584_s3 = inlined_call_operand.vmem [shape: bf16[32,256], index: 3, kind: output, shape index: {}]  }
   0x1 LB: > { %s412_s13 = sadd.s32 4294967295, %s486_s12   ;;  %p416_p0 = scmp.ge.s32.totalorder %s486_s12, 1  ;;  %s486_s12 = sphi %s509_s12, %s13_s12  }
   0x2   : > { %p138_p1 = scmp.lt.s32.totalorder %s486_s12, 3 }
   0x4   : > { %p139_p2 = pnand %p416_p0, %p138_p1 }
   0x5   : > { %v455_v0 = vld [vmem:[%s582_s1 + $0x4] ss:$8 sps:$4 sm:$0xff] (!%p139_p2)   ;;  %s417_s16 = sshll.u32 (!%p139_p2), %s412_s13, 1  ;;  %v457_v1 = vld [vmem:[%s582_s1] ss:$8 sps:$4 sm:$0xff] (!%p139_p2)   ;;  %v488_v2 = vmov (!%p139_p2), 0   ;;  %v197_v18 = vlaneseq (!%p139_p2) }
   0x6   : > { %142 = sbr.rel (%p139_p2) target bundleno = 260 (0x104), region = 32  ;;  %325 = vmatprep.mubr.bf16.mxu0 (!%p139_p2), %v488_v2  ;;  %p164_p3 = scmp.lt.s32.totalorder (!%p139_p2), %s417_s16, 3  ;;  %293 = vmatprep.subr.bf16.mxu0 (!%p139_p2), %v455_v0  ;;  %v458_v3 = vld [vmem:[%s582_s1 + $0x14] ss:$8 sps:$4 sm:$0xff] (!%p139_p2)   ;;  %v460_v4 = vld [vmem:[%s582_s1 + $0x10] ss:$8 sps:$4 sm:$0xff] (!%p139_p2)  }
   0x7   : > { %294 = vmatpush1.bf16.msra.mxu0 (!%p139_p2), %v457_v1  ;;  %v461_v5 = vld [vmem:[%s582_s1 + $0x24] ss:$8 sps:$4 sm:$0xff] (!%p139_p2)   ;;  %v463_v6 = vld [vmem:[%s582_s1 + $0x20] ss:$8 sps:$4 sm:$0xff] (!%p139_p2)   ;;  %v464_v7 = vld [vmem:[%s582_s1 + $0x34] ss:$8 sps:$4 sm:$0xff] (!%p139_p2)  }
   0x8   : > { %295 = vmatprep.subr.bf16.mxu0 (!%p139_p2), %v458_v3  ;;  %v466_v8 = vld [vmem:[%s582_s1 + $0x30] ss:$8 sps:$4 sm:$0xff] (!%p139_p2)   ;;  %v467_v9 = vld [vmem:[%s582_s1 + $0x44] ss:$8 sps:$4 sm:$0xff] (!%p139_p2)   ;;  %v469_v10 = vld [vmem:[%s582_s1 + $0x40] ss:$8 sps:$4 sm:$0xff] (!%p139_p2)  }
   0x9   : > { %v470_v11 = vld [vmem:[%s582_s1 + $0x54] ss:$8 sps:$4 sm:$0xff] (!%p139_p2)   ;;  %v472_v12 = vld [vmem:[%s582_s1 + $0x50] ss:$8 sps:$4 sm:$0xff] (!%p139_p2)   ;;  %v473_v13 = vld [vmem:[%s582_s1 + $0x64] ss:$8 sps:$4 sm:$0xff] (!%p139_p2)  }
   0xa   : > { %v475_v14 = vld [vmem:[%s582_s1 + $0x60] ss:$8 sps:$4 sm:$0xff] (!%p139_p2)   ;;  %v476_v15 = vld [vmem:[%s582_s1 + $0x74] ss:$8 sps:$4 sm:$0xff] (!%p139_p2)   ;;  %v478_v16 = vld [vmem:[%s582_s1 + $0x70] ss:$8 sps:$4 sm:$0xff] (!%p139_p2)  }
   0xb   : > { %296 = vmatpush1.bf16.msra.mxu0 (!%p139_p2), %v460_v4  ;;  %v198_v19 = vshrl.u32 (!%p139_p2), %v197_v18, 7  ;;  %v195_v21 = vld [vmem:[%s583_s2] sm:$0x3] (!%p139_p2) }
   0xc   : > { %297 = vmatprep.subr.bf16.mxu0 (!%p139_p2), %v461_v5 }
   0xd   : > { %s586_s16 = smov (!%p164_p3, %s417_s16), 3  ;;  %v199_v20 = vsub.s32 0, %v198_v19  ;;  %v203_v22 = vsub.s32 1, %v198_v19 }
   0xe   : > { %s418_s25 = sshll.u32 %s586_s16, 2  ;;  %s443_s28 = sshll.u32 %s586_s16, 3 }
   0xf   : > { %s167_s5 = scalar_lea.vmem %s581_s0, %s418_s25  ;;  %298 = vmatpush1.bf16.msra.mxu0 %v463_v6  ;;  %v200_v23 = vrot.slane %v195_v21, %v199_v20  ;;  %v204_v24 = vrot.slane %v195_v21, %v203_v22  ;;  %s174_s4 = scalar_lea.vmem %s584_s3, %s443_s28 }
  0x10   : > { %299 = vmatprep.subr.bf16.mxu0 %v464_v7  ;;  %v479_v17 = vld [vmem:[%s167_s5] sm:$0xff]  }
  0x13   : > { %300 = vmatpush1.bf16.msra.mxu0 %v466_v8 }
  0x14   : > { %301 = vmatprep.subr.bf16.mxu0 %v467_v9 }
  0x17   : > { %302 = vmatpush1.bf16.msra.mxu0 %v469_v10 }
  0x18   : > { %303 = vmatprep.subr.bf16.mxu0 %v470_v11 }
  0x1b   : > { %304 = vmatpush1.bf16.msra.mxu0 %v472_v12 }
  0x1c   : > { %305 = vmatprep.subr.bf16.mxu0 %v473_v13 }
  0x1f   : > { %306 = vmatpush1.bf16.msra.mxu0 %v475_v14 }
  0x20   : > { %307 = vmatprep.subr.bf16.mxu0 %v476_v15 }
  0x23   : > { %308 = vmatpush1.bf16.msra.mxu0 %v478_v16 }
  0x26   : > { %326 = vmatmul.mubr.bf16.vlgmr.msra.gmra.mrb[0].mxu0 %v479_v17 }
  0xf9   : > { %v327_v25 = vpop.f32.mrb[0].mxu0 }
  0xfa   : > { %v328_v26 = vadd.f32 %v327_v25, %v200_v23  ;;  %v329_v27 = vpop.f32.mrb[1].mxu0 }
  0xfb   : > { %v330_v28 = vadd.f32 %v329_v27, %v204_v24  ;;  %v331_v29 = vpop.f32.mrb[2].mxu0 }
  0xfc   : > { %v336_v30 = vmax.f32 %v328_v26, 0.0  ;;  %v332_v31 = vadd.f32 %v331_v29, %v200_v23  ;;  %v333_v32 = vpop.f32.mrb[3].mxu0 }
  0xfd   : > { %v337_v33 = vmax.f32 %v330_v28, 0.0  ;;  %v334_v34 = vadd.f32 %v333_v32, %v204_v24 }
  0xfe   : > { %v338_v35 = vmax.f32 %v332_v31, 0.0 }
  0xff   : > { %v444_v36 = vpack.c.bf16 %v337_v33, %v336_v30  ;;  %v339_v37 = vmax.f32 %v334_v34, 0.0 }
 0x101   : > { %352 = vst [vmem:[%s174_s4] sm:$0xff] %v444_v36  ;;  %v445_v38 = vpack.c.bf16 %v339_v37, %v338_v35 }
 0x103   : > { %353 = vst [vmem:[%s174_s4 + $0x8] sm:$0xff] %v445_v38 }
 0x104 PF: > { %s13_s12 = sadd.s32 1, %s486_s12  }
 0x105   : > { %p10_p4 = scmp.ge.s32.totalorder %s13_s12, 4  }
 0x107   :  { %12 = sbr.rel (!%p10_p4) target bundleno = 1 (0x1), region = 62 }

// kernel: _lambda_.37
= control target key start
LH: loop header
LB: loop body
LE: loop exit
PB: predicated region body
PF: predicated region fallthrough
CT: control target
= control target key end

     0   :  { %s984_s15 = smov 0   ;;  %s986_s16 = smov 0   ;;  %s1172_s0 = inlined_call_operand.vmem [shape: bf16[2,12,3,256], index: 0, kind: input, shape index: {}]   ;;  %s1173_s1 = inlined_call_operand.vmem [shape: f32[9,256], index: 1, kind: input, shape index: {}]   ;;  %s1174_s2 = inlined_call_operand.vmem [shape: f32[1,256], index: 2, kind: input, shape index: {}]   ;;  %s1175_s3 = inlined_call_operand.vmem [shape: bf16[2,2,2,256], index: 3, kind: output, shape index: {0}]   ;;  %s1176_s4 = inlined_call_operand.vmem [shape: f32[2,1,256], index: 4, kind: output, shape index: {1}]  }
   0x1   :  { %s988_s17 = smov 0   ;;  %s990_s18 = smov 0  }
   0x2   :  { %s992_s19 = smov 0   ;;  %s994_s20 = smov 0  }
   0x3   :  { %s996_s21 = smov 0   ;;  %s998_s22 = smov 0  }
   0x4   :  { %s1000_s23 = smov 0  }
   0x5 LB: > { %s772_s24 = sadd.s32 4294967295, %s956_s23   ;;  %s30_s25 = sadd.s32 1, %s948_s21  ;;  %s956_s23 = sphi %s1000_s23, %s15_s23   ;;  %s952_s22 = sphi %s998_s22, %s1187_s22   ;;  %s948_s21 = sphi %s996_s21, %s1186_s21   ;;  %s944_s20 = sphi %s994_s20, %s1185_s20   ;;  %s940_s19 = sphi %s992_s19, %s1184_s19   ;;  %s936_s18 = sphi %s990_s18, %s1183_s18   ;;  %s932_s17 = sphi %s988_s17, %s1182_s17   ;;  %s928_s16 = sphi %s986_s16, %s1181_s16   ;;  %s924_s15 = sphi %s984_s15, %s1180_s15  }
   0x6   : > { %p32_p0 = scmp.ge.s32.totalorder %s30_s25, 2  ;;  %s34_s26 = sadd.s32 1, %s952_s22 }
   0x7   : > { %s43_s27 = sadd.s32 1, %s936_s18  ;;  %p50_p1 = scmp.ne.s32.totalorder %s936_s18, %s932_s17 }
   0x8   : > { %s1189_s25 = smov (%p32_p0, %s30_s25), 0  ;;  %s1191_s26 = smov (!%p32_p0, %s34_s26), %s952_s22 }
   0x9   : > { %s39_s28 = ssub.s32 %s948_s21, %s1189_s25  ;;  %p51_p2 = scmp.eq.s32.totalorder %s956_s23, 0 }
   0xa   : > { %p36_p3 = scmp.ge.s32.totalorder %s1191_s26, 2  ;;  %p67_p4 = scmp.eq.s32.totalorder %s39_s28, 0 }
   0xb   : > { %p1044_p5 = por %p51_p2, %p50_p1  ;;  %s69_s30 = sadd.s32 1, %s928_s16 }
   0xc   : > { %s1193_s26 = smov (%p36_p3, %s1191_s26), 0  ;;  %p76_p6 = scmp.ne.s32.totalorder %s928_s16, %s924_s15 }
   0xd   : > { %s1052_s5 = scalar_select %p67_p4, %s928_s16, %s69_s30  }
   0xe   : > { %s38_s6 = ssub.s32 %s952_s22, %s1193_s26  ;;  %p136_p7 = scmp.eq.s32.totalorder %s772_s24, 3 }
   0xf   : > { %s40_s7 = sor.u32 %s39_s28, %s38_s6  ;;  %p1058_p9 = por %p76_p6, %p51_p2 }
  0x10   : > { %p41_p8 = scmp.eq.s32.totalorder %s40_s7, 0  ;;  %p1065_p10 = por %p136_p7, %p50_p1 }
  0x11   : > { %p775_p11 = scmp.ge.s32.totalorder %s956_s23, 4 }
  0x12   : > { %s1070_s10 = scalar_select %p41_p8, %s936_s18, %s43_s27  }
  0x13   : > { %186 = sbr.rel (%p775_p11) target bundleno = 48 (0x30), region = 16 }
  0x1a   : > { %189 = sbr.rel (!%p1044_p5) target bundleno = 41 (0x29), region = 20  ;;  %s191_s11 = sand.u32 (%p1044_p5), 1, %s936_s18  }
  0x1b   : > { %s811_s12 = smul.u32 (%p1044_p5), 24, %s952_s22 }
  0x1c   : > { %s810_s13 = smul.u32 (%p1044_p5), 24, %s191_s11 }
  0x1d   : > { %s195_s14 = sadd.s32 (%p1044_p5), %s948_s21, %s811_s12 }
  0x1e   : > { %s776_s24 = sshll.u32 (%p1044_p5), %s195_s14, 1  ;;  %s193_s27 = scalar_lea.vmem (%p1044_p5), [#allocation2], %s810_s13 }
  0x1f   : > { %s197_s6 = scalar_lea.vmem (%p1044_p5), %s1172_s0, %s776_s24 }
  0x20   : > { %v213_v0 = vld [vmem:[%s197_s6] sm:$0x3] (%p1044_p5)  ;;  %v215_v1 = vld [vmem:[%s197_s6 + $0x4] sm:$0x3] (%p1044_p5)  ;;  %v217_v2 = vld [vmem:[%s197_s6 + $0x8] sm:$0x3] (%p1044_p5) }
  0x21   : > { %214 = vst [vmem:[%s193_s27] sm:$0x3] %v213_v0  ;;  %216 = vst [vmem:[%s193_s27 + $0x2] sm:$0x3] %v215_v1  ;;  %v219_v3 = vld [vmem:[%s197_s6 + $0xc] sm:$0x3] }
  0x22   : > { %218 = vst [vmem:[%s193_s27 + $0x4] sm:$0x3] %v217_v2  ;;  %v221_v4 = vld [vmem:[%s197_s6 + $0x10] sm:$0x3]  ;;  %v223_v5 = vld [vmem:[%s197_s6 + $0x14] sm:$0x3] }
  0x23   : > { %220 = vst [vmem:[%s193_s27 + $0x6] sm:$0x3] %v219_v3  ;;  %222 = vst [vmem:[%s193_s27 + $0x8] sm:$0x3] %v221_v4  ;;  %v225_v6 = vld [vmem:[%s197_s6 + $0x18] sm:$0x3] }
  0x24   : > { %224 = vst [vmem:[%s193_s27 + $0xa] sm:$0x3] %v223_v5  ;;  %v227_v7 = vld [vmem:[%s197_s6 + $0x1c] sm:$0x3]  ;;  %v229_v8 = vld [vmem:[%s197_s6 + $0x20] sm:$0x3] }
  0x25   : > { %226 = vst [vmem:[%s193_s27 + $0xc] sm:$0x3] %v225_v6  ;;  %228 = vst [vmem:[%s193_s27 + $0xe] sm:$0x3] %v227_v7  ;;  %v231_v9 = vld [vmem:[%s197_s6 + $0x24] sm:$0x3] }
  0x26   : > { %230 = vst [vmem:[%s193_s27 + $0x10] sm:$0x3] %v229_v8  ;;  %v233_v10 = vld [vmem:[%s197_s6 + $0x28] sm:$0x3]  ;;  %v235_v11 = vld [vmem:[%s197_s6 + $0x2c] sm:$0x3] }
  0x27   : > { %232 = vst [vmem:[%s193_s27 + $0x12] sm:$0x3] %v231_v9  ;;  %234 = vst [vmem:[%s193_s27 + $0x14] sm:$0x3] %v233_v10 }
  0x28   : > { %236 = vst [vmem:[%s193_s27 + $0x16] sm:$0x3] %v235_v11 }
  0x29 PF: > { %283 = sbr.rel (!%p1058_p9) target bundleno = 48 (0x30), region = 61  ;;  %s285_s29 = sand.u32 (%p1058_p9), 1, %s928_s16  }
  0x2a   : > { %s778_s7 = sshll.u32 (%p1058_p9), %s948_s21, 3  ;;  %s777_s11 = sshll.u32 (%p1058_p9), %s285_s29, 4 }
  0x2b   : > { %s289_s14 = scalar_lea.vmem (%p1058_p9), %s1173_s1, %s778_s7  ;;  %s287_s24 = scalar_lea.vmem (%p1058_p9), [#allocation3], %s777_s11 }
  0x2c   : > { %v319_v12 = vld [vmem:[%s289_s14] sm:$0xff] (%p1058_p9)  ;;  %v321_v13 = vld [vmem:[%s289_s14 + $0x10] sm:$0xff] (%p1058_p9) }
  0x2d   : > { %320 = vst [vmem:[%s287_s24] sm:$0xff] (%p1058_p9), %v319_v12  ;;  %322 = vst [vmem:[%s287_s24 + $0x8] sm:$0xff] (%p1058_p9), %v321_v13 }
  0x30 PF: > { %p779_p12 = scmp.ge.s32.totalorder %s956_s23, 1  ;;  %p333_p13 = scmp.lt.s32.totalorder %s956_s23, 5 }
  0x32   : > { %p334_p0 = pnand %p779_p12, %p333_p13 }
  0x33   : > { %p385_p1 = scmp.lt.s32.totalorder (!%p334_p0), %s940_s19, 1  ;;  %p389_p2 = scmp.lt.s32.totalorder (!%p334_p0), %s944_s20, 1  ;;  %v958_v17 = vmov (!%p334_p0), 0.0   ;;  %vm554_vm0 = vcmask (!%p334_p0), 1041408  }
  0x34   : > { %337 = sbr.rel (%p334_p0) target bundleno = 101 (0x65), region = 103  ;;  %s340_s8 = sand.u32 (!%p334_p0), 1, %s932_s17  }
  0x35   : > { %s347_s28 = sand.u32 (!%p334_p0), 1, %s924_s15   ;;  %s812_s27 = smul.u32 (!%p334_p0), 24, %s340_s8 }
  0x36   : > { %s780_s29 = sshll.u32 (!%p334_p0), %s347_s28, 4 }
  0x37   : > { %s1106_s24 = scalar_lea.vmem (!%p334_p0), [#allocation2], %s812_s27  ;;  %s1110_s15 = scalar_lea.vmem (!%p334_p0), [#allocation3], %s780_s29 }
  0x38   : > { %v399_v14 = vld [vmem:[%s1106_s24] sm:$0x3] (!%p334_p0)  ;;  %v400_v15 = vld [vmem:[%s1106_s24 + $0x2] sm:$0x3] (!%p334_p0)  ;;  %v790_v16 = vld [vmem:[%s1110_s15] ss:$0 sm:$0xff] (!%p334_p0) }
  0x39   : > { %v402_v18 = vunpack.c.l.bf16 (!%p334_p0), %v399_v14  ;;  %v403_v19 = vunpack.c.l.bf16 (!%p334_p0), %v400_v15  ;;  %v783_v20 = vld [vmem:[%s1106_s24 + $0x6] sm:$0x3] (!%p334_p0)  ;;  %v784_v21 = vld [vmem:[%s1106_s24 + $0x8] sm:$0x3] (!%p334_p0)  ;;  %v786_v25 = vld [vmem:[%s1106_s24 + $0xc] sm:$0x3] (!%p334_p0) }
  0x3a   : > { %v791_v22 = vld [vmem:[%s1110_s15 + $0x1] ss:$0 sm:$0xff] (!%p334_p0)  ;;  %v411_v23 = vunpack.c.l.bf16 (!%p334_p0), %v783_v20  ;;  %v412_v24 = vunpack.c.l.bf16 (!%p334_p0), %v784_v21  ;;  %v788_v26 = vld [vmem:[%s1106_s24 + $0x12] sm:$0x3] (!%p334_p0)  ;;  %v419_v28 = vunpack.c.l.bf16 (!%p334_p0), %v786_v25  ;;  %v797_v33 = vld [vmem:[%s1110_s15 + $0x5] ss:$0 sm:$0xff] (!%p334_p0) }
  0x3b   : > { %s1095_s30 = scalar_select %p385_p1, %s940_s19, 1  ;;  %v792_v27 = vld [vmem:[%s1110_s15 + $0x2] ss:$0 sm:$0xff]  ;;  %v426_v29 = vunpack.c.l.bf16 %v788_v26  ;;  %v433_v30 = vmul.f32 %v790_v16, %v402_v18  ;;  %v434_v31 = vmul.f32 %v790_v16, %v403_v19  ;;  %v795_v32 = vld [vmem:[%s1110_s15 + $0x3] ss:$0 sm:$0xff] }
  0x3c   : > { %s390_s6 = scalar_select %p389_p2, %s944_s20, 1  ;;  %v442_v34 = vmul.f32 %v791_v22, %v411_v23  ;;  %v443_v35 = vmul.f32 %v791_v22, %v412_v24  ;;  %v451_v36 = vmul.f32 %v792_v27, %v402_v18  ;;  %v796_v37 = vld [vmem:[%s1110_s15 + $0x4] ss:$0 sm:$0xff]  ;;  %v452_v38 = vmul.f32 %v792_v27, %v403_v19  ;;  %v401_v40 = vld [vmem:[%s1106_s24 + $0x4] sm:$0x3] }
  0x3d   : > { %v486_v39 = vmul.f32 %v797_v33, %v419_v28  ;;  %v468_v44 = vmul.f32 %v795_v32, %v419_v28  ;;  %v787_v45 = vld [vmem:[%s1106_s24 + $0xe] sm:$0x3]  ;;  %v789_v46 = vld [vmem:[%s1106_s24 + $0x14] sm:$0x3]  ;;  %v477_v47 = vmul.f32 %v796_v37, %v426_v29  ;;  %v802_v54 = vld [vmem:[%s1110_s15 + $0x8] ss:$0 sm:$0xff]  ;;  %v404_v55 = vunpack.c.l.bf16 %v401_v40  ;;  %s387_s27 = scalar_lea.vmem %s1174_s2, %s1095_s30 }
  0x3e   : > { %s782_s7 = sshll.u32 %s390_s6, 1  ;;  %v444_v41 = vadd.f32 %v442_v34, %v433_v30  ;;  %v445_v42 = vadd.f32 %v443_v35, %v434_v31  ;;  %v793_v43 = vrot.slane %v451_v36, 9  ;;  %v800_v49 = vld [vmem:[%s1110_s15 + $0x6] ss:$0 sm:$0xff]  ;;  %v420_v50 = vunpack.c.l.bf16 %v787_v45  ;;  %v785_v56 = vld [vmem:[%s1106_s24 + $0xa] sm:$0x3] }
  0x3f   : > { %s394_s11 = sadd.s32 %s782_s7, %s1095_s30  ;;  %v427_v51 = vunpack.c.l.bf16 %v789_v46  ;;  %v794_v52 = vrot.slane %v452_v38, 9  ;;  %v798_v53 = vrot.slane %v486_v39, 9  ;;  %v801_v58 = vld [vmem:[%s1110_s15 + $0x7] ss:$0 sm:$0xff]  ;;  %v503_v62 = vmul.f32 %v800_v49, %v403_v19  ;;  %s781_s29 = sshll.u32 %s340_s8, 1 }
  0x40   : > { %s1104_s14 = scalar_lea.vmem %s1176_s4, %s394_s11  ;;  %v461_v48 = vadd.f32 %v793_v43, %v444_v41  ;;  %v469_v60 = vmul.f32 %v795_v32, %v420_v50  ;;  %v487_v63 = vmul.f32 %v797_v33, %v420_v50  ;;  %v521_v1 = vmul.f32 %v802_v54, %v403_v19  ;;  %s375_s30 = scalar_lea.vmem [#allocation4], %s781_s29 }
  0x41   : > { %552 = vst [vmem:[%s1104_s14] sm:$0x1] %v958_v17  ;;  %v462_v59 = vadd.f32 %v794_v52, %v445_v42  ;;  %v478_v61 = vmul.f32 %v796_v37, %v427_v51  ;;  %v413_v2 = vunpack.c.l.bf16 %v785_v56  ;;  %v512_v4 = vmul.f32 %v801_v58, %v412_v24  ;;  %v805_v17 = vld [vmem:[%s387_s27] ss:$0 sm:$0xff]  ;;  %s807_s17 = sshll.u32 (%p1065_p10), %s944_s20, 2 }
  0x42   : > { %v470_v57 = vadd.f32 %v468_v44, %v461_v48  ;;  %v799_v5 = vrot.slane %v487_v63, 9  ;;  %v504_v8 = vmul.f32 %v800_v49, %v404_v55  ;;  %v522_v9 = vmul.f32 %v802_v54, %v404_v55  ;;  %s584_s8 = sadd.s32 (%p1065_p10), %s940_s19, %s807_s17 }
  0x43   : > { %v471_v3 = vadd.f32 %v469_v60, %v462_v59  ;;  %v803_v11 = vrot.slane %v521_v1, 9  ;;  %v513_v13 = vmul.f32 %v801_v58, %v413_v2  ;;  %s585_s12 = scalar_lea.vmem (%p1065_p10), %s1175_s3, %s584_s8 }
  0x44   : > { %v479_v0 = vadd.f32 %v477_v47, %v470_v57  ;;  %v804_v16 = vrot.slane %v522_v9, 9 }
  0x45   : > { %v480_v7 = vadd.f32 %v478_v61, %v471_v3 }
  0x46   : > { %v496_v6 = vadd.f32 %v798_v53, %v479_v0 }
  0x47   : > { %v497_v12 = vadd.f32 %v799_v5, %v480_v7 }
  0x48   : > { %v505_v10 = vadd.f32 %v503_v62, %v496_v6  ;;  %v553_v35 = vld [vmem:[%s1104_s14] sm:$0x1] }
  0x49   : > { %v506_v15 = vadd.f32 %v504_v8, %v497_v12 }
  0x4a   : > { %v514_v14 = vadd.f32 %v512_v4, %v505_v10 }
  0x4b   : > { %v515_v19 = vadd.f32 %v513_v13, %v506_v15 }
  0x4c   : > { %v531_v18 = vadd.f32 %v803_v11, %v514_v14 }
  0x4d   : > { %v532_v21 = vadd.f32 %v804_v16, %v515_v19 }
  0x4e   : > { %v540_v20 = vadd.f32 %v805_v17, %v531_v18 }
  0x4f   : > { %v541_v23 = vadd.f32 %v805_v17, %v532_v21 }
  0x50   : > { %v542_v22 = vmax.f32 %v540_v20, 0.0 }
  0x51   : > { %v543_v26 = vmax.f32 %v541_v23, 0.0 }
  0x52   : > { %v544_v24 = vpack.c.bf16 %v542_v22, %v542_v22  ;;  %v555_v25 = vsel %vm554_vm0, %v542_v22, 0.0 }
  0x53   : > { %v545_v27 = vpack.c.bf16 %v543_v26, %v543_v26  ;;  %v556_v28 = vsel %vm554_vm0, %v543_v26, 0.0 }
  0x54   : > { %546 = vst [vmem:[%s375_s30] sm:$0x1] %v544_v24  ;;  %v557_v29 = vadd.f32 %v556_v28, %v555_v25 }
  0x55   : > { %547 = vst [vmem:[%s375_s30 + $0x1] sm:$0x1] %v545_v27 }
  0x56   : > { %v558_v30 = vrot.slane %v557_v29, 4 }
  0x58   : > { %v559_v31 = vadd.f32 %v558_v30, %v557_v29 }
  0x5a   : > { %v560_v32 = vrot.slane %v559_v31, 2 }
  0x5b   : > { %v601_v38 = vld [vmem:[%s375_s30] sm:$0x1] (%p1065_p10) }
  0x5c   : > { %v561_v33 = vadd.f32 %v560_v32, %v559_v31  ;;  %v603_v39 = vld [vmem:[%s375_s30 + $0x1] sm:$0x1] (%p1065_p10)  ;;  %602 = vst [vmem:[%s585_s12] sm:$0x1] (%p1065_p10), %v601_v38 }
  0x5d   : > { %604 = vst [vmem:[%s585_s12 + $0x2] sm:$0x1] (%p1065_p10), %v603_v39 }
  0x5e   : > { %v562_v34 = vrot.slane %v561_v33, 1  ;;  %579 = sbr.rel (!%p1065_p10) target bundleno = 101 (0x65), region = 119 }
  0x60   : > { %v563_v36 = vadd.f32 %v562_v34, %v561_v33 }
  0x62   : > { %v564_v37 = vadd.f32 %v563_v36, %v553_v35 }
  0x64   : > { %565 = vst [vmem:[%s1104_s14] sm:$0x1] %v564_v37 }
  0x65 PF: > { %s15_s23 = sadd.s32 1, %s956_s23   ;;  %s1180_s15 = smov %s928_s16 }
  0x66   : > { %p12_p3 = scmp.ge.s32.totalorder %s15_s23, 6   ;;  %s1181_s16 = smov %s1052_s5 }
  0x67   : > { %s1182_s17 = smov %s936_s18  ;;  %s1183_s18 = smov %s1070_s10 }
  0x68   : > { %s1184_s19 = smov %s948_s21  ;;  %s1185_s20 = smov %s952_s22 }
  0x69   : > { %s1186_s21 = smov %s1189_s25  ;;  %s1187_s22 = smov %s1193_s26 }
  0x6a   :  { %14 = sbr.rel (!%p12_p3) target bundleno = 5 (0x5), region = 211 }

// kernel: _lambda_.39
= control target key start
LH: loop header
LB: loop body
LE: loop exit
PB: predicated region body
PF: predicated region fallthrough
CT: control target
= control target key end

     0   :  { %s676_s15 = smov 0   ;;  %s678_s16 = smov 0   ;;  %s768_s0 = inlined_call_operand.vmem [shape: bf16[2,8,256], index: 0, kind: input, shape index: {}]   ;;  %s769_s1 = inlined_call_operand.vmem [shape: f32[2,1,256], index: 1, kind: input, shape index: {}]   ;;  %s770_s2 = inlined_call_operand.vmem [shape: bf16[256,128], index: 2, kind: input, shape index: {}]   ;;  %s771_s3 = inlined_call_operand.vmem [shape: f32[1,128], index: 3, kind: input, shape index: {}]   ;;  %s772_s4 = inlined_call_operand.vmem [shape: bf16[2,8,128], index: 4, kind: output, shape index: {}]  }
   0x1   :  { %s680_s17 = smov 0  }
   0x2 LB: > { %s26_s18 = sadd.s32 1, %s645_s16  ;;  %p540_p0 = scmp.ge.s32.totalorder %s649_s17, 1  ;;  %s649_s17 = sphi %s680_s17, %s14_s17   ;;  %s645_s16 = sphi %s678_s16, %s774_s16   ;;  %s641_s15 = sphi %s676_s15, %s773_s15  }
   0x3   : > { %p28_p1 = scmp.ge.s32.totalorder %s26_s18, 2  ;;  %p191_p2 = scmp.lt.s32.totalorder %s649_s17, 3 }
   0x5   : > { %s776_s18 = smov (%p28_p1, %s26_s18), 0  ;;  %p192_p3 = pnand %p540_p0, %p191_p2 }
   0x6   : > { %v611_v0 = vld [vmem:[%s770_s2 + $0x40] sm:$0xff] (!%p192_p3)   ;;  %v613_v2 = vld [vmem:[%s770_s2 + $0x48] sm:$0xff] (!%p192_p3)   ;;  %p227_p4 = scmp.lt.s32.totalorder (!%p192_p3), %s641_s15, 1  ;;  %v615_v4 = vld [vmem:[%s770_s2 + $0x50] sm:$0xff] (!%p192_p3)   ;;  %v253_v5 = vlaneseq (!%p192_p3) }
   0x7   : > { %195 = sbr.rel (%p192_p3) target bundleno = 259 (0x103), region = 36  ;;  %v612_v1 = vld [vmem:[%s770_s2] sm:$0xff] (!%p192_p3)   ;;  %565 = vmatprep.subr.bf16.mxu0 (!%p192_p3), %v611_v0  ;;  %v614_v3 = vld [vmem:[%s770_s2 + $0x8] sm:$0xff] (!%p192_p3)   ;;  %v616_v6 = vld [vmem:[%s770_s2 + $0x10] sm:$0xff] (!%p192_p3)  }
   0x8   : > { %566 = vmatpush3.bf16.msra.mxu0 (!%p192_p3), %v612_v1  ;;  %v617_v7 = vld [vmem:[%s770_s2 + $0x58] sm:$0xff] (!%p192_p3)   ;;  %v254_v8 = vshrl.u32 (!%p192_p3), %v253_v5, 7  ;;  %v619_v10 = vld [vmem:[%s770_s2 + $0x60] sm:$0xff] (!%p192_p3)   ;;  %v621_v13 = vld [vmem:[%s770_s2 + $0x68] sm:$0xff] (!%p192_p3)  }
   0x9   : > { %567 = vmatprep.subr.bf16.mxu0 (!%p192_p3), %v613_v2  ;;  %v618_v9 = vld [vmem:[%s770_s2 + $0x18] sm:$0xff] (!%p192_p3)   ;;  %v620_v12 = vld [vmem:[%s770_s2 + $0x20] sm:$0xff] (!%p192_p3)   ;;  %v622_v19 = vld [vmem:[%s770_s2 + $0x28] sm:$0xff] (!%p192_p3)  }
   0xa   : > { %v259_v11 = vsub.s32 (!%p192_p3), 1, %v254_v8  ;;  %v255_v18 = vsub.s32 (!%p192_p3), 0, %v254_v8  ;;  %v623_v21 = vld [vmem:[%s770_s2 + $0x70] sm:$0xff] (!%p192_p3)   ;;  %v625_v26 = vld [vmem:[%s770_s2 + $0x78] sm:$0xff] (!%p192_p3)   ;;  %v545_v31 = vld [vmem:[%s771_s3] ss:$0 sm:$0xff] (!%p192_p3) }
   0xb   : > { %v624_v25 = vld [vmem:[%s770_s2 + $0x30] sm:$0xff] (!%p192_p3)   ;;  %v626_v28 = vld [vmem:[%s770_s2 + $0x38] sm:$0xff] (!%p192_p3)  }
   0xc   : > { %568 = vmatpush3.bf16.msra.mxu0 (!%p192_p3), %v614_v3 }
   0xd   : > { %569 = vmatprep.subr.bf16.mxu0 (!%p192_p3), %v615_v4 }
   0xe   : > { %s778_s15 = smov (!%p227_p4, %s641_s15), 1 }
   0xf   : > { %s564_s7 = sshll.u32 %s778_s15, 3  ;;  %s543_s8 = sshll.u32 %s778_s15, 1 }
  0x10   : > { %570 = vmatpush3.bf16.msra.mxu0 %v616_v6  ;;  %s235_s19 = scalar_lea.vmem %s768_s0, %s564_s7  ;;  %s239_s22 = scalar_lea.vmem %s769_s1, %s543_s8 }
  0x11   : > { %571 = vmatprep.subr.bf16.mxu0 %v617_v7  ;;  %v248_v14 = vld [vmem:[%s235_s19] sm:$0xff]  ;;  %s544_s13 = sshll.u32 %s778_s15, 2 }
  0x12   : > { %v251_v15 = vld [vmem:[%s239_s22] sm:$0x3]  ;;  %v250_v16 = vunpack.c.h.bf16 %v248_v14  ;;  %v249_v23 = vunpack.c.l.bf16 %v248_v14  ;;  %s246_s20 = scalar_lea.vmem %s772_s4, %s544_s13 }
  0x13   : > { %v260_v17 = vrot.slane %v251_v15, %v259_v11  ;;  %v256_v24 = vrot.slane %v251_v15, %v255_v18 }
  0x14   : > { %572 = vmatpush3.bf16.msra.mxu0 %v618_v9 }
  0x15   : > { %573 = vmatprep.subr.bf16.mxu0 %v619_v10  ;;  %v264_v20 = vmul.f32 %v260_v17, %v250_v16  ;;  %v263_v27 = vmul.f32 %v256_v24, %v249_v23 }
  0x17   : > { %v266_v22 = vpack.c.bf16 %v264_v20, %v264_v20  ;;  %v265_v29 = vpack.c.bf16 %v263_v27, %v263_v27 }
  0x18   : > { %574 = vmatpush3.bf16.msra.mxu0 %v620_v12 }
  0x19   : > { %575 = vmatprep.subr.bf16.mxu0 %v621_v13  ;;  %434 = vmatprep.mubr.bf16.mxu0 %v266_v22 }
  0x1c   : > { %576 = vmatpush3.bf16.msra.mxu0 %v622_v19 }
  0x1d   : > { %577 = vmatprep.subr.bf16.mxu0 %v623_v21 }
  0x20   : > { %578 = vmatpush3.bf16.msra.mxu0 %v624_v25 }
  0x21   : > { %579 = vmatprep.subr.bf16.mxu0 %v625_v26 }
  0x24   : > { %580 = vmatpush3.bf16.msra.mxu0 %v626_v28 }
  0x27   : > { %435 = vmatmul.mubr.bf16.vlgmr.msra.gmra.mrb[0].mxu0 %v265_v29 }
  0xfa   : > { %v581_v30 = vpop.f32.mrb[0].mxu0 }
  0xfb   : > { %v582_v32 = vpop.f32.mrb[1].mxu0 }
  0xfc   : > { %v583_v33 = vadd.f32 %v582_v32, %v581_v30  ;;  %v584_v34 = vpop.f32.mrb[2].mxu0 }
  0xfd   : > { %v585_v35 = vpop.f32.mrb[3].mxu0 }
  0xfe   : > { %v437_v36 = vadd.f32 %v583_v33, %v545_v31 }
 0x100   : > { %v442_v37 = vpack.c.bf16 %v437_v36, %v437_v36 }
 0x102   : > { %443 = vst [vmem:[%s246_s20] sm:$0xf] %v442_v37 }
 0x103 PF: > { %s14_s17 = sadd.s32 1, %s649_s17   ;;  %s773_s15 = smov %s645_s16 }
 0x104   : > { %p11_p5 = scmp.ge.s32.totalorder %s14_s17, 4   ;;  %s774_s16 = smov %s776_s18 }
 0x106   :  { %13 = sbr.rel (!%p11_p5) target bundleno = 2 (0x2), region = 69 }

// kernel: _lambda_.38
= control target key start
LH: loop header
LB: loop body
LE: loop exit
PB: predicated region body
PF: predicated region fallthrough
CT: control target
= control target key end

     0   :  { %v477_v38 = vmov 0   ;;  %v222_v48 = vlaneseq  ;;  %s622_s1 = inlined_call_operand.vmem [shape: bf16[256,128], index: 1, kind: input, shape index: {}]   ;;  %s623_s0 = inlined_call_operand.vmem [shape: f32[8,256], index: 0, kind: input, shape index: {}]   ;;  %s624_s3 = inlined_call_operand.vmem [shape: bf16[128,256], index: 3, kind: input, shape index: {}]   ;;  %s625_s2 = inlined_call_operand.vmem [shape: f32[1,128], index: 2, kind: input, shape index: {}]   ;;  %s626_s4 = inlined_call_operand.vmem [shape: f32[1,256], index: 4, kind: input, shape index: {}]   ;;  %s627_s5 = inlined_call_operand.vmem [shape: f32[8,256], index: 5, kind: output, shape index: {}]  }
   0x1   :  { %v429_v0 = vld [vmem:[%s622_s1 + $0x40] sm:$0xff]   ;;  %v431_v2 = vld [vmem:[%s622_s1 + $0x48] sm:$0xff]   ;;  %v433_v4 = vld [vmem:[%s622_s1 + $0x50] sm:$0xff]   ;;  %344 = vmatprep.mubr.bf16.mxu1 %v477_v38 }
   0x2   :  { %v430_v1 = vld [vmem:[%s622_s1] sm:$0xff]   ;;  %406 = vmatprep.subr.bf16.mxu0 %v429_v0  ;;  %v432_v3 = vld [vmem:[%s622_s1 + $0x8] sm:$0xff]   ;;  %v434_v5 = vld [vmem:[%s622_s1 + $0x10] sm:$0xff]   ;;  %v223_v49 = vshrl.u32 %v222_v48, 7 }
   0x3   :  { %407 = vmatpush3.bf16.msra.mxu0 %v430_v1  ;;  %v435_v6 = vld [vmem:[%s622_s1 + $0x58] sm:$0xff]   ;;  %v437_v8 = vld [vmem:[%s622_s1 + $0x60] sm:$0xff]   ;;  %v439_v10 = vld [vmem:[%s622_s1 + $0x68] sm:$0xff]  }
   0x4   :  { %408 = vmatprep.subr.bf16.mxu0 %v431_v2  ;;  %v436_v7 = vld [vmem:[%s622_s1 + $0x18] sm:$0xff]   ;;  %v438_v9 = vld [vmem:[%s622_s1 + $0x20] sm:$0xff]   ;;  %v22_v11 = vld [vmem:[%s623_s0 + $0x8] sm:$0xff]  ;;  %v224_v50 = vsub.s32 0, %v223_v49  ;;  %v228_v52 = vsub.s32 1, %v223_v49 }
   0x5   :  { %v24_v12 = vmul.f32 0.25, %v22_v11  ;;  %v445_v13 = vld [vmem:[%s624_s3 + $0x4] ss:$8 sps:$4 sm:$0xff]   ;;  %v447_v14 = vld [vmem:[%s624_s3] ss:$8 sps:$4 sm:$0xff]   ;;  %v441_v18 = vld [vmem:[%s622_s1 + $0x70] sm:$0xff]  }
   0x6   :  { %v448_v15 = vld [vmem:[%s624_s3 + $0x14] ss:$8 sps:$4 sm:$0xff]   ;;  %v440_v16 = vld [vmem:[%s622_s1 + $0x28] sm:$0xff]   ;;  %312 = vmatprep.subr.bf16.mxu1 %v445_v13  ;;  %v450_v19 = vld [vmem:[%s624_s3 + $0x10] ss:$8 sps:$4 sm:$0xff]  }
   0x7   :  { %409 = vmatpush3.bf16.msra.mxu0 %v432_v3  ;;  %v26_v17 = vpack.c.bf16 %v24_v12, %v24_v12  ;;  %313 = vmatpush1.bf16.msra.mxu1 %v447_v14  ;;  %v442_v20 = vld [vmem:[%s622_s1 + $0x30] sm:$0xff]   ;;  %v451_v21 = vld [vmem:[%s624_s3 + $0x24] ss:$8 sps:$4 sm:$0xff]   ;;  %v443_v22 = vld [vmem:[%s622_s1 + $0x78] sm:$0xff]  }
   0x8   :  { %410 = vmatprep.subr.bf16.mxu0 %v433_v4  ;;  %314 = vmatprep.subr.bf16.mxu1 %v448_v15  ;;  %v21_v23 = vld [vmem:[%s623_s0] sm:$0xff]  ;;  %v454_v25 = vld [vmem:[%s624_s3 + $0x34] ss:$8 sps:$4 sm:$0xff]   ;;  %v456_v28 = vld [vmem:[%s624_s3 + $0x30] ss:$8 sps:$4 sm:$0xff]  }
   0x9   :  { %194 = vmatprep.mubr.bf16.mxu0 %v26_v17  ;;  %v453_v24 = vld [vmem:[%s624_s3 + $0x20] ss:$8 sps:$4 sm:$0xff]   ;;  %v23_v26 = vmul.f32 0.25, %v21_v23  ;;  %v444_v27 = vld [vmem:[%s622_s1 + $0x38] sm:$0xff]   ;;  %v457_v29 = vld [vmem:[%s624_s3 + $0x44] ss:$8 sps:$4 sm:$0xff]  }
   0xa   :  { %v459_v31 = vld [vmem:[%s624_s3 + $0x40] ss:$8 sps:$4 sm:$0xff]   ;;  %v460_v32 = vld [vmem:[%s624_s3 + $0x54] ss:$8 sps:$4 sm:$0xff]   ;;  %v462_v33 = vld [vmem:[%s624_s3 + $0x50] ss:$8 sps:$4 sm:$0xff]  }
   0xb   :  { %411 = vmatpush3.bf16.msra.mxu0 %v434_v5  ;;  %315 = vmatpush1.bf16.msra.mxu1 %v450_v19  ;;  %v25_v30 = vpack.c.bf16 %v23_v26, %v23_v26  ;;  %v463_v34 = vld [vmem:[%s624_s3 + $0x64] ss:$8 sps:$4 sm:$0xff]   ;;  %v465_v35 = vld [vmem:[%s624_s3 + $0x60] ss:$8 sps:$4 sm:$0xff]   ;;  %v466_v36 = vld [vmem:[%s624_s3 + $0x74] ss:$8 sps:$4 sm:$0xff]  }
   0xc   :  { %412 = vmatprep.subr.bf16.mxu0 %v435_v6  ;;  %316 = vmatprep.subr.bf16.mxu1 %v451_v21  ;;  %v468_v37 = vld [vmem:[%s624_s3 + $0x70] ss:$8 sps:$4 sm:$0xff]   ;;  %v371_v40 = vld [vmem:[%s625_s2] ss:$0 sm:$0xff] }
   0xd   :  { %v220_v51 = vld [vmem:[%s626_s4] sm:$0x3] }
   0xe   :  { %v225_v53 = vrot.slane %v220_v51, %v224_v50  ;;  %v229_v54 = vrot.slane %v220_v51, %v228_v52 }
   0xf   :  { %413 = vmatpush3.bf16.msra.mxu0 %v436_v7  ;;  %317 = vmatpush1.bf16.msra.mxu1 %v453_v24 }
  0x10   :  { %414 = vmatprep.subr.bf16.mxu0 %v437_v8  ;;  %318 = vmatprep.subr.bf16.mxu1 %v454_v25 }
  0x13   :  { %415 = vmatpush3.bf16.msra.mxu0 %v438_v9  ;;  %319 = vmatpush1.bf16.msra.mxu1 %v456_v28 }
  0x14   :  { %416 = vmatprep.subr.bf16.mxu0 %v439_v10  ;;  %320 = vmatprep.subr.bf16.mxu1 %v457_v29 }
  0x17   :  { %417 = vmatpush3.bf16.msra.mxu0 %v440_v16  ;;  %321 = vmatpush1.bf16.msra.mxu1 %v459_v31 }
  0x18   :  { %418 = vmatprep.subr.bf16.mxu0 %v441_v18  ;;  %322 = vmatprep.subr.bf16.mxu1 %v460_v32 }
  0x1b   :  { %419 = vmatpush3.bf16.msra.mxu0 %v442_v20  ;;  %323 = vmatpush1.bf16.msra.mxu1 %v462_v33 }
  0x1c   :  { %420 = vmatprep.subr.bf16.mxu0 %v443_v22  ;;  %324 = vmatprep.subr.bf16.mxu1 %v463_v34 }
  0x1f   :  { %421 = vmatpush3.bf16.msra.mxu0 %v444_v27  ;;  %325 = vmatpush1.bf16.msra.mxu1 %v465_v35 }
  0x20   :  { %326 = vmatprep.subr.bf16.mxu1 %v466_v36 }
  0x22   :  { %195 = vmatmul.mubr.bf16.vlgmr.msra.gmra.mrb[0].mxu0 %v25_v30 }
  0x23   :  { %327 = vmatpush1.bf16.msra.mxu1 %v468_v37 }
  0xf5   :  { %v422_v39 = vpop.f32.mrb[0].mxu0 }
  0xf6   :  { %v423_v41 = vpop.f32.mrb[1].mxu0 }
  0xf7   :  { %v424_v42 = vadd.f32 %v423_v41, %v422_v39  ;;  %v425_v43 = vpop.f32.mrb[2].mxu0 }
  0xf8   :  { %v426_v44 = vpop.f32.mrb[3].mxu0 }
  0xf9   :  { %v197_v45 = vadd.f32 %v424_v42, %v371_v40 }
  0xfb   :  { %v202_v46 = vmax.f32 %v197_v45, 0.0 }
  0xfd   :  { %v203_v47 = vpack.c.bf16 %v202_v46, %v202_v46 }
  0xff   :  { %345 = vmatmul.mubr.bf16.vlgmr.msra.gmra.mrb[0].mxu1 %v203_v47 }
 0x1d2   :  { %v346_v55 = vpop.f32.mrb[0].mxu1 }
 0x1d3   :  { %v347_v56 = vadd.f32 %v346_v55, %v225_v53  ;;  %v348_v57 = vpop.f32.mrb[1].mxu1 }
 0x1d4   :  { %v349_v58 = vadd.f32 %v348_v57, %v229_v54  ;;  %v350_v59 = vpop.f32.mrb[2].mxu1 }
 0x1d5   :  { %v404_v60 = vmul.f32 -1.442695, %v347_v56  ;;  %v351_v61 = vpop.f32.mrb[3].mxu1 }
 0x1d6   :  { %v405_v62 = vmul.f32 -1.442695, %v349_v58 }
 0x1d7   :  { %469 = vpow2.f32 %v404_v60 }
 0x1d8   :  { %471 = vpow2.f32 %v405_v62 }
 0x1e1   :  { %v470_v63 = vpop.eup %469 }
 0x1e2   :  { %v472_v0 = vpop.eup %471  ;;  %v359_v1 = vadd.f32 1.0, %v470_v63 }
 0x1e3   :  { %v360_v2 = vadd.f32 1.0, %v472_v0 }
 0x1e4   :  { %473 = vrcp.f32 %v359_v1 }
 0x1e5   :  { %475 = vrcp.f32 %v360_v2 }
 0x1ee   :  { %v474_v3 = vpop.eup %473 }
 0x1ef   :  { %v476_v4 = vpop.eup %475  ;;  %365 = vst [vmem:[%s627_s5] sm:$0xff] %v474_v3 }
 0x1f0   :  { %366 = vst [vmem:[%s627_s5 + $0x8] sm:$0xff] %v476_v4 }

// kernel: _lambda_.40
= control target key start
LH: loop header
LB: loop body
LE: loop exit
PB: predicated region body
PF: predicated region fallthrough
CT: control target
= control target key end

     0   :  { %v423_v1 = vmov 0   ;;  %v50_v34 = vlaneseq  ;;  %s552_s1 = inlined_call_operand.vmem [shape: bf16[128,512], index: 1, kind: input, shape index: {}]   ;;  %s553_s0 = inlined_call_operand.vmem [shape: bf16[8,128], index: 0, kind: input, shape index: {}]   ;;  %s554_s2 = inlined_call_operand.vmem [shape: f32[1,512], index: 2, kind: input, shape index: {}]   ;;  %s555_s3 = inlined_call_operand.vmem [shape: bf16[8,512], index: 3, kind: output, shape index: {}]  }
   0x1   :  { %v375_v0 = vld [vmem:[%s552_s1 + $0x4] ss:$16 sps:$4 sm:$0xff]   ;;  %262 = vmatprep.mubr.bf16.mxu0 %v423_v1  ;;  %303 = vmatprep.mubr.bf16.mxu1 %v423_v1  ;;  %v377_v2 = vld [vmem:[%s552_s1 + $0xc] ss:$16 sps:$4 sm:$0xff]   ;;  %v379_v3 = vld [vmem:[%s552_s1] ss:$16 sps:$4 sm:$0xff]  }
   0x2   :  { %230 = vmatprep.subr.bf16.mxu0 %v375_v0  ;;  %v380_v4 = vld [vmem:[%s552_s1 + $0x8] ss:$16 sps:$4 sm:$0xff]   ;;  %271 = vmatprep.subr.bf16.mxu1 %v377_v2  ;;  %v381_v5 = vld [vmem:[%s552_s1 + $0x24] ss:$16 sps:$4 sm:$0xff]   ;;  %v383_v6 = vld [vmem:[%s552_s1 + $0x2c] ss:$16 sps:$4 sm:$0xff]  }
   0x3   :  { %231 = vmatpush1.bf16.msra.mxu0 %v379_v3  ;;  %272 = vmatpush1.bf16.msra.mxu1 %v380_v4  ;;  %v385_v7 = vld [vmem:[%s552_s1 + $0x20] ss:$16 sps:$4 sm:$0xff]   ;;  %v386_v8 = vld [vmem:[%s552_s1 + $0x28] ss:$16 sps:$4 sm:$0xff]   ;;  %v387_v9 = vld [vmem:[%s552_s1 + $0x44] ss:$16 sps:$4 sm:$0xff]  }
   0x4   :  { %232 = vmatprep.subr.bf16.mxu0 %v381_v5  ;;  %273 = vmatprep.subr.bf16.mxu1 %v383_v6  ;;  %v389_v10 = vld [vmem:[%s552_s1 + $0x4c] ss:$16 sps:$4 sm:$0xff]   ;;  %v391_v11 = vld [vmem:[%s552_s1 + $0x40] ss:$16 sps:$4 sm:$0xff]   ;;  %v392_v12 = vld [vmem:[%s552_s1 + $0x48] ss:$16 sps:$4 sm:$0xff]  }
   0x5   :  { %v393_v13 = vld [vmem:[%s552_s1 + $0x64] ss:$16 sps:$4 sm:$0xff]   ;;  %v395_v14 = vld [vmem:[%s552_s1 + $0x6c] ss:$16 sps:$4 sm:$0xff]   ;;  %v397_v15 = vld [vmem:[%s552_s1 + $0x60] ss:$16 sps:$4 sm:$0xff]  }
   0x6   :  { %v398_v16 = vld [vmem:[%s552_s1 + $0x68] ss:$16 sps:$4 sm:$0xff]   ;;  %v399_v17 = vld [vmem:[%s552_s1 + $0x84] ss:$16 sps:$4 sm:$0xff]   ;;  %v401_v18 = vld [vmem:[%s552_s1 + $0x8c] ss:$16 sps:$4 sm:$0xff]  }
   0x7   :  { %233 = vmatpush1.bf16.msra.mxu0 %v385_v7  ;;  %274 = vmatpush1.bf16.msra.mxu1 %v386_v8  ;;  %v403_v19 = vld [vmem:[%s552_s1 + $0x80] ss:$16 sps:$4 sm:$0xff]   ;;  %v404_v20 = vld [vmem:[%s552_s1 + $0x88] ss:$16 sps:$4 sm:$0xff]   ;;  %v405_v21 = vld [vmem:[%s552_s1 + $0xa4] ss:$16 sps:$4 sm:$0xff]  }
   0x8   :  { %234 = vmatprep.subr.bf16.mxu0 %v387_v9  ;;  %275 = vmatprep.subr.bf16.mxu1 %v389_v10  ;;  %v407_v22 = vld [vmem:[%s552_s1 + $0xac] ss:$16 sps:$4 sm:$0xff]   ;;  %v409_v23 = vld [vmem:[%s552_s1 + $0xa0] ss:$16 sps:$4 sm:$0xff]   ;;  %v410_v24 = vld [vmem:[%s552_s1 + $0xa8] ss:$16 sps:$4 sm:$0xff]  }
   0x9   :  { %v411_v25 = vld [vmem:[%s552_s1 + $0xc4] ss:$16 sps:$4 sm:$0xff]   ;;  %v413_v26 = vld [vmem:[%s552_s1 + $0xcc] ss:$16 sps:$4 sm:$0xff]   ;;  %v415_v27 = vld [vmem:[%s552_s1 + $0xc0] ss:$16 sps:$4 sm:$0xff]  }
   0xa   :  { %v416_v28 = vld [vmem:[%s552_s1 + $0xc8] ss:$16 sps:$4 sm:$0xff]   ;;  %v417_v29 = vld [vmem:[%s552_s1 + $0xe4] ss:$16 sps:$4 sm:$0xff]   ;;  %v419_v30 = vld [vmem:[%s552_s1 + $0xec] ss:$16 sps:$4 sm:$0xff]  }
   0xb   :  { %235 = vmatpush1.bf16.msra.mxu0 %v391_v11  ;;  %276 = vmatpush1.bf16.msra.mxu1 %v392_v12  ;;  %v421_v31 = vld [vmem:[%s552_s1 + $0xe0] ss:$16 sps:$4 sm:$0xff]   ;;  %v422_v32 = vld [vmem:[%s552_s1 + $0xe8] ss:$16 sps:$4 sm:$0xff]   ;;  %v51_v35 = vshrl.u32 %v50_v34, 7 }
   0xc   :  { %236 = vmatprep.subr.bf16.mxu0 %v393_v13  ;;  %277 = vmatprep.subr.bf16.mxu1 %v395_v14  ;;  %v15_v33 = vld [vmem:[%s553_s0] sm:$0xf] }
   0xd   :  { %v52_v36 = vsub.s32 0, %v51_v35  ;;  %v60_v37 = vsub.s32 2, %v51_v35  ;;  %v48_v38 = vld [vmem:[%s554_s2] sm:$0xf]  ;;  %v56_v39 = vsub.s32 1, %v51_v35  ;;  %v64_v40 = vsub.s32 3, %v51_v35 }
   0xf   :  { %237 = vmatpush1.bf16.msra.mxu0 %v397_v15  ;;  %278 = vmatpush1.bf16.msra.mxu1 %v398_v16  ;;  %v53_v41 = vrot.slane %v48_v38, %v52_v36  ;;  %v61_v42 = vrot.slane %v48_v38, %v60_v37  ;;  %v57_v43 = vrot.slane %v48_v38, %v56_v39 }
  0x10   :  { %238 = vmatprep.subr.bf16.mxu0 %v399_v17  ;;  %279 = vmatprep.subr.bf16.mxu1 %v401_v18  ;;  %v65_v44 = vrot.slane %v48_v38, %v64_v40 }
  0x13   :  { %239 = vmatpush1.bf16.msra.mxu0 %v403_v19  ;;  %280 = vmatpush1.bf16.msra.mxu1 %v404_v20 }
  0x14   :  { %240 = vmatprep.subr.bf16.mxu0 %v405_v21  ;;  %281 = vmatprep.subr.bf16.mxu1 %v407_v22 }
  0x17   :  { %241 = vmatpush1.bf16.msra.mxu0 %v409_v23  ;;  %282 = vmatpush1.bf16.msra.mxu1 %v410_v24 }
  0x18   :  { %242 = vmatprep.subr.bf16.mxu0 %v411_v25  ;;  %283 = vmatprep.subr.bf16.mxu1 %v413_v26 }
  0x1b   :  { %243 = vmatpush1.bf16.msra.mxu0 %v415_v27  ;;  %284 = vmatpush1.bf16.msra.mxu1 %v416_v28 }
  0x1c   :  { %244 = vmatprep.subr.bf16.mxu0 %v417_v29  ;;  %285 = vmatprep.subr.bf16.mxu1 %v419_v30 }
  0x1f   :  { %245 = vmatpush1.bf16.msra.mxu0 %v421_v31  ;;  %286 = vmatpush1.bf16.msra.mxu1 %v422_v32 }
  0x22   :  { %263 = vmatmul.mubr.bf16.vlgmr.msra.gmra.mrb[0].mxu0 %v15_v33  ;;  %304 = vmatmul.mubr.bf16.vlgmr.msra.gmra.mrb[0].mxu1 %v15_v33 }
  0xf5   :  { %v264_v45 = vpop.f32.mrb[0].mxu0  ;;  %v305_v46 = vpop.f32.mrb[0].mxu1 }
  0xf6   :  { %v265_v47 = vadd.f32 %v264_v45, %v53_v41  ;;  %v306_v48 = vadd.f32 %v305_v46, %v61_v42  ;;  %v266_v49 = vpop.f32.mrb[1].mxu0  ;;  %v307_v50 = vpop.f32.mrb[1].mxu1 }
  0xf7   :  { %v267_v51 = vadd.f32 %v266_v49, %v57_v43  ;;  %v308_v52 = vadd.f32 %v307_v50, %v65_v44  ;;  %v268_v53 = vpop.f32.mrb[2].mxu0  ;;  %v309_v54 = vpop.f32.mrb[2].mxu1 }
  0xf8   :  { %v312_v55 = vmax.f32 %v265_v47, 0.0  ;;  %v314_v56 = vmax.f32 %v306_v48, 0.0  ;;  %v269_v57 = vpop.f32.mrb[3].mxu0  ;;  %v310_v58 = vpop.f32.mrb[3].mxu1 }
  0xf9   :  { %v313_v59 = vmax.f32 %v267_v51, 0.0  ;;  %v315_v60 = vmax.f32 %v308_v52, 0.0 }
  0xfb   :  { %v372_v61 = vpack.c.bf16 %v313_v59, %v312_v55  ;;  %v373_v62 = vpack.c.bf16 %v315_v60, %v314_v56 }
  0xfd   :  { %332 = vst [vmem:[%s555_s3] sm:$0xff] %v372_v61  ;;  %333 = vst [vmem:[%s555_s3 + $0x8] sm:$0xff] %v373_v62 }

// kernel: _lambda_.41
= control target key start
LH: loop header
LB: loop body
LE: loop exit
PB: predicated region body
PF: predicated region fallthrough
CT: control target
= control target key end

     0   :  { %s942_s15 = smov 0   ;;  %s944_s16 = smov 0   ;;  %s1118_s0 = inlined_call_operand.vmem [shape: bf16[2,4,4,512], index: 0, kind: input, shape index: {}]   ;;  %s1119_s1 = inlined_call_operand.vmem [shape: f32[9,512], index: 1, kind: input, shape index: {}]   ;;  %s1120_s2 = inlined_call_operand.vmem [shape: f32[1,512], index: 2, kind: input, shape index: {}]   ;;  %s1121_s3 = inlined_call_operand.vmem [shape: bf16[2,2,2,512], index: 3, kind: output, shape index: {0}]   ;;  %s1122_s4 = inlined_call_operand.vmem [shape: f32[2,1,512], index: 4, kind: output, shape index: {1}]  }
   0x1   :  { %s946_s17 = smov 0   ;;  %s948_s18 = smov 0  }
   0x2   :  { %s950_s19 = smov 0   ;;  %s952_s20 = smov 0  }
   0x3   :  { %s954_s21 = smov 0   ;;  %s956_s22 = smov 0  }
   0x4   :  { %s958_s23 = smov 0  }
   0x5 LB: > { %s731_s24 = sadd.s32 4294967295, %s914_s23   ;;  %s30_s25 = sadd.s32 1, %s906_s21  ;;  %s914_s23 = sphi %s958_s23, %s15_s23   ;;  %s910_s22 = sphi %s956_s22, %s1133_s22   ;;  %s906_s21 = sphi %s954_s21, %s1132_s21   ;;  %s902_s20 = sphi %s952_s20, %s1131_s20   ;;  %s898_s19 = sphi %s950_s19, %s1130_s19   ;;  %s894_s18 = sphi %s948_s18, %s1129_s18   ;;  %s890_s17 = sphi %s946_s17, %s1128_s17   ;;  %s886_s16 = sphi %s944_s16, %s1127_s16   ;;  %s882_s15 = sphi %s942_s15, %s1126_s15  }
   0x6   : > { %p32_p0 = scmp.ge.s32.totalorder %s30_s25, 4  ;;  %s34_s26 = sadd.s32 1, %s910_s22 }
   0x7   : > { %s43_s27 = sadd.s32 1, %s894_s18  ;;  %p50_p1 = scmp.ne.s32.totalorder %s894_s18, %s890_s17 }
   0x8   : > { %s1135_s25 = smov (%p32_p0, %s30_s25), 0  ;;  %s1137_s26 = smov (!%p32_p0, %s34_s26), %s910_s22 }
   0x9   : > { %s39_s28 = ssub.s32 %s906_s21, %s1135_s25  ;;  %p51_p2 = scmp.eq.s32.totalorder %s914_s23, 0 }
   0xa   : > { %p36_p3 = scmp.ge.s32.totalorder %s1137_s26, 2  ;;  %p67_p4 = scmp.eq.s32.totalorder %s39_s28, 0 }
   0xb   : > { %p1002_p5 = por %p51_p2, %p50_p1  ;;  %s69_s30 = sadd.s32 1, %s886_s16 }
   0xc   : > { %s1139_s26 = smov (%p36_p3, %s1137_s26), 0  ;;  %p76_p6 = scmp.ne.s32.totalorder %s886_s16, %s882_s15 }
   0xd   : > { %s1010_s5 = scalar_select %p67_p4, %s886_s16, %s69_s30  }
   0xe   : > { %s38_s6 = ssub.s32 %s910_s22, %s1139_s26  ;;  %p136_p7 = scmp.eq.s32.totalorder %s731_s24, 7 }
   0xf   : > { %s40_s7 = sor.u32 %s39_s28, %s38_s6  ;;  %p1016_p9 = por %p76_p6, %p51_p2 }
  0x10   : > { %p41_p8 = scmp.eq.s32.totalorder %s40_s7, 0  ;;  %p1023_p10 = por %p136_p7, %p50_p1 }
  0x11   : > { %p734_p11 = scmp.ge.s32.totalorder %s914_s23, 8 }
  0x12   : > { %s1028_s10 = scalar_select %p41_p8, %s894_s18, %s43_s27  }
  0x13   : > { %186 = sbr.rel (%p734_p11) target bundleno = 41 (0x29), region = 16 }
  0x1a   : > { %189 = sbr.rel (!%p1002_p5) target bundleno = 34 (0x22), region = 20  ;;  %s191_s11 = sand.u32 (%p1002_p5), 1, %s894_s18  }
  0x1b   : > { %s736_s12 = sshll.u32 (%p1002_p5), %s910_s22, 4  ;;  %s735_s13 = sshll.u32 (%p1002_p5), %s191_s11, 3 }
  0x1c   : > { %s195_s14 = sadd.s32 (%p1002_p5), %s906_s21, %s736_s12  ;;  %s193_s27 = scalar_lea.vmem (%p1002_p5), [#allocation2], %s735_s13 }
  0x1d   : > { %s737_s24 = sshll.u32 (%p1002_p5), %s195_s14, 1 }
  0x1e   : > { %s197_s6 = scalar_lea.vmem (%p1002_p5), %s1118_s0, %s737_s24 }
  0x1f   : > { %v213_v0 = vld [vmem:[%s197_s6] sm:$0x3] (%p1002_p5)  ;;  %v215_v1 = vld [vmem:[%s197_s6 + $0x8] sm:$0x3] (%p1002_p5)  ;;  %v217_v2 = vld [vmem:[%s197_s6 + $0x10] sm:$0x3] (%p1002_p5) }
  0x20   : > { %214 = vst [vmem:[%s193_s27] sm:$0x3] (%p1002_p5), %v213_v0  ;;  %216 = vst [vmem:[%s193_s27 + $0x2] sm:$0x3] (%p1002_p5), %v215_v1  ;;  %v219_v3 = vld [vmem:[%s197_s6 + $0x18] sm:$0x3] (%p1002_p5) }
  0x21   : > { %218 = vst [vmem:[%s193_s27 + $0x4] sm:$0x3] %v217_v2  ;;  %220 = vst [vmem:[%s193_s27 + $0x6] sm:$0x3] %v219_v3 }
  0x22 PF: > { %251 = sbr.rel (!%p1016_p9) target bundleno = 41 (0x29), region = 61  ;;  %s253_s29 = sand.u32 (%p1016_p9), 1, %s886_s16  }
  0x23   : > { %s739_s7 = sshll.u32 (%p1016_p9), %s906_s21, 3  ;;  %s738_s11 = sshll.u32 (%p1016_p9), %s253_s29, 4 }
  0x24   : > { %s257_s24 = scalar_lea.vmem (%p1016_p9), %s1119_s1, %s739_s7  ;;  %s255_s13 = scalar_lea.vmem (%p1016_p9), [#allocation3], %s738_s11 }
  0x25   : > { %v287_v4 = vld [vmem:[%s257_s24] sm:$0xff] (%p1016_p9) }
  0x26   : > { %v289_v5 = vld [vmem:[%s257_s24 + $0x20] sm:$0xff] (%p1016_p9)  ;;  %288 = vst [vmem:[%s255_s13] sm:$0xff] (%p1016_p9), %v287_v4 }
  0x27   : > { %290 = vst [vmem:[%s255_s13 + $0x8] sm:$0xff] (%p1016_p9), %v289_v5 }
  0x29 PF: > { %p740_p12 = scmp.ge.s32.totalorder %s914_s23, 1  ;;  %p301_p13 = scmp.lt.s32.totalorder %s914_s23, 9 }
  0x2b   : > { %p302_p0 = pnand %p740_p12, %p301_p13 }
  0x2c   : > { %p353_p1 = scmp.lt.s32.totalorder (!%p302_p0), %s898_s19, 3  ;;  %p357_p2 = scmp.lt.s32.totalorder (!%p302_p0), %s902_s20, 1  ;;  %v916_v11 = vmov (!%p302_p0), 0.0   ;;  %vm525_vm0 = vcmask (!%p302_p0), 1041408  }
  0x2d   : > { %305 = sbr.rel (%p302_p0) target bundleno = 93 (0x5d), region = 103  ;;  %s308_s8 = sand.u32 (!%p302_p0), 1, %s890_s17  }
  0x2e   : > { %s315_s28 = sand.u32 (!%p302_p0), 1, %s882_s15   ;;  %s741_s27 = sshll.u32 (!%p302_p0), %s308_s8, 3 }
  0x2f   : > { %s742_s29 = sshll.u32 (!%p302_p0), %s315_s28, 4  ;;  %s310_s12 = scalar_lea.vmem (!%p302_p0), [#allocation2], %s741_s27 }
  0x30   : > { %v367_v6 = vld [vmem:[%s310_s12] sm:$0x3] (!%p302_p0)  ;;  %v368_v7 = vld [vmem:[%s310_s12 + $0x2] sm:$0x3] (!%p302_p0)  ;;  %v369_v8 = vld [vmem:[%s310_s12 + $0x4] sm:$0x3] (!%p302_p0) }
  0x31   : > { %v371_v9 = vunpack.c.l.bf16 (!%p302_p0), %v367_v6  ;;  %v372_v10 = vunpack.c.l.bf16 (!%p302_p0), %v368_v7  ;;  %s1065_s15 = scalar_lea.vmem (!%p302_p0), [#allocation3], %s742_s29  ;;  %v370_v20 = vld [vmem:[%s310_s12 + $0x6] sm:$0x3] (!%p302_p0)  ;;  %v373_v21 = vunpack.c.l.bf16 (!%p302_p0), %v369_v8  ;;  %s743_s29 = sshll.u32 (!%p302_p0), %s308_s8, 1 }
  0x32   : > { %v745_v12 = vld [vmem:[%s1065_s15] ss:$0 sm:$0xff] (!%p302_p0)  ;;  %v746_v13 = vld [vmem:[%s1065_s15 + $0x1] ss:$0 sm:$0xff] (!%p302_p0)  ;;  %v749_v18 = vld [vmem:[%s1065_s15 + $0x2] ss:$0 sm:$0xff] (!%p302_p0)  ;;  %v374_v32 = vunpack.c.l.bf16 (!%p302_p0), %v370_v20 }
  0x33   : > { %v380_v14 = vmul.f32 (!%p302_p0), %v745_v12, %v371_v9  ;;  %v381_v15 = vmul.f32 (!%p302_p0), %v745_v12, %v372_v10  ;;  %v389_v16 = vmul.f32 (!%p302_p0), %v746_v13, %v371_v9  ;;  %v390_v17 = vmul.f32 (!%p302_p0), %v746_v13, %v372_v10  ;;  %v753_v19 = vld [vmem:[%s1065_s15 + $0x4] ss:$0 sm:$0xff] (!%p302_p0)  ;;  %v752_v24 = vld [vmem:[%s1065_s15 + $0x3] ss:$0 sm:$0xff] (!%p302_p0)  ;;  %v756_v25 = vld [vmem:[%s1065_s15 + $0x5] ss:$0 sm:$0xff] (!%p302_p0) }
  0x34   : > { %s1053_s30 = scalar_select %p353_p1, %s898_s19, 3  ;;  %v406_v22 = vmul.f32 %v749_v18, %v371_v9  ;;  %v407_v23 = vmul.f32 %v749_v18, %v372_v10  ;;  %v432_v28 = vmul.f32 %v753_v19, %v372_v10  ;;  %v449_v31 = vmul.f32 %v756_v25, %v372_v10  ;;  %v760_v36 = vld [vmem:[%s1065_s15 + $0x7] ss:$0 sm:$0xff]  ;;  %v759_v43 = vld [vmem:[%s1065_s15 + $0x6] ss:$0 sm:$0xff] }
  0x35   : > { %s358_s6 = scalar_select %p357_p2, %s902_s20, 1  ;;  %v747_v26 = vrot.slane %v389_v16, 9  ;;  %v748_v27 = vrot.slane %v390_v17, 9  ;;  %v423_v35 = vmul.f32 %v752_v24, %v372_v10  ;;  %v424_v37 = vmul.f32 %v752_v24, %v373_v21  ;;  %v763_v46 = vld [vmem:[%s1065_s15 + $0x8] ss:$0 sm:$0xff] }
  0x36   : > { %v750_v29 = vrot.slane %v406_v22, 10  ;;  %v751_v30 = vrot.slane %v407_v23, 10  ;;  %v433_v38 = vmul.f32 %v753_v19, %v373_v21  ;;  %v450_v39 = vmul.f32 %v756_v25, %v373_v21  ;;  %s355_s27 = scalar_lea.vmem %s1120_s2, %s1053_s30  ;;  %s768_s17 = sshll.u32 (%p1023_p10), %s902_s20, 3 }
  0x37   : > { %s744_s7 = sshll.u32 %s358_s6, 2  ;;  %v399_v33 = vadd.f32 %v747_v26, %v380_v14  ;;  %v400_v34 = vadd.f32 %v748_v27, %v381_v15  ;;  %v754_v42 = vrot.slane %v432_v28, 9  ;;  %v757_v44 = vrot.slane %v449_v31, 10  ;;  %v766_v4 = vld [vmem:[%s355_s27] ss:$0 sm:$0xff]  ;;  %s555_s8 = sadd.s32 (%p1023_p10), %s898_s19, %s768_s17 }
  0x38   : > { %s362_s11 = sadd.s32 %s744_s7, %s1053_s30  ;;  %v475_v45 = vmul.f32 %v760_v36, %v373_v21  ;;  %v755_v47 = vrot.slane %v433_v38, 9  ;;  %v758_v50 = vrot.slane %v450_v39, 10  ;;  %v476_v51 = vmul.f32 %v760_v36, %v374_v32  ;;  %s343_s30 = scalar_lea.vmem [#allocation4], %s743_s29 }
  0x39   : > { %s1062_s13 = scalar_lea.vmem %s1122_s4, %s362_s11  ;;  %v416_v40 = vadd.f32 %v750_v29, %v399_v33  ;;  %v417_v41 = vadd.f32 %v751_v30, %v400_v34  ;;  %v466_v52 = vmul.f32 %v759_v43, %v373_v21  ;;  %v467_v53 = vmul.f32 %v759_v43, %v374_v32  ;;  %s556_s12 = scalar_lea.vmem (%p1023_p10), %s1121_s3, %s555_s8 }
  0x3a   : > { %523 = vst [vmem:[%s1062_s13] sm:$0x1] %v916_v11  ;;  %v492_v55 = vmul.f32 %v763_v46, %v373_v21  ;;  %v493_v57 = vmul.f32 %v763_v46, %v374_v32  ;;  %v761_v59 = vrot.slane %v475_v45, 9  ;;  %v762_v61 = vrot.slane %v476_v51, 9 }
  0x3b   : > { %v425_v48 = vadd.f32 %v423_v35, %v416_v40  ;;  %v426_v49 = vadd.f32 %v424_v37, %v417_v41 }
  0x3c   : > { %v764_v63 = vrot.slane %v492_v55, 10  ;;  %v765_v1 = vrot.slane %v493_v57, 10 }
  0x3d   : > { %v442_v54 = vadd.f32 %v754_v42, %v425_v48  ;;  %v443_v56 = vadd.f32 %v755_v47, %v426_v49 }
  0x3f   : > { %v459_v58 = vadd.f32 %v757_v44, %v442_v54  ;;  %v460_v60 = vadd.f32 %v758_v50, %v443_v56 }
  0x41   : > { %v468_v62 = vadd.f32 %v466_v52, %v459_v58  ;;  %v469_v0 = vadd.f32 %v467_v53, %v460_v60  ;;  %v524_v21 = vld [vmem:[%s1062_s13] sm:$0x1] }
  0x43   : > { %v485_v2 = vadd.f32 %v761_v59, %v468_v62  ;;  %v486_v3 = vadd.f32 %v762_v61, %v469_v0 }
  0x45   : > { %v502_v5 = vadd.f32 %v764_v63, %v485_v2  ;;  %v503_v6 = vadd.f32 %v765_v1, %v486_v3 }
  0x47   : > { %v511_v7 = vadd.f32 %v766_v4, %v502_v5  ;;  %v512_v8 = vadd.f32 %v766_v4, %v503_v6 }
  0x49   : > { %v513_v9 = vmax.f32 %v511_v7, 0.0  ;;  %v514_v10 = vmax.f32 %v512_v8, 0.0 }
  0x4b   : > { %v515_v11 = vpack.c.bf16 %v513_v9, %v513_v9  ;;  %v526_v12 = vsel %vm525_vm0, %v513_v9, 0.0  ;;  %v516_v13 = vpack.c.bf16 %v514_v10, %v514_v10  ;;  %v527_v14 = vsel %vm525_vm0, %v514_v10, 0.0 }
  0x4c   : > { %v528_v15 = vadd.f32 %v527_v14, %v526_v12 }
  0x4d   : > { %517 = vst [vmem:[%s343_s30] sm:$0x1] %v515_v11  ;;  %518 = vst [vmem:[%s343_s30 + $0x1] sm:$0x1] %v516_v13 }
  0x4e   : > { %v529_v16 = vrot.slane %v528_v15, 4 }
  0x50   : > { %v530_v17 = vadd.f32 %v529_v16, %v528_v15 }
  0x52   : > { %v531_v18 = vrot.slane %v530_v17, 2 }
  0x54   : > { %v532_v19 = vadd.f32 %v531_v18, %v530_v17  ;;  %v572_v24 = vld [vmem:[%s343_s30] sm:$0x1] (%p1023_p10)  ;;  %v574_v25 = vld [vmem:[%s343_s30 + $0x1] sm:$0x1] (%p1023_p10) }
  0x55   : > { %573 = vst [vmem:[%s556_s12] sm:$0x1] (%p1023_p10), %v572_v24  ;;  %575 = vst [vmem:[%s556_s12 + $0x4] sm:$0x1] (%p1023_p10), %v574_v25 }
  0x56   : > { %v533_v20 = vrot.slane %v532_v19, 1  ;;  %550 = sbr.rel (!%p1023_p10) target bundleno = 93 (0x5d), region = 119 }
  0x58   : > { %v534_v22 = vadd.f32 %v533_v20, %v532_v19 }
  0x5a   : > { %v535_v23 = vadd.f32 %v534_v22, %v524_v21 }
  0x5c   : > { %536 = vst [vmem:[%s1062_s13] sm:$0x1] %v535_v23 }
  0x5d PF: > { %s15_s23 = sadd.s32 1, %s914_s23   ;;  %s1126_s15 = smov %s886_s16 }
  0x5e   : > { %p12_p3 = scmp.ge.s32.totalorder %s15_s23, 10   ;;  %s1127_s16 = smov %s1010_s5 }
  0x5f   : > { %s1128_s17 = smov %s894_s18  ;;  %s1129_s18 = smov %s1028_s10 }
  0x60   : > { %s1130_s19 = smov %s906_s21  ;;  %s1131_s20 = smov %s910_s22 }
  0x61   : > { %s1132_s21 = smov %s1135_s25  ;;  %s1133_s22 = smov %s1139_s26 }
  0x62   :  { %14 = sbr.rel (!%p12_p3) target bundleno = 5 (0x5), region = 208 }

// kernel: _lambda_.42
= control target key start
LH: loop header
LB: loop body
LE: loop exit
PB: predicated region body
PF: predicated region fallthrough
CT: control target
= control target key end

     0   :  { %s1169_s1 = inlined_call_operand.vmem [shape: bf16[512,128], index: 1, kind: input, shape index: {}]   ;;  %s1170_s0 = inlined_call_operand.vmem [shape: f32[8,512], index: 0, kind: input, shape index: {}]   ;;  %s1171_s3 = inlined_call_operand.vmem [shape: bf16[128,512], index: 3, kind: input, shape index: {}]   ;;  %s1172_s2 = inlined_call_operand.vmem [shape: f32[1,128], index: 2, kind: input, shape index: {}]   ;;  %s1173_s4 = inlined_call_operand.vmem [shape: f32[1,512], index: 4, kind: input, shape index: {}]   ;;  %s1174_s5 = inlined_call_operand.vmem [shape: f32[8,512], index: 5, kind: output, shape index: {}]  }
   0x1   :  { %v820_v0 = vld [vmem:[%s1169_s1 + $0x40] sm:$0xff]   ;;  %v824_v4 = vld [vmem:[%s1169_s1 + $0x48] sm:$0xff]   ;;  %v828_v8 = vld [vmem:[%s1169_s1 + $0x50] sm:$0xff]  }
   0x2   :  { %v821_v1 = vld [vmem:[%s1169_s1 + $0xc0] sm:$0xff]   ;;  %775 = vmatprep.subr.bf16.mxu0 %v820_v0  ;;  %v825_v5 = vld [vmem:[%s1169_s1 + $0xc8] sm:$0xff]   ;;  %v829_v9 = vld [vmem:[%s1169_s1 + $0xd0] sm:$0xff]  }
   0x3   :  { %v822_v2 = vld [vmem:[%s1169_s1] sm:$0xff]   ;;  %797 = vmatprep.subr.bf16.mxu1 %v821_v1  ;;  %v826_v6 = vld [vmem:[%s1169_s1 + $0x8] sm:$0xff]   ;;  %v830_v10 = vld [vmem:[%s1169_s1 + $0x10] sm:$0xff]  }
   0x4   :  { %v823_v3 = vld [vmem:[%s1169_s1 + $0x80] sm:$0xff]   ;;  %776 = vmatpush3.bf16.msra.mxu0 %v822_v2  ;;  %v827_v7 = vld [vmem:[%s1169_s1 + $0x88] sm:$0xff]   ;;  %v831_v11 = vld [vmem:[%s1169_s1 + $0x90] sm:$0xff]  }
   0x5   :  { %798 = vmatpush3.bf16.msra.mxu1 %v823_v3  ;;  %777 = vmatprep.subr.bf16.mxu0 %v824_v4  ;;  %v832_v12 = vld [vmem:[%s1169_s1 + $0x58] sm:$0xff]   ;;  %v836_v16 = vld [vmem:[%s1169_s1 + $0x60] sm:$0xff]   ;;  %v840_v20 = vld [vmem:[%s1169_s1 + $0x68] sm:$0xff]  }
   0x6   :  { %799 = vmatprep.subr.bf16.mxu1 %v825_v5  ;;  %v833_v13 = vld [vmem:[%s1169_s1 + $0xd8] sm:$0xff]   ;;  %v837_v17 = vld [vmem:[%s1169_s1 + $0xe0] sm:$0xff]   ;;  %v841_v21 = vld [vmem:[%s1169_s1 + $0xe8] sm:$0xff]  }
   0x7   :  { %v834_v14 = vld [vmem:[%s1169_s1 + $0x18] sm:$0xff]   ;;  %v838_v18 = vld [vmem:[%s1169_s1 + $0x20] sm:$0xff]   ;;  %v842_v22 = vld [vmem:[%s1169_s1 + $0x28] sm:$0xff]  }
   0x8   :  { %778 = vmatpush3.bf16.msra.mxu0 %v826_v6  ;;  %v835_v15 = vld [vmem:[%s1169_s1 + $0x98] sm:$0xff]   ;;  %v839_v19 = vld [vmem:[%s1169_s1 + $0xa0] sm:$0xff]   ;;  %v843_v23 = vld [vmem:[%s1169_s1 + $0xa8] sm:$0xff]  }
   0x9   :  { %800 = vmatpush3.bf16.msra.mxu1 %v827_v7  ;;  %779 = vmatprep.subr.bf16.mxu0 %v828_v8  ;;  %v844_v24 = vld [vmem:[%s1169_s1 + $0x70] sm:$0xff]   ;;  %v848_v28 = vld [vmem:[%s1169_s1 + $0x78] sm:$0xff]   ;;  %v22_v32 = vld [vmem:[%s1170_s0 + $0x8] sm:$0xff] }
   0xa   :  { %801 = vmatprep.subr.bf16.mxu1 %v829_v9  ;;  %v845_v25 = vld [vmem:[%s1169_s1 + $0xf0] sm:$0xff]   ;;  %v849_v29 = vld [vmem:[%s1169_s1 + $0xf8] sm:$0xff]   ;;  %v21_v34 = vld [vmem:[%s1170_s0] sm:$0xff]  ;;  %v26_v35 = vmul.f32 0.25, %v22_v32 }
   0xb   :  { %v846_v26 = vld [vmem:[%s1169_s1 + $0x30] sm:$0xff]   ;;  %v850_v30 = vld [vmem:[%s1169_s1 + $0x38] sm:$0xff]   ;;  %v25_v37 = vmul.f32 0.25, %v21_v34  ;;  %v410_v32 = vld [vmem:[%s1173_s4] sm:$0xf] }
   0xc   :  { %780 = vmatpush3.bf16.msra.mxu0 %v830_v10  ;;  %v847_v27 = vld [vmem:[%s1169_s1 + $0xb0] sm:$0xff]   ;;  %v851_v31 = vld [vmem:[%s1169_s1 + $0xb8] sm:$0xff]   ;;  %v30_v41 = vpack.c.bf16 %v26_v35, %v26_v35 }
   0xd   :  { %802 = vmatpush3.bf16.msra.mxu1 %v831_v11  ;;  %781 = vmatprep.subr.bf16.mxu0 %v832_v12  ;;  %v24_v33 = vld [vmem:[%s1170_s0 + $0x18] sm:$0xff]  ;;  %v23_v38 = vld [vmem:[%s1170_s0 + $0x10] sm:$0xff]  ;;  %v29_v43 = vpack.c.bf16 %v25_v37, %v25_v37  ;;  %v916_v12 = vmov 0  }
   0xe   :  { %803 = vmatprep.subr.bf16.mxu1 %v833_v13  ;;  %v28_v36 = vmul.f32 0.25, %v24_v33  ;;  %v27_v39 = vmul.f32 0.25, %v23_v38  ;;  %v854_v40 = vld [vmem:[%s1171_s3 + $0x4] ss:$16 sps:$4 sm:$0xff]   ;;  %v852_v44 = vld [vmem:[%s1171_s3] ss:$16 sps:$4 sm:$0xff]   ;;  %328 = vmatprep.mubr.bf16.mxu0 %v30_v41 }
   0xf   :  { %v857_v45 = vld [vmem:[%s1171_s3 + $0xc] ss:$16 sps:$4 sm:$0xff]   ;;  %v855_v47 = vld [vmem:[%s1171_s3 + $0x8] ss:$16 sps:$4 sm:$0xff]   ;;  %v860_v48 = vld [vmem:[%s1171_s3 + $0x24] ss:$16 sps:$4 sm:$0xff]  }
  0x10   :  { %782 = vmatpush3.bf16.msra.mxu0 %v834_v14  ;;  %v32_v42 = vpack.c.bf16 %v28_v36, %v28_v36  ;;  %v31_v46 = vpack.c.bf16 %v27_v39, %v27_v39  ;;  %v863_v49 = vld [vmem:[%s1171_s3 + $0x2c] ss:$16 sps:$4 sm:$0xff]   ;;  %v858_v50 = vld [vmem:[%s1171_s3 + $0x20] ss:$16 sps:$4 sm:$0xff]   ;;  %v861_v51 = vld [vmem:[%s1171_s3 + $0x28] ss:$16 sps:$4 sm:$0xff]  }
  0x11   :  { %804 = vmatpush3.bf16.msra.mxu1 %v835_v15  ;;  %783 = vmatprep.subr.bf16.mxu0 %v836_v16  ;;  %v866_v52 = vld [vmem:[%s1171_s3 + $0x44] ss:$16 sps:$4 sm:$0xff]   ;;  %v869_v53 = vld [vmem:[%s1171_s3 + $0x4c] ss:$16 sps:$4 sm:$0xff]   ;;  %v864_v54 = vld [vmem:[%s1171_s3 + $0x40] ss:$16 sps:$4 sm:$0xff]  }
  0x12   :  { %805 = vmatprep.subr.bf16.mxu1 %v837_v17  ;;  %368 = vmatprep.mubr.bf16.mxu1 %v32_v42  ;;  %v867_v55 = vld [vmem:[%s1171_s3 + $0x48] ss:$16 sps:$4 sm:$0xff]   ;;  %v872_v56 = vld [vmem:[%s1171_s3 + $0x64] ss:$16 sps:$4 sm:$0xff]   ;;  %v870_v57 = vld [vmem:[%s1171_s3 + $0x60] ss:$16 sps:$4 sm:$0xff]  }
  0x13   :  { %v875_v58 = vld [vmem:[%s1171_s3 + $0x6c] ss:$16 sps:$4 sm:$0xff]   ;;  %v873_v59 = vld [vmem:[%s1171_s3 + $0x68] ss:$16 sps:$4 sm:$0xff]   ;;  %v878_v60 = vld [vmem:[%s1171_s3 + $0x84] ss:$16 sps:$4 sm:$0xff]  }
  0x14   :  { %784 = vmatpush3.bf16.msra.mxu0 %v838_v18  ;;  %v881_v61 = vld [vmem:[%s1171_s3 + $0x8c] ss:$16 sps:$4 sm:$0xff]   ;;  %v876_v62 = vld [vmem:[%s1171_s3 + $0x80] ss:$16 sps:$4 sm:$0xff]   ;;  %v879_v63 = vld [vmem:[%s1171_s3 + $0x88] ss:$16 sps:$4 sm:$0xff]  }
  0x15   :  { %806 = vmatpush3.bf16.msra.mxu1 %v839_v19  ;;  %785 = vmatprep.subr.bf16.mxu0 %v840_v20  ;;  %v884_v0 = vld [vmem:[%s1171_s3 + $0xa4] ss:$16 sps:$4 sm:$0xff]   ;;  %v887_v1 = vld [vmem:[%s1171_s3 + $0xac] ss:$16 sps:$4 sm:$0xff]   ;;  %v882_v2 = vld [vmem:[%s1171_s3 + $0xa0] ss:$16 sps:$4 sm:$0xff]  }
  0x16   :  { %807 = vmatprep.subr.bf16.mxu1 %v841_v21  ;;  %v885_v3 = vld [vmem:[%s1171_s3 + $0xa8] ss:$16 sps:$4 sm:$0xff]   ;;  %v890_v4 = vld [vmem:[%s1171_s3 + $0xc4] ss:$16 sps:$4 sm:$0xff]   ;;  %v893_v5 = vld [vmem:[%s1171_s3 + $0xcc] ss:$16 sps:$4 sm:$0xff]  }
  0x17   :  { %v888_v6 = vld [vmem:[%s1171_s3 + $0xc0] ss:$16 sps:$4 sm:$0xff]   ;;  %v891_v7 = vld [vmem:[%s1171_s3 + $0xc8] ss:$16 sps:$4 sm:$0xff]   ;;  %v896_v8 = vld [vmem:[%s1171_s3 + $0xe4] ss:$16 sps:$4 sm:$0xff]  }
  0x18   :  { %786 = vmatpush3.bf16.msra.mxu0 %v842_v22  ;;  %v899_v9 = vld [vmem:[%s1171_s3 + $0xec] ss:$16 sps:$4 sm:$0xff]   ;;  %v894_v10 = vld [vmem:[%s1171_s3 + $0xe0] ss:$16 sps:$4 sm:$0xff]   ;;  %v897_v11 = vld [vmem:[%s1171_s3 + $0xe8] ss:$16 sps:$4 sm:$0xff]  }
  0x19   :  { %808 = vmatpush3.bf16.msra.mxu1 %v843_v23  ;;  %787 = vmatprep.subr.bf16.mxu0 %v844_v24  ;;  %v706_v15 = vld [vmem:[%s1172_s2] ss:$0 sm:$0xff] }
  0x1a   :  { %809 = vmatprep.subr.bf16.mxu1 %v845_v25 }
  0x1c   :  { %788 = vmatpush3.bf16.msra.mxu0 %v846_v26 }
  0x1d   :  { %810 = vmatpush3.bf16.msra.mxu1 %v847_v27  ;;  %789 = vmatprep.subr.bf16.mxu0 %v848_v28  ;;  %v412_v28 = vlaneseq }
  0x1e   :  { %811 = vmatprep.subr.bf16.mxu1 %v849_v29 }
  0x1f   :  { %v413_v29 = vshrl.u32 %v412_v28, 7 }
  0x20   :  { %790 = vmatpush3.bf16.msra.mxu0 %v850_v30 }
  0x21   :  { %812 = vmatpush3.bf16.msra.mxu1 %v851_v31  ;;  %592 = vmatprep.subr.bf16.mxu0 %v854_v40  ;;  %v414_v30 = vsub.s32 0, %v413_v29  ;;  %v422_v31 = vsub.s32 2, %v413_v29  ;;  %v418_v33 = vsub.s32 1, %v413_v29  ;;  %v426_v34 = vsub.s32 3, %v413_v29 }
  0x22   :  { %633 = vmatprep.subr.bf16.mxu1 %v857_v45 }
  0x23   :  { %329 = vmatmul.mubr.bf16.vlgmr.msra.gmra.mrb[0].mxu0 %v29_v43  ;;  %v415_v35 = vrot.slane %v410_v32, %v414_v30  ;;  %v423_v36 = vrot.slane %v410_v32, %v422_v31  ;;  %v419_v37 = vrot.slane %v410_v32, %v418_v33  ;;  %v427_v38 = vrot.slane %v410_v32, %v426_v34 }
  0x24   :  { %369 = vmatmul.mubr.bf16.vlgmr.msra.gmra.mrb[0].mxu1 %v31_v46  ;;  %593 = vmatpush1.bf16.msra.mxu0 %v852_v44 }
  0x25   :  { %634 = vmatpush1.bf16.msra.mxu1 %v855_v47  ;;  %594 = vmatprep.subr.bf16.mxu0 %v860_v48 }
  0x26   :  { %635 = vmatprep.subr.bf16.mxu1 %v863_v49  ;;  %624 = vmatprep.mubr.bf16.mxu0 %v916_v12 }
  0x27   :  { %665 = vmatprep.mubr.bf16.mxu1 %v916_v12 }
  0x28   :  { %595 = vmatpush1.bf16.msra.mxu0 %v858_v50 }
  0x29   :  { %636 = vmatpush1.bf16.msra.mxu1 %v861_v51  ;;  %596 = vmatprep.subr.bf16.mxu0 %v866_v52 }
  0x2a   :  { %637 = vmatprep.subr.bf16.mxu1 %v869_v53 }
  0x2c   :  { %597 = vmatpush1.bf16.msra.mxu0 %v864_v54 }
  0x2d   :  { %638 = vmatpush1.bf16.msra.mxu1 %v867_v55  ;;  %598 = vmatprep.subr.bf16.mxu0 %v872_v56 }
  0x2e   :  { %639 = vmatprep.subr.bf16.mxu1 %v875_v58 }
  0x30   :  { %599 = vmatpush1.bf16.msra.mxu0 %v870_v57 }
  0x31   :  { %640 = vmatpush1.bf16.msra.mxu1 %v873_v59  ;;  %600 = vmatprep.subr.bf16.mxu0 %v878_v60 }
  0x32   :  { %641 = vmatprep.subr.bf16.mxu1 %v881_v61 }
  0x34   :  { %601 = vmatpush1.bf16.msra.mxu0 %v876_v62 }
  0x35   :  { %642 = vmatpush1.bf16.msra.mxu1 %v879_v63  ;;  %602 = vmatprep.subr.bf16.mxu0 %v884_v0 }
  0x36   :  { %643 = vmatprep.subr.bf16.mxu1 %v887_v1 }
  0x38   :  { %603 = vmatpush1.bf16.msra.mxu0 %v882_v2 }
  0x39   :  { %644 = vmatpush1.bf16.msra.mxu1 %v885_v3  ;;  %604 = vmatprep.subr.bf16.mxu0 %v890_v4 }
  0x3a   :  { %645 = vmatprep.subr.bf16.mxu1 %v893_v5 }
  0x3c   :  { %605 = vmatpush1.bf16.msra.mxu0 %v888_v6 }
  0x3d   :  { %646 = vmatpush1.bf16.msra.mxu1 %v891_v7  ;;  %606 = vmatprep.subr.bf16.mxu0 %v896_v8 }
  0x3e   :  { %647 = vmatprep.subr.bf16.mxu1 %v899_v9 }
  0x40   :  { %607 = vmatpush1.bf16.msra.mxu0 %v894_v10 }
  0x41   :  { %648 = vmatpush1.bf16.msra.mxu1 %v897_v11 }
  0xf6   :  { %v791_v13 = vpop.f32.mrb[0].mxu0 }
  0xf7   :  { %v813_v14 = vpop.f32.mrb[0].mxu1  ;;  %v792_v16 = vpop.f32.mrb[1].mxu0 }
  0xf8   :  { %v814_v17 = vpop.f32.mrb[1].mxu1  ;;  %v793_v18 = vadd.f32 %v792_v16, %v791_v13  ;;  %v794_v20 = vpop.f32.mrb[2].mxu0 }
  0xf9   :  { %v815_v19 = vadd.f32 %v814_v17, %v813_v14  ;;  %v816_v21 = vpop.f32.mrb[2].mxu1  ;;  %v795_v22 = vpop.f32.mrb[3].mxu0 }
  0xfa   :  { %v817_v23 = vpop.f32.mrb[3].mxu1  ;;  %v331_v24 = vadd.f32 %v793_v18, %v706_v15 }
  0xfc   :  { %v371_v25 = vadd.f32 %v815_v19, %v331_v24 }
  0xfe   :  { %v376_v26 = vmax.f32 %v371_v25, 0.0 }
 0x100   :  { %v377_v27 = vpack.c.bf16 %v376_v26, %v376_v26 }
 0x102   :  { %625 = vmatmul.mubr.bf16.vlgmr.msra.gmra.mrb[4].mxu0 %v377_v27  ;;  %666 = vmatmul.mubr.bf16.vlgmr.msra.gmra.mrb[4].mxu1 %v377_v27 }
 0x1d5   :  { %v626_v39 = vpop.f32.mrb[4].mxu0  ;;  %v667_v40 = vpop.f32.mrb[4].mxu1 }
 0x1d6   :  { %v627_v41 = vadd.f32 %v626_v39, %v415_v35  ;;  %v668_v42 = vadd.f32 %v667_v40, %v423_v36  ;;  %v628_v43 = vpop.f32.mrb[5].mxu0  ;;  %v669_v44 = vpop.f32.mrb[5].mxu1 }
 0x1d7   :  { %v629_v45 = vadd.f32 %v628_v43, %v419_v37  ;;  %v670_v46 = vadd.f32 %v669_v44, %v427_v38  ;;  %v630_v47 = vpop.f32.mrb[6].mxu0  ;;  %v671_v48 = vpop.f32.mrb[6].mxu1 }
 0x1d8   :  { %v771_v49 = vmul.f32 -1.442695, %v627_v41  ;;  %v773_v50 = vmul.f32 -1.442695, %v668_v42  ;;  %v631_v51 = vpop.f32.mrb[7].mxu0  ;;  %v672_v52 = vpop.f32.mrb[7].mxu1 }
 0x1d9   :  { %v772_v53 = vmul.f32 -1.442695, %v629_v45  ;;  %v774_v54 = vmul.f32 -1.442695, %v670_v46 }
 0x1da   :  { %900 = vpow2.f32 %v771_v49 }
 0x1db   :  { %902 = vpow2.f32 %v773_v50 }
 0x1dc   :  { %904 = vpow2.f32 %v772_v53 }
 0x1dd   :  { %906 = vpow2.f32 %v774_v54 }
 0x1e4   :  { %v901_v55 = vpop.eup %900 }
 0x1e5   :  { %v903_v56 = vpop.eup %902  ;;  %v686_v57 = vadd.f32 1.0, %v901_v55 }
 0x1e6   :  { %v905_v58 = vpop.eup %904  ;;  %v688_v59 = vadd.f32 1.0, %v903_v56 }
 0x1e7   :  { %v907_v60 = vpop.eup %906  ;;  %908 = vrcp.f32 %v686_v57  ;;  %v687_v61 = vadd.f32 1.0, %v905_v58 }
 0x1e8   :  { %910 = vrcp.f32 %v688_v59  ;;  %v689_v62 = vadd.f32 1.0, %v907_v60 }
 0x1e9   :  { %912 = vrcp.f32 %v687_v61 }
 0x1ea   :  { %914 = vrcp.f32 %v689_v62 }
 0x1f1   :  { %v909_v63 = vpop.eup %908 }
 0x1f2   :  { %v911_v0 = vpop.eup %910  ;;  %698 = vst [vmem:[%s1174_s5] sm:$0xff] %v909_v63 }
 0x1f3   :  { %v913_v1 = vpop.eup %912  ;;  %700 = vst [vmem:[%s1174_s5 + $0x10] sm:$0xff] %v911_v0 }
 0x1f4   :  { %v915_v2 = vpop.eup %914  ;;  %699 = vst [vmem:[%s1174_s5 + $0x8] sm:$0xff] %v913_v1 }
 0x1f5   :  { %701 = vst [vmem:[%s1174_s5 + $0x18] sm:$0xff] %v915_v2 }

// kernel: _lambda_.43
= control target key start
LH: loop header
LB: loop body
LE: loop exit
PB: predicated region body
PF: predicated region fallthrough
CT: control target
= control target key end

     0   :  { %s994_s18 = smov 0   ;;  %s996_s19 = smov 0   ;;  %s1141_s0 = inlined_call_operand.vmem [shape: bf16[2,8,512], index: 0, kind: input, shape index: {}]   ;;  %s1142_s1 = inlined_call_operand.vmem [shape: f32[2,1,512], index: 1, kind: input, shape index: {}]   ;;  %s1143_s2 = inlined_call_operand.vmem [shape: bf16[512,128], index: 2, kind: input, shape index: {}]   ;;  %s1144_s3 = inlined_call_operand.vmem [shape: f32[1,128], index: 3, kind: input, shape index: {}]   ;;  %s1145_s4 = inlined_call_operand.vmem [shape: bf16[2,8,128], index: 4, kind: input, shape index: {}]   ;;  %s1146_s5 = inlined_call_operand.vmem [shape: bf16[2,8,128], index: 5, kind: output, shape index: {}]  }
   0x1   :  { %s998_s20 = smov 0  }
   0x2 LB: > { %s27_s21 = sadd.s32 1, %s958_s19  ;;  %p798_p0 = scmp.ge.s32.totalorder %s962_s20, 1  ;;  %s962_s20 = sphi %s998_s20, %s15_s20   ;;  %s958_s19 = sphi %s996_s19, %s1148_s19   ;;  %s954_s18 = sphi %s994_s18, %s1147_s18  }
   0x3   : > { %p29_p1 = scmp.ge.s32.totalorder %s27_s21, 2  ;;  %p230_p2 = scmp.lt.s32.totalorder %s962_s20, 3 }
   0x5   : > { %s1150_s21 = smov (%p29_p1, %s27_s21), 0  ;;  %p231_p3 = pnand %p798_p0, %p230_p2 }
   0x6   : > { %v908_v0 = vld [vmem:[%s1143_s2 + $0x40] sm:$0xff] (!%p231_p3)   ;;  %v912_v4 = vld [vmem:[%s1143_s2 + $0x48] sm:$0xff] (!%p231_p3)   ;;  %v916_v8 = vld [vmem:[%s1143_s2 + $0x50] sm:$0xff] (!%p231_p3)   ;;  %p275_p4 = scmp.lt.s32.totalorder (!%p231_p3), %s954_s18, 1  ;;  %v311_v20 = vlaneseq (!%p231_p3) }
   0x7   : > { %234 = sbr.rel (%p231_p3) target bundleno = 264 (0x108), region = 40  ;;  %v909_v1 = vld [vmem:[%s1143_s2 + $0xc0] sm:$0xff] (!%p231_p3)   ;;  %840 = vmatprep.subr.bf16.mxu0 (!%p231_p3), %v908_v0  ;;  %v913_v5 = vld [vmem:[%s1143_s2 + $0xc8] sm:$0xff] (!%p231_p3)   ;;  %v917_v9 = vld [vmem:[%s1143_s2 + $0xd0] sm:$0xff] (!%p231_p3)  }
   0x8   : > { %v910_v2 = vld [vmem:[%s1143_s2] sm:$0xff] (!%p231_p3)   ;;  %862 = vmatprep.subr.bf16.mxu1 (!%p231_p3), %v909_v1  ;;  %v914_v6 = vld [vmem:[%s1143_s2 + $0x8] sm:$0xff] (!%p231_p3)   ;;  %v918_v10 = vld [vmem:[%s1143_s2 + $0x10] sm:$0xff] (!%p231_p3)   ;;  %v312_v25 = vshrl.u32 (!%p231_p3), %v311_v20, 7 }
   0x9   : > { %v911_v3 = vld [vmem:[%s1143_s2 + $0x80] sm:$0xff] (!%p231_p3)   ;;  %841 = vmatpush3.bf16.msra.mxu0 (!%p231_p3), %v910_v2  ;;  %v915_v7 = vld [vmem:[%s1143_s2 + $0x88] sm:$0xff] (!%p231_p3)   ;;  %v919_v11 = vld [vmem:[%s1143_s2 + $0x90] sm:$0xff] (!%p231_p3)  }
   0xa   : > { %863 = vmatpush3.bf16.msra.mxu1 (!%p231_p3), %v911_v3  ;;  %842 = vmatprep.subr.bf16.mxu0 (!%p231_p3), %v912_v4  ;;  %v920_v12 = vld [vmem:[%s1143_s2 + $0x58] sm:$0xff] (!%p231_p3)   ;;  %v924_v16 = vld [vmem:[%s1143_s2 + $0x60] sm:$0xff] (!%p231_p3)   ;;  %v928_v21 = vld [vmem:[%s1143_s2 + $0x68] sm:$0xff] (!%p231_p3)   ;;  %v317_v30 = vsub.s32 (!%p231_p3), 1, %v312_v25  ;;  %v325_v32 = vsub.s32 (!%p231_p3), 3, %v312_v25  ;;  %v313_v34 = vsub.s32 (!%p231_p3), 0, %v312_v25 }
   0xb   : > { %864 = vmatprep.subr.bf16.mxu1 (!%p231_p3), %v913_v5  ;;  %v921_v13 = vld [vmem:[%s1143_s2 + $0xd8] sm:$0xff] (!%p231_p3)   ;;  %v925_v17 = vld [vmem:[%s1143_s2 + $0xe0] sm:$0xff] (!%p231_p3)   ;;  %v929_v22 = vld [vmem:[%s1143_s2 + $0xe8] sm:$0xff] (!%p231_p3)   ;;  %v321_v36 = vsub.s32 (!%p231_p3), 2, %v312_v25 }
   0xc   : > { %v922_v14 = vld [vmem:[%s1143_s2 + $0x18] sm:$0xff] (!%p231_p3)   ;;  %v926_v18 = vld [vmem:[%s1143_s2 + $0x20] sm:$0xff] (!%p231_p3)   ;;  %v930_v23 = vld [vmem:[%s1143_s2 + $0x28] sm:$0xff] (!%p231_p3)  }
   0xd   : > { %843 = vmatpush3.bf16.msra.mxu0 (!%p231_p3), %v914_v6  ;;  %v923_v15 = vld [vmem:[%s1143_s2 + $0x98] sm:$0xff] (!%p231_p3)   ;;  %v927_v19 = vld [vmem:[%s1143_s2 + $0xa0] sm:$0xff] (!%p231_p3)   ;;  %v931_v24 = vld [vmem:[%s1143_s2 + $0xa8] sm:$0xff] (!%p231_p3)  }
   0xe   : > { %865 = vmatpush3.bf16.msra.mxu1 %v915_v7  ;;  %844 = vmatprep.subr.bf16.mxu0 %v916_v8  ;;  %s1152_s18 = smov (!%p275_p4, %s954_s18), 1  ;;  %v932_v26 = vld [vmem:[%s1143_s2 + $0x70] sm:$0xff]   ;;  %v936_v31 = vld [vmem:[%s1143_s2 + $0x78] sm:$0xff]   ;;  %v804_v59 = vld [vmem:[%s1144_s3] ss:$0 sm:$0xff] }
   0xf   : > { %866 = vmatprep.subr.bf16.mxu1 %v917_v9  ;;  %v933_v27 = vld [vmem:[%s1143_s2 + $0xf0] sm:$0xff]   ;;  %s839_s7 = sshll.u32 %s1152_s18, 4  ;;  %s1097_s10 = sshll.u32 %s1152_s18, 2  ;;  %v937_v33 = vld [vmem:[%s1143_s2 + $0xf8] sm:$0xff]  }
  0x10   : > { %v934_v28 = vld [vmem:[%s1143_s2 + $0x30] sm:$0xff]   ;;  %s283_s22 = scalar_lea.vmem %s1141_s0, %s839_s7  ;;  %s287_s25 = scalar_lea.vmem %s1142_s1, %s1097_s10  ;;  %v938_v35 = vld [vmem:[%s1143_s2 + $0x38] sm:$0xff]  }
  0x11   : > { %845 = vmatpush3.bf16.msra.mxu0 %v918_v10  ;;  %v935_v29 = vld [vmem:[%s1143_s2 + $0xb0] sm:$0xff]   ;;  %v939_v37 = vld [vmem:[%s1143_s2 + $0xb8] sm:$0xff]   ;;  %v303_v38 = vld [vmem:[%s283_s22] sm:$0xff]  ;;  %s294_s7 = scalar_lea.vmem %s1145_s4, %s1097_s10  ;;  %s301_s13 = scalar_lea.vmem %s1146_s5, %s1097_s10 }
  0x12   : > { %867 = vmatpush3.bf16.msra.mxu1 %v919_v11  ;;  %846 = vmatprep.subr.bf16.mxu0 %v920_v12  ;;  %v309_v39 = vld [vmem:[%s287_s25] sm:$0xf]  ;;  %v304_v40 = vld [vmem:[%s283_s22 + $0x8] sm:$0xff]  ;;  %v305_v41 = vunpack.c.l.bf16 %v303_v38  ;;  %v306_v42 = vunpack.c.h.bf16 %v303_v38 }
  0x13   : > { %868 = vmatprep.subr.bf16.mxu1 %v921_v13  ;;  %v318_v43 = vrot.slane %v309_v39, %v317_v30  ;;  %v307_v44 = vunpack.c.l.bf16 %v304_v40  ;;  %v308_v45 = vunpack.c.h.bf16 %v304_v40  ;;  %v326_v46 = vrot.slane %v309_v39, %v325_v32  ;;  %v682_v61 = vld [vmem:[%s294_s7] sm:$0xf] }
  0x14   : > { %v314_v47 = vrot.slane %v309_v39, %v313_v34  ;;  %v322_v48 = vrot.slane %v309_v39, %v321_v36  ;;  %v683_v5 = vunpack.c.l.bf16 %v682_v61 }
  0x15   : > { %847 = vmatpush3.bf16.msra.mxu0 %v922_v14  ;;  %v332_v49 = vmul.f32 %v318_v43, %v306_v42  ;;  %v334_v50 = vmul.f32 %v326_v46, %v308_v45 }
  0x16   : > { %869 = vmatpush3.bf16.msra.mxu1 %v923_v15  ;;  %848 = vmatprep.subr.bf16.mxu0 %v924_v16  ;;  %v331_v51 = vmul.f32 %v314_v47, %v305_v41  ;;  %v333_v52 = vmul.f32 %v322_v48, %v307_v44 }
  0x17   : > { %870 = vmatprep.subr.bf16.mxu1 %v925_v17  ;;  %v336_v53 = vpack.c.bf16 %v332_v49, %v332_v49  ;;  %v338_v54 = vpack.c.bf16 %v334_v50, %v334_v50 }
  0x18   : > { %v335_v55 = vpack.c.bf16 %v331_v51, %v331_v51  ;;  %v337_v56 = vpack.c.bf16 %v333_v52, %v333_v52 }
  0x19   : > { %849 = vmatpush3.bf16.msra.mxu0 %v926_v18  ;;  %634 = vmatprep.mubr.bf16.mxu0 %v336_v53 }
  0x1a   : > { %871 = vmatpush3.bf16.msra.mxu1 %v927_v19  ;;  %850 = vmatprep.subr.bf16.mxu0 %v928_v21 }
  0x1b   : > { %872 = vmatprep.subr.bf16.mxu1 %v929_v22  ;;  %674 = vmatprep.mubr.bf16.mxu1 %v338_v54 }
  0x1d   : > { %851 = vmatpush3.bf16.msra.mxu0 %v930_v23 }
  0x1e   : > { %873 = vmatpush3.bf16.msra.mxu1 %v931_v24  ;;  %852 = vmatprep.subr.bf16.mxu0 %v932_v26 }
  0x1f   : > { %874 = vmatprep.subr.bf16.mxu1 %v933_v27 }
  0x21   : > { %853 = vmatpush3.bf16.msra.mxu0 %v934_v28 }
  0x22   : > { %875 = vmatpush3.bf16.msra.mxu1 %v935_v29  ;;  %854 = vmatprep.subr.bf16.mxu0 %v936_v31 }
  0x23   : > { %876 = vmatprep.subr.bf16.mxu1 %v937_v33 }
  0x25   : > { %855 = vmatpush3.bf16.msra.mxu0 %v938_v35 }
  0x26   : > { %877 = vmatpush3.bf16.msra.mxu1 %v939_v37 }
  0x28   : > { %635 = vmatmul.mubr.bf16.vlgmr.msra.gmra.mrb[0].mxu0 %v335_v55 }
  0x29   : > { %675 = vmatmul.mubr.bf16.vlgmr.msra.gmra.mrb[0].mxu1 %v337_v56 }
  0xfb   : > { %v856_v57 = vpop.f32.mrb[0].mxu0 }
  0xfc   : > { %v878_v58 = vpop.f32.mrb[0].mxu1  ;;  %v857_v60 = vpop.f32.mrb[1].mxu0 }
  0xfd   : > { %v858_v62 = vadd.f32 %v857_v60, %v856_v57  ;;  %v879_v63 = vpop.f32.mrb[1].mxu1  ;;  %v859_v0 = vpop.f32.mrb[2].mxu0 }
  0xfe   : > { %v880_v1 = vadd.f32 %v879_v63, %v878_v58  ;;  %v881_v2 = vpop.f32.mrb[2].mxu1  ;;  %v860_v3 = vpop.f32.mrb[3].mxu0 }
  0xff   : > { %v637_v4 = vadd.f32 %v858_v62, %v804_v59  ;;  %v882_v6 = vpop.f32.mrb[3].mxu1 }
 0x101   : > { %v677_v7 = vadd.f32 %v880_v1, %v637_v4 }
 0x103   : > { %v684_v8 = vadd.f32 %v683_v5, %v677_v7 }
 0x105   : > { %v685_v9 = vpack.c.bf16 %v684_v8, %v684_v8 }
 0x107   : > { %686 = vst [vmem:[%s301_s13] sm:$0xf] %v685_v9 }
 0x108 PF: > { %s15_s20 = sadd.s32 1, %s962_s20   ;;  %s1147_s18 = smov %s958_s19 }
 0x109   : > { %p12_p5 = scmp.ge.s32.totalorder %s15_s20, 4   ;;  %s1148_s19 = smov %s1150_s21 }
 0x10b   :  { %14 = sbr.rel (!%p12_p5) target bundleno = 2 (0x2), region = 76 }

</bundles_post_ra>
